<compile_context>
chip_gen: v7x
topology: tpu7x:2x2x1
jax: 0.10.0
libtpu: 0.0.40
codegen_flags: <defaults>
</compile_context>

<pallas_src>
import numpy as np
import jax
import jax.numpy as jnp
from jax.experimental import pallas as pl
from jax.experimental.pallas import tpu as pltpu


# ----------------------------------------------------------------------------
# Bilinear-resize weights (PyTorch F.interpolate, align_corners=False), trace-time.
# ----------------------------------------------------------------------------
def _bilinear_matrix(out_size, in_size):
    scale = in_size / out_size
    A = np.zeros((out_size, in_size), dtype=np.float32)
    for i in range(out_size):
        src = max((i + 0.5) * scale - 0.5, 0.0)
        i0 = min(int(np.floor(src)), in_size - 1)
        i1 = min(i0 + 1, in_size - 1)
        frac = src - i0
        A[i, i0] += 1.0 - frac
        A[i, i1] += frac
    return A


def _mean_resize_matrix(n_batch, out_hw, in_hw):
    # G[(n, Y, X), (n, yo, xo)] = A[Y, yo] * A[X, xo]   (block-diagonal over batch)
    A = _bilinear_matrix(out_hw, in_hw)
    K = np.einsum("Ya,Xb->YXab", A, A).reshape(out_hw * out_hw, in_hw * in_hw)
    return np.kron(np.eye(n_batch, dtype=np.float32), K).astype(np.float32)


# ----------------------------------------------------------------------------
# Fused kernel: whole FeatureMapPiler forward in one grid step.
# ----------------------------------------------------------------------------
def fused_piler_kernel(xpar_ref, w1_ref, b1_ref, w2_ref, b2_ref,
                       wfc_ref, bfc_ref, g2_ref,
                       pile1_ref, pile2_ref, probs_ref, buf_ref):
    n = xpar_ref.shape[0] // 4          # batch size
    cin = xpar_ref.shape[3]             # 4
    c1 = w1_ref.shape[2]                # 8   (conv1 out channels)
    c2 = w2_ref.shape[2]                # 16  (conv2 out channels)
    nb = n * 64                         # rows per parity block of fm1 / rows of fm2

    # conv2 input buffer: zero-padded (pad=1), parity-split, channels-last fm1.
    buf_ref[...] = jnp.zeros(buf_ref.shape, buf_ref.dtype)

    # ---- conv1: 3x3, stride 1, pad 1, + ReLU -- one output-parity block at a time ----
    # Output pixel (y, x) = (2*yh + yp, 2*xh + xp); block rows are ordered (batch, yh, xh).
    for yp in range(2):
        for xp in range(2):
            acc = jnp.zeros((nb, c1), jnp.float32)
            for i in range(3):
                for j in range(3):
                    q = ((yp + i) % 2) * 2 + (xp + j) % 2      # input parity buffer
                    a = (yp + i) // 2                          # row-half offset
                    b = (xp + j) // 2                          # col-half offset
                    slab = xpar_ref[q * n:(q + 1) * n, a:a + 8, b:b + 8, :]  # (n,8,8,cin)
                    acc = acc + jnp.dot(slab.reshape(nb, cin), w1_ref[i * 3 + j],
                                        preferred_element_type=jnp.float32)
            fm1_blk = jnp.maximum(acc + b1_ref[...], 0.0)                    # (nb, c1)

            p = yp * 2 + xp
            # piled map #1: channel mean (16->16 bilinear, align_corners=False, is identity)
            pile1_ref[p * nb:(p + 1) * nb, :] = jnp.mean(fm1_blk, axis=1, keepdims=True)
            # scatter into conv2's zero-padded parity buffer (fm1 pixel (y,x) -> pad (y+1,x+1))
            dst = ((1 - yp) * 2 + (1 - xp)) * n
            buf_ref[dst:dst + n, yp:yp + 8, xp:xp + 8, :] = fm1_blk.reshape(n, 8, 8, c1)

    # ---- conv2: 3x3, stride 2, pad 1, + ReLU ----
    # Output rows ordered (batch, yo, xo); each tap is a unit-stride slice of the
    # parity buffer (row/col parity of padded coordinate 2*yo+i is i%2, half index yo+i//2).
    acc2 = jnp.zeros((nb, c2), jnp.float32)
    for i in range(3):
        for j in range(3):
            q = (i % 2) * 2 + (j % 2)
            slab = buf_ref[q * n:(q + 1) * n, i // 2:i // 2 + 8, j // 2:j // 2 + 8, :]
            acc2 = acc2 + jnp.dot(slab.reshape(nb, c1), w2_ref[i * 3 + j],
                                  preferred_element_type=jnp.float32)
    fm2 = jnp.maximum(acc2 + b2_ref[...], 0.0)                               # (nb, c2)

    # ---- piled map #2: channel mean + 8x8 -> 16x16 bilinear resize (one matrix) ----
    cm2 = jnp.mean(fm2, axis=1, keepdims=True)                               # (nb, 1)
    for r in range(4):                                                       # chunked rows
        pile2_ref[r * nb:(r + 1) * nb, :] = jnp.dot(
            g2_ref[r * nb:(r + 1) * nb, :], cm2, preferred_element_type=jnp.float32)

    # ---- head: global average pool -> linear -> softmax(dim=-1) ----
    pooled = jnp.mean(fm2.reshape(n, 64, c2), axis=1)                        # (n, c2)
    logits = jnp.dot(pooled, wfc_ref[...],
                     preferred_element_type=jnp.float32) + bfc_ref[...]
    m = jnp.max(logits, axis=-1, keepdims=True)
    e = jnp.exp(logits - m)
    probs_ref[...] = e / jnp.sum(e, axis=-1, keepdims=True)


# ----------------------------------------------------------------------------
# FeatureMapPiler forward (single fused pallas_call + cheap layout plumbing)
# ----------------------------------------------------------------------------
def feature_map_piler_forward(x, params):
    # TODO(synk): PyTorch-side hook registration/removal bookkeeping (and the debug
    #             print() inside forward) has no kernel equivalent; the hooked feature
    #             maps are produced explicitly inside the fused kernel.
    N, C, H, W = x.shape
    assert (H, W) == (16, 16), "synthetic wrapped model is defined for 16x16 inputs"

    # Input preprocessing (tiny XLA ops on the 8 KiB input / weights only):
    # zero-pad and split by (row, col) parity so every conv tap is a unit-stride slice.
    xpad = jnp.pad(x, ((0, 0), (0, 0), (1, 1), (1, 1)))                      # (N, C, 18, 18)
    xpar = jnp.stack([xpad[:, :, rp::2, cp::2] for rp in (0, 1) for cp in (0, 1)], axis=0)
    xpar = xpar.transpose(0, 1, 3, 4, 2).reshape(4 * N, 9, 9, C)             # channels last

    w1 = params["w1"].transpose(2, 3, 1, 0).reshape(9, C, 8)                 # (tap, Cin, Cout)
    w2 = params["w2"].transpose(2, 3, 1, 0).reshape(9, 8, 16)
    b1 = params["b1"].reshape(1, 8)
    b2 = params["b2"].reshape(1, 16)
    wfc = params["w_fc"]                                                     # (16, 10)
    bfc = params["b_fc"].reshape(1, 10)
    g2 = jnp.asarray(_mean_resize_matrix(N, 16, 8))                          # (N*256, N*64)

    pile1, pile2, probs = pl.pallas_call(
        fused_piler_kernel,
        out_shape=(jax.ShapeDtypeStruct((N * 256, 1), jnp.float32),
                   jax.ShapeDtypeStruct((N * 256, 1), jnp.float32),
                   jax.ShapeDtypeStruct((N, 10), jnp.float32)),
        grid=(1,),
        in_specs=[
            pl.BlockSpec((4 * N, 9, 9, C), lambda i: (0, 0, 0, 0)),
            pl.BlockSpec((9, C, 8), lambda i: (0, 0, 0)),
            pl.BlockSpec((1, 8), lambda i: (0, 0)),
            pl.BlockSpec((9, 8, 16), lambda i: (0, 0, 0)),
            pl.BlockSpec((1, 16), lambda i: (0, 0)),
            pl.BlockSpec((16, 10), lambda i: (0, 0)),
            pl.BlockSpec((1, 10), lambda i: (0, 0)),
            pl.BlockSpec((N * 256, N * 64), lambda i: (0, 0)),
        ],
        out_specs=[
            pl.BlockSpec((N * 256, 1), lambda i: (0, 0)),
            pl.BlockSpec((N * 256, 1), lambda i: (0, 0)),
            pl.BlockSpec((N, 10), lambda i: (0, 0)),
        ],
        scratch_shapes=[pltpu.VMEM((4 * N, 9, 9, 8), jnp.float32)],
        compiler_params=pltpu.CompilerParams(dimension_semantics=("arbitrary",)),
    )(xpar, w1, b1, w2, b2, wfc, bfc, g2)

    # Layout plumbing on the tiny (<= 4 KiB) outputs:
    # pile1 rows are (yp, xp, n, yh, xh) with y = 2*yh + yp, x = 2*xh + xp;
    # pile2 rows are already (n, Y, X).
    p1 = pile1.reshape(2, 2, N, 8, 8).transpose(2, 3, 0, 4, 1).reshape(N, 16, 16)
    p2 = pile2.reshape(N, 16, 16)
    concatenated = jnp.stack([p1, p2], axis=1)                               # (N, 2, 16, 16)
    return concatenated, probs


# ----------------------------------------------------------------------------
# Plain-XLA reference (validation only) and synthetic model parameters
# ----------------------------------------------------------------------------
def reference_forward(x, params):
    f1 = jax.lax.conv_general_dilated(
        x, params["w1"], window_strides=(1, 1), padding=((1, 1), (1, 1)),
        dimension_numbers=("NCHW", "OIHW", "NCHW"))
    f1 = jnp.maximum(f1 + params["b1"][None, :, None, None], 0.0)
    f2 = jax.lax.conv_general_dilated(
        f1, params["w2"], window_strides=(2, 2), padding=((1, 1), (1, 1)),
        dimension_numbers=("NCHW", "OIHW", "NCHW"))
    f2 = jnp.maximum(f2 + params["b2"][None, :, None, None], 0.0)
    pooled = f2.mean(axis=(2, 3))
    probs = jax.nn.softmax(pooled @ params["w_fc"] + params["b_fc"], axis=-1)
    A = jnp.asarray(_bilinear_matrix(16, 8))
    pile1 = f1.mean(axis=1)                                   # 16->16 resize is identity
    pile2 = jnp.einsum("Ya,Xb,nab->nYX", A, A, f2.mean(axis=1))
    return jnp.stack([pile1, pile2], axis=1), probs


def init_params(key):
    ks = jax.random.split(key, 6)

    def conv_w(k, cout, cin, kh, kw):
        fan_in = cin * kh * kw
        return jax.random.normal(k, (cout, cin, kh, kw), jnp.float32) * (2.0 / fan_in) ** 0.5

    return {
        "w1": conv_w(ks[0], 8, 4, 3, 3),
        "b1": jax.random.normal(ks[1], (8,), jnp.float32) * 0.01,
        "w2": conv_w(ks[2], 16, 8, 3, 3),
        "b2": jax.random.normal(ks[3], (16,), jnp.float32) * 0.01,
        "w_fc": jax.random.normal(ks[4], (16, 10), jnp.float32) * (1.0 / 16.0) ** 0.5,
        "b_fc": jax.random.normal(ks[5], (10,), jnp.float32) * 0.01,
    }


if __name__ == "__main__":
    key = jax.random.PRNGKey(0)
    k_x, k_p = jax.random.split(key)
    x = jax.random.normal(k_x, (2, 4, 16, 16), jnp.float32)   # NCHW
    params = init_params(k_p)

    concat_fm, probs = jax.jit(feature_map_piler_forward)(x, params)
    jax.block_until_ready((concat_fm, probs))

    assert concat_fm.shape == (2, 2, 16, 16)
    assert probs.shape == (2, 10)
    assert bool(jnp.allclose(jnp.sum(probs, axis=-1), 1.0, atol=1e-5))

    ref_fm, ref_probs = reference_forward(x, params)
    assert bool(jnp.allclose(concat_fm, ref_fm, atol=1e-4, rtol=1e-4))
    assert bool(jnp.allclose(probs, ref_probs, atol=1e-5, rtol=1e-4))
    print("KERNEL_OK")
</pallas_src>

<mosaic_0001>
module attributes {stable_mosaic.version = 11 : i64} {
  func.func @fused_piler_kernel(%arg0: i32, %arg1: memref<8x9x9x4xf32, #tpu.memory_space<vmem>>, %arg2: memref<9x4x8xf32, #tpu.memory_space<vmem>>, %arg3: memref<1x8xf32, #tpu.memory_space<vmem>>, %arg4: memref<9x8x16xf32, #tpu.memory_space<vmem>>, %arg5: memref<1x16xf32, #tpu.memory_space<vmem>>, %arg6: memref<16x10xf32, #tpu.memory_space<vmem>>, %arg7: memref<1x10xf32, #tpu.memory_space<vmem>>, %arg8: memref<512x128xf32, #tpu.memory_space<vmem>>, %arg9: memref<512x1xf32, #tpu.memory_space<vmem>>, %arg10: memref<512x1xf32, #tpu.memory_space<vmem>>, %arg11: memref<2x10xf32, #tpu.memory_space<vmem>>, %arg12: memref<8x9x9x8xf32, #tpu.memory_space<vmem>>) attributes {dimension_semantics = [#tpu.dimension_semantics<arbitrary>], iteration_bounds = array<i64: 1>, scalar_prefetch = 0 : i64, scratch_operands = 1 : i64, tpu.core_type = #tpu.core_type<tc>, window_params = [{pipeline_mode = #tpu.pipeline_mode<synchronous>, transform_indices = @transform_0, window_bounds = array<i64: 8, 9, 9, 4>}, {pipeline_mode = #tpu.pipeline_mode<synchronous>, transform_indices = @transform_1, window_bounds = array<i64: 9, 4, 8>}, {pipeline_mode = #tpu.pipeline_mode<synchronous>, transform_indices = @transform_2, window_bounds = array<i64: 1, 8>}, {pipeline_mode = #tpu.pipeline_mode<synchronous>, transform_indices = @transform_3, window_bounds = array<i64: 9, 8, 16>}, {pipeline_mode = #tpu.pipeline_mode<synchronous>, transform_indices = @transform_4, window_bounds = array<i64: 1, 16>}, {pipeline_mode = #tpu.pipeline_mode<synchronous>, transform_indices = @transform_5, window_bounds = array<i64: 16, 10>}, {pipeline_mode = #tpu.pipeline_mode<synchronous>, transform_indices = @transform_6, window_bounds = array<i64: 1, 10>}, {pipeline_mode = #tpu.pipeline_mode<synchronous>, transform_indices = @transform_7, window_bounds = array<i64: 512, 128>}, {pipeline_mode = #tpu.pipeline_mode<synchronous>, transform_indices = @transform_8, window_bounds = array<i64: 512, 1>}, {pipeline_mode = #tpu.pipeline_mode<synchronous>, transform_indices = @transform_9, window_bounds = array<i64: 512, 1>}, {pipeline_mode = #tpu.pipeline_mode<synchronous>, transform_indices = @transform_10, window_bounds = array<i64: 2, 10>}]} {
    %cst = arith.constant 0.000000e+00 : f32
    %0 = vector.broadcast %cst : f32 to vector<8x9x9x8xf32>
    %c0 = arith.constant 0 : index
    %c0_0 = arith.constant 0 : index
    %c0_1 = arith.constant 0 : index
    %c0_2 = arith.constant 0 : index
    %1 = vector.load %arg12[%c0, %c0_0, %c0_1, %c0_2] : memref<8x9x9x8xf32, #tpu.memory_space<vmem>>, vector<8x9x9x8xf32>
    tpu.vector_store %arg12[%c0, %c0_0, %c0_1, %c0_2], %0 {strides = array<i32>} : memref<8x9x9x8xf32, #tpu.memory_space<vmem>>, vector<8x9x9x8xf32>,
    %cst_3 = arith.constant 0.000000e+00 : f32
    %2 = vector.broadcast %cst_3 : f32 to vector<128x8xf32>
    %c0_4 = arith.constant 0 : index
    %c0_5 = arith.constant 0 : index
    %c0_6 = arith.constant 0 : index
    %c0_7 = arith.constant 0 : index
    %3 = vector.load %arg1[%c0_4, %c0_5, %c0_6, %c0_7] : memref<8x9x9x4xf32, #tpu.memory_space<vmem>>, vector<2x8x8x4xf32>
    %4 = vector.shape_cast %3 : vector<2x8x8x4xf32> to vector<128x4xf32>
    %c0_8 = arith.constant 0 : index
    %c0_9 = arith.constant 0 : index
    %c0_10 = arith.constant 0 : index
    %5 = vector.load %arg2[%c0_8, %c0_9, %c0_10] : memref<9x4x8xf32, #tpu.memory_space<vmem>>, vector<1x4x8xf32>
    %6 = vector.shape_cast %5 : vector<1x4x8xf32> to vector<4x8xf32>
    %cst_11 = arith.constant dense<0.000000e+00> : vector<128x8xf32>
    %7 = tpu.matmul %4, %6, %cst_11 {dimension_numbers = #tpu.dot_dimension_numbers<[1], [0], [0], [1], [0, 0, 1, 1], [], []>} : vector<128x4xf32>, vector<4x8xf32>, vector<128x8xf32> -> vector<128x8xf32>
    %8 = arith.addf %2, %7 : vector<128x8xf32>
    %c2 = arith.constant 2 : index
    %c0_12 = arith.constant 0 : index
    %c0_13 = arith.constant 0 : index
    %c0_14 = arith.constant 0 : index
    %9 = vector.load %arg1[%c2, %c0_12, %c0_13, %c0_14] : memref<8x9x9x4xf32, #tpu.memory_space<vmem>>, vector<2x8x8x4xf32>
    %10 = vector.shape_cast %9 : vector<2x8x8x4xf32> to vector<128x4xf32>
    %c1 = arith.constant 1 : index
    %c0_15 = arith.constant 0 : index
    %c0_16 = arith.constant 0 : index
    %11 = vector.load %arg2[%c1, %c0_15, %c0_16] : memref<9x4x8xf32, #tpu.memory_space<vmem>>, vector<1x4x8xf32>
    %12 = vector.shape_cast %11 : vector<1x4x8xf32> to vector<4x8xf32>
    %cst_17 = arith.constant dense<0.000000e+00> : vector<128x8xf32>
    %13 = tpu.matmul %10, %12, %cst_17 {dimension_numbers = #tpu.dot_dimension_numbers<[1], [0], [0], [1], [0, 0, 1, 1], [], []>} : vector<128x4xf32>, vector<4x8xf32>, vector<128x8xf32> -> vector<128x8xf32>
    %14 = arith.addf %8, %13 : vector<128x8xf32>
    %c0_18 = arith.constant 0 : index
    %c0_19 = arith.constant 0 : index
    %c1_20 = arith.constant 1 : index
    %c0_21 = arith.constant 0 : index
    %15 = vector.load %arg1[%c0_18, %c0_19, %c1_20, %c0_21] : memref<8x9x9x4xf32, #tpu.memory_space<vmem>>, vector<2x8x8x4xf32>
    %16 = vector.shape_cast %15 : vector<2x8x8x4xf32> to vector<128x4xf32>
    %c2_22 = arith.constant 2 : index
    %c0_23 = arith.constant 0 : index
    %c0_24 = arith.constant 0 : index
    %17 = vector.load %arg2[%c2_22, %c0_23, %c0_24] : memref<9x4x8xf32, #tpu.memory_space<vmem>>, vector<1x4x8xf32>
    %18 = vector.shape_cast %17 : vector<1x4x8xf32> to vector<4x8xf32>
    %cst_25 = arith.constant dense<0.000000e+00> : vector<128x8xf32>
    %19 = tpu.matmul %16, %18, %cst_25 {dimension_numbers = #tpu.dot_dimension_numbers<[1], [0], [0], [1], [0, 0, 1, 1], [], []>} : vector<128x4xf32>, vector<4x8xf32>, vector<128x8xf32> -> vector<128x8xf32>
    %20 = arith.addf %14, %19 : vector<128x8xf32>
    %c4 = arith.constant 4 : index
    %c0_26 = arith.constant 0 : index
    %c0_27 = arith.constant 0 : index
    %c0_28 = arith.constant 0 : index
    %21 = vector.load %arg1[%c4, %c0_26, %c0_27, %c0_28] : memref<8x9x9x4xf32, #tpu.memory_space<vmem>>, vector<2x8x8x4xf32>
    %22 = vector.shape_cast %21 : vector<2x8x8x4xf32> to vector<128x4xf32>
    %c3 = arith.constant 3 : index
    %c0_29 = arith.constant 0 : index
    %c0_30 = arith.constant 0 : index
    %23 = vector.load %arg2[%c3, %c0_29, %c0_30] : memref<9x4x8xf32, #tpu.memory_space<vmem>>, vector<1x4x8xf32>
    %24 = vector.shape_cast %23 : vector<1x4x8xf32> to vector<4x8xf32>
    %cst_31 = arith.constant dense<0.000000e+00> : vector<128x8xf32>
    %25 = tpu.matmul %22, %24, %cst_31 {dimension_numbers = #tpu.dot_dimension_numbers<[1], [0], [0], [1], [0, 0, 1, 1], [], []>} : vector<128x4xf32>, vector<4x8xf32>, vector<128x8xf32> -> vector<128x8xf32>
    %26 = arith.addf %20, %25 : vector<128x8xf32>
    %c6 = arith.constant 6 : index
    %c0_32 = arith.constant 0 : index
    %c0_33 = arith.constant 0 : index
    %c0_34 = arith.constant 0 : index
    %27 = vector.load %arg1[%c6, %c0_32, %c0_33, %c0_34] : memref<8x9x9x4xf32, #tpu.memory_space<vmem>>, vector<2x8x8x4xf32>
    %28 = vector.shape_cast %27 : vector<2x8x8x4xf32> to vector<128x4xf32>
    %c4_35 = arith.constant 4 : index
    %c0_36 = arith.constant 0 : index
    %c0_37 = arith.constant 0 : index
    %29 = vector.load %arg2[%c4_35, %c0_36, %c0_37] : memref<9x4x8xf32, #tpu.memory_space<vmem>>, vector<1x4x8xf32>
    %30 = vector.shape_cast %29 : vector<1x4x8xf32> to vector<4x8xf32>
    %cst_38 = arith.constant dense<0.000000e+00> : vector<128x8xf32>
    %31 = tpu.matmul %28, %30, %cst_38 {dimension_numbers = #tpu.dot_dimension_numbers<[1], [0], [0], [1], [0, 0, 1, 1], [], []>} : vector<128x4xf32>, vector<4x8xf32>, vector<128x8xf32> -> vector<128x8xf32>
    %32 = arith.addf %26, %31 : vector<128x8xf32>
    %c4_39 = arith.constant 4 : index
    %c0_40 = arith.constant 0 : index
    %c1_41 = arith.constant 1 : index
    %c0_42 = arith.constant 0 : index
    %33 = vector.load %arg1[%c4_39, %c0_40, %c1_41, %c0_42] : memref<8x9x9x4xf32, #tpu.memory_space<vmem>>, vector<2x8x8x4xf32>
    %34 = vector.shape_cast %33 : vector<2x8x8x4xf32> to vector<128x4xf32>
    %c5 = arith.constant 5 : index
    %c0_43 = arith.constant 0 : index
    %c0_44 = arith.constant 0 : index
    %35 = vector.load %arg2[%c5, %c0_43, %c0_44] : memref<9x4x8xf32, #tpu.memory_space<vmem>>, vector<1x4x8xf32>
    %36 = vector.shape_cast %35 : vector<1x4x8xf32> to vector<4x8xf32>
    %cst_45 = arith.constant dense<0.000000e+00> : vector<128x8xf32>
    %37 = tpu.matmul %34, %36, %cst_45 {dimension_numbers = #tpu.dot_dimension_numbers<[1], [0], [0], [1], [0, 0, 1, 1], [], []>} : vector<128x4xf32>, vector<4x8xf32>, vector<128x8xf32> -> vector<128x8xf32>
    %38 = arith.addf %32, %37 : vector<128x8xf32>
    %c0_46 = arith.constant 0 : index
    %c1_47 = arith.constant 1 : index
    %c0_48 = arith.constant 0 : index
    %c0_49 = arith.constant 0 : index
    %39 = vector.load %arg1[%c0_46, %c1_47, %c0_48, %c0_49] : memref<8x9x9x4xf32, #tpu.memory_space<vmem>>, vector<2x8x8x4xf32>
    %40 = vector.shape_cast %39 : vector<2x8x8x4xf32> to vector<128x4xf32>
    %c6_50 = arith.constant 6 : index
    %c0_51 = arith.constant 0 : index
    %c0_52 = arith.constant 0 : index
    %41 = vector.load %arg2[%c6_50, %c0_51, %c0_52] : memref<9x4x8xf32, #tpu.memory_space<vmem>>, vector<1x4x8xf32>
    %42 = vector.shape_cast %41 : vector<1x4x8xf32> to vector<4x8xf32>
    %cst_53 = arith.constant dense<0.000000e+00> : vector<128x8xf32>
    %43 = tpu.matmul %40, %42, %cst_53 {dimension_numbers = #tpu.dot_dimension_numbers<[1], [0], [0], [1], [0, 0, 1, 1], [], []>} : vector<128x4xf32>, vector<4x8xf32>, vector<128x8xf32> -> vector<128x8xf32>
    %44 = arith.addf %38, %43 : vector<128x8xf32>
    %c2_54 = arith.constant 2 : index
    %c1_55 = arith.constant 1 : index
    %c0_56 = arith.constant 0 : index
    %c0_57 = arith.constant 0 : index
    %45 = vector.load %arg1[%c2_54, %c1_55, %c0_56, %c0_57] : memref<8x9x9x4xf32, #tpu.memory_space<vmem>>, vector<2x8x8x4xf32>
    %46 = vector.shape_cast %45 : vector<2x8x8x4xf32> to vector<128x4xf32>
    %c7 = arith.constant 7 : index
    %c0_58 = arith.constant 0 : index
    %c0_59 = arith.constant 0 : index
    %47 = vector.load %arg2[%c7, %c0_58, %c0_59] : memref<9x4x8xf32, #tpu.memory_space<vmem>>, vector<1x4x8xf32>
    %48 = vector.shape_cast %47 : vector<1x4x8xf32> to vector<4x8xf32>
    %cst_60 = arith.constant dense<0.000000e+00> : vector<128x8xf32>
    %49 = tpu.matmul %46, %48, %cst_60 {dimension_numbers = #tpu.dot_dimension_numbers<[1], [0], [0], [1], [0, 0, 1, 1], [], []>} : vector<128x4xf32>, vector<4x8xf32>, vector<128x8xf32> -> vector<128x8xf32>
    %50 = arith.addf %44, %49 : vector<128x8xf32>
    %c0_61 = arith.constant 0 : index
    %c1_62 = arith.constant 1 : index
    %c1_63 = arith.constant 1 : index
    %c0_64 = arith.constant 0 : index
    %51 = vector.load %arg1[%c0_61, %c1_62, %c1_63, %c0_64] : memref<8x9x9x4xf32, #tpu.memory_space<vmem>>, vector<2x8x8x4xf32>
    %52 = vector.shape_cast %51 : vector<2x8x8x4xf32> to vector<128x4xf32>
    %c8 = arith.constant 8 : index
    %c0_65 = arith.constant 0 : index
    %c0_66 = arith.constant 0 : index
    %53 = vector.load %arg2[%c8, %c0_65, %c0_66] : memref<9x4x8xf32, #tpu.memory_space<vmem>>, vector<1x4x8xf32>
    %54 = vector.shape_cast %53 : vector<1x4x8xf32> to vector<4x8xf32>
    %cst_67 = arith.constant dense<0.000000e+00> : vector<128x8xf32>
    %55 = tpu.matmul %52, %54, %cst_67 {dimension_numbers = #tpu.dot_dimension_numbers<[1], [0], [0], [1], [0, 0, 1, 1], [], []>} : vector<128x4xf32>, vector<4x8xf32>, vector<128x8xf32> -> vector<128x8xf32>
    %56 = arith.addf %50, %55 : vector<128x8xf32>
    %c0_68 = arith.constant 0 : index
    %c0_69 = arith.constant 0 : index
    %57 = vector.load %arg3[%c0_68, %c0_69] : memref<1x8xf32, #tpu.memory_space<vmem>>, vector<1x8xf32>
    %58 = vector.broadcast %57 : vector<1x8xf32> to vector<128x8xf32>
    %59 = arith.addf %56, %58 : vector<128x8xf32>
    %cst_70 = arith.constant 0.000000e+00 : f32
    %60 = vector.broadcast %cst_70 : f32 to vector<128x8xf32>
    %61 = arith.maximumf %59, %60 : vector<128x8xf32>
    %cst_71 = arith.constant dense<0.000000e+00> : vector<128xf32>
    %62 = vector.multi_reduction <add>, %61, %cst_71 [1] : vector<128x8xf32> to vector<128xf32>
    %63 = vector.shape_cast %62 : vector<128xf32> to vector<128x1xf32>
    %cst_72 = arith.constant 8.000000e+00 : f32
    %64 = vector.broadcast %cst_72 : f32 to vector<128x1xf32>
    %65 = arith.divf %63, %64 : vector<128x1xf32>
    %c0_73 = arith.constant 0 : index
    %c0_74 = arith.constant 0 : index
    %66 = vector.load %arg9[%c0_73, %c0_74] : memref<512x1xf32, #tpu.memory_space<vmem>>, vector<128x1xf32>
    tpu.vector_store %arg9[%c0_73, %c0_74], %65 {strides = array<i32>} : memref<512x1xf32, #tpu.memory_space<vmem>>, vector<128x1xf32>,
    %67 = vector.shape_cast %61 : vector<128x8xf32> to vector<2x8x8x8xf32>
    %c6_75 = arith.constant 6 : index
    %c0_76 = arith.constant 0 : index
    %c0_77 = arith.constant 0 : index
    %c0_78 = arith.constant 0 : index
    %68 = vector.load %arg12[%c6_75, %c0_76, %c0_77, %c0_78] : memref<8x9x9x8xf32, #tpu.memory_space<vmem>>, vector<2x8x8x8xf32>
    tpu.vector_store %arg12[%c6_75, %c0_76, %c0_77, %c0_78], %67 {strides = array<i32>} : memref<8x9x9x8xf32, #tpu.memory_space<vmem>>, vector<2x8x8x8xf32>,
    %cst_79 = arith.constant 0.000000e+00 : f32
    %69 = vector.broadcast %cst_79 : f32 to vector<128x8xf32>
    %c2_80 = arith.constant 2 : index
    %c0_81 = arith.constant 0 : index
    %c0_82 = arith.constant 0 : index
    %c0_83 = arith.constant 0 : index
    %70 = vector.load %arg1[%c2_80, %c0_81, %c0_82, %c0_83] : memref<8x9x9x4xf32, #tpu.memory_space<vmem>>, vector<2x8x8x4xf32>
    %71 = vector.shape_cast %70 : vector<2x8x8x4xf32> to vector<128x4xf32>
    %c0_84 = arith.constant 0 : index
    %c0_85 = arith.constant 0 : index
    %c0_86 = arith.constant 0 : index
    %72 = vector.load %arg2[%c0_84, %c0_85, %c0_86] : memref<9x4x8xf32, #tpu.memory_space<vmem>>, vector<1x4x8xf32>
    %73 = vector.shape_cast %72 : vector<1x4x8xf32> to vector<4x8xf32>
    %cst_87 = arith.constant dense<0.000000e+00> : vector<128x8xf32>
    %74 = tpu.matmul %71, %73, %cst_87 {dimension_numbers = #tpu.dot_dimension_numbers<[1], [0], [0], [1], [0, 0, 1, 1], [], []>} : vector<128x4xf32>, vector<4x8xf32>, vector<128x8xf32> -> vector<128x8xf32>
    %75 = arith.addf %69, %74 : vector<128x8xf32>
    %c0_88 = arith.constant 0 : index
    %c0_89 = arith.constant 0 : index
    %c1_90 = arith.constant 1 : index
    %c0_91 = arith.constant 0 : index
    %76 = vector.load %arg1[%c0_88, %c0_89, %c1_90, %c0_91] : memref<8x9x9x4xf32, #tpu.memory_space<vmem>>, vector<2x8x8x4xf32>
    %77 = vector.shape_cast %76 : vector<2x8x8x4xf32> to vector<128x4xf32>
    %c1_92 = arith.constant 1 : index
    %c0_93 = arith.constant 0 : index
    %c0_94 = arith.constant 0 : index
    %78 = vector.load %arg2[%c1_92, %c0_93, %c0_94] : memref<9x4x8xf32, #tpu.memory_space<vmem>>, vector<1x4x8xf32>
    %79 = vector.shape_cast %78 : vector<1x4x8xf32> to vector<4x8xf32>
    %cst_95 = arith.constant dense<0.000000e+00> : vector<128x8xf32>
    %80 = tpu.matmul %77, %79, %cst_95 {dimension_numbers = #tpu.dot_dimension_numbers<[1], [0], [0], [1], [0, 0, 1, 1], [], []>} : vector<128x4xf32>, vector<4x8xf32>, vector<128x8xf32> -> vector<128x8xf32>
    %81 = arith.addf %75, %80 : vector<128x8xf32>
    %c2_96 = arith.constant 2 : index
    %c0_97 = arith.constant 0 : index
    %c1_98 = arith.constant 1 : index
    %c0_99 = arith.constant 0 : index
    %82 = vector.load %arg1[%c2_96, %c0_97, %c1_98, %c0_99] : memref<8x9x9x4xf32, #tpu.memory_space<vmem>>, vector<2x8x8x4xf32>
    %83 = vector.shape_cast %82 : vector<2x8x8x4xf32> to vector<128x4xf32>
    %c2_100 = arith.constant 2 : index
    %c0_101 = arith.constant 0 : index
    %c0_102 = arith.constant 0 : index
    %84 = vector.load %arg2[%c2_100, %c0_101, %c0_102] : memref<9x4x8xf32, #tpu.memory_space<vmem>>, vector<1x4x8xf32>
    %85 = vector.shape_cast %84 : vector<1x4x8xf32> to vector<4x8xf32>
    %cst_103 = arith.constant dense<0.000000e+00> : vector<128x8xf32>
    %86 = tpu.matmul %83, %85, %cst_103 {dimension_numbers = #tpu.dot_dimension_numbers<[1], [0], [0], [1], [0, 0, 1, 1], [], []>} : vector<128x4xf32>, vector<4x8xf32>, vector<128x8xf32> -> vector<128x8xf32>
    %87 = arith.addf %81, %86 : vector<128x8xf32>
    %c6_104 = arith.constant 6 : index
    %c0_105 = arith.constant 0 : index
    %c0_106 = arith.constant 0 : index
    %c0_107 = arith.constant 0 : index
    %88 = vector.load %arg1[%c6_104, %c0_105, %c0_106, %c0_107] : memref<8x9x9x4xf32, #tpu.memory_space<vmem>>, vector<2x8x8x4xf32>
    %89 = vector.shape_cast %88 : vector<2x8x8x4xf32> to vector<128x4xf32>
    %c3_108 = arith.constant 3 : index
    %c0_109 = arith.constant 0 : index
    %c0_110 = arith.constant 0 : index
    %90 = vector.load %arg2[%c3_108, %c0_109, %c0_110] : memref<9x4x8xf32, #tpu.memory_space<vmem>>, vector<1x4x8xf32>
    %91 = vector.shape_cast %90 : vector<1x4x8xf32> to vector<4x8xf32>
    %cst_111 = arith.constant dense<0.000000e+00> : vector<128x8xf32>
    %92 = tpu.matmul %89, %91, %cst_111 {dimension_numbers = #tpu.dot_dimension_numbers<[1], [0], [0], [1], [0, 0, 1, 1], [], []>} : vector<128x4xf32>, vector<4x8xf32>, vector<128x8xf32> -> vector<128x8xf32>
    %93 = arith.addf %87, %92 : vector<128x8xf32>
    %c4_112 = arith.constant 4 : index
    %c0_113 = arith.constant 0 : index
    %c1_114 = arith.constant 1 : index
    %c0_115 = arith.constant 0 : index
    %94 = vector.load %arg1[%c4_112, %c0_113, %c1_114, %c0_115] : memref<8x9x9x4xf32, #tpu.memory_space<vmem>>, vector<2x8x8x4xf32>
    %95 = vector.shape_cast %94 : vector<2x8x8x4xf32> to vector<128x4xf32>
    %c4_116 = arith.constant 4 : index
    %c0_117 = arith.constant 0 : index
    %c0_118 = arith.constant 0 : index
    %96 = vector.load %arg2[%c4_116, %c0_117, %c0_118] : memref<9x4x8xf32, #tpu.memory_space<vmem>>, vector<1x4x8xf32>
    %97 = vector.shape_cast %96 : vector<1x4x8xf32> to vector<4x8xf32>
    %cst_119 = arith.constant dense<0.000000e+00> : vector<128x8xf32>
    %98 = tpu.matmul %95, %97, %cst_119 {dimension_numbers = #tpu.dot_dimension_numbers<[1], [0], [0], [1], [0, 0, 1, 1], [], []>} : vector<128x4xf32>, vector<4x8xf32>, vector<128x8xf32> -> vector<128x8xf32>
    %99 = arith.addf %93, %98 : vector<128x8xf32>
    %c6_120 = arith.constant 6 : index
    %c0_121 = arith.constant 0 : index
    %c1_122 = arith.constant 1 : index
    %c0_123 = arith.constant 0 : index
    %100 = vector.load %arg1[%c6_120, %c0_121, %c1_122, %c0_123] : memref<8x9x9x4xf32, #tpu.memory_space<vmem>>, vector<2x8x8x4xf32>
    %101 = vector.shape_cast %100 : vector<2x8x8x4xf32> to vector<128x4xf32>
    %c5_124 = arith.constant 5 : index
    %c0_125 = arith.constant 0 : index
    %c0_126 = arith.constant 0 : index
    %102 = vector.load %arg2[%c5_124, %c0_125, %c0_126] : memref<9x4x8xf32, #tpu.memory_space<vmem>>, vector<1x4x8xf32>
    %103 = vector.shape_cast %102 : vector<1x4x8xf32> to vector<4x8xf32>
    %cst_127 = arith.constant dense<0.000000e+00> : vector<128x8xf32>
    %104 = tpu.matmul %101, %103, %cst_127 {dimension_numbers = #tpu.dot_dimension_numbers<[1], [0], [0], [1], [0, 0, 1, 1], [], []>} : vector<128x4xf32>, vector<4x8xf32>, vector<128x8xf32> -> vector<128x8xf32>
    %105 = arith.addf %99, %104 : vector<128x8xf32>
    %c2_128 = arith.constant 2 : index
    %c1_129 = arith.constant 1 : index
    %c0_130 = arith.constant 0 : index
    %c0_131 = arith.constant 0 : index
    %106 = vector.load %arg1[%c2_128, %c1_129, %c0_130, %c0_131] : memref<8x9x9x4xf32, #tpu.memory_space<vmem>>, vector<2x8x8x4xf32>
    %107 = vector.shape_cast %106 : vector<2x8x8x4xf32> to vector<128x4xf32>
    %c6_132 = arith.constant 6 : index
    %c0_133 = arith.constant 0 : index
    %c0_134 = arith.constant 0 : index
    %108 = vector.load %arg2[%c6_132, %c0_133, %c0_134] : memref<9x4x8xf32, #tpu.memory_space<vmem>>, vector<1x4x8xf32>
    %109 = vector.shape_cast %108 : vector<1x4x8xf32> to vector<4x8xf32>
    %cst_135 = arith.constant dense<0.000000e+00> : vector<128x8xf32>
    %110 = tpu.matmul %107, %109, %cst_135 {dimension_numbers = #tpu.dot_dimension_numbers<[1], [0], [0], [1], [0, 0, 1, 1], [], []>} : vector<128x4xf32>, vector<4x8xf32>, vector<128x8xf32> -> vector<128x8xf32>
    %111 = arith.addf %105, %110 : vector<128x8xf32>
    %c0_136 = arith.constant 0 : index
    %c1_137 = arith.constant 1 : index
    %c1_138 = arith.constant 1 : index
    %c0_139 = arith.constant 0 : index
    %112 = vector.load %arg1[%c0_136, %c1_137, %c1_138, %c0_139] : memref<8x9x9x4xf32, #tpu.memory_space<vmem>>, vector<2x8x8x4xf32>
    %113 = vector.shape_cast %112 : vector<2x8x8x4xf32> to vector<128x4xf32>
    %c7_140 = arith.constant 7 : index
    %c0_141 = arith.constant 0 : index
    %c0_142 = arith.constant 0 : index
    %114 = vector.load %arg2[%c7_140, %c0_141, %c0_142] : memref<9x4x8xf32, #tpu.memory_space<vmem>>, vector<1x4x8xf32>
    %115 = vector.shape_cast %114 : vector<1x4x8xf32> to vector<4x8xf32>
    %cst_143 = arith.constant dense<0.000000e+00> : vector<128x8xf32>
    %116 = tpu.matmul %113, %115, %cst_143 {dimension_numbers = #tpu.dot_dimension_numbers<[1], [0], [0], [1], [0, 0, 1, 1], [], []>} : vector<128x4xf32>, vector<4x8xf32>, vector<128x8xf32> -> vector<128x8xf32>
    %117 = arith.addf %111, %116 : vector<128x8xf32>
    %c2_144 = arith.constant 2 : index
    %c1_145 = arith.constant 1 : index
    %c1_146 = arith.constant 1 : index
    %c0_147 = arith.constant 0 : index
    %118 = vector.load %arg1[%c2_144, %c1_145, %c1_146, %c0_147] : memref<8x9x9x4xf32, #tpu.memory_space<vmem>>, vector<2x8x8x4xf32>
    %119 = vector.shape_cast %118 : vector<2x8x8x4xf32> to vector<128x4xf32>
    %c8_148 = arith.constant 8 : index
    %c0_149 = arith.constant 0 : index
    %c0_150 = arith.constant 0 : index
    %120 = vector.load %arg2[%c8_148, %c0_149, %c0_150] : memref<9x4x8xf32, #tpu.memory_space<vmem>>, vector<1x4x8xf32>
    %121 = vector.shape_cast %120 : vector<1x4x8xf32> to vector<4x8xf32>
    %cst_151 = arith.constant dense<0.000000e+00> : vector<128x8xf32>
    %122 = tpu.matmul %119, %121, %cst_151 {dimension_numbers = #tpu.dot_dimension_numbers<[1], [0], [0], [1], [0, 0, 1, 1], [], []>} : vector<128x4xf32>, vector<4x8xf32>, vector<128x8xf32> -> vector<128x8xf32>
    %123 = arith.addf %117, %122 : vector<128x8xf32>
    %c0_152 = arith.constant 0 : index
    %c0_153 = arith.constant 0 : index
    %124 = vector.load %arg3[%c0_152, %c0_153] : memref<1x8xf32, #tpu.memory_space<vmem>>, vector<1x8xf32>
    %125 = vector.broadcast %124 : vector<1x8xf32> to vector<128x8xf32>
    %126 = arith.addf %123, %125 : vector<128x8xf32>
    %cst_154 = arith.constant 0.000000e+00 : f32
    %127 = vector.broadcast %cst_154 : f32 to vector<128x8xf32>
    %128 = arith.maximumf %126, %127 : vector<128x8xf32>
    %cst_155 = arith.constant dense<0.000000e+00> : vector<128xf32>
    %129 = vector.multi_reduction <add>, %128, %cst_155 [1] : vector<128x8xf32> to vector<128xf32>
    %130 = vector.shape_cast %129 : vector<128xf32> to vector<128x1xf32>
    %cst_156 = arith.constant 8.000000e+00 : f32
    %131 = vector.broadcast %cst_156 : f32 to vector<128x1xf32>
    %132 = arith.divf %130, %131 : vector<128x1xf32>
    %c128 = arith.constant 128 : index
    %c0_157 = arith.constant 0 : index
    %133 = vector.load %arg9[%c128, %c0_157] : memref<512x1xf32, #tpu.memory_space<vmem>>, vector<128x1xf32>
    tpu.vector_store %arg9[%c128, %c0_157], %132 {strides = array<i32>} : memref<512x1xf32, #tpu.memory_space<vmem>>, vector<128x1xf32>,
    %134 = vector.shape_cast %128 : vector<128x8xf32> to vector<2x8x8x8xf32>
    %c4_158 = arith.constant 4 : index
    %c0_159 = arith.constant 0 : index
    %c1_160 = arith.constant 1 : index
    %c0_161 = arith.constant 0 : index
    %135 = vector.load %arg12[%c4_158, %c0_159, %c1_160, %c0_161] : memref<8x9x9x8xf32, #tpu.memory_space<vmem>>, vector<2x8x8x8xf32>
    tpu.vector_store %arg12[%c4_158, %c0_159, %c1_160, %c0_161], %134 {strides = array<i32>} : memref<8x9x9x8xf32, #tpu.memory_space<vmem>>, vector<2x8x8x8xf32>,
    %cst_162 = arith.constant 0.000000e+00 : f32
    %136 = vector.broadcast %cst_162 : f32 to vector<128x8xf32>
    %c4_163 = arith.constant 4 : index
    %c0_164 = arith.constant 0 : index
    %c0_165 = arith.constant 0 : index
    %c0_166 = arith.constant 0 : index
    %137 = vector.load %arg1[%c4_163, %c0_164, %c0_165, %c0_166] : memref<8x9x9x4xf32, #tpu.memory_space<vmem>>, vector<2x8x8x4xf32>
    %138 = vector.shape_cast %137 : vector<2x8x8x4xf32> to vector<128x4xf32>
    %c0_167 = arith.constant 0 : index
    %c0_168 = arith.constant 0 : index
    %c0_169 = arith.constant 0 : index
    %139 = vector.load %arg2[%c0_167, %c0_168, %c0_169] : memref<9x4x8xf32, #tpu.memory_space<vmem>>, vector<1x4x8xf32>
    %140 = vector.shape_cast %139 : vector<1x4x8xf32> to vector<4x8xf32>
    %cst_170 = arith.constant dense<0.000000e+00> : vector<128x8xf32>
    %141 = tpu.matmul %138, %140, %cst_170 {dimension_numbers = #tpu.dot_dimension_numbers<[1], [0], [0], [1], [0, 0, 1, 1], [], []>} : vector<128x4xf32>, vector<4x8xf32>, vector<128x8xf32> -> vector<128x8xf32>
    %142 = arith.addf %136, %141 : vector<128x8xf32>
    %c6_171 = arith.constant 6 : index
    %c0_172 = arith.constant 0 : index
    %c0_173 = arith.constant 0 : index
    %c0_174 = arith.constant 0 : index
    %143 = vector.load %arg1[%c6_171, %c0_172, %c0_173, %c0_174] : memref<8x9x9x4xf32, #tpu.memory_space<vmem>>, vector<2x8x8x4xf32>
    %144 = vector.shape_cast %143 : vector<2x8x8x4xf32> to vector<128x4xf32>
    %c1_175 = arith.constant 1 : index
    %c0_176 = arith.constant 0 : index
    %c0_177 = arith.constant 0 : index
    %145 = vector.load %arg2[%c1_175, %c0_176, %c0_177] : memref<9x4x8xf32, #tpu.memory_space<vmem>>, vector<1x4x8xf32>
    %146 = vector.shape_cast %145 : vector<1x4x8xf32> to vector<4x8xf32>
    %cst_178 = arith.constant dense<0.000000e+00> : vector<128x8xf32>
    %147 = tpu.matmul %144, %146, %cst_178 {dimension_numbers = #tpu.dot_dimension_numbers<[1], [0], [0], [1], [0, 0, 1, 1], [], []>} : vector<128x4xf32>, vector<4x8xf32>, vector<128x8xf32> -> vector<128x8xf32>
    %148 = arith.addf %142, %147 : vector<128x8xf32>
    %c4_179 = arith.constant 4 : index
    %c0_180 = arith.constant 0 : index
    %c1_181 = arith.constant 1 : index
    %c0_182 = arith.constant 0 : index
    %149 = vector.load %arg1[%c4_179, %c0_180, %c1_181, %c0_182] : memref<8x9x9x4xf32, #tpu.memory_space<vmem>>, vector<2x8x8x4xf32>
    %150 = vector.shape_cast %149 : vector<2x8x8x4xf32> to vector<128x4xf32>
    %c2_183 = arith.constant 2 : index
    %c0_184 = arith.constant 0 : index
    %c0_185 = arith.constant 0 : index
    %151 = vector.load %arg2[%c2_183, %c0_184, %c0_185] : memref<9x4x8xf32, #tpu.memory_space<vmem>>, vector<1x4x8xf32>
    %152 = vector.shape_cast %151 : vector<1x4x8xf32> to vector<4x8xf32>
    %cst_186 = arith.constant dense<0.000000e+00> : vector<128x8xf32>
    %153 = tpu.matmul %150, %152, %cst_186 {dimension_numbers = #tpu.dot_dimension_numbers<[1], [0], [0], [1], [0, 0, 1, 1], [], []>} : vector<128x4xf32>, vector<4x8xf32>, vector<128x8xf32> -> vector<128x8xf32>
    %154 = arith.addf %148, %153 : vector<128x8xf32>
    %c0_187 = arith.constant 0 : index
    %c1_188 = arith.constant 1 : index
    %c0_189 = arith.constant 0 : index
    %c0_190 = arith.constant 0 : index
    %155 = vector.load %arg1[%c0_187, %c1_188, %c0_189, %c0_190] : memref<8x9x9x4xf32, #tpu.memory_space<vmem>>, vector<2x8x8x4xf32>
    %156 = vector.shape_cast %155 : vector<2x8x8x4xf32> to vector<128x4xf32>
    %c3_191 = arith.constant 3 : index
    %c0_192 = arith.constant 0 : index
    %c0_193 = arith.constant 0 : index
    %157 = vector.load %arg2[%c3_191, %c0_192, %c0_193] : memref<9x4x8xf32, #tpu.memory_space<vmem>>, vector<1x4x8xf32>
    %158 = vector.shape_cast %157 : vector<1x4x8xf32> to vector<4x8xf32>
    %cst_194 = arith.constant dense<0.000000e+00> : vector<128x8xf32>
    %159 = tpu.matmul %156, %158, %cst_194 {dimension_numbers = #tpu.dot_dimension_numbers<[1], [0], [0], [1], [0, 0, 1, 1], [], []>} : vector<128x4xf32>, vector<4x8xf32>, vector<128x8xf32> -> vector<128x8xf32>
    %160 = arith.addf %154, %159 : vector<128x8xf32>
    %c2_195 = arith.constant 2 : index
    %c1_196 = arith.constant 1 : index
    %c0_197 = arith.constant 0 : index
    %c0_198 = arith.constant 0 : index
    %161 = vector.load %arg1[%c2_195, %c1_196, %c0_197, %c0_198] : memref<8x9x9x4xf32, #tpu.memory_space<vmem>>, vector<2x8x8x4xf32>
    %162 = vector.shape_cast %161 : vector<2x8x8x4xf32> to vector<128x4xf32>
    %c4_199 = arith.constant 4 : index
    %c0_200 = arith.constant 0 : index
    %c0_201 = arith.constant 0 : index
    %163 = vector.load %arg2[%c4_199, %c0_200, %c0_201] : memref<9x4x8xf32, #tpu.memory_space<vmem>>, vector<1x4x8xf32>
    %164 = vector.shape_cast %163 : vector<1x4x8xf32> to vector<4x8xf32>
    %cst_202 = arith.constant dense<0.000000e+00> : vector<128x8xf32>
    %165 = tpu.matmul %162, %164, %cst_202 {dimension_numbers = #tpu.dot_dimension_numbers<[1], [0], [0], [1], [0, 0, 1, 1], [], []>} : vector<128x4xf32>, vector<4x8xf32>, vector<128x8xf32> -> vector<128x8xf32>
    %166 = arith.addf %160, %165 : vector<128x8xf32>
    %c0_203 = arith.constant 0 : index
    %c1_204 = arith.constant 1 : index
    %c1_205 = arith.constant 1 : index
    %c0_206 = arith.constant 0 : index
    %167 = vector.load %arg1[%c0_203, %c1_204, %c1_205, %c0_206] : memref<8x9x9x4xf32, #tpu.memory_space<vmem>>, vector<2x8x8x4xf32>
    %168 = vector.shape_cast %167 : vector<2x8x8x4xf32> to vector<128x4xf32>
    %c5_207 = arith.constant 5 : index
    %c0_208 = arith.constant 0 : index
    %c0_209 = arith.constant 0 : index
    %169 = vector.load %arg2[%c5_207, %c0_208, %c0_209] : memref<9x4x8xf32, #tpu.memory_space<vmem>>, vector<1x4x8xf32>
    %170 = vector.shape_cast %169 : vector<1x4x8xf32> to vector<4x8xf32>
    %cst_210 = arith.constant dense<0.000000e+00> : vector<128x8xf32>
    %171 = tpu.matmul %168, %170, %cst_210 {dimension_numbers = #tpu.dot_dimension_numbers<[1], [0], [0], [1], [0, 0, 1, 1], [], []>} : vector<128x4xf32>, vector<4x8xf32>, vector<128x8xf32> -> vector<128x8xf32>
    %172 = arith.addf %166, %171 : vector<128x8xf32>
    %c4_211 = arith.constant 4 : index
    %c1_212 = arith.constant 1 : index
    %c0_213 = arith.constant 0 : index
    %c0_214 = arith.constant 0 : index
    %173 = vector.load %arg1[%c4_211, %c1_212, %c0_213, %c0_214] : memref<8x9x9x4xf32, #tpu.memory_space<vmem>>, vector<2x8x8x4xf32>
    %174 = vector.shape_cast %173 : vector<2x8x8x4xf32> to vector<128x4xf32>
    %c6_215 = arith.constant 6 : index
    %c0_216 = arith.constant 0 : index
    %c0_217 = arith.constant 0 : index
    %175 = vector.load %arg2[%c6_215, %c0_216, %c0_217] : memref<9x4x8xf32, #tpu.memory_space<vmem>>, vector<1x4x8xf32>
    %176 = vector.shape_cast %175 : vector<1x4x8xf32> to vector<4x8xf32>
    %cst_218 = arith.constant dense<0.000000e+00> : vector<128x8xf32>
    %177 = tpu.matmul %174, %176, %cst_218 {dimension_numbers = #tpu.dot_dimension_numbers<[1], [0], [0], [1], [0, 0, 1, 1], [], []>} : vector<128x4xf32>, vector<4x8xf32>, vector<128x8xf32> -> vector<128x8xf32>
    %178 = arith.addf %172, %177 : vector<128x8xf32>
    %c6_219 = arith.constant 6 : index
    %c1_220 = arith.constant 1 : index
    %c0_221 = arith.constant 0 : index
    %c0_222 = arith.constant 0 : index
    %179 = vector.load %arg1[%c6_219, %c1_220, %c0_221, %c0_222] : memref<8x9x9x4xf32, #tpu.memory_space<vmem>>, vector<2x8x8x4xf32>
    %180 = vector.shape_cast %179 : vector<2x8x8x4xf32> to vector<128x4xf32>
    %c7_223 = arith.constant 7 : index
    %c0_224 = arith.constant 0 : index
    %c0_225 = arith.constant 0 : index
    %181 = vector.load %arg2[%c7_223, %c0_224, %c0_225] : memref<9x4x8xf32, #tpu.memory_space<vmem>>, vector<1x4x8xf32>
    %182 = vector.shape_cast %181 : vector<1x4x8xf32> to vector<4x8xf32>
    %cst_226 = arith.constant dense<0.000000e+00> : vector<128x8xf32>
    %183 = tpu.matmul %180, %182, %cst_226 {dimension_numbers = #tpu.dot_dimension_numbers<[1], [0], [0], [1], [0, 0, 1, 1], [], []>} : vector<128x4xf32>, vector<4x8xf32>, vector<128x8xf32> -> vector<128x8xf32>
    %184 = arith.addf %178, %183 : vector<128x8xf32>
    %c4_227 = arith.constant 4 : index
    %c1_228 = arith.constant 1 : index
    %c1_229 = arith.constant 1 : index
    %c0_230 = arith.constant 0 : index
    %185 = vector.load %arg1[%c4_227, %c1_228, %c1_229, %c0_230] : memref<8x9x9x4xf32, #tpu.memory_space<vmem>>, vector<2x8x8x4xf32>
    %186 = vector.shape_cast %185 : vector<2x8x8x4xf32> to vector<128x4xf32>
    %c8_231 = arith.constant 8 : index
    %c0_232 = arith.constant 0 : index
    %c0_233 = arith.constant 0 : index
    %187 = vector.load %arg2[%c8_231, %c0_232, %c0_233] : memref<9x4x8xf32, #tpu.memory_space<vmem>>, vector<1x4x8xf32>
    %188 = vector.shape_cast %187 : vector<1x4x8xf32> to vector<4x8xf32>
    %cst_234 = arith.constant dense<0.000000e+00> : vector<128x8xf32>
    %189 = tpu.matmul %186, %188, %cst_234 {dimension_numbers = #tpu.dot_dimension_numbers<[1], [0], [0], [1], [0, 0, 1, 1], [], []>} : vector<128x4xf32>, vector<4x8xf32>, vector<128x8xf32> -> vector<128x8xf32>
    %190 = arith.addf %184, %189 : vector<128x8xf32>
    %c0_235 = arith.constant 0 : index
    %c0_236 = arith.constant 0 : index
    %191 = vector.load %arg3[%c0_235, %c0_236] : memref<1x8xf32, #tpu.memory_space<vmem>>, vector<1x8xf32>
    %192 = vector.broadcast %191 : vector<1x8xf32> to vector<128x8xf32>
    %193 = arith.addf %190, %192 : vector<128x8xf32>
    %cst_237 = arith.constant 0.000000e+00 : f32
    %194 = vector.broadcast %cst_237 : f32 to vector<128x8xf32>
    %195 = arith.maximumf %193, %194 : vector<128x8xf32>
    %cst_238 = arith.constant dense<0.000000e+00> : vector<128xf32>
    %196 = vector.multi_reduction <add>, %195, %cst_238 [1] : vector<128x8xf32> to vector<128xf32>
    %197 = vector.shape_cast %196 : vector<128xf32> to vector<128x1xf32>
    %cst_239 = arith.constant 8.000000e+00 : f32
    %198 = vector.broadcast %cst_239 : f32 to vector<128x1xf32>
    %199 = arith.divf %197, %198 : vector<128x1xf32>
    %c256 = arith.constant 256 : index
    %c0_240 = arith.constant 0 : index
    %200 = vector.load %arg9[%c256, %c0_240] : memref<512x1xf32, #tpu.memory_space<vmem>>, vector<128x1xf32>
    tpu.vector_store %arg9[%c256, %c0_240], %199 {strides = array<i32>} : memref<512x1xf32, #tpu.memory_space<vmem>>, vector<128x1xf32>,
    %201 = vector.shape_cast %195 : vector<128x8xf32> to vector<2x8x8x8xf32>
    %c2_241 = arith.constant 2 : index
    %c1_242 = arith.constant 1 : index
    %c0_243 = arith.constant 0 : index
    %c0_244 = arith.constant 0 : index
    %202 = vector.load %arg12[%c2_241, %c1_242, %c0_243, %c0_244] : memref<8x9x9x8xf32, #tpu.memory_space<vmem>>, vector<2x8x8x8xf32>
    tpu.vector_store %arg12[%c2_241, %c1_242, %c0_243, %c0_244], %201 {strides = array<i32>} : memref<8x9x9x8xf32, #tpu.memory_space<vmem>>, vector<2x8x8x8xf32>,
    %cst_245 = arith.constant 0.000000e+00 : f32
    %203 = vector.broadcast %cst_245 : f32 to vector<128x8xf32>
    %c6_246 = arith.constant 6 : index
    %c0_247 = arith.constant 0 : index
    %c0_248 = arith.constant 0 : index
    %c0_249 = arith.constant 0 : index
    %204 = vector.load %arg1[%c6_246, %c0_247, %c0_248, %c0_249] : memref<8x9x9x4xf32, #tpu.memory_space<vmem>>, vector<2x8x8x4xf32>
    %205 = vector.shape_cast %204 : vector<2x8x8x4xf32> to vector<128x4xf32>
    %c0_250 = arith.constant 0 : index
    %c0_251 = arith.constant 0 : index
    %c0_252 = arith.constant 0 : index
    %206 = vector.load %arg2[%c0_250, %c0_251, %c0_252] : memref<9x4x8xf32, #tpu.memory_space<vmem>>, vector<1x4x8xf32>
    %207 = vector.shape_cast %206 : vector<1x4x8xf32> to vector<4x8xf32>
    %cst_253 = arith.constant dense<0.000000e+00> : vector<128x8xf32>
    %208 = tpu.matmul %205, %207, %cst_253 {dimension_numbers = #tpu.dot_dimension_numbers<[1], [0], [0], [1], [0, 0, 1, 1], [], []>} : vector<128x4xf32>, vector<4x8xf32>, vector<128x8xf32> -> vector<128x8xf32>
    %209 = arith.addf %203, %208 : vector<128x8xf32>
    %c4_254 = arith.constant 4 : index
    %c0_255 = arith.constant 0 : index
    %c1_256 = arith.constant 1 : index
    %c0_257 = arith.constant 0 : index
    %210 = vector.load %arg1[%c4_254, %c0_255, %c1_256, %c0_257] : memref<8x9x9x4xf32, #tpu.memory_space<vmem>>, vector<2x8x8x4xf32>
    %211 = vector.shape_cast %210 : vector<2x8x8x4xf32> to vector<128x4xf32>
    %c1_258 = arith.constant 1 : index
    %c0_259 = arith.constant 0 : index
    %c0_260 = arith.constant 0 : index
    %212 = vector.load %arg2[%c1_258, %c0_259, %c0_260] : memref<9x4x8xf32, #tpu.memory_space<vmem>>, vector<1x4x8xf32>
    %213 = vector.shape_cast %212 : vector<1x4x8xf32> to vector<4x8xf32>
    %cst_261 = arith.constant dense<0.000000e+00> : vector<128x8xf32>
    %214 = tpu.matmul %211, %213, %cst_261 {dimension_numbers = #tpu.dot_dimension_numbers<[1], [0], [0], [1], [0, 0, 1, 1], [], []>} : vector<128x4xf32>, vector<4x8xf32>, vector<128x8xf32> -> vector<128x8xf32>
    %215 = arith.addf %209, %214 : vector<128x8xf32>
    %c6_262 = arith.constant 6 : index
    %c0_263 = arith.constant 0 : index
    %c1_264 = arith.constant 1 : index
    %c0_265 = arith.constant 0 : index
    %216 = vector.load %arg1[%c6_262, %c0_263, %c1_264, %c0_265] : memref<8x9x9x4xf32, #tpu.memory_space<vmem>>, vector<2x8x8x4xf32>
    %217 = vector.shape_cast %216 : vector<2x8x8x4xf32> to vector<128x4xf32>
    %c2_266 = arith.constant 2 : index
    %c0_267 = arith.constant 0 : index
    %c0_268 = arith.constant 0 : index
    %218 = vector.load %arg2[%c2_266, %c0_267, %c0_268] : memref<9x4x8xf32, #tpu.memory_space<vmem>>, vector<1x4x8xf32>
    %219 = vector.shape_cast %218 : vector<1x4x8xf32> to vector<4x8xf32>
    %cst_269 = arith.constant dense<0.000000e+00> : vector<128x8xf32>
    %220 = tpu.matmul %217, %219, %cst_269 {dimension_numbers = #tpu.dot_dimension_numbers<[1], [0], [0], [1], [0, 0, 1, 1], [], []>} : vector<128x4xf32>, vector<4x8xf32>, vector<128x8xf32> -> vector<128x8xf32>
    %221 = arith.addf %215, %220 : vector<128x8xf32>
    %c2_270 = arith.constant 2 : index
    %c1_271 = arith.constant 1 : index
    %c0_272 = arith.constant 0 : index
    %c0_273 = arith.constant 0 : index
    %222 = vector.load %arg1[%c2_270, %c1_271, %c0_272, %c0_273] : memref<8x9x9x4xf32, #tpu.memory_space<vmem>>, vector<2x8x8x4xf32>
    %223 = vector.shape_cast %222 : vector<2x8x8x4xf32> to vector<128x4xf32>
    %c3_274 = arith.constant 3 : index
    %c0_275 = arith.constant 0 : index
    %c0_276 = arith.constant 0 : index
    %224 = vector.load %arg2[%c3_274, %c0_275, %c0_276] : memref<9x4x8xf32, #tpu.memory_space<vmem>>, vector<1x4x8xf32>
    %225 = vector.shape_cast %224 : vector<1x4x8xf32> to vector<4x8xf32>
    %cst_277 = arith.constant dense<0.000000e+00> : vector<128x8xf32>
    %226 = tpu.matmul %223, %225, %cst_277 {dimension_numbers = #tpu.dot_dimension_numbers<[1], [0], [0], [1], [0, 0, 1, 1], [], []>} : vector<128x4xf32>, vector<4x8xf32>, vector<128x8xf32> -> vector<128x8xf32>
    %227 = arith.addf %221, %226 : vector<128x8xf32>
    %c0_278 = arith.constant 0 : index
    %c1_279 = arith.constant 1 : index
    %c1_280 = arith.constant 1 : index
    %c0_281 = arith.constant 0 : index
    %228 = vector.load %arg1[%c0_278, %c1_279, %c1_280, %c0_281] : memref<8x9x9x4xf32, #tpu.memory_space<vmem>>, vector<2x8x8x4xf32>
    %229 = vector.shape_cast %228 : vector<2x8x8x4xf32> to vector<128x4xf32>
    %c4_282 = arith.constant 4 : index
    %c0_283 = arith.constant 0 : index
    %c0_284 = arith.constant 0 : index
    %230 = vector.load %arg2[%c4_282, %c0_283, %c0_284] : memref<9x4x8xf32, #tpu.memory_space<vmem>>, vector<1x4x8xf32>
    %231 = vector.shape_cast %230 : vector<1x4x8xf32> to vector<4x8xf32>
    %cst_285 = arith.constant dense<0.000000e+00> : vector<128x8xf32>
    %232 = tpu.matmul %229, %231, %cst_285 {dimension_numbers = #tpu.dot_dimension_numbers<[1], [0], [0], [1], [0, 0, 1, 1], [], []>} : vector<128x4xf32>, vector<4x8xf32>, vector<128x8xf32> -> vector<128x8xf32>
    %233 = arith.addf %227, %232 : vector<128x8xf32>
    %c2_286 = arith.constant 2 : index
    %c1_287 = arith.constant 1 : index
    %c1_288 = arith.constant 1 : index
    %c0_289 = arith.constant 0 : index
    %234 = vector.load %arg1[%c2_286, %c1_287, %c1_288, %c0_289] : memref<8x9x9x4xf32, #tpu.memory_space<vmem>>, vector<2x8x8x4xf32>
    %235 = vector.shape_cast %234 : vector<2x8x8x4xf32> to vector<128x4xf32>
    %c5_290 = arith.constant 5 : index
    %c0_291 = arith.constant 0 : index
    %c0_292 = arith.constant 0 : index
    %236 = vector.load %arg2[%c5_290, %c0_291, %c0_292] : memref<9x4x8xf32, #tpu.memory_space<vmem>>, vector<1x4x8xf32>
    %237 = vector.shape_cast %236 : vector<1x4x8xf32> to vector<4x8xf32>
    %cst_293 = arith.constant dense<0.000000e+00> : vector<128x8xf32>
    %238 = tpu.matmul %235, %237, %cst_293 {dimension_numbers = #tpu.dot_dimension_numbers<[1], [0], [0], [1], [0, 0, 1, 1], [], []>} : vector<128x4xf32>, vector<4x8xf32>, vector<128x8xf32> -> vector<128x8xf32>
    %239 = arith.addf %233, %238 : vector<128x8xf32>
    %c6_294 = arith.constant 6 : index
    %c1_295 = arith.constant 1 : index
    %c0_296 = arith.constant 0 : index
    %c0_297 = arith.constant 0 : index
    %240 = vector.load %arg1[%c6_294, %c1_295, %c0_296, %c0_297] : memref<8x9x9x4xf32, #tpu.memory_space<vmem>>, vector<2x8x8x4xf32>
    %241 = vector.shape_cast %240 : vector<2x8x8x4xf32> to vector<128x4xf32>
    %c6_298 = arith.constant 6 : index
    %c0_299 = arith.constant 0 : index
    %c0_300 = arith.constant 0 : index
    %242 = vector.load %arg2[%c6_298, %c0_299, %c0_300] : memref<9x4x8xf32, #tpu.memory_space<vmem>>, vector<1x4x8xf32>
    %243 = vector.shape_cast %242 : vector<1x4x8xf32> to vector<4x8xf32>
    %cst_301 = arith.constant dense<0.000000e+00> : vector<128x8xf32>
    %244 = tpu.matmul %241, %243, %cst_301 {dimension_numbers = #tpu.dot_dimension_numbers<[1], [0], [0], [1], [0, 0, 1, 1], [], []>} : vector<128x4xf32>, vector<4x8xf32>, vector<128x8xf32> -> vector<128x8xf32>
    %245 = arith.addf %239, %244 : vector<128x8xf32>
    %c4_302 = arith.constant 4 : index
    %c1_303 = arith.constant 1 : index
    %c1_304 = arith.constant 1 : index
    %c0_305 = arith.constant 0 : index
    %246 = vector.load %arg1[%c4_302, %c1_303, %c1_304, %c0_305] : memref<8x9x9x4xf32, #tpu.memory_space<vmem>>, vector<2x8x8x4xf32>
    %247 = vector.shape_cast %246 : vector<2x8x8x4xf32> to vector<128x4xf32>
    %c7_306 = arith.constant 7 : index
    %c0_307 = arith.constant 0 : index
    %c0_308 = arith.constant 0 : index
    %248 = vector.load %arg2[%c7_306, %c0_307, %c0_308] : memref<9x4x8xf32, #tpu.memory_space<vmem>>, vector<1x4x8xf32>
    %249 = vector.shape_cast %248 : vector<1x4x8xf32> to vector<4x8xf32>
    %cst_309 = arith.constant dense<0.000000e+00> : vector<128x8xf32>
    %250 = tpu.matmul %247, %249, %cst_309 {dimension_numbers = #tpu.dot_dimension_numbers<[1], [0], [0], [1], [0, 0, 1, 1], [], []>} : vector<128x4xf32>, vector<4x8xf32>, vector<128x8xf32> -> vector<128x8xf32>
    %251 = arith.addf %245, %250 : vector<128x8xf32>
    %c6_310 = arith.constant 6 : index
    %c1_311 = arith.constant 1 : index
    %c1_312 = arith.constant 1 : index
    %c0_313 = arith.constant 0 : index
    %252 = vector.load %arg1[%c6_310, %c1_311, %c1_312, %c0_313] : memref<8x9x9x4xf32, #tpu.memory_space<vmem>>, vector<2x8x8x4xf32>
    %253 = vector.shape_cast %252 : vector<2x8x8x4xf32> to vector<128x4xf32>
    %c8_314 = arith.constant 8 : index
    %c0_315 = arith.constant 0 : index
    %c0_316 = arith.constant 0 : index
    %254 = vector.load %arg2[%c8_314, %c0_315, %c0_316] : memref<9x4x8xf32, #tpu.memory_space<vmem>>, vector<1x4x8xf32>
    %255 = vector.shape_cast %254 : vector<1x4x8xf32> to vector<4x8xf32>
    %cst_317 = arith.constant dense<0.000000e+00> : vector<128x8xf32>
    %256 = tpu.matmul %253, %255, %cst_317 {dimension_numbers = #tpu.dot_dimension_numbers<[1], [0], [0], [1], [0, 0, 1, 1], [], []>} : vector<128x4xf32>, vector<4x8xf32>, vector<128x8xf32> -> vector<128x8xf32>
    %257 = arith.addf %251, %256 : vector<128x8xf32>
    %c0_318 = arith.constant 0 : index
    %c0_319 = arith.constant 0 : index
    %258 = vector.load %arg3[%c0_318, %c0_319] : memref<1x8xf32, #tpu.memory_space<vmem>>, vector<1x8xf32>
    %259 = vector.broadcast %258 : vector<1x8xf32> to vector<128x8xf32>
    %260 = arith.addf %257, %259 : vector<128x8xf32>
    %cst_320 = arith.constant 0.000000e+00 : f32
    %261 = vector.broadcast %cst_320 : f32 to vector<128x8xf32>
    %262 = arith.maximumf %260, %261 : vector<128x8xf32>
    %cst_321 = arith.constant dense<0.000000e+00> : vector<128xf32>
    %263 = vector.multi_reduction <add>, %262, %cst_321 [1] : vector<128x8xf32> to vector<128xf32>
    %264 = vector.shape_cast %263 : vector<128xf32> to vector<128x1xf32>
    %cst_322 = arith.constant 8.000000e+00 : f32
    %265 = vector.broadcast %cst_322 : f32 to vector<128x1xf32>
    %266 = arith.divf %264, %265 : vector<128x1xf32>
    %c384 = arith.constant 384 : index
    %c0_323 = arith.constant 0 : index
    %267 = vector.load %arg9[%c384, %c0_323] : memref<512x1xf32, #tpu.memory_space<vmem>>, vector<128x1xf32>
    tpu.vector_store %arg9[%c384, %c0_323], %266 {strides = array<i32>} : memref<512x1xf32, #tpu.memory_space<vmem>>, vector<128x1xf32>,
    %268 = vector.shape_cast %262 : vector<128x8xf32> to vector<2x8x8x8xf32>
    %c0_324 = arith.constant 0 : index
    %c1_325 = arith.constant 1 : index
    %c1_326 = arith.constant 1 : index
    %c0_327 = arith.constant 0 : index
    %269 = vector.load %arg12[%c0_324, %c1_325, %c1_326, %c0_327] : memref<8x9x9x8xf32, #tpu.memory_space<vmem>>, vector<2x8x8x8xf32>
    tpu.vector_store %arg12[%c0_324, %c1_325, %c1_326, %c0_327], %268 {strides = array<i32>} : memref<8x9x9x8xf32, #tpu.memory_space<vmem>>, vector<2x8x8x8xf32>,
    %cst_328 = arith.constant 0.000000e+00 : f32
    %270 = vector.broadcast %cst_328 : f32 to vector<128x16xf32>
    %c0_329 = arith.constant 0 : index
    %c0_330 = arith.constant 0 : index
    %c0_331 = arith.constant 0 : index
    %c0_332 = arith.constant 0 : index
    %271 = vector.load %arg12[%c0_329, %c0_330, %c0_331, %c0_332] : memref<8x9x9x8xf32, #tpu.memory_space<vmem>>, vector<2x8x8x8xf32>
    %272 = vector.shape_cast %271 : vector<2x8x8x8xf32> to vector<128x8xf32>
    %c0_333 = arith.constant 0 : index
    %c0_334 = arith.constant 0 : index
    %c0_335 = arith.constant 0 : index
    %273 = vector.load %arg4[%c0_333, %c0_334, %c0_335] : memref<9x8x16xf32, #tpu.memory_space<vmem>>, vector<1x8x16xf32>
    %274 = vector.shape_cast %273 : vector<1x8x16xf32> to vector<8x16xf32>
    %cst_336 = arith.constant dense<0.000000e+00> : vector<128x16xf32>
    %275 = tpu.matmul %272, %274, %cst_336 {dimension_numbers = #tpu.dot_dimension_numbers<[1], [0], [0], [1], [0, 0, 1, 1], [], []>} : vector<128x8xf32>, vector<8x16xf32>, vector<128x16xf32> -> vector<128x16xf32>
    %276 = arith.addf %270, %275 : vector<128x16xf32>
    %c2_337 = arith.constant 2 : index
    %c0_338 = arith.constant 0 : index
    %c0_339 = arith.constant 0 : index
    %c0_340 = arith.constant 0 : index
    %277 = vector.load %arg12[%c2_337, %c0_338, %c0_339, %c0_340] : memref<8x9x9x8xf32, #tpu.memory_space<vmem>>, vector<2x8x8x8xf32>
    %278 = vector.shape_cast %277 : vector<2x8x8x8xf32> to vector<128x8xf32>
    %c1_341 = arith.constant 1 : index
    %c0_342 = arith.constant 0 : index
    %c0_343 = arith.constant 0 : index
    %279 = vector.load %arg4[%c1_341, %c0_342, %c0_343] : memref<9x8x16xf32, #tpu.memory_space<vmem>>, vector<1x8x16xf32>
    %280 = vector.shape_cast %279 : vector<1x8x16xf32> to vector<8x16xf32>
    %cst_344 = arith.constant dense<0.000000e+00> : vector<128x16xf32>
    %281 = tpu.matmul %278, %280, %cst_344 {dimension_numbers = #tpu.dot_dimension_numbers<[1], [0], [0], [1], [0, 0, 1, 1], [], []>} : vector<128x8xf32>, vector<8x16xf32>, vector<128x16xf32> -> vector<128x16xf32>
    %282 = arith.addf %276, %281 : vector<128x16xf32>
    %c0_345 = arith.constant 0 : index
    %c0_346 = arith.constant 0 : index
    %c1_347 = arith.constant 1 : index
    %c0_348 = arith.constant 0 : index
    %283 = vector.load %arg12[%c0_345, %c0_346, %c1_347, %c0_348] : memref<8x9x9x8xf32, #tpu.memory_space<vmem>>, vector<2x8x8x8xf32>
    %284 = vector.shape_cast %283 : vector<2x8x8x8xf32> to vector<128x8xf32>
    %c2_349 = arith.constant 2 : index
    %c0_350 = arith.constant 0 : index
    %c0_351 = arith.constant 0 : index
    %285 = vector.load %arg4[%c2_349, %c0_350, %c0_351] : memref<9x8x16xf32, #tpu.memory_space<vmem>>, vector<1x8x16xf32>
    %286 = vector.shape_cast %285 : vector<1x8x16xf32> to vector<8x16xf32>
    %cst_352 = arith.constant dense<0.000000e+00> : vector<128x16xf32>
    %287 = tpu.matmul %284, %286, %cst_352 {dimension_numbers = #tpu.dot_dimension_numbers<[1], [0], [0], [1], [0, 0, 1, 1], [], []>} : vector<128x8xf32>, vector<8x16xf32>, vector<128x16xf32> -> vector<128x16xf32>
    %288 = arith.addf %282, %287 : vector<128x16xf32>
    %c4_353 = arith.constant 4 : index
    %c0_354 = arith.constant 0 : index
    %c0_355 = arith.constant 0 : index
    %c0_356 = arith.constant 0 : index
    %289 = vector.load %arg12[%c4_353, %c0_354, %c0_355, %c0_356] : memref<8x9x9x8xf32, #tpu.memory_space<vmem>>, vector<2x8x8x8xf32>
    %290 = vector.shape_cast %289 : vector<2x8x8x8xf32> to vector<128x8xf32>
    %c3_357 = arith.constant 3 : index
    %c0_358 = arith.constant 0 : index
    %c0_359 = arith.constant 0 : index
    %291 = vector.load %arg4[%c3_357, %c0_358, %c0_359] : memref<9x8x16xf32, #tpu.memory_space<vmem>>, vector<1x8x16xf32>
    %292 = vector.shape_cast %291 : vector<1x8x16xf32> to vector<8x16xf32>
    %cst_360 = arith.constant dense<0.000000e+00> : vector<128x16xf32>
    %293 = tpu.matmul %290, %292, %cst_360 {dimension_numbers = #tpu.dot_dimension_numbers<[1], [0], [0], [1], [0, 0, 1, 1], [], []>} : vector<128x8xf32>, vector<8x16xf32>, vector<128x16xf32> -> vector<128x16xf32>
    %294 = arith.addf %288, %293 : vector<128x16xf32>
    %c6_361 = arith.constant 6 : index
    %c0_362 = arith.constant 0 : index
    %c0_363 = arith.constant 0 : index
    %c0_364 = arith.constant 0 : index
    %295 = vector.load %arg12[%c6_361, %c0_362, %c0_363, %c0_364] : memref<8x9x9x8xf32, #tpu.memory_space<vmem>>, vector<2x8x8x8xf32>
    %296 = vector.shape_cast %295 : vector<2x8x8x8xf32> to vector<128x8xf32>
    %c4_365 = arith.constant 4 : index
    %c0_366 = arith.constant 0 : index
    %c0_367 = arith.constant 0 : index
    %297 = vector.load %arg4[%c4_365, %c0_366, %c0_367] : memref<9x8x16xf32, #tpu.memory_space<vmem>>, vector<1x8x16xf32>
    %298 = vector.shape_cast %297 : vector<1x8x16xf32> to vector<8x16xf32>
    %cst_368 = arith.constant dense<0.000000e+00> : vector<128x16xf32>
    %299 = tpu.matmul %296, %298, %cst_368 {dimension_numbers = #tpu.dot_dimension_numbers<[1], [0], [0], [1], [0, 0, 1, 1], [], []>} : vector<128x8xf32>, vector<8x16xf32>, vector<128x16xf32> -> vector<128x16xf32>
    %300 = arith.addf %294, %299 : vector<128x16xf32>
    %c4_369 = arith.constant 4 : index
    %c0_370 = arith.constant 0 : index
    %c1_371 = arith.constant 1 : index
    %c0_372 = arith.constant 0 : index
    %301 = vector.load %arg12[%c4_369, %c0_370, %c1_371, %c0_372] : memref<8x9x9x8xf32, #tpu.memory_space<vmem>>, vector<2x8x8x8xf32>
    %302 = vector.shape_cast %301 : vector<2x8x8x8xf32> to vector<128x8xf32>
    %c5_373 = arith.constant 5 : index
    %c0_374 = arith.constant 0 : index
    %c0_375 = arith.constant 0 : index
    %303 = vector.load %arg4[%c5_373, %c0_374, %c0_375] : memref<9x8x16xf32, #tpu.memory_space<vmem>>, vector<1x8x16xf32>
    %304 = vector.shape_cast %303 : vector<1x8x16xf32> to vector<8x16xf32>
    %cst_376 = arith.constant dense<0.000000e+00> : vector<128x16xf32>
    %305 = tpu.matmul %302, %304, %cst_376 {dimension_numbers = #tpu.dot_dimension_numbers<[1], [0], [0], [1], [0, 0, 1, 1], [], []>} : vector<128x8xf32>, vector<8x16xf32>, vector<128x16xf32> -> vector<128x16xf32>
    %306 = arith.addf %300, %305 : vector<128x16xf32>
    %c0_377 = arith.constant 0 : index
    %c1_378 = arith.constant 1 : index
    %c0_379 = arith.constant 0 : index
    %c0_380 = arith.constant 0 : index
    %307 = vector.load %arg12[%c0_377, %c1_378, %c0_379, %c0_380] : memref<8x9x9x8xf32, #tpu.memory_space<vmem>>, vector<2x8x8x8xf32>
    %308 = vector.shape_cast %307 : vector<2x8x8x8xf32> to vector<128x8xf32>
    %c6_381 = arith.constant 6 : index
    %c0_382 = arith.constant 0 : index
    %c0_383 = arith.constant 0 : index
    %309 = vector.load %arg4[%c6_381, %c0_382, %c0_383] : memref<9x8x16xf32, #tpu.memory_space<vmem>>, vector<1x8x16xf32>
    %310 = vector.shape_cast %309 : vector<1x8x16xf32> to vector<8x16xf32>
    %cst_384 = arith.constant dense<0.000000e+00> : vector<128x16xf32>
    %311 = tpu.matmul %308, %310, %cst_384 {dimension_numbers = #tpu.dot_dimension_numbers<[1], [0], [0], [1], [0, 0, 1, 1], [], []>} : vector<128x8xf32>, vector<8x16xf32>, vector<128x16xf32> -> vector<128x16xf32>
    %312 = arith.addf %306, %311 : vector<128x16xf32>
    %c2_385 = arith.constant 2 : index
    %c1_386 = arith.constant 1 : index
    %c0_387 = arith.constant 0 : index
    %c0_388 = arith.constant 0 : index
    %313 = vector.load %arg12[%c2_385, %c1_386, %c0_387, %c0_388] : memref<8x9x9x8xf32, #tpu.memory_space<vmem>>, vector<2x8x8x8xf32>
    %314 = vector.shape_cast %313 : vector<2x8x8x8xf32> to vector<128x8xf32>
    %c7_389 = arith.constant 7 : index
    %c0_390 = arith.constant 0 : index
    %c0_391 = arith.constant 0 : index
    %315 = vector.load %arg4[%c7_389, %c0_390, %c0_391] : memref<9x8x16xf32, #tpu.memory_space<vmem>>, vector<1x8x16xf32>
    %316 = vector.shape_cast %315 : vector<1x8x16xf32> to vector<8x16xf32>
    %cst_392 = arith.constant dense<0.000000e+00> : vector<128x16xf32>
    %317 = tpu.matmul %314, %316, %cst_392 {dimension_numbers = #tpu.dot_dimension_numbers<[1], [0], [0], [1], [0, 0, 1, 1], [], []>} : vector<128x8xf32>, vector<8x16xf32>, vector<128x16xf32> -> vector<128x16xf32>
    %318 = arith.addf %312, %317 : vector<128x16xf32>
    %c0_393 = arith.constant 0 : index
    %c1_394 = arith.constant 1 : index
    %c1_395 = arith.constant 1 : index
    %c0_396 = arith.constant 0 : index
    %319 = vector.load %arg12[%c0_393, %c1_394, %c1_395, %c0_396] : memref<8x9x9x8xf32, #tpu.memory_space<vmem>>, vector<2x8x8x8xf32>
    %320 = vector.shape_cast %319 : vector<2x8x8x8xf32> to vector<128x8xf32>
    %c8_397 = arith.constant 8 : index
    %c0_398 = arith.constant 0 : index
    %c0_399 = arith.constant 0 : index
    %321 = vector.load %arg4[%c8_397, %c0_398, %c0_399] : memref<9x8x16xf32, #tpu.memory_space<vmem>>, vector<1x8x16xf32>
    %322 = vector.shape_cast %321 : vector<1x8x16xf32> to vector<8x16xf32>
    %cst_400 = arith.constant dense<0.000000e+00> : vector<128x16xf32>
    %323 = tpu.matmul %320, %322, %cst_400 {dimension_numbers = #tpu.dot_dimension_numbers<[1], [0], [0], [1], [0, 0, 1, 1], [], []>} : vector<128x8xf32>, vector<8x16xf32>, vector<128x16xf32> -> vector<128x16xf32>
    %324 = arith.addf %318, %323 : vector<128x16xf32>
    %c0_401 = arith.constant 0 : index
    %c0_402 = arith.constant 0 : index
    %325 = vector.load %arg5[%c0_401, %c0_402] : memref<1x16xf32, #tpu.memory_space<vmem>>, vector<1x16xf32>
    %326 = vector.broadcast %325 : vector<1x16xf32> to vector<128x16xf32>
    %327 = arith.addf %324, %326 : vector<128x16xf32>
    %cst_403 = arith.constant 0.000000e+00 : f32
    %328 = vector.broadcast %cst_403 : f32 to vector<128x16xf32>
    %329 = arith.maximumf %327, %328 : vector<128x16xf32>
    %cst_404 = arith.constant dense<0.000000e+00> : vector<128xf32>
    %330 = vector.multi_reduction <add>, %329, %cst_404 [1] : vector<128x16xf32> to vector<128xf32>
    %331 = vector.shape_cast %330 : vector<128xf32> to vector<128x1xf32>
    %cst_405 = arith.constant 1.600000e+01 : f32
    %332 = vector.broadcast %cst_405 : f32 to vector<128x1xf32>
    %333 = arith.divf %331, %332 : vector<128x1xf32>
    %c0_406 = arith.constant 0 : index
    %c0_407 = arith.constant 0 : index
    %334 = vector.load %arg8[%c0_406, %c0_407] : memref<512x128xf32, #tpu.memory_space<vmem>>, vector<128x128xf32>
    %cst_408 = arith.constant dense<0.000000e+00> : vector<128x1xf32>
    %335 = tpu.matmul %334, %333, %cst_408 {dimension_numbers = #tpu.dot_dimension_numbers<[1], [0], [0], [1], [0, 0, 1, 1], [], []>} : vector<128x128xf32>, vector<128x1xf32>, vector<128x1xf32> -> vector<128x1xf32>
    %c0_409 = arith.constant 0 : index
    %c0_410 = arith.constant 0 : index
    %336 = vector.load %arg10[%c0_409, %c0_410] : memref<512x1xf32, #tpu.memory_space<vmem>>, vector<128x1xf32>
    tpu.vector_store %arg10[%c0_409, %c0_410], %335 {strides = array<i32>} : memref<512x1xf32, #tpu.memory_space<vmem>>, vector<128x1xf32>,
    %c128_411 = arith.constant 128 : index
    %c0_412 = arith.constant 0 : index
    %337 = vector.load %arg8[%c128_411, %c0_412] : memref<512x128xf32, #tpu.memory_space<vmem>>, vector<128x128xf32>
    %cst_413 = arith.constant dense<0.000000e+00> : vector<128x1xf32>
    %338 = tpu.matmul %337, %333, %cst_413 {dimension_numbers = #tpu.dot_dimension_numbers<[1], [0], [0], [1], [0, 0, 1, 1], [], []>} : vector<128x128xf32>, vector<128x1xf32>, vector<128x1xf32> -> vector<128x1xf32>
    %c128_414 = arith.constant 128 : index
    %c0_415 = arith.constant 0 : index
    %339 = vector.load %arg10[%c128_414, %c0_415] : memref<512x1xf32, #tpu.memory_space<vmem>>, vector<128x1xf32>
    tpu.vector_store %arg10[%c128_414, %c0_415], %338 {strides = array<i32>} : memref<512x1xf32, #tpu.memory_space<vmem>>, vector<128x1xf32>,
    %c256_416 = arith.constant 256 : index
    %c0_417 = arith.constant 0 : index
    %340 = vector.load %arg8[%c256_416, %c0_417] : memref<512x128xf32, #tpu.memory_space<vmem>>, vector<128x128xf32>
    %cst_418 = arith.constant dense<0.000000e+00> : vector<128x1xf32>
    %341 = tpu.matmul %340, %333, %cst_418 {dimension_numbers = #tpu.dot_dimension_numbers<[1], [0], [0], [1], [0, 0, 1, 1], [], []>} : vector<128x128xf32>, vector<128x1xf32>, vector<128x1xf32> -> vector<128x1xf32>
    %c256_419 = arith.constant 256 : index
    %c0_420 = arith.constant 0 : index
    %342 = vector.load %arg10[%c256_419, %c0_420] : memref<512x1xf32, #tpu.memory_space<vmem>>, vector<128x1xf32>
    tpu.vector_store %arg10[%c256_419, %c0_420], %341 {strides = array<i32>} : memref<512x1xf32, #tpu.memory_space<vmem>>, vector<128x1xf32>,
    %c384_421 = arith.constant 384 : index
    %c0_422 = arith.constant 0 : index
    %343 = vector.load %arg8[%c384_421, %c0_422] : memref<512x128xf32, #tpu.memory_space<vmem>>, vector<128x128xf32>
    %cst_423 = arith.constant dense<0.000000e+00> : vector<128x1xf32>
    %344 = tpu.matmul %343, %333, %cst_423 {dimension_numbers = #tpu.dot_dimension_numbers<[1], [0], [0], [1], [0, 0, 1, 1], [], []>} : vector<128x128xf32>, vector<128x1xf32>, vector<128x1xf32> -> vector<128x1xf32>
    %c384_424 = arith.constant 384 : index
    %c0_425 = arith.constant 0 : index
    %345 = vector.load %arg10[%c384_424, %c0_425] : memref<512x1xf32, #tpu.memory_space<vmem>>, vector<128x1xf32>
    tpu.vector_store %arg10[%c384_424, %c0_425], %344 {strides = array<i32>} : memref<512x1xf32, #tpu.memory_space<vmem>>, vector<128x1xf32>,
    %346 = vector.shape_cast %329 : vector<128x16xf32> to vector<2x64x16xf32>
    %cst_426 = arith.constant dense<0.000000e+00> : vector<2x16xf32>
    %347 = vector.multi_reduction <add>, %346, %cst_426 [1] : vector<2x64x16xf32> to vector<2x16xf32>
    %cst_427 = arith.constant 6.400000e+01 : f32
    %348 = vector.broadcast %cst_427 : f32 to vector<2x16xf32>
    %349 = arith.divf %347, %348 : vector<2x16xf32>
    %c0_428 = arith.constant 0 : index
    %c0_429 = arith.constant 0 : index
    %350 = vector.load %arg6[%c0_428, %c0_429] : memref<16x10xf32, #tpu.memory_space<vmem>>, vector<16x10xf32>
    %cst_430 = arith.constant dense<0.000000e+00> : vector<2x10xf32>
    %351 = tpu.matmul %349, %350, %cst_430 {dimension_numbers = #tpu.dot_dimension_numbers<[1], [0], [0], [1], [0, 0, 1, 1], [], []>} : vector<2x16xf32>, vector<16x10xf32>, vector<2x10xf32> -> vector<2x10xf32>
    %c0_431 = arith.constant 0 : index
    %c0_432 = arith.constant 0 : index
    %352 = vector.load %arg7[%c0_431, %c0_432] : memref<1x10xf32, #tpu.memory_space<vmem>>, vector<1x10xf32>
    %353 = vector.broadcast %352 : vector<1x10xf32> to vector<2x10xf32>
    %354 = arith.addf %351, %353 : vector<2x10xf32>
    %cst_433 = arith.constant dense<0xFF800000> : vector<2xf32>
    %355 = vector.multi_reduction <maximumf>, %354, %cst_433 [1] : vector<2x10xf32> to vector<2xf32>
    %356 = vector.shape_cast %355 : vector<2xf32> to vector<2x1xf32>
    %357 = vector.broadcast %356 : vector<2x1xf32> to vector<2x10xf32>
    %358 = arith.subf %354, %357 : vector<2x10xf32>
    %359 = math.exp %358 : vector<2x10xf32>
    %cst_434 = arith.constant dense<0.000000e+00> : vector<2xf32>
    %360 = vector.multi_reduction <add>, %359, %cst_434 [1] : vector<2x10xf32> to vector<2xf32>
    %361 = vector.shape_cast %360 : vector<2xf32> to vector<2x1xf32>
    %362 = vector.broadcast %361 : vector<2x1xf32> to vector<2x10xf32>
    %363 = arith.divf %359, %362 : vector<2x10xf32>
    %c0_435 = arith.constant 0 : index
    %c0_436 = arith.constant 0 : index
    %364 = vector.load %arg11[%c0_435, %c0_436] : memref<2x10xf32, #tpu.memory_space<vmem>>, vector<2x10xf32>
    tpu.vector_store %arg11[%c0_435, %c0_436], %363 {strides = array<i32>} : memref<2x10xf32, #tpu.memory_space<vmem>>, vector<2x10xf32>,
    return
  }
  func.func @transform_0(%arg0: i32) -> (i32, i32, i32, i32) {
    %c0_i32 = arith.constant 0 : i32
    %c0_i32_0 = arith.constant 0 : i32
    %c0_i32_1 = arith.constant 0 : i32
    %c0_i32_2 = arith.constant 0 : i32
    %c0_i32_3 = arith.constant 0 : i32
    return %c0_i32, %c0_i32_0, %c0_i32_1, %c0_i32_2 : i32, i32, i32, i32
  }
  func.func @transform_1(%arg0: i32) -> (i32, i32, i32) {
    %c0_i32 = arith.constant 0 : i32
    %c0_i32_0 = arith.constant 0 : i32
    %c0_i32_1 = arith.constant 0 : i32
    %c0_i32_2 = arith.constant 0 : i32
    return %c0_i32, %c0_i32_0, %c0_i32_1 : i32, i32, i32
  }
  func.func @transform_2(%arg0: i32) -> (i32, i32) {
    %c0_i32 = arith.constant 0 : i32
    %c0_i32_0 = arith.constant 0 : i32
    %c0_i32_1 = arith.constant 0 : i32
    return %c0_i32, %c0_i32_0 : i32, i32
  }
  func.func @transform_3(%arg0: i32) -> (i32, i32, i32) {
    %c0_i32 = arith.constant 0 : i32
    %c0_i32_0 = arith.constant 0 : i32
    %c0_i32_1 = arith.constant 0 : i32
    %c0_i32_2 = arith.constant 0 : i32
    return %c0_i32, %c0_i32_0, %c0_i32_1 : i32, i32, i32
  }
  func.func @transform_4(%arg0: i32) -> (i32, i32) {
    %c0_i32 = arith.constant 0 : i32
    %c0_i32_0 = arith.constant 0 : i32
    %c0_i32_1 = arith.constant 0 : i32
    return %c0_i32, %c0_i32_0 : i32, i32
  }
  func.func @transform_5(%arg0: i32) -> (i32, i32) {
    %c0_i32 = arith.constant 0 : i32
    %c0_i32_0 = arith.constant 0 : i32
    %c0_i32_1 = arith.constant 0 : i32
    return %c0_i32, %c0_i32_0 : i32, i32
  }
  func.func @transform_6(%arg0: i32) -> (i32, i32) {
    %c0_i32 = arith.constant 0 : i32
    %c0_i32_0 = arith.constant 0 : i32
    %c0_i32_1 = arith.constant 0 : i32
    return %c0_i32, %c0_i32_0 : i32, i32
  }
  func.func @transform_7(%arg0: i32) -> (i32, i32) {
    %c0_i32 = arith.constant 0 : i32
    %c0_i32_0 = arith.constant 0 : i32
    %c0_i32_1 = arith.constant 0 : i32
    return %c0_i32, %c0_i32_0 : i32, i32
  }
  func.func @transform_8(%arg0: i32) -> (i32, i32) {
    %c0_i32 = arith.constant 0 : i32
    %c0_i32_0 = arith.constant 0 : i32
    %c0_i32_1 = arith.constant 0 : i32
    return %c0_i32, %c0_i32_0 : i32, i32
  }
  func.func @transform_9(%arg0: i32) -> (i32, i32) {
    %c0_i32 = arith.constant 0 : i32
    %c0_i32_0 = arith.constant 0 : i32
    %c0_i32_1 = arith.constant 0 : i32
    return %c0_i32, %c0_i32_0 : i32, i32
  }
  func.func @transform_10(%arg0: i32) -> (i32, i32) {
    %c0_i32 = arith.constant 0 : i32
    %c0_i32_0 = arith.constant 0 : i32
    %c0_i32_1 = arith.constant 0 : i32
    return %c0_i32, %c0_i32_0 : i32, i32
  }
}

</mosaic_0001>

<bundles_post_ra>
// kernel: feature_map_piler_forward.1
= control target key start
LH: loop header
LB: loop body
LE: loop exit
PB: predicated region body
PF: predicated region fallthrough
CT: control target
= control target key end

     0   :  { %vm264_vm0 = vcmask 1043456   ;;  %vm215_vm1 = vcmask 31744   ;;  %s21004_s0 = inlined_call_operand.vmem [shape: f32[8,9,9,4], index: 0, kind: input, shape index: {}]   ;;  %s21005_s1 = inlined_call_operand.vmem [shape: f32[9,4,8], index: 1, kind: input, shape index: {}]   ;;  %s21006_s2 = inlined_call_operand.vmem [shape: f32[1,8], index: 2, kind: input, shape index: {}]   ;;  %s21007_s3 = inlined_call_operand.vmem [shape: f32[9,8,16], index: 3, kind: input, shape index: {}]   ;;  %s21008_s4 = inlined_call_operand.vmem [shape: f32[1,16], index: 4, kind: input, shape index: {}]   ;;  %s21009_s5 = inlined_call_operand.vmem [shape: f32[16,10], index: 5, kind: input, shape index: {}]   ;;  %s21010_s6 = inlined_call_operand.vmem [shape: f32[1,10], index: 6, kind: input, shape index: {}]   ;;  %s21011_s7 = inlined_call_operand.vmem [shape: f32[512,128], index: 7, kind: input, shape index: {}]   ;;  %s21012_s8 = inlined_call_operand.vmem [shape: f32[512,1], index: 8, kind: output, shape index: {0}]   ;;  %s21013_s9 = inlined_call_operand.vmem [shape: f32[512,1], index: 9, kind: output, shape index: {1}]   ;;  %s21014_s10 = inlined_call_operand.hbm [shape: f32[2,10], index: 10, kind: output, shape index: {2}]  }
   0x1   :  { %v11847_v0 = vld [vmem:[%s21005_s1 + $0x4] sm:$0xf]  ;;  %v16329_v1 = vld [vmem:[%s21005_s1 + $0x8] sm:$0xf]  ;;  %v16347_v4 = vld [vmem:[%s21004_s0 + $0x130] sm:$0xff] }
   0x2   :  { %v16334_v2 = vld [vmem:[%s21004_s0 + $0x120] sm:$0xff]  ;;  %14058 = vmatprep.subr.msk.mxu1 %vm264_vm0, %v11847_v0  ;;  %14110 = vmatprep.subr.msk.mxu0 %vm264_vm0, %v16329_v1  ;;  %v16358_v6 = vld [vmem:[%s21004_s0 + $0x11] sm:$0xff]  ;;  %v11916_v13 = vld [vmem:[%s21005_s1 + $0xc] sm:$0xf] }
   0x3   :  { %v16342_v3 = vld [vmem:[%s21004_s0 + $0x1] sm:$0xff]  ;;  %14059 = vmatpush3.msk.msra.mxu1 %vm264_vm0, %v11847_v0  ;;  %14060 = vmatprep.mubr.msk.f32.mxu1 %vm215_vm1, %v16334_v2  ;;  %v16383_v9 = vld [vmem:[%s21004_s0 + $0x150] sm:$0xff] }
   0x4   :  { %v195_v5 = vld [vmem:[%s21005_s1] sm:$0xf]  ;;  %14111 = vmatpush3.msk.msra.mxu0 %vm264_vm0, %v16329_v1  ;;  %14112 = vmatprep.mubr.msk.f32.mxu0 %vm215_vm1, %v16342_v3  ;;  %v16392_v10 = vld [vmem:[%s21004_s0 + $0x31] sm:$0xff]  ;;  %v16621_v44 = vld [vmem:[%s21005_s1 + $0x4] sm:$0xf] }
   0x5   :  { %v16367_v7 = vld [vmem:[%s21004_s0 + $0x140] sm:$0xff]  ;;  %14061 = vmatmul.mubr.msk.f32.vlgmr.msra.gmra.mrb[0].mxu1 %vm215_vm1, %v16347_v4  ;;  %14084 = vmatprep.subr.msk.mxu1 %vm264_vm0, %v195_v5  ;;  %v16419_v14 = vld [vmem:[%s21004_s0 + $0x170] sm:$0xff] }
   0x6   :  { %v16372_v8 = vld [vmem:[%s21004_s0 + $0x21] sm:$0xff]  ;;  %14113 = vmatmul.mubr.msk.f32.vlgmr.msra.gmra.mrb[0].mxu0 %vm215_vm1, %v16358_v6  ;;  %14085 = vmatpush3.msk.msra.mxu1 %vm264_vm0, %v195_v5  ;;  %v16426_v15 = vld [vmem:[%s21004_s0 + $0x51] sm:$0xff] }
   0x7   :  { %14063 = vmatprep.mubr.msk.f32.mxu1 %vm215_vm1, %v16367_v7  ;;  %14115 = vmatprep.mubr.msk.f32.mxu0 %vm215_vm1, %v16372_v8  ;;  %v16397_v11 = vld [vmem:[%s21004_s0 + $0x160] sm:$0xff]  ;;  %v16448_v18 = vld [vmem:[%s21004_s0 + $0x190] sm:$0xff] }
   0x8   :  { %v16402_v12 = vld [vmem:[%s21004_s0 + $0x41] sm:$0xff]  ;;  %15590 = vmatprep.subr.msk.mxu1 %vm264_vm0, %v16329_v1  ;;  %14136 = vmatprep.subr.msk.mxu0 %vm264_vm0, %v11916_v13  ;;  %v16455_v19 = vld [vmem:[%s21004_s0 + $0x71] sm:$0xff] }
   0x9   :  { %14064 = vmatmul.mubr.msk.f32.gmra.mrb[2].mxu1 %vm215_vm1, %v16383_v9  ;;  %v16431_v16 = vld [vmem:[%s21004_s0 + $0x180] sm:$0xff]  ;;  %14137 = vmatpush3.msk.msra.mxu0 %vm264_vm0, %v11916_v13  ;;  %v16460_v20 = vld [vmem:[%s21004_s0 + $0x1b0] sm:$0xff] }
   0xa   :  { %14116 = vmatmul.mubr.msk.f32.gmra.mrb[2].mxu0 %vm215_vm1, %v16392_v10  ;;  %14066 = vmatprep.mubr.msk.f32.mxu1 %vm215_vm1, %v16397_v11  ;;  %v16437_v17 = vld [vmem:[%s21004_s0 + $0x61] sm:$0xff]  ;;  %v16465_v21 = vld [vmem:[%s21004_s0 + $0x91] sm:$0xff] }
   0xb   :  { %14118 = vmatprep.mubr.msk.f32.mxu0 %vm215_vm1, %v16402_v12  ;;  %v16476_v22 = vld [vmem:[%s21004_s0 + $0x1c0] sm:$0xff]  ;;  %v16488_v24 = vld [vmem:[%s21004_s0 + $0x1d0] sm:$0xff] }
   0xc   :  { %v16483_v23 = vld [vmem:[%s21004_s0 + $0xa1] sm:$0xff]  ;;  %v11950_v25 = vld [vmem:[%s21005_s1 + $0x10] sm:$0xf]  ;;  %v16570_v36 = vld [vmem:[%s21005_s1 + $0x14] sm:$0xf] }
   0xd   :  { %14067 = vmatmul.mubr.msk.f32.gmra.mrb[4].mxu1 %vm215_vm1, %v16419_v14  ;;  %v16496_v26 = vld [vmem:[%s21004_s0 + $0x240] sm:$0xff]  ;;  %14162 = vmatprep.subr.msk.mxu0 %vm264_vm0, %v11950_v25  ;;  %v16515_v28 = vld [vmem:[%s21004_s0 + $0x250] sm:$0xff] }
   0xe   :  { %14119 = vmatmul.mubr.msk.f32.gmra.mrb[4].mxu0 %vm215_vm1, %v16426_v15  ;;  %14069 = vmatprep.mubr.msk.f32.mxu1 %vm215_vm1, %v16431_v16  ;;  %21177 = vst [vmem:[#allocation6_spill] sm:$0xff] %v16496_v26  ;;  %v16508_v27 = vld [vmem:[%s21004_s0 + $0x1e0] sm:$0xff]  ;;  %21178 = vst [vmem:[#allocation7_spill] sm:$0xff] %v16515_v28  ;;  %v16520_v29 = vld [vmem:[%s21004_s0 + $0x1f0] sm:$0xff] }
   0xf   :  { %14121 = vmatprep.mubr.msk.f32.mxu0 %vm215_vm1, %v16437_v17  ;;  %v16525_v30 = vld [vmem:[%s21004_s0 + $0x260] sm:$0xff]  ;;  %v16543_v32 = vld [vmem:[%s21004_s0 + $0x270] sm:$0xff] }
  0x10   :  { %21179 = vst [vmem:[#allocation8_spill] sm:$0xff] %v16525_v30  ;;  %v16536_v31 = vld [vmem:[%s21004_s0 + $0x200] sm:$0xff]  ;;  %21180 = vst [vmem:[#allocation9_spill] sm:$0xff] %v16543_v32  ;;  %v16548_v33 = vld [vmem:[%s21004_s0 + $0x210] sm:$0xff] }
  0x11   :  { %14070 = vmatmul.mubr.msk.f32.gmra.mrb[6].mxu1 %vm215_vm1, %v16448_v18  ;;  %v16554_v34 = vld [vmem:[%s21004_s0 + $0x280] sm:$0xff]  ;;  %v16577_v37 = vld [vmem:[%s21004_s0 + $0x290] sm:$0xff] }
  0x12   :  { %14122 = vmatmul.mubr.msk.f32.gmra.mrb[6].mxu0 %vm215_vm1, %v16455_v19  ;;  %14072 = vmatprep.mubr.msk.f32.mxu1 %vm215_vm1, %v16460_v20  ;;  %21181 = vst [vmem:[#allocation10_spill] sm:$0xff] %v16554_v34  ;;  %v16565_v35 = vld [vmem:[%s21004_s0 + $0x220] sm:$0xff]  ;;  %21182 = vst [vmem:[#allocation11_spill] sm:$0xff] %v16577_v37  ;;  %v16597_v40 = vld [vmem:[%s21004_s0 + $0x10] sm:$0xff] }
  0x13   :  { %14124 = vmatprep.mubr.msk.f32.mxu0 %vm215_vm1, %v16465_v21  ;;  %v179_v38 = vld [vmem:[%s21004_s0] sm:$0xff]  ;;  %v16604_v41 = vld [vmem:[%s21004_s0 + $0x2b0] sm:$0xff] }
  0x14   :  { %v16587_v39 = vld [vmem:[%s21004_s0 + $0x2a0] sm:$0xff]  ;;  %21184 = vst [vmem:[#allocation13_spill] sm:$0xff] %v16604_v41  ;;  %v16614_v43 = vld [vmem:[%s21004_s0 + $0x2d0] sm:$0xff] }
  0x15   :  { %14073 = vmatmul.mubr.msk.f32.gmra.mrb[8].mxu1 %vm215_vm1, %v16476_v22  ;;  %21183 = vst [vmem:[#allocation12_spill] sm:$0xff] %v16587_v39  ;;  %v16609_v42 = vld [vmem:[%s21004_s0 + $0x20] sm:$0xff]  ;;  %21185 = vst [vmem:[#allocation14_spill] sm:$0xff] %v16614_v43  ;;  %v16630_v45 = vld [vmem:[%s21004_s0 + $0x30] sm:$0xff] }
  0x16   :  { %14125 = vmatmul.mubr.msk.f32.gmra.mrb[8].mxu0 %vm215_vm1, %v16483_v23  ;;  %14075 = vmatprep.mubr.msk.f32.mxu1 %vm215_vm1, %v16488_v24  ;;  %v16639_v46 = vld [vmem:[%s21004_s0 + $0x2e0] sm:$0xff]  ;;  %v16649_v48 = vld [vmem:[%s21004_s0 + $0x2f0] sm:$0xff] }
  0x17   :  { %14138 = vmatprep.mubr.msk.f32.mxu0 %vm215_vm1, %v16496_v26  ;;  %21186 = vst [vmem:[#allocation15_spill] sm:$0xff] %v16639_v46  ;;  %v16644_v47 = vld [vmem:[%s21004_s0 + $0x40] sm:$0xff]  ;;  %21187 = vst [vmem:[#allocation16_spill] sm:$0xff] %v16649_v48  ;;  %v16662_v49 = vld [vmem:[%s21004_s0 + $0x50] sm:$0xff] }
  0x19   :  { %14076 = vmatmul.mubr.msk.f32.gmra.mrb[10].mxu1 %vm215_vm1, %v16508_v27 }
  0x1a   :  { %14139 = vmatmul.mubr.msk.f32.vlgmr.msra.gmra.mrb[0].mxu0 %vm215_vm1, %v16515_v28  ;;  %14078 = vmatprep.mubr.msk.f32.mxu1 %vm215_vm1, %v16520_v29 }
  0x1b   :  { %14141 = vmatprep.mubr.msk.f32.mxu0 %vm215_vm1, %v16525_v30  ;;  %14163 = vmatpush3.msk.msra.mxu0 %vm264_vm0, %v11950_v25 }
  0x1c   :  { %14188 = vmatprep.subr.msk.mxu0 %vm264_vm0, %v16570_v36 }
  0x1d   :  { %14079 = vmatmul.mubr.msk.f32.gmra.mrb[12].mxu1 %vm215_vm1, %v16536_v31 }
  0x1e   :  { %14142 = vmatmul.mubr.msk.f32.gmra.mrb[2].mxu0 %vm215_vm1, %v16543_v32  ;;  %14081 = vmatprep.mubr.msk.f32.mxu1 %vm215_vm1, %v16548_v33 }
  0x1f   :  { %14144 = vmatprep.mubr.msk.f32.mxu0 %vm215_vm1, %v16554_v34 }
  0x21   :  { %14082 = vmatmul.mubr.msk.f32.gmra.mrb[14].mxu1 %vm215_vm1, %v16565_v35 }
  0x22   :  { %14145 = vmatmul.mubr.msk.f32.gmra.mrb[4].mxu0 %vm215_vm1, %v16577_v37  ;;  %14086 = vmatprep.mubr.msk.f32.mxu1 %vm215_vm1, %v179_v38 }
  0x23   :  { %14147 = vmatprep.mubr.msk.f32.mxu0 %vm215_vm1, %v16587_v39 }
  0x25   :  { %14087 = vmatmul.mubr.msk.f32.vlgmr.msra.gmra.mrb[0].mxu1 %vm215_vm1, %v16597_v40 }
  0x26   :  { %14148 = vmatmul.mubr.msk.f32.gmra.mrb[6].mxu0 %vm215_vm1, %v16604_v41  ;;  %15591 = vmatpush3.msk.msra.mxu1 %vm264_vm0, %v16329_v1 }
  0x27   :  { %14089 = vmatprep.mubr.msk.f32.mxu1 %vm215_vm1, %v16609_v42  ;;  %14150 = vmatprep.mubr.msk.f32.mxu0 %vm215_vm1, %v16614_v43 }
  0x28   :  { %14292 = vmatprep.subr.msk.mxu1 %vm264_vm0, %v16621_v44 }
  0x29   :  { %14090 = vmatmul.mubr.msk.f32.gmra.mrb[2].mxu1 %vm215_vm1, %v16630_v45 }
  0x2a   :  { %14151 = vmatmul.mubr.msk.f32.gmra.mrb[8].mxu0 %vm215_vm1, %v16639_v46  ;;  %14092 = vmatprep.mubr.msk.f32.mxu1 %vm215_vm1, %v16644_v47 }
  0x2b   :  { %16 = vsyncpa [#allocation4], 0  ;;  %14153 = vmatprep.mubr.msk.f32.mxu0 %vm215_vm1, %v16649_v48  ;;  %v16669_v50 = vld [vmem:[%s21004_s0 + $0x300] sm:$0xff]  ;;  %v16679_v52 = vld [vmem:[%s21004_s0 + $0x310] sm:$0xff]  ;;  %vm33_vm2 = vcmask 64512   ;;  %vm35_vm3 = vcmask 57344  }
  0x2c   :  { %21188 = vst [vmem:[#allocation17_spill] sm:$0xff] %v16669_v50  ;;  %v16674_v51 = vld [vmem:[%s21004_s0 + $0x60] sm:$0xff]  ;;  %21189 = vst [vmem:[#allocation18_spill] sm:$0xff] %v16679_v52  ;;  %v16690_v53 = vld [vmem:[%s21004_s0 + $0x70] sm:$0xff]  ;;  %vm10908_vm4 = vcmask 130048   ;;  %vm11722_vm5 = vcmask 1041409  }
  0x2d   :  { %14093 = vmatmul.mubr.msk.f32.gmra.mrb[4].mxu1 %vm215_vm1, %v16662_v49  ;;  %v16697_v54 = vld [vmem:[%s21004_s0 + $0x320] sm:$0xff]  ;;  %v187_v55 = vld [vmem:[%s21004_s0 + $0x90] sm:$0xff]  ;;  %v16767_v1 = vld [vmem:[%s21005_s1 + $0x18] sm:$0xf]  ;;  %vm2327_vm6 = vcmask 7168   ;;  %vm16266_vm7 = vmmov 0  }
  0x2e   :  { %14154 = vmatmul.mubr.msk.f32.gmra.mrb[10].mxu0 %vm215_vm1, %v16669_v50  ;;  %14095 = vmatprep.mubr.msk.f32.mxu1 %vm215_vm1, %v16674_v51  ;;  %21190 = vst [vmem:[#allocation19_spill] sm:$0xff] %v16697_v54  ;;  %v16705_v56 = vld [vmem:[%s21004_s0 + $0x330] sm:$0xff]  ;;  %v16715_v57 = vld [vmem:[%s21004_s0 + $0xa0] sm:$0xff]  ;;  %vm11796_vm8 = vcmask 74752   ;;  %s16267_s16 = smov [#allocation3]  }
  0x2f   :  { %14156 = vmatprep.mubr.msk.f32.mxu0 %vm215_vm1, %v16679_v52  ;;  %21191 = vst [vmem:[#allocation20_spill] sm:$0xff] %v16705_v56  ;;  %v16722_v58 = vld [vmem:[%s21004_s0 + $0x340] sm:$0xff]  ;;  %v16727_v59 = vld [vmem:[%s21004_s0 + $0xb0] sm:$0xff]  ;;  %s11819_s17 = sshll.u32 %s16267_s16, 4  ;;  %s11820_s17 = int_to_ptr.vmem [resolvable:$true] %s11819_s17 }
  0x30   :  { %21192 = vst [vmem:[#allocation21_spill] sm:$0xff] %v16722_v58  ;;  %v16732_v60 = vld [vmem:[%s21004_s0 + $0x360] sm:$0xff]  ;;  %v16750_v62 = vld [vmem:[%s21004_s0 + $0x370] sm:$0xff]  ;;  %p16245_p1 = scmp.lt.s32.totalorder %s11820_s17, %s11820_s17 }
  0x31   :  { %14096 = vmatmul.mubr.msk.f32.gmra.mrb[6].mxu1 %vm215_vm1, %v16690_v53  ;;  %v16743_v61 = vld [vmem:[%s21004_s0 + $0xc0] sm:$0xff]  ;;  %v16755_v63 = vld [vmem:[%s21004_s0 + $0xd0] sm:$0xff] }
  0x32   :  { %14157 = vmatmul.mubr.msk.f32.gmra.mrb[12].mxu0 %vm215_vm1, %v16697_v54  ;;  %14098 = vmatprep.mubr.msk.f32.mxu1 %vm215_vm1, %v187_v55  ;;  %v16760_v0 = vld [vmem:[%s21004_s0 + $0x380] sm:$0xff]  ;;  %v16783_v13 = vld [vmem:[%s21004_s0 + $0x390] sm:$0xff] }
  0x33   :  { %14159 = vmatprep.mubr.msk.f32.mxu0 %vm215_vm1, %v16705_v56  ;;  %v16776_v5 = vld [vmem:[%s21004_s0 + $0xe0] sm:$0xff]  ;;  %v16788_v25 = vld [vmem:[%s21004_s0 + $0xf0] sm:$0xff] }
  0x34   :  { %v16795_v38 = vld [vmem:[%s21004_s0 + $0x3a0] sm:$0xff]  ;;  %v16815_v55 = vld [vmem:[%s21004_s0 + $0x3b0] sm:$0xff] }
  0x35   :  { %14099 = vmatmul.mubr.msk.f32.gmra.mrb[8].mxu1 %vm215_vm1, %v16715_v57  ;;  %v16825_v56 = vld [vmem:[%s21004_s0 + $0x3c0] sm:$0xff]  ;;  %v16843_v52 = vld [vmem:[%s21004_s0 + $0x3d0] sm:$0xff] }
  0x36   :  { %14160 = vmatmul.mubr.msk.f32.gmra.mrb[14].mxu0 %vm215_vm1, %v16722_v58  ;;  %14101 = vmatprep.mubr.msk.f32.mxu1 %vm215_vm1, %v16727_v59  ;;  %v16820_v58 = vld [vmem:[%s21004_s0 + $0xb1] sm:$0xff]  ;;  %v16836_v54 = vld [vmem:[%s21004_s0 + $0xc1] sm:$0xff] }
  0x37   :  { %14164 = vmatprep.mubr.msk.f32.mxu0 %vm215_vm1, %v16732_v60  ;;  %v16848_v50 = vld [vmem:[%s21004_s0 + $0xd1] sm:$0xff]  ;;  %v2377_v46 = vld [vmem:[%s21005_s1] sm:$0xf] }
  0x38   :  { %v16853_v48 = vld [vmem:[%s21004_s0 + $0x3f0] sm:$0xff]  ;;  %v16867_v43 = vld [vmem:[%s21004_s0 + $0xe1] sm:$0xff] }
  0x39   :  { %14102 = vmatmul.mubr.msk.f32.gmra.mrb[10].mxu1 %vm215_vm1, %v16743_v61  ;;  %v16876_v41 = vld [vmem:[%s21004_s0 + $0x400] sm:$0xff]  ;;  %v16886_v39 = vld [vmem:[%s21004_s0 + $0x410] sm:$0xff] }
  0x3a   :  { %14165 = vmatmul.mubr.msk.f32.vlgmr.msra.gmra.mrb[0].mxu0 %vm215_vm1, %v16750_v62  ;;  %14104 = vmatprep.mubr.msk.f32.mxu1 %vm215_vm1, %v16755_v63  ;;  %v16898_v37 = vld [vmem:[%s21004_s0 + $0x101] sm:$0xff]  ;;  %v16910_v32 = vld [vmem:[%s21004_s0 + $0x430] sm:$0xff] }
  0x3b   :  { %14167 = vmatprep.mubr.msk.f32.mxu0 %vm215_vm1, %v16760_v0  ;;  %14189 = vmatpush3.msk.msra.mxu0 %vm264_vm0, %v16570_v36  ;;  %v16808_v36 = vld [vmem:[%s21004_s0 + $0x100] sm:$0xff]  ;;  %21193 = vst [vmem:[#allocation22_spill] sm:$0xff] %v16910_v32  ;;  %v16928_v28 = vld [vmem:[%s21004_s0 + $0x450] sm:$0xff] }
  0x3c   :  { %14214 = vmatprep.subr.msk.mxu0 %vm264_vm0, %v16767_v1  ;;  %v16905_v34 = vld [vmem:[%s21004_s0 + $0x420] sm:$0xff]  ;;  %21195 = vst [vmem:[#allocation24_spill] sm:$0xff] %v16928_v28 }
  0x3d   :  { %14105 = vmatmul.mubr.msk.f32.gmra.mrb[12].mxu1 %vm215_vm1, %v16776_v5  ;;  %v16923_v30 = vld [vmem:[%s21004_s0 + $0x440] sm:$0xff] }
  0x3e   :  { %14168 = vmatmul.mubr.msk.f32.gmra.mrb[2].mxu0 %vm215_vm1, %v16783_v13  ;;  %14107 = vmatprep.mubr.msk.f32.mxu1 %vm215_vm1, %v16788_v25  ;;  %21194 = vst [vmem:[#allocation23_spill] sm:$0xff] %v16923_v30  ;;  %v16945_v26 = vld [vmem:[%s21004_s0 + $0x460] sm:$0xff] }
  0x3f   :  { %14170 = vmatprep.mubr.msk.f32.mxu0 %vm215_vm1, %v16795_v38  ;;  %21196 = vst [vmem:[#allocation25_spill] sm:$0xff] %v16945_v26 }
  0x41   :  { %14108 = vmatmul.mubr.msk.f32.gmra.mrb[14].mxu1 %vm215_vm1, %v16808_v36 }
  0x42   :  { %14171 = vmatmul.mubr.msk.f32.gmra.mrb[4].mxu0 %vm215_vm1, %v16815_v55  ;;  %14127 = vmatprep.mubr.msk.f32.mxu1 %vm215_vm1, %v16820_v58 }
  0x43   :  { %14173 = vmatprep.mubr.msk.f32.mxu0 %vm215_vm1, %v16825_v56 }
  0x45   :  { %14128 = vmatmul.mubr.msk.f32.vlgmr.msra.gmra.mrb[10].mxu1 %vm215_vm1, %v16836_v54 }
  0x46   :  { %14174 = vmatmul.mubr.msk.f32.gmra.mrb[6].mxu0 %vm215_vm1, %v16843_v52  ;;  %14293 = vmatpush3.msk.msra.mxu1 %vm264_vm0, %v16621_v44  ;;  %v16881_v44 = vld [vmem:[%s21004_s0 + $0xf1] sm:$0xff] }
  0x47   :  { %14130 = vmatprep.mubr.msk.f32.mxu1 %vm215_vm1, %v16848_v50  ;;  %14176 = vmatprep.mubr.msk.f32.mxu0 %vm215_vm1, %v16853_v48 }
  0x48   :  { %14318 = vmatprep.subr.msk.mxu1 %vm264_vm0, %v2377_v46 }
  0x49   :  { %14131 = vmatmul.mubr.msk.f32.gmra.mrb[12].mxu1 %vm215_vm1, %v16867_v43 }
  0x4a   :  { %14177 = vmatmul.mubr.msk.f32.gmra.mrb[8].mxu0 %vm215_vm1, %v16876_v41  ;;  %14133 = vmatprep.mubr.msk.f32.mxu1 %vm215_vm1, %v16881_v44 }
  0x4b   :  { %14179 = vmatprep.mubr.msk.f32.mxu0 %vm215_vm1, %v16886_v39 }
  0x4d   :  { %14134 = vmatmul.mubr.msk.f32.gmra.mrb[14].mxu1 %vm215_vm1, %v16898_v37 }
  0x4e   :  { %14180 = vmatmul.mubr.msk.f32.gmra.mrb[10].mxu0 %vm215_vm1, %v16905_v34  ;;  %14294 = vmatprep.mubr.msk.f32.mxu1 %vm215_vm1, %v16342_v3  ;;  %v12172_v3 = vld [vmem:[%s21005_s1 + $0x8] sm:$0xf] }
  0x4f   :  { %14182 = vmatprep.mubr.msk.f32.mxu0 %vm215_vm1, %v16910_v32  ;;  %v16950_v32 = vld [vmem:[%s21004_s0 + $0x241] sm:$0xff] }
  0x50   :  { %21197 = vst [vmem:[#allocation26_spill] sm:$0xff] %v16950_v32 }
  0x51   :  { %14295 = vmatmul.mubr.msk.f32.vlgmr.msra.gmra.mrb[16].mxu1 %vm215_vm1, %v16358_v6 }
  0x52   :  { %14183 = vmatmul.mubr.msk.f32.gmra.mrb[12].mxu0 %vm215_vm1, %v16923_v30  ;;  %14319 = vmatpush3.msk.msra.mxu1 %vm264_vm0, %v2377_v46  ;;  %v16964_v46 = vld [vmem:[%s21004_s0 + $0x251] sm:$0xff]  ;;  %v16992_v30 = vld [vmem:[%s21004_s0 + $0x281] sm:$0xff] }
  0x53   :  { %14185 = vmatprep.mubr.msk.f32.mxu0 %vm215_vm1, %v16928_v28  ;;  %14297 = vmatprep.mubr.msk.f32.mxu1 %vm215_vm1, %v16372_v8  ;;  %v16969_v28 = vld [vmem:[%s21004_s0 + $0x261] sm:$0xff]  ;;  %21199 = vst [vmem:[#allocation28_spill] sm:$0xff] %v16992_v30 }
  0x54   :  { %14344 = vmatprep.subr.msk.mxu1 %vm264_vm0, %v12172_v3  ;;  %21198 = vst [vmem:[#allocation27_spill] sm:$0xff] %v16969_v28 }
  0x55   :  { %14298 = vmatmul.mubr.msk.f32.gmra.mrb[18].mxu1 %vm215_vm1, %v16392_v10 }
  0x56   :  { %14186 = vmatmul.mubr.msk.f32.gmra.mrb[14].mxu0 %vm215_vm1, %v16945_v26  ;;  %14300 = vmatprep.mubr.msk.f32.mxu1 %vm215_vm1, %v16402_v12  ;;  %v12052_v26 = vld [vmem:[%s21005_s1 + $0x1c] sm:$0xf] }
  0x57   :  { %14190 = vmatprep.mubr.msk.f32.mxu0 %vm215_vm1, %v16950_v32  ;;  %v16985_v32 = vld [vmem:[%s21004_s0 + $0x271] sm:$0xff] }
  0x59   :  { %14301 = vmatmul.mubr.msk.f32.gmra.mrb[20].mxu1 %vm215_vm1, %v16426_v15 }
  0x5a   :  { %14191 = vmatmul.mubr.msk.f32.vlgmr.msra.gmra.mrb[0].mxu0 %vm215_vm1, %v16964_v46  ;;  %14303 = vmatprep.mubr.msk.f32.mxu1 %vm215_vm1, %v16437_v17 }
  0x5b   :  { %14193 = vmatprep.mubr.msk.f32.mxu0 %vm215_vm1, %v16969_v28  ;;  %14215 = vmatpush3.msk.msra.mxu0 %vm264_vm0, %v16767_v1  ;;  %v17006_v1 = vld [vmem:[%s21004_s0 + $0x291] sm:$0xff]  ;;  %v17011_v28 = vld [vmem:[%s21004_s0 + $0x2a1] sm:$0xff] }
  0x5c   :  { %14240 = vmatprep.subr.msk.mxu0 %vm264_vm0, %v12052_v26  ;;  %21200 = vst [vmem:[#allocation29_spill] sm:$0xff] %v17006_v1  ;;  %21201 = vst [vmem:[#allocation30_spill] sm:$0xff] %v17011_v28 }
  0x5d   :  { %14304 = vmatmul.mubr.msk.f32.gmra.mrb[22].mxu1 %vm215_vm1, %v16455_v19 }
  0x5e   :  { %14194 = vmatmul.mubr.msk.f32.gmra.mrb[2].mxu0 %vm215_vm1, %v16985_v32  ;;  %14306 = vmatprep.mubr.msk.f32.mxu1 %vm215_vm1, %v16465_v21  ;;  %v17024_v21 = vld [vmem:[%s21004_s0 + $0x2b1] sm:$0xff] }
  0x5f   :  { %14196 = vmatprep.mubr.msk.f32.mxu0 %vm215_vm1, %v16992_v30  ;;  %21202 = vst [vmem:[#allocation31_spill] sm:$0xff] %v17024_v21  ;;  %v17029_v30 = vld [vmem:[%s21004_s0 + $0x2d1] sm:$0xff] }
  0x60   :  { %21203 = vst [vmem:[#allocation32_spill] sm:$0xff] %v17029_v30 }
  0x61   :  { %14307 = vmatmul.mubr.msk.f32.gmra.mrb[24].mxu1 %vm215_vm1, %v16483_v23 }
  0x62   :  { %14197 = vmatmul.mubr.msk.f32.gmra.mrb[4].mxu0 %vm215_vm1, %v17006_v1  ;;  %14309 = vmatprep.mubr.msk.f32.mxu1 %vm215_vm1, %v16820_v58  ;;  %v17047_v1 = vld [vmem:[%s21004_s0 + $0x2f1] sm:$0xff] }
  0x63   :  { %14199 = vmatprep.mubr.msk.f32.mxu0 %vm215_vm1, %v17011_v28  ;;  %v17042_v28 = vld [vmem:[%s21004_s0 + $0x2e1] sm:$0xff]  ;;  %21205 = vst [vmem:[#allocation34_spill] sm:$0xff] %v17047_v1 }
  0x64   :  { %21204 = vst [vmem:[#allocation33_spill] sm:$0xff] %v17042_v28 }
  0x65   :  { %14310 = vmatmul.mubr.msk.f32.gmra.mrb[26].mxu1 %vm215_vm1, %v16836_v54 }
  0x66   :  { %14200 = vmatmul.mubr.msk.f32.gmra.mrb[6].mxu0 %vm215_vm1, %v17024_v21  ;;  %14312 = vmatprep.mubr.msk.f32.mxu1 %vm215_vm1, %v16848_v50  ;;  %v17065_v21 = vld [vmem:[%s21004_s0 + $0x311] sm:$0xff] }
  0x67   :  { %14202 = vmatprep.mubr.msk.f32.mxu0 %vm215_vm1, %v17029_v30  ;;  %v17060_v30 = vld [vmem:[%s21004_s0 + $0x301] sm:$0xff]  ;;  %21206 = vst [vmem:[#allocation35_spill] sm:$0xff] %v17065_v21 }
  0x69   :  { %14313 = vmatmul.mubr.msk.f32.gmra.mrb[28].mxu1 %vm215_vm1, %v16867_v43 }
  0x6a   :  { %14203 = vmatmul.mubr.msk.f32.gmra.mrb[8].mxu0 %vm215_vm1, %v17042_v28  ;;  %14315 = vmatprep.mubr.msk.f32.mxu1 %vm215_vm1, %v16881_v44  ;;  %v17083_v28 = vld [vmem:[%s21004_s0 + $0x331] sm:$0xff] }
  0x6b   :  { %14205 = vmatprep.mubr.msk.f32.mxu0 %vm215_vm1, %v17047_v1  ;;  %v17078_v1 = vld [vmem:[%s21004_s0 + $0x321] sm:$0xff] }
  0x6d   :  { %14316 = vmatmul.mubr.msk.f32.gmra.mrb[30].mxu1 %vm215_vm1, %v16898_v37 }
  0x6e   :  { %14206 = vmatmul.mubr.msk.f32.gmra.mrb[10].mxu0 %vm215_vm1, %v17060_v30  ;;  %14320 = vmatprep.mubr.msk.f32.mxu1 %vm215_vm1, %v16334_v2  ;;  %v12206_v2 = vld [vmem:[%s21005_s1 + $0xc] sm:$0xf] }
  0x6f   :  { %14208 = vmatprep.mubr.msk.f32.mxu0 %vm215_vm1, %v17065_v21  ;;  %v17100_v21 = vld [vmem:[%s21004_s0 + $0x341] sm:$0xff] }
  0x71   :  { %14321 = vmatmul.mubr.msk.f32.vlgmr.msra.gmra.mrb[16].mxu1 %vm215_vm1, %v16347_v4 }
  0x72   :  { %14209 = vmatmul.mubr.msk.f32.gmra.mrb[12].mxu0 %vm215_vm1, %v17078_v1  ;;  %14345 = vmatpush3.msk.msra.mxu1 %vm264_vm0, %v12172_v3  ;;  %v12086_v3 = vld [vmem:[%s21005_s1 + $0x20] sm:$0xf] }
  0x73   :  { %14211 = vmatprep.mubr.msk.f32.mxu0 %vm215_vm1, %v17083_v28  ;;  %14323 = vmatprep.mubr.msk.f32.mxu1 %vm215_vm1, %v16367_v7 }
  0x74   :  { %14370 = vmatprep.subr.msk.mxu1 %vm264_vm0, %v12206_v2 }
  0x75   :  { %14324 = vmatmul.mubr.msk.f32.gmra.mrb[18].mxu1 %vm215_vm1, %v16383_v9 }
  0x76   :  { %14212 = vmatmul.mubr.msk.f32.gmra.mrb[14].mxu0 %vm215_vm1, %v17100_v21  ;;  %14326 = vmatprep.mubr.msk.f32.mxu1 %vm215_vm1, %v16397_v11 }
  0x77   :  { %14216 = vmatprep.mubr.msk.f32.mxu0 %vm215_vm1, %v16597_v40  ;;  %v17172_v40 = vld [vmem:[%s21004_s0 + $0x131] sm:$0xff] }
  0x79   :  { %14327 = vmatmul.mubr.msk.f32.gmra.mrb[20].mxu1 %vm215_vm1, %v16419_v14 }
  0x7a   :  { %14217 = vmatmul.mubr.msk.f32.vlgmr.msra.gmra.mrb[0].mxu0 %vm215_vm1, %v16609_v42  ;;  %14329 = vmatprep.mubr.msk.f32.mxu1 %vm215_vm1, %v16431_v16  ;;  %v17179_v42 = vld [vmem:[%s21004_s0 + $0x141] sm:$0xff] }
  0x7b   :  { %14219 = vmatprep.mubr.msk.f32.mxu0 %vm215_vm1, %v16630_v45  ;;  %14241 = vmatpush3.msk.msra.mxu0 %vm264_vm0, %v12052_v26  ;;  %v17143_v26 = vld [vmem:[%s21004_s0 + $0x80] sm:$0xff]  ;;  %v12240_v45 = vld [vmem:[%s21005_s1 + $0x10] sm:$0xf] }
  0x7c   :  { %14266 = vmatprep.subr.msk.mxu0 %vm264_vm0, %v12086_v3 }
  0x7d   :  { %14330 = vmatmul.mubr.msk.f32.gmra.mrb[22].mxu1 %vm215_vm1, %v16448_v18 }
  0x7e   :  { %14220 = vmatmul.mubr.msk.f32.gmra.mrb[2].mxu0 %vm215_vm1, %v16644_v47  ;;  %14332 = vmatprep.mubr.msk.f32.mxu1 %vm215_vm1, %v16460_v20  ;;  %v12156_v20 = vld [vmem:[%s21004_s0 + $0x121] sm:$0xff]  ;;  %v17192_v47 = vld [vmem:[%s21004_s0 + $0x151] sm:$0xff] }
  0x7f   :  { %14222 = vmatprep.mubr.msk.f32.mxu0 %vm215_vm1, %v16662_v49  ;;  %v17201_v49 = vld [vmem:[%s21004_s0 + $0x110] sm:$0xff] }
  0x81   :  { %14333 = vmatmul.mubr.msk.f32.gmra.mrb[24].mxu1 %vm215_vm1, %v16476_v22 }
  0x82   :  { %14223 = vmatmul.mubr.msk.f32.gmra.mrb[4].mxu0 %vm215_vm1, %v16674_v51  ;;  %14335 = vmatprep.mubr.msk.f32.mxu1 %vm215_vm1, %v16488_v24  ;;  %v17206_v51 = vld [vmem:[%s21004_s0 + $0x161] sm:$0xff] }
  0x83   :  { %14225 = vmatprep.mubr.msk.f32.mxu0 %vm215_vm1, %v16690_v53  ;;  %v17218_v53 = vld [vmem:[%s21004_s0 + $0x171] sm:$0xff] }
  0x85   :  { %14336 = vmatmul.mubr.msk.f32.gmra.mrb[26].mxu1 %vm215_vm1, %v16508_v27 }
  0x86   :  { %14226 = vmatmul.mubr.msk.f32.gmra.mrb[6].mxu0 %vm215_vm1, %v17143_v26  ;;  %14338 = vmatprep.mubr.msk.f32.mxu1 %vm215_vm1, %v16520_v29 }
  0x87   :  { %14228 = vmatprep.mubr.msk.f32.mxu0 %vm215_vm1, %v16715_v57  ;;  %v17225_v57 = vld [vmem:[%s21004_s0 + $0x181] sm:$0xff] }
  0x89   :  { %14339 = vmatmul.mubr.msk.f32.gmra.mrb[28].mxu1 %vm215_vm1, %v16536_v31 }
  0x8a   :  { %14229 = vmatmul.mubr.msk.f32.gmra.mrb[8].mxu0 %vm215_vm1, %v16727_v59  ;;  %14341 = vmatprep.mubr.msk.f32.mxu1 %vm215_vm1, %v16548_v33  ;;  %v12427_v59 = vld [vmem:[%s21005_s1 + $0x4] sm:$0xf] }
  0x8b   :  { %14231 = vmatprep.mubr.msk.f32.mxu0 %vm215_vm1, %v16743_v61  ;;  %v12164_v61 = vld [vmem:[%s21004_s0 + $0x1b1] sm:$0xff] }
  0x8d   :  { %14342 = vmatmul.mubr.msk.f32.gmra.mrb[30].mxu1 %vm215_vm1, %v16565_v35 }
  0x8e   :  { %14232 = vmatmul.mubr.msk.f32.gmra.mrb[10].mxu0 %vm215_vm1, %v16755_v63  ;;  %14346 = vmatprep.mubr.msk.f32.mxu1 %vm215_vm1, %v12156_v20  ;;  %v17304_v63 = vld [vmem:[%s21004_s0 + $0x211] sm:$0xff] }
  0x8f   :  { %14234 = vmatprep.mubr.msk.f32.mxu0 %vm215_vm1, %v16776_v5  ;;  %v17315_v5 = vld [vmem:[%s21004_s0 + $0x221] sm:$0xff] }
  0x91   :  { %14347 = vmatmul.mubr.msk.f32.vlgmr.msra.gmra.mrb[16].mxu1 %vm215_vm1, %v17172_v40 }
  0x92   :  { %14235 = vmatmul.mubr.msk.f32.gmra.mrb[12].mxu0 %vm215_vm1, %v16788_v25  ;;  %14371 = vmatpush3.msk.msra.mxu1 %vm264_vm0, %v12206_v2  ;;  %v21223_v2 = vld [vmem:[#allocation8_spill] sm:$0xff] }
  0x93   :  { %14237 = vmatprep.mubr.msk.f32.mxu0 %vm215_vm1, %v16808_v36  ;;  %14349 = vmatprep.mubr.msk.f32.mxu1 %vm215_vm1, %v17179_v42  ;;  %v17538_v36 = vld [vmem:[%s21005_s1 + $0xc] sm:$0xf] }
  0x94   :  { %14396 = vmatprep.subr.msk.mxu1 %vm264_vm0, %v12240_v45 }
  0x95   :  { %14350 = vmatmul.mubr.msk.f32.gmra.mrb[18].mxu1 %vm215_vm1, %v17192_v47 }
  0x96   :  { %14238 = vmatmul.mubr.msk.f32.gmra.mrb[14].mxu0 %vm215_vm1, %v17201_v49  ;;  %14352 = vmatprep.mubr.msk.f32.mxu1 %vm215_vm1, %v17206_v51 }
  0x97   :  { %14242 = vmatprep.mubr.msk.f32.mxu0 %vm215_vm1, %v16347_v4  ;;  %v17239_v4 = vld [vmem:[%s21004_s0 + $0x191] sm:$0xff] }
  0x99   :  { %14353 = vmatmul.mubr.msk.f32.gmra.mrb[20].mxu1 %vm215_vm1, %v17218_v53 }
  0x9a   :  { %14243 = vmatmul.mubr.msk.f32.vlgmr.msra.gmra.mrb[0].mxu0 %vm215_vm1, %v16367_v7  ;;  %14355 = vmatprep.mubr.msk.f32.mxu1 %vm215_vm1, %v17225_v57  ;;  %v17256_v7 = vld [vmem:[%s21004_s0 + $0x1c1] sm:$0xff] }
  0x9b   :  { %14245 = vmatprep.mubr.msk.f32.mxu0 %vm215_vm1, %v16383_v9  ;;  %14267 = vmatpush3.msk.msra.mxu0 %vm264_vm0, %v12086_v3  ;;  %v17263_v9 = vld [vmem:[%s21004_s0 + $0x1d1] sm:$0xff] }
  0x9c   :  { %14526 = vmatprep.subr.msk.mxu0 %vm264_vm0, %v12427_v59  ;;  %v12266_v3 = vld [vmem:[%s21004_s0 + $0x3f1] sm:$0xff] }
  0x9d   :  { %14356 = vmatmul.mubr.msk.f32.gmra.mrb[22].mxu1 %vm215_vm1, %v17239_v4 }
  0x9e   :  { %14246 = vmatmul.mubr.msk.f32.gmra.mrb[2].mxu0 %vm215_vm1, %v16397_v11  ;;  %14358 = vmatprep.mubr.msk.f32.mxu1 %vm215_vm1, %v12164_v61  ;;  %v17274_v11 = vld [vmem:[%s21004_s0 + $0x1e1] sm:$0xff] }
  0x9f   :  { %14248 = vmatprep.mubr.msk.f32.mxu0 %vm215_vm1, %v16419_v14  ;;  %v17281_v14 = vld [vmem:[%s21004_s0 + $0x1a0] sm:$0xff] }
  0xa0   :  { %v12267_v61 = vld [vmem:[%s21004_s0 + $0x401] sm:$0xff] }
  0xa1   :  { %14359 = vmatmul.mubr.msk.f32.gmra.mrb[24].mxu1 %vm215_vm1, %v17256_v7 }
  0xa2   :  { %14249 = vmatmul.mubr.msk.f32.gmra.mrb[4].mxu0 %vm215_vm1, %v16431_v16  ;;  %14361 = vmatprep.mubr.msk.f32.mxu1 %vm215_vm1, %v17263_v9  ;;  %v17286_v16 = vld [vmem:[%s21004_s0 + $0x1f1] sm:$0xff] }
  0xa3   :  { %14251 = vmatprep.mubr.msk.f32.mxu0 %vm215_vm1, %v16448_v18  ;;  %v17297_v18 = vld [vmem:[%s21004_s0 + $0x201] sm:$0xff] }
  0xa5   :  { %14362 = vmatmul.mubr.msk.f32.gmra.mrb[26].mxu1 %vm215_vm1, %v17274_v11 }
  0xa6   :  { %14252 = vmatmul.mubr.msk.f32.gmra.mrb[6].mxu0 %vm215_vm1, %v17281_v14  ;;  %14364 = vmatprep.mubr.msk.f32.mxu1 %vm215_vm1, %v17286_v16 }
  0xa7   :  { %14254 = vmatprep.mubr.msk.f32.mxu0 %vm215_vm1, %v16476_v22  ;;  %v12274_v22 = vld [vmem:[%s21005_s1 + $0x14] sm:$0xf] }
  0xa9   :  { %14365 = vmatmul.mubr.msk.f32.gmra.mrb[28].mxu1 %vm215_vm1, %v17297_v18 }
  0xaa   :  { %14255 = vmatmul.mubr.msk.f32.gmra.mrb[8].mxu0 %vm215_vm1, %v16488_v24  ;;  %14367 = vmatprep.mubr.msk.f32.mxu1 %vm215_vm1, %v17304_v63  ;;  %v17342_v24 = vld [vmem:[%s21004_s0 + $0x230] sm:$0xff] }
  0xab   :  { %14257 = vmatprep.mubr.msk.f32.mxu0 %vm215_vm1, %v16508_v27  ;;  %v4542_v27 = vld [vmem:[%s21005_s1] sm:$0xf] }
  0xad   :  { %14368 = vmatmul.mubr.msk.f32.gmra.mrb[30].mxu1 %vm215_vm1, %v17315_v5 }
  0xae   :  { %14258 = vmatmul.mubr.msk.f32.gmra.mrb[10].mxu0 %vm215_vm1, %v16520_v29  ;;  %14372 = vmatprep.mubr.msk.f32.mxu1 %vm215_vm1, %v16732_v60  ;;  %v17426_v29 = vld [vmem:[%s21004_s0 + $0x111] sm:$0xff] }
  0xaf   :  { %14260 = vmatprep.mubr.msk.f32.mxu0 %vm215_vm1, %v16536_v31  ;;  %v21213_v31 = vld [vmem:[#allocation28_spill] sm:$0xff] }
  0xb1   :  { %14373 = vmatmul.mubr.msk.f32.vlgmr.msra.gmra.mrb[16].mxu1 %vm215_vm1, %v16750_v62 }
  0xb2   :  { %14261 = vmatmul.mubr.msk.f32.gmra.mrb[12].mxu0 %vm215_vm1, %v16548_v33  ;;  %14397 = vmatpush3.msk.msra.mxu1 %vm264_vm0, %v12240_v45  ;;  %v21214_v33 = vld [vmem:[#allocation29_spill] sm:$0xff] }
  0xb3   :  { %14263 = vmatprep.mubr.msk.f32.mxu0 %vm215_vm1, %v16565_v35  ;;  %14375 = vmatprep.mubr.msk.f32.mxu1 %vm215_vm1, %v16760_v0  ;;  %v12478_v35 = vld [vmem:[%s21005_s1 + $0x8] sm:$0xf] }
  0xb4   :  { %14422 = vmatprep.subr.msk.mxu1 %vm264_vm0, %v12274_v22 }
  0xb5   :  { %14376 = vmatmul.mubr.msk.f32.gmra.mrb[18].mxu1 %vm215_vm1, %v16783_v13 }
  0xb6   :  { %14264 = vmatmul.mubr.msk.f32.gmra.mrb[14].mxu0 %vm215_vm1, %v17342_v24  ;;  %14378 = vmatprep.mubr.msk.f32.mxu1 %vm215_vm1, %v16795_v38 }
  0xb7   :  { %14268 = vmatprep.mubr.msk.f32.mxu0 %vm215_vm1, %v16358_v6  ;;  %v17385_v6 = vld [vmem:[%s21004_s0 + $0x81] sm:$0xff] }
  0xb9   :  { %14379 = vmatmul.mubr.msk.f32.gmra.mrb[20].mxu1 %vm215_vm1, %v16815_v55 }
  0xba   :  { %14269 = vmatmul.mubr.msk.f32.vlgmr.msra.gmra.mrb[0].mxu0 %vm215_vm1, %v16372_v8  ;;  %14381 = vmatprep.mubr.msk.f32.mxu1 %vm215_vm1, %v16825_v56  ;;  %v21207_v8 = vld [vmem:[#allocation22_spill] sm:$0xff] }
  0xbb   :  { %14271 = vmatprep.mubr.msk.f32.mxu0 %vm215_vm1, %v16392_v10  ;;  %14527 = vmatpush3.msk.msra.mxu0 %vm264_vm0, %v12427_v59  ;;  %v21208_v10 = vld [vmem:[#allocation23_spill] sm:$0xff]  ;;  %v21224_v59 = vld [vmem:[#allocation9_spill] sm:$0xff] }
  0xbc   :  { %14552 = vmatprep.subr.msk.mxu0 %vm264_vm0, %v4542_v27 }
  0xbd   :  { %14382 = vmatmul.mubr.msk.f32.gmra.mrb[22].mxu1 %vm215_vm1, %v16843_v52 }
  0xbe   :  { %14272 = vmatmul.mubr.msk.f32.gmra.mrb[2].mxu0 %vm215_vm1, %v16402_v12  ;;  %14384 = vmatprep.mubr.msk.f32.mxu1 %vm215_vm1, %v16853_v48  ;;  %v21209_v12 = vld [vmem:[#allocation24_spill] sm:$0xff] }
  0xbf   :  { %14274 = vmatprep.mubr.msk.f32.mxu0 %vm215_vm1, %v16426_v15  ;;  %v21210_v15 = vld [vmem:[#allocation25_spill] sm:$0xff] }
  0xc1   :  { %14385 = vmatmul.mubr.msk.f32.gmra.mrb[24].mxu1 %vm215_vm1, %v16876_v41 }
  0xc2   :  { %14275 = vmatmul.mubr.msk.f32.gmra.mrb[4].mxu0 %vm215_vm1, %v16437_v17  ;;  %14387 = vmatprep.mubr.msk.f32.mxu1 %vm215_vm1, %v16886_v39  ;;  %v21211_v17 = vld [vmem:[#allocation26_spill] sm:$0xff] }
  0xc3   :  { %14277 = vmatprep.mubr.msk.f32.mxu0 %vm215_vm1, %v16455_v19  ;;  %v12308_v19 = vld [vmem:[%s21005_s1 + $0x18] sm:$0xf] }
  0xc5   :  { %14388 = vmatmul.mubr.msk.f32.gmra.mrb[26].mxu1 %vm215_vm1, %v16905_v34 }
  0xc6   :  { %14278 = vmatmul.mubr.msk.f32.gmra.mrb[6].mxu0 %vm215_vm1, %v17385_v6  ;;  %14390 = vmatprep.mubr.msk.f32.mxu1 %vm215_vm1, %v21207_v8 }
  0xc7   :  { %14280 = vmatprep.mubr.msk.f32.mxu0 %vm215_vm1, %v16483_v23  ;;  %v21212_v23 = vld [vmem:[#allocation27_spill] sm:$0xff] }
  0xc9   :  { %14391 = vmatmul.mubr.msk.f32.gmra.mrb[28].mxu1 %vm215_vm1, %v21208_v10 }
  0xca   :  { %14281 = vmatmul.mubr.msk.f32.gmra.mrb[8].mxu0 %vm215_vm1, %v16820_v58  ;;  %14393 = vmatprep.mubr.msk.f32.mxu1 %vm215_vm1, %v21209_v12  ;;  %v21219_v58 = vld [vmem:[#allocation34_spill] sm:$0xff] }
  0xcb   :  { %14283 = vmatprep.mubr.msk.f32.mxu0 %vm215_vm1, %v16836_v54  ;;  %v21218_v54 = vld [vmem:[#allocation33_spill] sm:$0xff] }
  0xcd   :  { %14394 = vmatmul.mubr.msk.f32.gmra.mrb[30].mxu1 %vm215_vm1, %v21210_v15 }
  0xce   :  { %14284 = vmatmul.mubr.msk.f32.gmra.mrb[10].mxu0 %vm215_vm1, %v16848_v50  ;;  %14398 = vmatprep.mubr.msk.f32.mxu1 %vm215_vm1, %v21211_v17  ;;  %v21217_v50 = vld [vmem:[#allocation32_spill] sm:$0xff] }
  0xcf   :  { %14286 = vmatprep.mubr.msk.f32.mxu0 %vm215_vm1, %v16867_v43  ;;  %v21216_v43 = vld [vmem:[#allocation31_spill] sm:$0xff] }
  0xd1   :  { %14399 = vmatmul.mubr.msk.f32.vlgmr.msra.gmra.mrb[16].mxu1 %vm215_vm1, %v16964_v46 }
  0xd2   :  { %14287 = vmatmul.mubr.msk.f32.gmra.mrb[12].mxu0 %vm215_vm1, %v16881_v44  ;;  %14423 = vmatpush3.msk.msra.mxu1 %vm264_vm0, %v12274_v22  ;;  %v12265_v44 = vld [vmem:[%s21004_s0 + $0x3d1] sm:$0xff]  ;;  %v21225_v22 = vld [vmem:[#allocation10_spill] sm:$0xff] }
  0xd3   :  { %14289 = vmatprep.mubr.msk.f32.mxu0 %vm215_vm1, %v16898_v37  ;;  %14401 = vmatprep.mubr.msk.f32.mxu1 %vm215_vm1, %v21212_v23  ;;  %v21215_v37 = vld [vmem:[#allocation30_spill] sm:$0xff] }
  0xd4   :  { %14448 = vmatprep.subr.msk.mxu1 %vm264_vm0, %v12308_v19 }
  0xd5   :  { %14402 = vmatmul.mubr.msk.f32.gmra.mrb[18].mxu1 %vm215_vm1, %v16985_v32 }
  0xd6   :  { %14290 = vmatmul.mubr.msk.f32.gmra.mrb[14].mxu0 %vm215_vm1, %v17426_v29  ;;  %14404 = vmatprep.mubr.msk.f32.mxu1 %vm215_vm1, %v21213_v31 }
  0xd7   :  { %14528 = vmatprep.mubr.msk.f32.mxu0 %vm215_vm1, %v16732_v60  ;;  %v21220_v60 = vld [vmem:[#allocation35_spill] sm:$0xff] }
  0xd9   :  { %14405 = vmatmul.mubr.msk.f32.gmra.mrb[20].mxu1 %vm215_vm1, %v21214_v33 }
  0xda   :  { %14529 = vmatmul.mubr.msk.f32.vlgmr.msra.gmra.mrb[16].mxu0 %vm215_vm1, %v16750_v62  ;;  %14407 = vmatprep.mubr.msk.f32.mxu1 %vm215_vm1, %v21215_v37  ;;  %v12263_v62 = vld [vmem:[%s21004_s0 + $0x3b1] sm:$0xff] }
  0xdb   :  { %14531 = vmatprep.mubr.msk.f32.mxu0 %vm215_vm1, %v16760_v0  ;;  %14553 = vmatpush3.msk.msra.mxu0 %vm264_vm0, %v4542_v27  ;;  %v21221_v0 = vld [vmem:[#allocation6_spill] sm:$0xff]  ;;  %v12268_v27 = vld [vmem:[%s21004_s0 + $0x411] sm:$0xff] }
  0xdc   :  { %14578 = vmatprep.subr.msk.mxu0 %vm264_vm0, %v12478_v35 }
  0xdd   :  { %14408 = vmatmul.mubr.msk.f32.gmra.mrb[22].mxu1 %vm215_vm1, %v21216_v43 }
  0xde   :  { %14532 = vmatmul.mubr.msk.f32.gmra.mrb[18].mxu0 %vm215_vm1, %v16783_v13  ;;  %14410 = vmatprep.mubr.msk.f32.mxu1 %vm215_vm1, %v21217_v50  ;;  %v12264_v13 = vld [vmem:[%s21004_s0 + $0x3c1] sm:$0xff] }
  0xdf   :  { %14534 = vmatprep.mubr.msk.f32.mxu0 %vm215_vm1, %v16795_v38 }
  0xe1   :  { %14411 = vmatmul.mubr.msk.f32.gmra.mrb[24].mxu1 %vm215_vm1, %v21218_v54 }
  0xe2   :  { %14535 = vmatmul.mubr.msk.f32.gmra.mrb[20].mxu0 %vm215_vm1, %v16815_v55  ;;  %14413 = vmatprep.mubr.msk.f32.mxu1 %vm215_vm1, %v21219_v58  ;;  %v21222_v55 = vld [vmem:[#allocation7_spill] sm:$0xff] }
  0xe3   :  { %14537 = vmatprep.mubr.msk.f32.mxu0 %vm215_vm1, %v16825_v56  ;;  %v12262_v56 = vld [vmem:[%s21004_s0 + $0x3a1] sm:$0xff] }
  0xe5   :  { %14414 = vmatmul.mubr.msk.f32.gmra.mrb[26].mxu1 %vm215_vm1, %v17060_v30 }
  0xe6   :  { %14538 = vmatmul.mubr.msk.f32.gmra.mrb[22].mxu0 %vm215_vm1, %v16843_v52  ;;  %14416 = vmatprep.mubr.msk.f32.mxu1 %vm215_vm1, %v21220_v60  ;;  %v12258_v52 = vld [vmem:[%s21004_s0 + $0x361] sm:$0xff] }
  0xe7   :  { %14540 = vmatprep.mubr.msk.f32.mxu0 %vm215_vm1, %v16853_v48  ;;  %v17502_v48 = vld [vmem:[%s21005_s1 + $0x1c] sm:$0xf] }
  0xe9   :  { %14417 = vmatmul.mubr.msk.f32.gmra.mrb[28].mxu1 %vm215_vm1, %v17078_v1 }
  0xea   :  { %14541 = vmatmul.mubr.msk.f32.gmra.mrb[24].mxu0 %vm215_vm1, %v16876_v41  ;;  %14419 = vmatprep.mubr.msk.f32.mxu1 %vm215_vm1, %v17083_v28  ;;  %v12259_v41 = vld [vmem:[%s21004_s0 + $0x371] sm:$0xff] }
  0xeb   :  { %14543 = vmatprep.mubr.msk.f32.mxu0 %vm215_vm1, %v16886_v39  ;;  %v12260_v39 = vld [vmem:[%s21004_s0 + $0x381] sm:$0xff] }
  0xed   :  { %14420 = vmatmul.mubr.msk.f32.gmra.mrb[30].mxu1 %vm215_vm1, %v17100_v21 }
  0xee   :  { %14544 = vmatmul.mubr.msk.f32.gmra.mrb[26].mxu0 %vm215_vm1, %v16905_v34  ;;  %14424 = vmatprep.mubr.msk.f32.mxu1 %vm215_vm1, %v12258_v52  ;;  %v12261_v34 = vld [vmem:[%s21004_s0 + $0x391] sm:$0xff] }
  0xef   :  { %14546 = vmatprep.mubr.msk.f32.mxu0 %vm215_vm1, %v21207_v8 }
  0xf1   :  { %14425 = vmatmul.mubr.msk.f32.vlgmr.msra.gmra.mrb[16].mxu1 %vm215_vm1, %v12259_v41 }
  0xf2   :  { %14547 = vmatmul.mubr.msk.f32.gmra.mrb[28].mxu0 %vm215_vm1, %v21208_v10  ;;  %14449 = vmatpush3.msk.msra.mxu1 %vm264_vm0, %v12308_v19  ;;  %v21227_v19 = vld [vmem:[#allocation12_spill] sm:$0xff] }
  0xf3   :  { %14427 = vmatprep.mubr.msk.f32.mxu1 %vm215_vm1, %v12260_v39  ;;  %14549 = vmatprep.mubr.msk.f32.mxu0 %vm215_vm1, %v21209_v12  ;;  %v21226_v12 = vld [vmem:[#allocation11_spill] sm:$0xff]  ;;  %v21228_v39 = vld [vmem:[#allocation13_spill] sm:$0xff] }
  0xf4   :  { %14474 = vmatprep.subr.msk.mxu1 %vm264_vm0, %v17502_v48 }
  0xf5   :  { %14428 = vmatmul.mubr.msk.f32.gmra.mrb[18].mxu1 %vm215_vm1, %v12261_v34  ;;  %v12271_v34 = vld [vmem:[%s21004_s0 + $0x441] sm:$0xff] }
  0xf6   :  { %14550 = vmatmul.mubr.msk.f32.gmra.mrb[30].mxu0 %vm215_vm1, %v21210_v15  ;;  %14430 = vmatprep.mubr.msk.f32.mxu1 %vm215_vm1, %v12262_v56  ;;  %v12269_v15 = vld [vmem:[%s21004_s0 + $0x421] sm:$0xff] }
  0xf7   :  { %14554 = vmatprep.mubr.msk.f32.mxu0 %vm215_vm1, %v21221_v0  ;;  %v21229_v56 = vld [vmem:[#allocation14_spill] sm:$0xff] }
  0xf8   :  { %v17530_v25 = vpop.f32.mrb[0].mxu1 }
  0xf9   :  { %v17532_v38 = vpop.f32.mrb[1].mxu1  ;;  %14431 = vmatmul.mubr.msk.f32.gmra.mrb[20].mxu1 %vm215_vm1, %v12263_v62  ;;  %v12272_v62 = vld [vmem:[%s21004_s0 + $0x451] sm:$0xff] }
  0xfa   :  { %14555 = vmatmul.mubr.msk.f32.vlgmr.msra.gmra.mrb[16].mxu0 %vm215_vm1, %v21222_v55  ;;  %14433 = vmatprep.mubr.msk.f32.mxu1 %vm215_vm1, %v12264_v13  ;;  %v21230_v55 = vld [vmem:[#allocation15_spill] sm:$0xff] }
  0xfb   :  { %14557 = vmatprep.mubr.msk.f32.mxu0 %vm215_vm1, %v21223_v2  ;;  %14579 = vmatpush3.msk.msra.mxu0 %vm264_vm0, %v12478_v35  ;;  %v12270_v35 = vld [vmem:[%s21004_s0 + $0x431] sm:$0xff] }
  0xfc   :  { %v17552_v20 = vpop.f32.mrb[2].mxu1  ;;  %14604 = vmatprep.subr.msk.mxu0 %vm264_vm0, %v17538_v36  ;;  %v21231_v2 = vld [vmem:[#allocation16_spill] sm:$0xff] }
  0xfd   :  { %v17556_v45 = vpop.f32.mrb[3].mxu1  ;;  %14434 = vmatmul.mubr.msk.f32.gmra.mrb[22].mxu1 %vm215_vm1, %v12265_v44  ;;  %v17613_v44 = vld [vmem:[%s21004_s0 + $0x461] sm:$0xff] }
  0xfe   :  { %14558 = vmatmul.mubr.msk.f32.gmra.mrb[18].mxu0 %vm215_vm1, %v21224_v59  ;;  %14436 = vmatprep.mubr.msk.f32.mxu1 %vm215_vm1, %v12266_v3  ;;  %v17620_v3 = vld [vmem:[%s21004_s0 + $0x130] sm:$0xff]  ;;  %v21059_v59 = vmov 0.0  }
  0xff   :  { %14560 = vmatprep.mubr.msk.f32.mxu0 %vm215_vm1, %v21225_v22  ;;  %145 = vst.msk [vmem:[#allocation2 + $0x370] sm:$0xff] %vm33_vm2, %v21059_v59  ;;  %34 = vst.msk [vmem:[#allocation2] sm:$0xff] %vm33_vm2, %v21059_v59  ;;  %v17767_v22 = vld [vmem:[%s21004_s0 + $0x140] sm:$0xff] }
 0x100   :  { %v17570_v8 = vpop.f32.mrb[4].mxu1  ;;  %37 = vst.msk [vmem:[#allocation2 + $0x10] sm:$0xff] %vm33_vm2, %v21059_v59  ;;  %39 = vst.msk [vmem:[#allocation2 + $0x20] sm:$0xff] %vm33_vm2, %v21059_v59 }
 0x101   :  { %v17572_v10 = vpop.f32.mrb[5].mxu1  ;;  %14437 = vmatmul.mubr.msk.f32.gmra.mrb[24].mxu1 %vm215_vm1, %v12267_v61  ;;  %41 = vst.msk [vmem:[#allocation2 + $0x30] sm:$0xff] %vm33_vm2, %v21059_v59  ;;  %43 = vst.msk [vmem:[#allocation2 + $0x40] sm:$0xff] %vm33_vm2, %v21059_v59  ;;  %v21232_v61 = vld [vmem:[#allocation17_spill] sm:$0xff] }
 0x102   :  { %14561 = vmatmul.mubr.msk.f32.gmra.mrb[20].mxu0 %vm215_vm1, %v21226_v12  ;;  %14439 = vmatprep.mubr.msk.f32.mxu1 %vm215_vm1, %v12268_v27  ;;  %45 = vst.msk [vmem:[#allocation2 + $0x50] sm:$0xff] %vm33_vm2, %v21059_v59  ;;  %47 = vst.msk [vmem:[#allocation2 + $0x60] sm:$0xff] %vm33_vm2, %v21059_v59  ;;  %v21233_v27 = vld [vmem:[#allocation18_spill] sm:$0xff]  ;;  %v17774_v12 = vld [vmem:[%s21004_s0 + $0x150] sm:$0xff] }
 0x103   :  { %14563 = vmatprep.mubr.msk.f32.mxu0 %vm215_vm1, %v21227_v19  ;;  %49 = vst.msk [vmem:[#allocation2 + $0x70] sm:$0xff] %vm33_vm2, %v21059_v59  ;;  %51 = vst.msk [vmem:[#allocation2 + $0x80] sm:$0xff] %vm33_vm2, %v21059_v59  ;;  %v21234_v19 = vld [vmem:[#allocation19_spill] sm:$0xff] }
 0x104   :  { %v17586_v52 = vpop.f32.mrb[6].mxu1  ;;  %53 = vst.msk [vmem:[#allocation2 + $0x90] sm:$0xff] %vm33_vm2, %v21059_v59  ;;  %55 = vst.msk [vmem:[#allocation2 + $0xa0] sm:$0xff] %vm33_vm2, %v21059_v59 }
 0x105   :  { %v17588_v41 = vpop.f32.mrb[7].mxu1  ;;  %14440 = vmatmul.mubr.msk.f32.gmra.mrb[26].mxu1 %vm215_vm1, %v12269_v15  ;;  %57 = vst.msk [vmem:[#allocation2 + $0xb0] sm:$0xff] %vm33_vm2, %v21059_v59  ;;  %59 = vst.msk [vmem:[#allocation2 + $0xc0] sm:$0xff] %vm33_vm2, %v21059_v59  ;;  %v12376_v15 = vld [vmem:[%s21005_s1 + $0x20] sm:$0xf] }
 0x106   :  { %14564 = vmatmul.mubr.msk.f32.gmra.mrb[22].mxu0 %vm215_vm1, %v21228_v39  ;;  %14442 = vmatprep.mubr.msk.f32.mxu1 %vm215_vm1, %v12270_v35  ;;  %61 = vst.msk [vmem:[#allocation2 + $0xd0] sm:$0xff] %vm33_vm2, %v21059_v59  ;;  %63 = vst.msk [vmem:[#allocation2 + $0xe0] sm:$0xff] %vm33_vm2, %v21059_v59  ;;  %v17788_v35 = vld [vmem:[%s21004_s0 + $0x160] sm:$0xff]  ;;  %v21235_v39 = vld [vmem:[#allocation20_spill] sm:$0xff] }
 0x107   :  { %14566 = vmatprep.mubr.msk.f32.mxu0 %vm215_vm1, %v21229_v56  ;;  %65 = vst.msk [vmem:[#allocation2 + $0xf0] sm:$0xff] %vm33_vm2, %v21059_v59  ;;  %67 = vst.msk [vmem:[#allocation2 + $0x100] sm:$0xff] %vm33_vm2, %v21059_v59  ;;  %v17809_v56 = vld [vmem:[%s21004_s0 + $0x180] sm:$0xff] }
 0x108   :  { %v17602_v0 = vpop.f32.mrb[8].mxu1  ;;  %69 = vst.msk [vmem:[#allocation2 + $0x110] sm:$0xff] %vm33_vm2, %v21059_v59  ;;  %71 = vst.msk [vmem:[#allocation2 + $0x120] sm:$0xff] %vm33_vm2, %v21059_v59 }
 0x109   :  { %v17604_v13 = vpop.f32.mrb[9].mxu1  ;;  %14443 = vmatmul.mubr.msk.f32.gmra.mrb[28].mxu1 %vm215_vm1, %v12271_v34  ;;  %73 = vst.msk [vmem:[#allocation2 + $0x130] sm:$0xff] %vm33_vm2, %v21059_v59  ;;  %75 = vst.msk [vmem:[#allocation2 + $0x140] sm:$0xff] %vm33_vm2, %v21059_v59  ;;  %v17797_v34 = vld [vmem:[%s21004_s0 + $0x170] sm:$0xff] }
 0x10a   :  { %14567 = vmatmul.mubr.msk.f32.gmra.mrb[24].mxu0 %vm215_vm1, %v21230_v55  ;;  %14445 = vmatprep.mubr.msk.f32.mxu1 %vm215_vm1, %v12272_v62  ;;  %77 = vst.msk [vmem:[#allocation2 + $0x150] sm:$0xff] %vm33_vm2, %v21059_v59  ;;  %79 = vst.msk [vmem:[#allocation2 + $0x160] sm:$0xff] %vm33_vm2, %v21059_v59  ;;  %v17816_v62 = vld [vmem:[%s21004_s0 + $0x190] sm:$0xff] }
 0x10b   :  { %14569 = vmatprep.mubr.msk.f32.mxu0 %vm215_vm1, %v21231_v2  ;;  %81 = vst.msk [vmem:[#allocation2 + $0x170] sm:$0xff] %vm33_vm2, %v21059_v59  ;;  %83 = vst.msk [vmem:[#allocation2 + $0x180] sm:$0xff] %vm33_vm2, %v21059_v59  ;;  %v17827_v2 = vld [vmem:[%s21005_s1 + $0x10] sm:$0xf] }
 0x10c   :  { %85 = vst.msk [vmem:[#allocation2 + $0x190] sm:$0xff] %vm33_vm2, %v21059_v59  ;;  %87 = vst.msk [vmem:[#allocation2 + $0x1a0] sm:$0xff] %vm33_vm2, %v21059_v59 }
 0x10d   :  { %89 = vst.msk [vmem:[#allocation2 + $0x1b0] sm:$0xff] %vm33_vm2, %v21059_v59  ;;  %91 = vst.msk [vmem:[#allocation2 + $0x1c0] sm:$0xff] %vm33_vm2, %v21059_v59  ;;  %14446 = vmatmul.mubr.msk.f32.gmra.mrb[30].mxu1 %vm215_vm1, %v17613_v44 }
 0x10e   :  { %93 = vst.msk [vmem:[#allocation2 + $0x1d0] sm:$0xff] %vm33_vm2, %v21059_v59  ;;  %95 = vst.msk [vmem:[#allocation2 + $0x1e0] sm:$0xff] %vm33_vm2, %v21059_v59  ;;  %14570 = vmatmul.mubr.msk.f32.gmra.mrb[26].mxu0 %vm215_vm1, %v21232_v61  ;;  %14450 = vmatprep.mubr.msk.f32.mxu1 %vm215_vm1, %v17620_v3 }
 0x10f   :  { %97 = vst.msk [vmem:[#allocation2 + $0x1f0] sm:$0xff] %vm33_vm2, %v21059_v59  ;;  %99 = vst.msk [vmem:[#allocation2 + $0x200] sm:$0xff] %vm33_vm2, %v21059_v59  ;;  %14572 = vmatprep.mubr.msk.f32.mxu0 %vm215_vm1, %v21233_v27 }
 0x110   :  { %101 = vst.msk [vmem:[#allocation2 + $0x210] sm:$0xff] %vm33_vm2, %v21059_v59  ;;  %103 = vst.msk [vmem:[#allocation2 + $0x220] sm:$0xff] %vm33_vm2, %v21059_v59 }
 0x111   :  { %105 = vst.msk [vmem:[#allocation2 + $0x230] sm:$0xff] %vm33_vm2, %v21059_v59  ;;  %107 = vst.msk [vmem:[#allocation2 + $0x240] sm:$0xff] %vm33_vm2, %v21059_v59  ;;  %14451 = vmatmul.mubr.msk.f32.vlgmr.msra.gmra.mrb[16].mxu1 %vm215_vm1, %v17767_v22 }
 0x112   :  { %109 = vst.msk [vmem:[#allocation2 + $0x250] sm:$0xff] %vm33_vm2, %v21059_v59  ;;  %111 = vst.msk [vmem:[#allocation2 + $0x260] sm:$0xff] %vm33_vm2, %v21059_v59  ;;  %14573 = vmatmul.mubr.msk.f32.gmra.mrb[28].mxu0 %vm215_vm1, %v21234_v19  ;;  %14475 = vmatpush3.msk.msra.mxu1 %vm264_vm0, %v17502_v48  ;;  %v21236_v48 = vld [vmem:[#allocation21_spill] sm:$0xff] }
 0x113   :  { %113 = vst.msk [vmem:[#allocation2 + $0x270] sm:$0xff] %vm33_vm2, %v21059_v59  ;;  %115 = vst.msk [vmem:[#allocation2 + $0x280] sm:$0xff] %vm33_vm2, %v21059_v59  ;;  %14453 = vmatprep.mubr.msk.f32.mxu1 %vm215_vm1, %v17774_v12  ;;  %14575 = vmatprep.mubr.msk.f32.mxu0 %vm215_vm1, %v21235_v39  ;;  %v17984_v39 = vld [vmem:[%s21004_s0 + $0x71] sm:$0xff] }
 0x114   :  { %117 = vst.msk [vmem:[#allocation2 + $0x290] sm:$0xff] %vm33_vm2, %v21059_v59  ;;  %119 = vst.msk [vmem:[#allocation2 + $0x2a0] sm:$0xff] %vm33_vm2, %v21059_v59  ;;  %14500 = vmatprep.subr.msk.mxu1 %vm264_vm0, %v12376_v15 }
 0x115   :  { %121 = vst.msk [vmem:[#allocation2 + $0x2b0] sm:$0xff] %vm33_vm2, %v21059_v59  ;;  %125 = vst.msk [vmem:[#allocation2 + $0x2d0] sm:$0xff] %vm33_vm2, %v21059_v59  ;;  %14454 = vmatmul.mubr.msk.f32.gmra.mrb[18].mxu1 %vm215_vm1, %v17788_v35 }
 0x116   :  { %127 = vst.msk [vmem:[#allocation2 + $0x2e0] sm:$0xff] %vm33_vm2, %v21059_v59  ;;  %129 = vst.msk [vmem:[#allocation2 + $0x2f0] sm:$0xff] %vm33_vm2, %v21059_v59  ;;  %14576 = vmatmul.mubr.msk.f32.gmra.mrb[30].mxu0 %vm215_vm1, %v21236_v48  ;;  %14456 = vmatprep.mubr.msk.f32.mxu1 %vm215_vm1, %v17797_v34  ;;  %v12580_v48 = vld [vmem:[%s21005_s1 + $0x14] sm:$0xf] }
 0x117   :  { %131 = vst.msk [vmem:[#allocation2 + $0x300] sm:$0xff] %vm33_vm2, %v21059_v59  ;;  %133 = vst.msk [vmem:[#allocation2 + $0x310] sm:$0xff] %vm33_vm2, %v21059_v59  ;;  %14580 = vmatprep.mubr.msk.f32.mxu0 %vm215_vm1, %v21211_v17  ;;  %v17838_v17 = vld [vmem:[%s21004_s0 + $0x1c0] sm:$0xff] }
 0x118   :  { %135 = vst.msk [vmem:[#allocation2 + $0x320] sm:$0xff] %vm33_vm2, %v21059_v59  ;;  %137 = vst.msk [vmem:[#allocation2 + $0x330] sm:$0xff] %vm33_vm2, %v21059_v59  ;;  %v17818_v55 = vpop.f32.mrb[10].mxu1 }
 0x119   :  { %139 = vst.msk [vmem:[#allocation2 + $0x340] sm:$0xff] %vm33_vm2, %v21059_v59  ;;  %143 = vst.msk [vmem:[#allocation2 + $0x360] sm:$0xff] %vm33_vm2, %v21059_v59  ;;  %v17820_v44 = vpop.f32.mrb[11].mxu1  ;;  %14457 = vmatmul.mubr.msk.f32.gmra.mrb[20].mxu1 %vm215_vm1, %v17809_v56 }
 0x11a   :  { %147 = vst.msk [vmem:[#allocation2 + $0x380] sm:$0xff] %vm33_vm2, %v21059_v59  ;;  %149 = vst.msk [vmem:[#allocation2 + $0x390] sm:$0xff] %vm33_vm2, %v21059_v59  ;;  %14581 = vmatmul.mubr.msk.f32.vlgmr.msra.gmra.mrb[16].mxu0 %vm215_vm1, %v16964_v46  ;;  %14459 = vmatprep.mubr.msk.f32.mxu1 %vm215_vm1, %v17816_v62 }
 0x11b   :  { %151 = vst.msk [vmem:[#allocation2 + $0x3a0] sm:$0xff] %vm33_vm2, %v21059_v59  ;;  %153 = vst.msk [vmem:[#allocation2 + $0x3b0] sm:$0xff] %vm33_vm2, %v21059_v59  ;;  %14583 = vmatprep.mubr.msk.f32.mxu0 %vm215_vm1, %v21212_v23  ;;  %14605 = vmatpush3.msk.msra.mxu0 %vm264_vm0, %v17538_v36  ;;  %v17857_v23 = vld [vmem:[%s21004_s0 + $0x1d0] sm:$0xff]  ;;  %v17864_v36 = vld [vmem:[%s21004_s0 + $0x1e0] sm:$0xff] }
 0x11c   :  { %155 = vst.msk [vmem:[#allocation2 + $0x3c0] sm:$0xff] %vm33_vm2, %v21059_v59  ;;  %157 = vst.msk [vmem:[#allocation2 + $0x3d0] sm:$0xff] %vm33_vm2, %v21059_v59  ;;  %v17842_v61 = vpop.f32.mrb[12].mxu1  ;;  %14630 = vmatprep.subr.msk.mxu0 %vm264_vm0, %v17827_v2 }
 0x11d   :  { %161 = vst.msk [vmem:[#allocation2 + $0x3f0] sm:$0xff] %vm33_vm2, %v21059_v59  ;;  %163 = vst.msk [vmem:[#allocation2 + $0x400] sm:$0xff] %vm33_vm2, %v21059_v59  ;;  %v17846_v46 = vpop.f32.mrb[13].mxu1  ;;  %14460 = vmatmul.mubr.msk.f32.gmra.mrb[22].mxu1 %vm215_vm1, %v17281_v14 }
 0x11e   :  { %165 = vst.msk [vmem:[#allocation2 + $0x410] sm:$0xff] %vm33_vm2, %v21059_v59  ;;  %167 = vst.msk [vmem:[#allocation2 + $0x420] sm:$0xff] %vm33_vm2, %v21059_v59  ;;  %14584 = vmatmul.mubr.msk.f32.gmra.mrb[18].mxu0 %vm215_vm1, %v16985_v32  ;;  %14462 = vmatprep.mubr.msk.f32.mxu1 %vm215_vm1, %v17838_v17  ;;  %v17879_v32 = vld [vmem:[%s21004_s0 + $0x1f0] sm:$0xff] }
 0x11f   :  { %169 = vst.msk [vmem:[#allocation2 + $0x430] sm:$0xff] %vm33_vm2, %v21059_v59  ;;  %171 = vst.msk [vmem:[#allocation2 + $0x440] sm:$0xff] %vm33_vm2, %v21059_v59  ;;  %14586 = vmatprep.mubr.msk.f32.mxu0 %vm215_vm1, %v21213_v31  ;;  %v17886_v31 = vld [vmem:[%s21004_s0 + $0x200] sm:$0xff] }
 0x120   :  { %173 = vst.msk [vmem:[#allocation2 + $0x450] sm:$0xff] %vm33_vm2, %v21059_v59  ;;  %175 = vst.msk [vmem:[#allocation2 + $0x460] sm:$0xff] %vm33_vm2, %v21059_v59  ;;  %v17866_v27 = vpop.f32.mrb[14].mxu1  ;;  %v18004_v59 = vld [vmem:[%s21004_s0 + $0xa1] sm:$0xff] }
 0x121   :  { %21237 = vst [vmem:[#allocation22_spill] sm:$0xff] %v17820_v44  ;;  %21238 = vst [vmem:[#allocation23_spill] sm:$0xff] %v17842_v61  ;;  %v17868_v19 = vpop.f32.mrb[15].mxu1  ;;  %14463 = vmatmul.mubr.msk.f32.gmra.mrb[24].mxu1 %vm215_vm1, %v17857_v23  ;;  %v18071_v61 = vld [vmem:[%s21004_s0 + $0x101] sm:$0xff] }
 0x122   :  { %21239 = vst [vmem:[#allocation24_spill] sm:$0xff] %v17846_v46  ;;  %21240 = vst [vmem:[#allocation25_spill] sm:$0xff] %v17866_v27  ;;  %14587 = vmatmul.mubr.msk.f32.gmra.mrb[20].mxu0 %vm215_vm1, %v21214_v33  ;;  %14465 = vmatprep.mubr.msk.f32.mxu1 %vm215_vm1, %v17864_v36  ;;  %v17897_v33 = vld [vmem:[%s21004_s0 + $0x210] sm:$0xff]  ;;  %v18048_v27 = vld [vmem:[%s21004_s0 + $0xe1] sm:$0xff] }
 0x123   :  { %21241 = vst [vmem:[#allocation26_spill] sm:$0xff] %v17868_v19  ;;  %14589 = vmatprep.mubr.msk.f32.mxu0 %vm215_vm1, %v21215_v37  ;;  %v17904_v37 = vld [vmem:[%s21004_s0 + $0x220] sm:$0xff] }
 0x124   :  { %v18029_v19 = vld [vmem:[%s21004_s0 + $0xc1] sm:$0xff] }
 0x125   :  { %14466 = vmatmul.mubr.msk.f32.gmra.mrb[26].mxu1 %vm215_vm1, %v17879_v32  ;;  %v12504_v46 = vld [vmem:[%s21004_s0 + $0xa0] sm:$0xff] }
 0x126   :  { %14590 = vmatmul.mubr.msk.f32.gmra.mrb[22].mxu0 %vm215_vm1, %v21216_v43  ;;  %14468 = vmatprep.mubr.msk.f32.mxu1 %vm215_vm1, %v17886_v31  ;;  %v17917_v43 = vld [vmem:[%s21004_s0 + $0x11] sm:$0xff]  ;;  %v12508_v44 = vld [vmem:[%s21004_s0 + $0xe0] sm:$0xff] }
 0x127   :  { %14592 = vmatprep.mubr.msk.f32.mxu0 %vm215_vm1, %v21217_v50  ;;  %v17928_v50 = vld [vmem:[%s21004_s0 + $0x21] sm:$0xff] }
 0x129   :  { %14469 = vmatmul.mubr.msk.f32.gmra.mrb[28].mxu1 %vm215_vm1, %v17897_v33 }
 0x12a   :  { %14593 = vmatmul.mubr.msk.f32.gmra.mrb[24].mxu0 %vm215_vm1, %v21218_v54  ;;  %14471 = vmatprep.mubr.msk.f32.mxu1 %vm215_vm1, %v17904_v37  ;;  %v17935_v54 = vld [vmem:[%s21004_s0 + $0x31] sm:$0xff] }
 0x12b   :  { %14595 = vmatprep.mubr.msk.f32.mxu0 %vm215_vm1, %v21219_v58  ;;  %v17950_v58 = vld [vmem:[%s21004_s0 + $0x41] sm:$0xff] }
 0x12d   :  { %14472 = vmatmul.mubr.msk.f32.gmra.mrb[30].mxu1 %vm215_vm1, %v17342_v24 }
 0x12e   :  { %14596 = vmatmul.mubr.msk.f32.gmra.mrb[26].mxu0 %vm215_vm1, %v17060_v30  ;;  %14476 = vmatprep.mubr.msk.f32.mxu1 %vm215_vm1, %v17917_v43  ;;  %v17942_v30 = vld [vmem:[%s21005_s1 + $0x4] sm:$0xf] }
 0x12f   :  { %14598 = vmatprep.mubr.msk.f32.mxu0 %vm215_vm1, %v21220_v60  ;;  %v17959_v60 = vld [vmem:[%s21004_s0 + $0x51] sm:$0xff] }
 0x131   :  { %14477 = vmatmul.mubr.msk.f32.vlgmr.msra.gmra.mrb[16].mxu1 %vm215_vm1, %v17928_v50 }
 0x132   :  { %14599 = vmatmul.mubr.msk.f32.gmra.mrb[28].mxu0 %vm215_vm1, %v17078_v1  ;;  %14501 = vmatpush3.msk.msra.mxu1 %vm264_vm0, %v12376_v15  ;;  %v12496_v1 = vld [vmem:[%s21004_s0 + $0x10] sm:$0xff]  ;;  %v12497_v15 = vld [vmem:[%s21004_s0 + $0x20] sm:$0xff] }
 0x133   :  { %14479 = vmatprep.mubr.msk.f32.mxu1 %vm215_vm1, %v17935_v54  ;;  %14601 = vmatprep.mubr.msk.f32.mxu0 %vm215_vm1, %v17083_v28  ;;  %v17975_v28 = vld [vmem:[%s21004_s0 + $0x61] sm:$0xff] }
 0x134   :  { %14760 = vmatprep.subr.msk.mxu1 %vm264_vm0, %v17942_v30 }
 0x135   :  { %14480 = vmatmul.mubr.msk.f32.gmra.mrb[18].mxu1 %vm215_vm1, %v17950_v58 }
 0x136   :  { %14602 = vmatmul.mubr.msk.f32.gmra.mrb[30].mxu0 %vm215_vm1, %v17100_v21  ;;  %14482 = vmatprep.mubr.msk.f32.mxu1 %vm215_vm1, %v17959_v60  ;;  %v12498_v21 = vld [vmem:[%s21004_s0 + $0x30] sm:$0xff] }
 0x137   :  { %14606 = vmatprep.mubr.msk.f32.mxu0 %vm215_vm1, %v12496_v1  ;;  %v12499_v1 = vld [vmem:[%s21004_s0 + $0x40] sm:$0xff] }
 0x139   :  { %14483 = vmatmul.mubr.msk.f32.gmra.mrb[20].mxu1 %vm215_vm1, %v17975_v28 }
 0x13a   :  { %14607 = vmatmul.mubr.msk.f32.vlgmr.msra.gmra.mrb[16].mxu0 %vm215_vm1, %v12497_v15  ;;  %14485 = vmatprep.mubr.msk.f32.mxu1 %vm215_vm1, %v17984_v39  ;;  %v12500_v15 = vld [vmem:[%s21004_s0 + $0x50] sm:$0xff] }
 0x13b   :  { %14609 = vmatprep.mubr.msk.f32.mxu0 %vm215_vm1, %v12498_v21  ;;  %14631 = vmatpush3.msk.msra.mxu0 %vm264_vm0, %v17827_v2  ;;  %v18020_v21 = vld [vmem:[%s21004_s0 + $0xb1] sm:$0xff]  ;;  %v12501_v2 = vld [vmem:[%s21004_s0 + $0x60] sm:$0xff] }
 0x13c   :  { %14656 = vmatprep.subr.msk.mxu0 %vm264_vm0, %v12580_v48 }
 0x13d   :  { %14486 = vmatmul.mubr.msk.f32.gmra.mrb[22].mxu1 %vm215_vm1, %v17385_v6 }
 0x13e   :  { %14610 = vmatmul.mubr.msk.f32.gmra.mrb[18].mxu0 %vm215_vm1, %v12499_v1  ;;  %14488 = vmatprep.mubr.msk.f32.mxu1 %vm215_vm1, %v18004_v59  ;;  %v12502_v1 = vld [vmem:[%s21004_s0 + $0x70] sm:$0xff] }
 0x13f   :  { %14612 = vmatprep.mubr.msk.f32.mxu0 %vm215_vm1, %v12500_v15  ;;  %v18042_v15 = vld [vmem:[%s21004_s0 + $0xd1] sm:$0xff] }
 0x141   :  { %14489 = vmatmul.mubr.msk.f32.gmra.mrb[24].mxu1 %vm215_vm1, %v18020_v21 }
 0x142   :  { %14613 = vmatmul.mubr.msk.f32.gmra.mrb[20].mxu0 %vm215_vm1, %v12501_v2  ;;  %14491 = vmatprep.mubr.msk.f32.mxu1 %vm215_vm1, %v18029_v19  ;;  %v18062_v2 = vld [vmem:[%s21004_s0 + $0xf1] sm:$0xff] }
 0x143   :  { %14615 = vmatprep.mubr.msk.f32.mxu0 %vm215_vm1, %v12502_v1  ;;  %v12505_v1 = vld [vmem:[%s21004_s0 + $0xb0] sm:$0xff] }
 0x145   :  { %14492 = vmatmul.mubr.msk.f32.gmra.mrb[26].mxu1 %vm215_vm1, %v18042_v15 }
 0x146   :  { %14616 = vmatmul.mubr.msk.f32.gmra.mrb[22].mxu0 %vm215_vm1, %v17143_v26  ;;  %14494 = vmatprep.mubr.msk.f32.mxu1 %vm215_vm1, %v18048_v27  ;;  %v12506_v26 = vld [vmem:[%s21004_s0 + $0xc0] sm:$0xff] }
 0x147   :  { %14618 = vmatprep.mubr.msk.f32.mxu0 %vm215_vm1, %v12504_v46  ;;  %v12507_v46 = vld [vmem:[%s21004_s0 + $0xd0] sm:$0xff] }
 0x149   :  { %14495 = vmatmul.mubr.msk.f32.gmra.mrb[28].mxu1 %vm215_vm1, %v18062_v2 }
 0x14a   :  { %14619 = vmatmul.mubr.msk.f32.gmra.mrb[24].mxu0 %vm215_vm1, %v12505_v1  ;;  %14497 = vmatprep.mubr.msk.f32.mxu1 %vm215_vm1, %v18071_v61  ;;  %v12509_v1 = vld [vmem:[%s21004_s0 + $0xf0] sm:$0xff] }
 0x14b   :  { %14621 = vmatprep.mubr.msk.f32.mxu0 %vm215_vm1, %v12506_v26  ;;  %v12510_v26 = vld [vmem:[%s21004_s0 + $0x100] sm:$0xff] }
 0x14d   :  { %14498 = vmatmul.mubr.msk.f32.gmra.mrb[30].mxu1 %vm215_vm1, %v17426_v29  ;;  %v6709_v29 = vld [vmem:[%s21005_s1] sm:$0xf] }
 0x14e   :  { %14622 = vmatmul.mubr.msk.f32.gmra.mrb[26].mxu0 %vm215_vm1, %v12507_v46  ;;  %14502 = vmatprep.mubr.msk.f32.mxu1 %vm215_vm1, %v17172_v40  ;;  %v12614_v40 = vld [vmem:[%s21005_s1 + $0x18] sm:$0xf] }
 0x14f   :  { %14624 = vmatprep.mubr.msk.f32.mxu0 %vm215_vm1, %v12508_v44  ;;  %v18340_v44 = vld [vmem:[%s21004_s0 + $0x370] sm:$0xff] }
 0x151   :  { %14503 = vmatmul.mubr.msk.f32.vlgmr.msra.gmra.mrb[16].mxu1 %vm215_vm1, %v17179_v42  ;;  %v12367_v42 = vld [vmem:[%s21004_s0 + $0x1a1] sm:$0xff] }
 0x152   :  { %14625 = vmatmul.mubr.msk.f32.gmra.mrb[28].mxu0 %vm215_vm1, %v12509_v1  ;;  %14761 = vmatpush3.msk.msra.mxu1 %vm264_vm0, %v17942_v30 }
 0x153   :  { %14505 = vmatprep.mubr.msk.f32.mxu1 %vm215_vm1, %v17192_v47  ;;  %14627 = vmatprep.mubr.msk.f32.mxu0 %vm215_vm1, %v12510_v26  ;;  %v12375_v47 = vld [vmem:[%s21004_s0 + $0x231] sm:$0xff]  ;;  %v18451_v26 = vld [vmem:[%s21005_s1 + $0x20] sm:$0xf] }
 0x154   :  { %14786 = vmatprep.subr.msk.mxu1 %vm264_vm0, %v6709_v29 }
 0x155   :  { %14506 = vmatmul.mubr.msk.f32.gmra.mrb[18].mxu1 %vm215_vm1, %v17206_v51  ;;  %v18180_v51 = vld [vmem:[%s21004_s0 + $0x251] sm:$0xff] }
 0x156   :  { %14628 = vmatmul.mubr.msk.f32.gmra.mrb[30].mxu0 %vm215_vm1, %v17201_v49  ;;  %14508 = vmatprep.mubr.msk.f32.mxu1 %vm215_vm1, %v17218_v53  ;;  %v12717_v49 = vld [vmem:[%s21004_s0 + $0x241] sm:$0xff] }
 0x157   :  { %14632 = vmatprep.mubr.msk.f32.mxu0 %vm215_vm1, %v17620_v3  ;;  %v18187_v53 = vld [vmem:[%s21004_s0 + $0x261] sm:$0xff]  ;;  %v18290_v3 = vld [vmem:[%s21004_s0 + $0x311] sm:$0xff] }
 0x159   :  { %14509 = vmatmul.mubr.msk.f32.gmra.mrb[20].mxu1 %vm215_vm1, %v17225_v57  ;;  %v18194_v57 = vld [vmem:[%s21005_s1 + $0x8] sm:$0xf] }
 0x15a   :  { %14633 = vmatmul.mubr.msk.f32.vlgmr.msra.gmra.mrb[16].mxu0 %vm215_vm1, %v17767_v22  ;;  %14511 = vmatprep.mubr.msk.f32.mxu1 %vm215_vm1, %v17239_v4  ;;  %v18202_v4 = vld [vmem:[%s21004_s0 + $0x271] sm:$0xff]  ;;  %v18301_v22 = vld [vmem:[%s21004_s0 + $0x321] sm:$0xff] }
 0x15b   :  { %14635 = vmatprep.mubr.msk.f32.mxu0 %vm215_vm1, %v17774_v12  ;;  %14657 = vmatpush3.msk.msra.mxu0 %vm264_vm0, %v12580_v48  ;;  %v18308_v12 = vld [vmem:[%s21004_s0 + $0x331] sm:$0xff] }
 0x15c   :  { %14682 = vmatprep.subr.msk.mxu0 %vm264_vm0, %v12614_v40 }
 0x15d   :  { %14512 = vmatmul.mubr.msk.f32.gmra.mrb[22].mxu1 %vm215_vm1, %v12367_v42 }
 0x15e   :  { %14636 = vmatmul.mubr.msk.f32.gmra.mrb[18].mxu0 %vm215_vm1, %v17788_v35  ;;  %14514 = vmatprep.mubr.msk.f32.mxu1 %vm215_vm1, %v17256_v7  ;;  %v18211_v7 = vld [vmem:[%s21004_s0 + $0x281] sm:$0xff] }
 0x15f   :  { %14638 = vmatprep.mubr.msk.f32.mxu0 %vm215_vm1, %v17797_v34  ;;  %v18329_v34 = vld [vmem:[%s21006_s2] ss:$0 sm:$0xff] }
 0x161   :  { %14515 = vmatmul.mubr.msk.f32.gmra.mrb[24].mxu1 %vm215_vm1, %v17263_v9  ;;  %v18224_v9 = vld [vmem:[%s21004_s0 + $0x291] sm:$0xff] }
 0x162   :  { %14639 = vmatmul.mubr.msk.f32.gmra.mrb[20].mxu0 %vm215_vm1, %v17809_v56  ;;  %14517 = vmatprep.mubr.msk.f32.mxu1 %vm215_vm1, %v17274_v11  ;;  %v18231_v11 = vld [vmem:[%s21004_s0 + $0x2a1] sm:$0xff] }
 0x163   :  { %14641 = vmatprep.mubr.msk.f32.mxu0 %vm215_vm1, %v17816_v62 }
 0x165   :  { %14518 = vmatmul.mubr.msk.f32.gmra.mrb[26].mxu1 %vm215_vm1, %v17286_v16  ;;  %v18247_v16 = vld [vmem:[%s21004_s0 + $0x2b1] sm:$0xff] }
 0x166   :  { %14642 = vmatmul.mubr.msk.f32.gmra.mrb[22].mxu0 %vm215_vm1, %v17281_v14  ;;  %14520 = vmatprep.mubr.msk.f32.mxu1 %vm215_vm1, %v17297_v18  ;;  %v18238_v14 = vld [vmem:[%s21005_s1 + $0x1c] sm:$0xf]  ;;  %v12725_v18 = vld [vmem:[%s21004_s0 + $0x2d1] sm:$0xff] }
 0x167   :  { %14644 = vmatprep.mubr.msk.f32.mxu0 %vm215_vm1, %v17838_v17 }
 0x169   :  { %14521 = vmatmul.mubr.msk.f32.gmra.mrb[28].mxu1 %vm215_vm1, %v17304_v63  ;;  %v18265_v63 = vld [vmem:[%s21004_s0 + $0x2e1] sm:$0xff] }
 0x16a   :  { %14645 = vmatmul.mubr.msk.f32.gmra.mrb[24].mxu0 %vm215_vm1, %v17857_v23  ;;  %14523 = vmatprep.mubr.msk.f32.mxu1 %vm215_vm1, %v17315_v5  ;;  %v18272_v5 = vld [vmem:[%s21004_s0 + $0x2f1] sm:$0xff] }
 0x16b   :  { %14647 = vmatprep.mubr.msk.f32.mxu0 %vm215_vm1, %v17864_v36 }
 0x16d   :  { %14524 = vmatmul.mubr.msk.f32.gmra.mrb[30].mxu1 %vm215_vm1, %v12375_v47  ;;  %v18461_v47 = vld [vmem:[%s21004_s0 + $0x3d0] sm:$0xff] }
 0x16e   :  { %14648 = vmatmul.mubr.msk.f32.gmra.mrb[26].mxu0 %vm215_vm1, %v17879_v32  ;;  %14762 = vmatprep.mubr.msk.f32.mxu1 %vm215_vm1, %v12717_v49 }
 0x16f   :  { %14650 = vmatprep.mubr.msk.f32.mxu0 %vm215_vm1, %v17886_v31 }
 0x171   :  { %14763 = vmatmul.mubr.msk.f32.vlgmr.msra.gmra.mrb[32].mxu1 %vm215_vm1, %v18180_v51 }
 0x172   :  { %14651 = vmatmul.mubr.msk.f32.gmra.mrb[28].mxu0 %vm215_vm1, %v17897_v33  ;;  %14787 = vmatpush3.msk.msra.mxu1 %vm264_vm0, %v6709_v29  ;;  %v18372_v33 = vld [vmem:[%s21004_s0 + $0x390] sm:$0xff] }
 0x173   :  { %14653 = vmatprep.mubr.msk.f32.mxu0 %vm215_vm1, %v17904_v37  ;;  %14765 = vmatprep.mubr.msk.f32.mxu1 %vm215_vm1, %v18187_v53 }
 0x174   :  { %14812 = vmatprep.subr.msk.mxu1 %vm264_vm0, %v18194_v57 }
 0x175   :  { %14766 = vmatmul.mubr.msk.f32.gmra.mrb[34].mxu1 %vm215_vm1, %v18202_v4 }
 0x176   :  { %14654 = vmatmul.mubr.msk.f32.gmra.mrb[30].mxu0 %vm215_vm1, %v17342_v24  ;;  %14768 = vmatprep.mubr.msk.f32.mxu1 %vm215_vm1, %v18211_v7  ;;  %v18283_v24 = vld [vmem:[%s21004_s0 + $0x301] sm:$0xff] }
 0x177   :  { %14658 = vmatprep.mubr.msk.f32.mxu0 %vm215_vm1, %v17917_v43 }
 0x179   :  { %14769 = vmatmul.mubr.msk.f32.gmra.mrb[36].mxu1 %vm215_vm1, %v18224_v9 }
 0x17a   :  { %14659 = vmatmul.mubr.msk.f32.vlgmr.msra.gmra.mrb[16].mxu0 %vm215_vm1, %v17928_v50  ;;  %14771 = vmatprep.mubr.msk.f32.mxu1 %vm215_vm1, %v18231_v11  ;;  %v18388_v50 = vld [vmem:[%s21004_s0 + $0x3a0] sm:$0xff] }
 0x17b   :  { %14661 = vmatprep.mubr.msk.f32.mxu0 %vm215_vm1, %v17935_v54  ;;  %14683 = vmatpush3.msk.msra.mxu0 %vm264_vm0, %v12614_v40 }
 0x17c   :  { %14708 = vmatprep.subr.msk.mxu0 %vm264_vm0, %v18238_v14 }
 0x17d   :  { %14772 = vmatmul.mubr.msk.f32.gmra.mrb[38].mxu1 %vm215_vm1, %v18247_v16 }
 0x17e   :  { %14662 = vmatmul.mubr.msk.f32.gmra.mrb[18].mxu0 %vm215_vm1, %v17950_v58  ;;  %14774 = vmatprep.mubr.msk.f32.mxu1 %vm215_vm1, %v12725_v18  ;;  %v12709_v18 = vld [vmem:[%s21004_s0 + $0x3f0] sm:$0xff] }
 0x17f   :  { %14664 = vmatprep.mubr.msk.f32.mxu0 %vm215_vm1, %v17959_v60 }
 0x181   :  { %14775 = vmatmul.mubr.msk.f32.gmra.mrb[40].mxu1 %vm215_vm1, %v18265_v63 }
 0x182   :  { %14665 = vmatmul.mubr.msk.f32.gmra.mrb[20].mxu0 %vm215_vm1, %v17975_v28  ;;  %14777 = vmatprep.mubr.msk.f32.mxu1 %vm215_vm1, %v18272_v5 }
 0x183   :  { %14667 = vmatprep.mubr.msk.f32.mxu0 %vm215_vm1, %v17984_v39  ;;  %v18418_v39 = vld [vmem:[%s21004_s0 + $0x3b0] sm:$0xff] }
 0x185   :  { %14778 = vmatmul.mubr.msk.f32.gmra.mrb[42].mxu1 %vm215_vm1, %v18283_v24 }
 0x186   :  { %14668 = vmatmul.mubr.msk.f32.gmra.mrb[22].mxu0 %vm215_vm1, %v17385_v6  ;;  %14780 = vmatprep.mubr.msk.f32.mxu1 %vm215_vm1, %v18290_v3  ;;  %v18319_v6 = vld [vmem:[%s21004_s0 + $0x341] sm:$0xff] }
 0x187   :  { %14670 = vmatprep.mubr.msk.f32.mxu0 %vm215_vm1, %v18004_v59  ;;  %v12701_v59 = vld [vmem:[%s21004_s0 + $0x360] sm:$0xff] }
 0x189   :  { %14781 = vmatmul.mubr.msk.f32.gmra.mrb[44].mxu1 %vm215_vm1, %v18301_v22 }
 0x18a   :  { %14671 = vmatmul.mubr.msk.f32.gmra.mrb[24].mxu0 %vm215_vm1, %v18020_v21  ;;  %14783 = vmatprep.mubr.msk.f32.mxu1 %vm215_vm1, %v18308_v12 }
 0x18b   :  { %14673 = vmatprep.mubr.msk.f32.mxu0 %vm215_vm1, %v18029_v19 }
 0x18d   :  { %v14270_v35 = vpop.f32.mrb[0].mxu0  ;;  %14784 = vmatmul.mubr.msk.f32.gmra.mrb[46].mxu1 %vm215_vm1, %v18319_v6 }
 0x18e   :  { %v15592_v56 = vadd.f32 %v14270_v35, %v17530_v25  ;;  %v2128_v62 = vpop.f32.mrb[1].mxu0  ;;  %14674 = vmatmul.mubr.msk.f32.gmra.mrb[26].mxu0 %vm215_vm1, %v18042_v15  ;;  %14788 = vmatprep.mubr.msk.f32.mxu1 %vm215_vm1, %v12701_v59  ;;  %v18351_v25 = vld [vmem:[%s21004_s0 + $0x380] sm:$0xff] }
 0x18f   :  { %v15593_v17 = vadd.f32 %v2128_v62, %v17532_v38  ;;  %14676 = vmatprep.mubr.msk.f32.mxu0 %vm215_vm1, %v18048_v27  ;;  %v18361_v38 = vld [vmem:[%s21005_s1 + $0xc] sm:$0xf]  ;;  %v18429_v15 = vld [vmem:[%s21004_s0 + $0x3c0] sm:$0xff] }
 0x190   :  { %v18346_v23 = vadd.f32 %v15592_v56, %v18329_v34 }
 0x191   :  { %v18354_v36 = vadd.f32 %v15593_v17, %v18329_v34  ;;  %v14273_v19 = vpop.f32.mrb[2].mxu0  ;;  %14789 = vmatmul.mubr.msk.f32.vlgmr.msra.gmra.mrb[32].mxu1 %vm215_vm1, %v18340_v44 }
 0x192   :  { %v21076_v27 = vmax.f32 %v18346_v23, 0.0  ;;  %v15594_v32 = vadd.f32 %v14273_v19, %v17552_v20  ;;  %v2138_v31 = vpop.f32.mrb[3].mxu0  ;;  %14677 = vmatmul.mubr.msk.f32.gmra.mrb[28].mxu0 %vm215_vm1, %v18062_v2  ;;  %14813 = vmatpush3.msk.msra.mxu1 %vm264_vm0, %v18194_v57  ;;  %v18383_v20 = vld [vmem:[%s21004_s0 + $0x111] sm:$0xff]  ;;  %v18500_v19 = vld [vmem:[%s21004_s0 + $0x400] sm:$0xff] }
 0x193   :  { %v21075_v37 = vmax.f32 %v18354_v36, 0.0  ;;  %v15595_v43 = vadd.f32 %v2138_v31, %v17556_v45  ;;  %14679 = vmatprep.mubr.msk.f32.mxu0 %vm215_vm1, %v18071_v61  ;;  %14791 = vmatprep.mubr.msk.f32.mxu1 %vm215_vm1, %v18351_v25  ;;  %v12598_v61 = vld [vmem:[%s21004_s0 + $0x250] sm:$0xff] }
 0x194   :  { %2346 = vst.msk [vmem:[#allocation2 + $0x370] sm:$0xff] %vm33_vm2, %v21076_v27  ;;  %v18394_v45 = vadd.f32 %v15594_v32, %v18329_v34  ;;  %14838 = vmatprep.subr.msk.mxu1 %vm264_vm0, %v18361_v38  ;;  %v12802_v27 = vld [vmem:[%s21004_s0 + $0x130] sm:$0xff] }
 0x195   :  { %2345 = vst.msk [vmem:[#allocation2 + $0x360] sm:$0xff] %vm33_vm2, %v21075_v37  ;;  %v18405_v54 = vadd.f32 %v15595_v43, %v18329_v34  ;;  %v14276_v30 = vpop.f32.mrb[4].mxu0  ;;  %14792 = vmatmul.mubr.msk.f32.gmra.mrb[34].mxu1 %vm215_vm1, %v18372_v33  ;;  %v18511_v43 = vld [vmem:[%s21004_s0 + $0x410] sm:$0xff]  ;;  %v18864_v37 = vld [vmem:[%s21004_s0 + $0x461] sm:$0xff] }
 0x196   :  { %v21074_v58 = vmax.f32 %v18394_v45, 0.0  ;;  %v15596_v60 = vadd.f32 %v14276_v30, %v17570_v8  ;;  %v2148_v28 = vpop.f32.mrb[5].mxu0  ;;  %14680 = vmatmul.mubr.msk.f32.gmra.mrb[30].mxu0 %vm215_vm1, %v18383_v20  ;;  %14794 = vmatprep.mubr.msk.f32.mxu1 %vm215_vm1, %v18388_v50  ;;  %v12599_v8 = vld [vmem:[%s21004_s0 + $0x260] sm:$0xff] }
 0x197   :  { %v21073_v48 = vmax.f32 %v18405_v54, 0.0  ;;  %v15597_v21 = vadd.f32 %v2148_v28, %v17572_v10  ;;  %14684 = vmatprep.mubr.msk.f32.mxu0 %vm215_vm1, %v12598_v61  ;;  %v12600_v10 = vld [vmem:[%s21004_s0 + $0x270] sm:$0xff] }
 0x198   :  { %2348 = vst.msk [vmem:[#allocation2 + $0x390] sm:$0xff] %vm33_vm2, %v21074_v58  ;;  %v18435_v2 = vadd.f32 %v15596_v60, %v18329_v34  ;;  %v18853_v58 = vld [vmem:[%s21004_s0 + $0x451] sm:$0xff] }
 0x199   :  { %2347 = vst.msk [vmem:[#allocation2 + $0x380] sm:$0xff] %vm33_vm2, %v21073_v48  ;;  %v18444_v46 = vadd.f32 %v15597_v21, %v18329_v34  ;;  %v14279_v1 = vpop.f32.mrb[6].mxu0  ;;  %14795 = vmatmul.mubr.msk.f32.gmra.mrb[36].mxu1 %vm215_vm1, %v18418_v39  ;;  %v18846_v48 = vld [vmem:[%s21004_s0 + $0x441] sm:$0xff] }
 0x19a   :  { %v21072_v29 = vmax.f32 %v18435_v2, 0.0  ;;  %v15598_v40 = vadd.f32 %v14279_v1, %v17586_v52  ;;  %v2158_v42 = vpop.f32.mrb[7].mxu0  ;;  %14685 = vmatmul.mubr.msk.f32.vlgmr.msra.gmra.mrb[16].mxu0 %vm215_vm1, %v12599_v8  ;;  %14797 = vmatprep.mubr.msk.f32.mxu1 %vm215_vm1, %v18429_v15  ;;  %v12601_v52 = vld [vmem:[%s21004_s0 + $0x280] sm:$0xff]  ;;  %v21242_v1 = vmov 0.0  }
 0x19b   :  { %v21071_v49 = vmax.f32 %v18444_v46, 0.0  ;;  %v15599_v57 = vadd.f32 %v2158_v42, %v17588_v41  ;;  %14687 = vmatprep.mubr.msk.f32.mxu0 %vm215_vm1, %v12600_v10  ;;  %14709 = vmatpush3.msk.msra.mxu0 %vm264_vm0, %v18238_v14  ;;  %v12602_v41 = vld [vmem:[%s21004_s0 + $0x290] sm:$0xff]  ;;  %v18538_v10 = vld [vmem:[%s21004_s0 + $0x420] sm:$0xff]  ;;  %110 = vst.msk [vmem:[#allocation2 + $0x258] sm:$0x1] %vm35_vm3, %v21242_v1 }
 0x19c   :  { %2350 = vst.msk [vmem:[#allocation2 + $0x3b0] sm:$0xff] %vm33_vm2, %v21072_v29  ;;  %v18478_v59 = vadd.f32 %v15598_v40, %v18329_v34  ;;  %14734 = vmatprep.subr.msk.mxu0 %vm264_vm0, %v18451_v26  ;;  %v21243_v40 = vld [vmem:[#allocation22_spill] sm:$0xff]  ;;  %v18835_v29 = vld [vmem:[%s21004_s0 + $0x431] sm:$0xff] }
 0x19d   :  { %2349 = vst.msk [vmem:[#allocation2 + $0x3a0] sm:$0xff] %vm33_vm2, %v21071_v49  ;;  %v18489_v14 = vadd.f32 %v15599_v57, %v18329_v34  ;;  %v14282_v35 = vpop.f32.mrb[8].mxu0  ;;  %14798 = vmatmul.mubr.msk.f32.gmra.mrb[38].mxu1 %vm215_vm1, %v18461_v47  ;;  %v12605_v57 = vld [vmem:[%s21004_s0 + $0x2c0] sm:$0xff] }
 0x19e   :  { %v21070_v56 = vmax.f32 %v18478_v59, 0.0  ;;  %v15600_v62 = vadd.f32 %v14282_v35, %v17602_v0  ;;  %v2168_v17 = vpop.f32.mrb[9].mxu0  ;;  %14688 = vmatmul.mubr.msk.f32.gmra.mrb[18].mxu0 %vm215_vm1, %v12601_v52  ;;  %14800 = vmatprep.mubr.msk.f32.mxu1 %vm215_vm1, %v12709_v18  ;;  %v12603_v0 = vld [vmem:[%s21004_s0 + $0x2a0] sm:$0xff]  ;;  %36 = vst.msk [vmem:[#allocation2 + $0x8] sm:$0x1] %vm35_vm3, %v21242_v1  ;;  %v18617_v52 = vld [vmem:[%s21004_s0 + $0x430] sm:$0xff] }
 0x19f   :  { %v21065_v32 = vmax.f32 %v18489_v14, 0.0  ;;  %v15601_v31 = vadd.f32 %v2168_v17, %v17604_v13  ;;  %14690 = vmatprep.mubr.msk.f32.mxu0 %vm215_vm1, %v12602_v41  ;;  %v12604_v13 = vld [vmem:[%s21004_s0 + $0x2b0] sm:$0xff]  ;;  %38 = vst.msk [vmem:[#allocation2 + $0x18] sm:$0x1] %vm35_vm3, %v21242_v1  ;;  %40 = vst.msk [vmem:[#allocation2 + $0x28] sm:$0x1] %vm35_vm3, %v21242_v1 }
 0x1a0   :  { %2352 = vst.msk [vmem:[#allocation2 + $0x3d0] sm:$0xff] %vm33_vm2, %v21070_v56  ;;  %v18517_v61 = vadd.f32 %v15600_v62, %v18329_v34  ;;  %v12606_v41 = vld [vmem:[%s21004_s0 + $0x2e0] sm:$0xff] }
 0x1a1   :  { %2351 = vst.msk [vmem:[#allocation2 + $0x3c0] sm:$0xff] %vm33_vm2, %v21065_v32  ;;  %v18526_v30 = vadd.f32 %v15601_v31, %v18329_v34  ;;  %v14285_v60 = vpop.f32.mrb[10].mxu0  ;;  %14801 = vmatmul.mubr.msk.f32.gmra.mrb[40].mxu1 %vm215_vm1, %v18500_v19  ;;  %v21244_v31 = vld [vmem:[#allocation23_spill] sm:$0xff]  ;;  %v18805_v56 = vld [vmem:[%s21004_s0 + $0x401] sm:$0xff] }
 0x1a2   :  { %v21064_v28 = vmax.f32 %v18517_v61, 0.0  ;;  %v15602_v21 = vadd.f32 %v14285_v60, %v17818_v55  ;;  %v2178_v8 = vpop.f32.mrb[11].mxu0  ;;  %14691 = vmatmul.mubr.msk.f32.gmra.mrb[20].mxu0 %vm215_vm1, %v12603_v0  ;;  %14803 = vmatprep.mubr.msk.f32.mxu1 %vm215_vm1, %v18511_v43  ;;  %42 = vst.msk [vmem:[#allocation2 + $0x38] sm:$0x1] %vm35_vm3, %v21242_v1  ;;  %44 = vst.msk [vmem:[#allocation2 + $0x48] sm:$0x1] %vm35_vm3, %v21242_v1 }
 0x1a3   :  { %46 = vst.msk [vmem:[#allocation2 + $0x58] sm:$0x1] %vm35_vm3, %v21242_v1  ;;  %48 = vst.msk [vmem:[#allocation2 + $0x68] sm:$0x1] %vm35_vm3, %v21242_v1  ;;  %v21062_v55 = vmax.f32 %v18526_v30, 0.0  ;;  %v15603_v42 = vadd.f32 %v2178_v8, %v21243_v40  ;;  %14693 = vmatprep.mubr.msk.f32.mxu0 %vm215_vm1, %v12604_v13  ;;  %v18644_v60 = vld [vmem:[%s21004_s0 + $0x440] sm:$0xff] }
 0x1a4   :  { %50 = vst.msk [vmem:[#allocation2 + $0x78] sm:$0x1] %vm35_vm3, %v21242_v1  ;;  %52 = vst.msk [vmem:[#allocation2 + $0x88] sm:$0x1] %vm35_vm3, %v21242_v1  ;;  %v18623_v18 = vadd.f32 %v15602_v21, %v18329_v34  ;;  %v21245_v8 = vld [vmem:[#allocation24_spill] sm:$0xff]  ;;  %v18830_v49 = vld [vmem:[%s21004_s0 + $0x3e0] sm:$0xff] }
 0x1a5   :  { %54 = vst.msk [vmem:[#allocation2 + $0x98] sm:$0x1] %vm35_vm3, %v21242_v1  ;;  %56 = vst.msk [vmem:[#allocation2 + $0xa8] sm:$0x1] %vm35_vm3, %v21242_v1  ;;  %v18632_v35 = vadd.f32 %v15603_v42, %v18329_v34  ;;  %v14288_v62 = vpop.f32.mrb[12].mxu0  ;;  %14804 = vmatmul.mubr.msk.f32.gmra.mrb[42].mxu1 %vm215_vm1, %v18538_v10  ;;  %v12607_v42 = vld [vmem:[%s21004_s0 + $0x2f0] sm:$0xff] }
 0x1a6   :  { %58 = vst.msk [vmem:[#allocation2 + $0xb8] sm:$0x1] %vm35_vm3, %v21242_v1  ;;  %60 = vst.msk [vmem:[#allocation2 + $0xc8] sm:$0x1] %vm35_vm3, %v21242_v1  ;;  %v21061_v17 = vmax.f32 %v18623_v18, 0.0  ;;  %v15604_v0 = vadd.f32 %v14288_v62, %v21244_v31  ;;  %v2188_v13 = vpop.f32.mrb[13].mxu0  ;;  %14694 = vmatmul.mubr.msk.f32.gmra.mrb[22].mxu0 %vm215_vm1, %v12605_v57  ;;  %14806 = vmatprep.mubr.msk.f32.mxu1 %vm215_vm1, %v18617_v52 }
 0x1a7   :  { %62 = vst.msk [vmem:[#allocation2 + $0xd8] sm:$0x1] %vm35_vm3, %v21242_v1  ;;  %64 = vst.msk [vmem:[#allocation2 + $0xe8] sm:$0x1] %vm35_vm3, %v21242_v1  ;;  %v21063_v21 = vmax.f32 %v18632_v35, 0.0  ;;  %v15605_v40 = vadd.f32 %v2188_v13, %v21245_v8  ;;  %14696 = vmatprep.mubr.msk.f32.mxu0 %vm215_vm1, %v12606_v41  ;;  %v18655_v57 = vld [vmem:[%s21004_s0 + $0x450] sm:$0xff] }
 0x1a8   :  { %66 = vst.msk [vmem:[#allocation2 + $0xf8] sm:$0x1] %vm35_vm3, %v21242_v1  ;;  %68 = vst.msk [vmem:[#allocation2 + $0x108] sm:$0x1] %vm35_vm3, %v21242_v1  ;;  %v18661_v62 = vadd.f32 %v15604_v0, %v18329_v34  ;;  %v12608_v41 = vld [vmem:[%s21004_s0 + $0x300] sm:$0xff] }
 0x1a9   :  { %70 = vst.msk [vmem:[#allocation2 + $0x118] sm:$0x1] %vm35_vm3, %v21242_v1  ;;  %108 = vst.msk [vmem:[#allocation2 + $0x248] sm:$0x1] %vm35_vm3, %v21242_v1  ;;  %v18670_v31 = vadd.f32 %v15605_v40, %v18329_v34  ;;  %v14291_v13 = vpop.f32.mrb[14].mxu0  ;;  %14807 = vmatmul.mubr.msk.f32.gmra.mrb[44].mxu1 %vm215_vm1, %v18644_v60 }
 0x1aa   :  { %112 = vst.msk [vmem:[#allocation2 + $0x268] sm:$0x1] %vm35_vm3, %v21242_v1  ;;  %114 = vst.msk [vmem:[#allocation2 + $0x278] sm:$0x1] %vm35_vm3, %v21242_v1  ;;  %v21066_v8 = vmax.f32 %v18661_v62, 0.0  ;;  %14697 = vmatmul.mubr.msk.f32.gmra.mrb[24].mxu0 %vm215_vm1, %v12607_v42  ;;  %14809 = vmatprep.mubr.msk.f32.mxu1 %vm215_vm1, %v18655_v57  ;;  %v12768_v42 = vld [vmem:[%s21004_s0 + $0x361] sm:$0xff] }
 0x1ab   :  { %116 = vst.msk [vmem:[#allocation2 + $0x288] sm:$0x1] %vm35_vm3, %v21242_v1  ;;  %118 = vst.msk [vmem:[#allocation2 + $0x298] sm:$0x1] %vm35_vm3, %v21242_v1  ;;  %v21069_v40 = vmax.f32 %v18670_v31, 0.0  ;;  %14699 = vmatprep.mubr.msk.f32.mxu0 %vm215_vm1, %v12608_v41 }
 0x1ac   :  { %120 = vst.msk [vmem:[#allocation2 + $0x2a8] sm:$0x1] %vm35_vm3, %v21242_v1  ;;  %122 = vst.msk [vmem:[#allocation2 + $0x2b8] sm:$0x1] %vm35_vm3, %v21242_v1 }
 0x1ad   :  { %126 = vst.msk [vmem:[#allocation2 + $0x2d8] sm:$0x1] %vm35_vm3, %v21242_v1  ;;  %128 = vst.msk [vmem:[#allocation2 + $0x2e8] sm:$0x1] %vm35_vm3, %v21242_v1 }
 0x1ae   :  { %130 = vst.msk [vmem:[#allocation2 + $0x2f8] sm:$0x1] %vm35_vm3, %v21242_v1  ;;  %132 = vst.msk [vmem:[#allocation2 + $0x308] sm:$0x1] %vm35_vm3, %v21242_v1 }
 0x1af   :  { %134 = vst.msk [vmem:[#allocation2 + $0x318] sm:$0x1] %vm35_vm3, %v21242_v1  ;;  %136 = vst.msk [vmem:[#allocation2 + $0x328] sm:$0x1] %vm35_vm3, %v21242_v1 }
 0x1b0   :  { %138 = vst.msk [vmem:[#allocation2 + $0x338] sm:$0x1] %vm35_vm3, %v21242_v1  ;;  %140 = vst.msk [vmem:[#allocation2 + $0x348] sm:$0x1] %vm35_vm3, %v21242_v1  ;;  %v12804_v1 = vld [vmem:[%s21004_s0 + $0x150] sm:$0xff] }
 0x1b1   :  { %2354 = vst.msk [vmem:[#allocation2 + $0x400] sm:$0xff] %vm33_vm2, %v21064_v28  ;;  %2353 = vst.msk [vmem:[#allocation2 + $0x3f0] sm:$0xff] %vm33_vm2, %v21062_v55  ;;  %v2198_v55 = vpop.f32.mrb[15].mxu0  ;;  %v21248_v28 = vld [vmem:[#allocation26_spill] sm:$0xff] }
 0x1b2   :  { %2356 = vst.msk [vmem:[#allocation2 + $0x420] sm:$0xff] %vm33_vm2, %v21061_v17  ;;  %2355 = vst.msk [vmem:[#allocation2 + $0x410] sm:$0xff] %vm33_vm2, %v21063_v21  ;;  %v21247_v17 = vld [vmem:[#allocation25_spill] sm:$0xff]  ;;  %v15607_v32 = vadd.f32 %v2198_v55, %v21248_v28 }
 0x1b3   :  { %21246 = vst [vmem:[#allocation27_spill] sm:$0xff] %v18670_v31  ;;  %v15606_v0 = vadd.f32 %v14291_v13, %v21247_v17  ;;  %v18682_v21 = vld [vmem:[%s21004_s0 + $0x460] sm:$0xff]  ;;  %v12609_v17 = vld [vmem:[%s21004_s0 + $0x310] sm:$0xff]  ;;  %2358 = vst.msk [vmem:[#allocation2 + $0x440] sm:$0xff] %vm33_vm2, %v21066_v8 }
 0x1b4   :  { %v12610_v28 = vld [vmem:[%s21004_s0 + $0x320] sm:$0xff]  ;;  %2357 = vst.msk [vmem:[#allocation2 + $0x430] sm:$0xff] %vm33_vm2, %v21069_v40  ;;  %v18706_v55 = vadd.f32 %v15607_v32, %v18329_v34  ;;  %14810 = vmatmul.mubr.msk.f32.gmra.mrb[46].mxu1 %vm215_vm1, %v18682_v21  ;;  %14700 = vmatmul.mubr.msk.f32.gmra.mrb[26].mxu0 %vm215_vm1, %v12609_v17  ;;  %v12611_v32 = vld [vmem:[%s21004_s0 + $0x330] sm:$0xff] }
 0x1b5   :  { %v18697_v13 = vadd.f32 %v15606_v0, %v18329_v34  ;;  %14814 = vmatprep.mubr.msk.f32.mxu1 %vm215_vm1, %v12768_v42  ;;  %v18716_v0 = vld [vmem:[%s21004_s0 + $0x371] sm:$0xff]  ;;  %14702 = vmatprep.mubr.msk.f32.mxu0 %vm215_vm1, %v12610_v28  ;;  %v12612_v17 = vld [vmem:[%s21004_s0 + $0x340] sm:$0xff] }
 0x1b6   :  { %21250 = vst [vmem:[#allocation29_spill] sm:$0xff] %v18706_v55  ;;  %v21068_v8 = vmax.f32 %v18706_v55, 0.0  ;;  %v18732_v42 = vld [vmem:[%s21004_s0 + $0x381] sm:$0xff]  ;;  %v12852_v28 = vld [vmem:[%s21005_s1 + $0x10] sm:$0xf] }
 0x1b7   :  { %21249 = vst [vmem:[#allocation28_spill] sm:$0xff] %v18697_v13  ;;  %v21067_v41 = vmax.f32 %v18697_v13, 0.0  ;;  %v12776_v40 = vld [vmem:[%s21004_s0 + $0x3f1] sm:$0xff]  ;;  %v12803_v13 = vld [vmem:[%s21004_s0 + $0x140] sm:$0xff] }
 0x1b8   :  { %2359 = vst.msk [vmem:[#allocation2 + $0x450] sm:$0xff] %vm33_vm2, %v21068_v8  ;;  %14815 = vmatmul.mubr.msk.f32.vlgmr.msra.gmra.mrb[32].mxu1 %vm215_vm1, %v18716_v0  ;;  %14703 = vmatmul.mubr.msk.f32.gmra.mrb[28].mxu0 %vm215_vm1, %v12611_v32  ;;  %v12613_v8 = vld [vmem:[%s21004_s0 + $0x350] sm:$0xff]  ;;  %v18759_v32 = vld [vmem:[%s21004_s0 + $0x3a1] sm:$0xff] }
 0x1b9   :  { %2360 = vst.msk [vmem:[#allocation2 + $0x460] sm:$0xff] %vm33_vm2, %v21067_v41  ;;  %14839 = vmatpush3.msk.msra.mxu1 %vm264_vm0, %v18361_v38  ;;  %v18748_v41 = vld [vmem:[%s21004_s0 + $0x391] sm:$0xff]  ;;  %14705 = vmatprep.mubr.msk.f32.mxu0 %vm215_vm1, %v12612_v17  ;;  %v18777_v17 = vld [vmem:[%s21004_s0 + $0x3c1] sm:$0xff] }
 0x1ba   :  { %14817 = vmatprep.mubr.msk.f32.mxu1 %vm215_vm1, %v18732_v42  ;;  %14864 = vmatprep.subr.msk.mxu1 %vm264_vm0, %v12852_v28  ;;  %v18770_v38 = vld [vmem:[%s21004_s0 + $0x3b1] sm:$0xff] }
 0x1bb   :  { %v12886_v55 = vld [vmem:[%s21005_s1 + $0x14] sm:$0xf] }
 0x1bc   :  { %14818 = vmatmul.mubr.msk.f32.gmra.mrb[34].mxu1 %vm215_vm1, %v18748_v41  ;;  %14706 = vmatmul.mubr.msk.f32.gmra.mrb[30].mxu0 %vm215_vm1, %v12613_v8  ;;  %v18788_v8 = vld [vmem:[%s21004_s0 + $0x3d1] sm:$0xff] }
 0x1bd   :  { %14820 = vmatprep.mubr.msk.f32.mxu1 %vm215_vm1, %v18759_v32  ;;  %14710 = vmatprep.mubr.msk.f32.mxu0 %vm215_vm1, %v18340_v44  ;;  %v12806_v31 = vld [vmem:[%s21004_s0 + $0x170] sm:$0xff] }
 0x1c0   :  { %14821 = vmatmul.mubr.msk.f32.gmra.mrb[36].mxu1 %vm215_vm1, %v18770_v38  ;;  %14711 = vmatmul.mubr.msk.f32.vlgmr.msra.gmra.mrb[16].mxu0 %vm215_vm1, %v18351_v25 }
 0x1c1   :  { %14823 = vmatprep.mubr.msk.f32.mxu1 %vm215_vm1, %v18777_v17  ;;  %14713 = vmatprep.mubr.msk.f32.mxu0 %vm215_vm1, %v18372_v33 }
 0x1c2   :  { %14735 = vmatpush3.msk.msra.mxu0 %vm264_vm0, %v18451_v26  ;;  %v18812_v26 = vld [vmem:[%s21004_s0 + $0x411] sm:$0xff] }
 0x1c4   :  { %14824 = vmatmul.mubr.msk.f32.gmra.mrb[38].mxu1 %vm215_vm1, %v18788_v8  ;;  %14714 = vmatmul.mubr.msk.f32.gmra.mrb[18].mxu0 %vm215_vm1, %v18388_v50 }
 0x1c5   :  { %14826 = vmatprep.mubr.msk.f32.mxu1 %vm215_vm1, %v12776_v40  ;;  %14716 = vmatprep.mubr.msk.f32.mxu0 %vm215_vm1, %v18418_v39  ;;  %v18823_v40 = vld [vmem:[%s21004_s0 + $0x421] sm:$0xff] }
 0x1c8   :  { %14827 = vmatmul.mubr.msk.f32.gmra.mrb[40].mxu1 %vm215_vm1, %v18805_v56  ;;  %14717 = vmatmul.mubr.msk.f32.gmra.mrb[20].mxu0 %vm215_vm1, %v18429_v15 }
 0x1c9   :  { %14829 = vmatprep.mubr.msk.f32.mxu1 %vm215_vm1, %v18812_v26  ;;  %14719 = vmatprep.mubr.msk.f32.mxu0 %vm215_vm1, %v18461_v47 }
 0x1cc   :  { %14830 = vmatmul.mubr.msk.f32.gmra.mrb[42].mxu1 %vm215_vm1, %v18823_v40  ;;  %14720 = vmatmul.mubr.msk.f32.gmra.mrb[22].mxu0 %vm215_vm1, %v18830_v49 }
 0x1cd   :  { %14832 = vmatprep.mubr.msk.f32.mxu1 %vm215_vm1, %v18835_v29  ;;  %14722 = vmatprep.mubr.msk.f32.mxu0 %vm215_vm1, %v18500_v19 }
 0x1d0   :  { %14833 = vmatmul.mubr.msk.f32.gmra.mrb[44].mxu1 %vm215_vm1, %v18846_v48  ;;  %14723 = vmatmul.mubr.msk.f32.gmra.mrb[24].mxu0 %vm215_vm1, %v18511_v43 }
 0x1d1   :  { %14835 = vmatprep.mubr.msk.f32.mxu1 %vm215_vm1, %v18853_v58  ;;  %14725 = vmatprep.mubr.msk.f32.mxu0 %vm215_vm1, %v18538_v10 }
 0x1d4   :  { %14836 = vmatmul.mubr.msk.f32.gmra.mrb[46].mxu1 %vm215_vm1, %v18864_v37  ;;  %14726 = vmatmul.mubr.msk.f32.gmra.mrb[26].mxu0 %vm215_vm1, %v18617_v52 }
 0x1d5   :  { %14840 = vmatprep.mubr.msk.f32.mxu1 %vm215_vm1, %v12802_v27  ;;  %14728 = vmatprep.mubr.msk.f32.mxu0 %vm215_vm1, %v18644_v60  ;;  %v12805_v27 = vld [vmem:[%s21004_s0 + $0x160] sm:$0xff] }
 0x1d8   :  { %14841 = vmatmul.mubr.msk.f32.vlgmr.msra.gmra.mrb[32].mxu1 %vm215_vm1, %v12803_v13  ;;  %14729 = vmatmul.mubr.msk.f32.gmra.mrb[28].mxu0 %vm215_vm1, %v18655_v57  ;;  %v18900_v13 = vld [vmem:[%s21004_s0 + $0x470] sm:$0xff] }
 0x1d9   :  { %14865 = vmatpush3.msk.msra.mxu1 %vm264_vm0, %v12852_v28  ;;  %14731 = vmatprep.mubr.msk.f32.mxu0 %vm215_vm1, %v18682_v21  ;;  %v12808_v28 = vld [vmem:[%s21004_s0 + $0x190] sm:$0xff] }
 0x1da   :  { %14843 = vmatprep.mubr.msk.f32.mxu1 %vm215_vm1, %v12804_v1  ;;  %14890 = vmatprep.subr.msk.mxu1 %vm264_vm0, %v12886_v55  ;;  %v12807_v1 = vld [vmem:[%s21004_s0 + $0x180] sm:$0xff] }
 0x1dc   :  { %14844 = vmatmul.mubr.msk.f32.gmra.mrb[34].mxu1 %vm215_vm1, %v12805_v27  ;;  %14732 = vmatmul.mubr.msk.f32.gmra.mrb[30].mxu0 %vm215_vm1, %v18900_v13  ;;  %v12814_v27 = vld [vmem:[%s21004_s0 + $0x200] sm:$0xff] }
 0x1dd   :  { %14846 = vmatprep.mubr.msk.f32.mxu1 %vm215_vm1, %v12806_v31  ;;  %14736 = vmatprep.mubr.msk.f32.mxu0 %vm215_vm1, %v18180_v51  ;;  %v12809_v31 = vld [vmem:[%s21004_s0 + $0x1a0] sm:$0xff] }
 0x1de   :  { %v12810_v51 = vld [vmem:[%s21004_s0 + $0x1c0] sm:$0xff] }
 0x1e0   :  { %14847 = vmatmul.mubr.msk.f32.gmra.mrb[36].mxu1 %vm215_vm1, %v12807_v1  ;;  %14737 = vmatmul.mubr.msk.f32.vlgmr.msra.gmra.mrb[16].mxu0 %vm215_vm1, %v18187_v53  ;;  %v12811_v53 = vld [vmem:[%s21004_s0 + $0x1d0] sm:$0xff] }
 0x1e1   :  { %14849 = vmatprep.mubr.msk.f32.mxu1 %vm215_vm1, %v12808_v28  ;;  %14739 = vmatprep.mubr.msk.f32.mxu0 %vm215_vm1, %v18202_v4  ;;  %v12812_v4 = vld [vmem:[%s21004_s0 + $0x1e0] sm:$0xff]  ;;  %v12817_v1 = vld [vmem:[%s21004_s0 + $0x230] sm:$0xff]  ;;  %v12920_v28 = vld [vmem:[%s21005_s1 + $0x18] sm:$0xf] }
 0x1e4   :  { %14850 = vmatmul.mubr.msk.f32.gmra.mrb[38].mxu1 %vm215_vm1, %v12809_v31  ;;  %14740 = vmatmul.mubr.msk.f32.gmra.mrb[18].mxu0 %vm215_vm1, %v18211_v7  ;;  %v12813_v7 = vld [vmem:[%s21004_s0 + $0x1f0] sm:$0xff]  ;;  %v12843_v31 = vld [vmem:[%s21004_s0 + $0x81] sm:$0xff] }
 0x1e5   :  { %14852 = vmatprep.mubr.msk.f32.mxu1 %vm215_vm1, %v12810_v51  ;;  %14742 = vmatprep.mubr.msk.f32.mxu0 %vm215_vm1, %v18224_v9  ;;  %v18954_v9 = vld [vmem:[%s21004_s0 + $0x2c1] sm:$0xff] }
 0x1e6   :  { %v12844_v51 = vld [vmem:[%s21004_s0 + $0xa1] sm:$0xff] }
 0x1e8   :  { %14853 = vmatmul.mubr.msk.f32.gmra.mrb[40].mxu1 %vm215_vm1, %v12811_v53  ;;  %14743 = vmatmul.mubr.msk.f32.gmra.mrb[20].mxu0 %vm215_vm1, %v18231_v11  ;;  %v12815_v11 = vld [vmem:[%s21004_s0 + $0x210] sm:$0xff] }
 0x1e9   :  { %14855 = vmatprep.mubr.msk.f32.mxu1 %vm215_vm1, %v12812_v4  ;;  %14745 = vmatprep.mubr.msk.f32.mxu0 %vm215_vm1, %v18247_v16  ;;  %v12816_v16 = vld [vmem:[%s21004_s0 + $0x220] sm:$0xff]  ;;  %v12845_v53 = vld [vmem:[%s21004_s0 + $0xb1] sm:$0xff] }
 0x1ea   :  { %v12846_v4 = vld [vmem:[%s21004_s0 + $0xc1] sm:$0xff] }
 0x1ec   :  { %14856 = vmatmul.mubr.msk.f32.gmra.mrb[42].mxu1 %vm215_vm1, %v12813_v7  ;;  %14746 = vmatmul.mubr.msk.f32.gmra.mrb[22].mxu0 %vm215_vm1, %v18954_v9  ;;  %v12847_v7 = vld [vmem:[%s21004_s0 + $0xd1] sm:$0xff] }
 0x1ed   :  { %14858 = vmatprep.mubr.msk.f32.mxu1 %vm215_vm1, %v12814_v27  ;;  %14748 = vmatprep.mubr.msk.f32.mxu0 %vm215_vm1, %v18265_v63  ;;  %v12836_v63 = vld [vmem:[%s21004_s0 + $0x11] sm:$0xff]  ;;  %v12848_v27 = vld [vmem:[%s21004_s0 + $0xe1] sm:$0xff] }
 0x1f0   :  { %14859 = vmatmul.mubr.msk.f32.gmra.mrb[44].mxu1 %vm215_vm1, %v12815_v11  ;;  %14749 = vmatmul.mubr.msk.f32.gmra.mrb[24].mxu0 %vm215_vm1, %v18272_v5  ;;  %v12837_v5 = vld [vmem:[%s21004_s0 + $0x21] sm:$0xff]  ;;  %v12849_v11 = vld [vmem:[%s21004_s0 + $0xf1] sm:$0xff] }
 0x1f1   :  { %14861 = vmatprep.mubr.msk.f32.mxu1 %vm215_vm1, %v12816_v16  ;;  %14751 = vmatprep.mubr.msk.f32.mxu0 %vm215_vm1, %v18283_v24  ;;  %v12838_v24 = vld [vmem:[%s21004_s0 + $0x31] sm:$0xff]  ;;  %v12850_v16 = vld [vmem:[%s21004_s0 + $0x101] sm:$0xff] }
 0x1f4   :  { %14862 = vmatmul.mubr.msk.f32.gmra.mrb[46].mxu1 %vm215_vm1, %v12817_v1  ;;  %14752 = vmatmul.mubr.msk.f32.gmra.mrb[26].mxu0 %vm215_vm1, %v18290_v3  ;;  %v12839_v3 = vld [vmem:[%s21004_s0 + $0x41] sm:$0xff]  ;;  %v12870_v1 = vld [vmem:[%s21004_s0 + $0x131] sm:$0xff] }
 0x1f5   :  { %14866 = vmatprep.mubr.msk.f32.mxu1 %vm215_vm1, %v12836_v63  ;;  %14754 = vmatprep.mubr.msk.f32.mxu0 %vm215_vm1, %v18301_v22  ;;  %v19011_v22 = vld [vmem:[%s21004_s0 + $0x351] sm:$0xff]  ;;  %v12871_v63 = vld [vmem:[%s21004_s0 + $0x141] sm:$0xff] }
 0x1f8   :  { %14867 = vmatmul.mubr.msk.f32.vlgmr.msra.gmra.mrb[32].mxu1 %vm215_vm1, %v12837_v5  ;;  %14755 = vmatmul.mubr.msk.f32.gmra.mrb[28].mxu0 %vm215_vm1, %v18308_v12  ;;  %v12840_v12 = vld [vmem:[%s21004_s0 + $0x51] sm:$0xff] }
 0x1f9   :  { %14891 = vmatpush3.msk.msra.mxu1 %vm264_vm0, %v12886_v55  ;;  %14757 = vmatprep.mubr.msk.f32.mxu0 %vm215_vm1, %v18319_v6  ;;  %v12841_v6 = vld [vmem:[%s21004_s0 + $0x61] sm:$0xff]  ;;  %v12842_v55 = vld [vmem:[%s21004_s0 + $0x71] sm:$0xff] }
 0x1fa   :  { %14869 = vmatprep.mubr.msk.f32.mxu1 %vm215_vm1, %v12838_v24  ;;  %14916 = vmatprep.subr.msk.mxu1 %vm264_vm0, %v12920_v28  ;;  %v12872_v5 = vld [vmem:[%s21004_s0 + $0x151] sm:$0xff]  ;;  %v12954_v24 = vld [vmem:[%s21005_s1 + $0x1c] sm:$0xf] }
 0x1fc   :  { %14870 = vmatmul.mubr.msk.f32.gmra.mrb[34].mxu1 %vm215_vm1, %v12839_v3  ;;  %14758 = vmatmul.mubr.msk.f32.gmra.mrb[30].mxu0 %vm215_vm1, %v19011_v22  ;;  %v12874_v3 = vld [vmem:[%s21004_s0 + $0x171] sm:$0xff] }
 0x1fd   :  { %14872 = vmatprep.mubr.msk.f32.mxu1 %vm215_vm1, %v12840_v12  ;;  %v12876_v12 = vld [vmem:[%s21004_s0 + $0x191] sm:$0xff] }
 0x200   :  { %14873 = vmatmul.mubr.msk.f32.gmra.mrb[36].mxu1 %vm215_vm1, %v12841_v6  ;;  %v12877_v6 = vld [vmem:[%s21004_s0 + $0x1a1] sm:$0xff] }
 0x201   :  { %14875 = vmatprep.mubr.msk.f32.mxu1 %vm215_vm1, %v12842_v55  ;;  %v12878_v55 = vld [vmem:[%s21004_s0 + $0x1c1] sm:$0xff] }
 0x204   :  { %14876 = vmatmul.mubr.msk.f32.gmra.mrb[38].mxu1 %vm215_vm1, %v12843_v31  ;;  %v12879_v31 = vld [vmem:[%s21004_s0 + $0x1d1] sm:$0xff] }
 0x205   :  { %14878 = vmatprep.mubr.msk.f32.mxu1 %vm215_vm1, %v12844_v51  ;;  %v12880_v51 = vld [vmem:[%s21004_s0 + $0x1e1] sm:$0xff] }
 0x208   :  { %14879 = vmatmul.mubr.msk.f32.gmra.mrb[40].mxu1 %vm215_vm1, %v12845_v53  ;;  %v12881_v53 = vld [vmem:[%s21004_s0 + $0x1f1] sm:$0xff] }
 0x209   :  { %14881 = vmatprep.mubr.msk.f32.mxu1 %vm215_vm1, %v12846_v4  ;;  %v12882_v4 = vld [vmem:[%s21004_s0 + $0x201] sm:$0xff] }
 0x20c   :  { %14882 = vmatmul.mubr.msk.f32.gmra.mrb[42].mxu1 %vm215_vm1, %v12847_v7 }
 0x20d   :  { %14884 = vmatprep.mubr.msk.f32.mxu1 %vm215_vm1, %v12848_v27 }
 0x210   :  { %14885 = vmatmul.mubr.msk.f32.gmra.mrb[44].mxu1 %vm215_vm1, %v12849_v11 }
 0x211   :  { %14887 = vmatprep.mubr.msk.f32.mxu1 %vm215_vm1, %v12850_v16 }
 0x214   :  { %14888 = vmatmul.mubr.msk.f32.gmra.mrb[46].mxu1 %vm215_vm1, %v18383_v20  ;;  %v12873_v20 = vld [vmem:[%s21004_s0 + $0x161] sm:$0xff] }
 0x215   :  { %14892 = vmatprep.mubr.msk.f32.mxu1 %vm215_vm1, %v12870_v1  ;;  %v12883_v1 = vld [vmem:[%s21004_s0 + $0x211] sm:$0xff] }
 0x218   :  { %14893 = vmatmul.mubr.msk.f32.vlgmr.msra.gmra.mrb[32].mxu1 %vm215_vm1, %v12871_v63 }
 0x219   :  { %14917 = vmatpush3.msk.msra.mxu1 %vm264_vm0, %v12920_v28  ;;  %14895 = vmatprep.mubr.msk.f32.mxu1 %vm215_vm1, %v12872_v5  ;;  %v12875_v28 = vld [vmem:[%s21004_s0 + $0x181] sm:$0xff] }
 0x21a   :  { %14942 = vmatprep.subr.msk.mxu1 %vm264_vm0, %v12954_v24  ;;  %v12884_v5 = vld [vmem:[%s21004_s0 + $0x221] sm:$0xff] }
 0x21c   :  { %14896 = vmatmul.mubr.msk.f32.gmra.mrb[34].mxu1 %vm215_vm1, %v12873_v20 }
 0x21d   :  { %14898 = vmatprep.mubr.msk.f32.mxu1 %vm215_vm1, %v12874_v3 }
 0x220   :  { %14899 = vmatmul.mubr.msk.f32.gmra.mrb[36].mxu1 %vm215_vm1, %v12875_v28 }
 0x221   :  { %14901 = vmatprep.mubr.msk.f32.mxu1 %vm215_vm1, %v12876_v12 }
 0x224   :  { %14902 = vmatmul.mubr.msk.f32.gmra.mrb[38].mxu1 %vm215_vm1, %v12877_v6  ;;  %v14504_v7 = vpop.f32.mrb[16].mxu1 }
 0x225   :  { %14904 = vmatprep.mubr.msk.f32.mxu1 %vm215_vm1, %v12878_v55  ;;  %v19119_v27 = vadd.f32 %v14504_v7, %v18329_v34  ;;  %v4295_v11 = vpop.f32.mrb[17].mxu1  ;;  %v12885_v55 = vld [vmem:[%s21004_s0 + $0x231] sm:$0xff] }
 0x226   :  { %v19123_v16 = vadd.f32 %v18329_v34, %v4295_v11 }
 0x227   :  { %21251 = vst [vmem:[#allocation30_spill] sm:$0xff] %v19119_v27  ;;  %v21083_v63 = vmax.f32 %v19119_v27, 0.0 }
 0x228   :  { %14905 = vmatmul.mubr.msk.f32.gmra.mrb[40].mxu1 %vm215_vm1, %v12879_v31  ;;  %21252 = vst [vmem:[#allocation31_spill] sm:$0xff] %v19123_v16  ;;  %v21112_v20 = vmax.f32 %v19123_v16, 0.0  ;;  %v14507_v3 = vpop.f32.mrb[18].mxu1 }
 0x229   :  { %14907 = vmatprep.mubr.msk.f32.mxu1 %vm215_vm1, %v12880_v51  ;;  %4511 = vst.msk [vmem:[#allocation2 + $0x251] sm:$0xff] %vm33_vm2, %v21083_v63  ;;  %v19138_v28 = vadd.f32 %v14507_v3, %v18329_v34  ;;  %v4305_v12 = vpop.f32.mrb[19].mxu1  ;;  %v13007_v63 = vld [vmem:[%s21007_s3 + $0x8] sm:$0xff] }
 0x22a   :  { %4510 = vst.msk [vmem:[#allocation2 + $0x241] sm:$0xff] %vm33_vm2, %v21112_v20  ;;  %v19145_v6 = vadd.f32 %v18329_v34, %v4305_v12  ;;  %v19173_v12 = vld [vmem:[%s21005_s1 + $0x20] sm:$0xf]  ;;  %14994 = vmatprep.subr.mxu0 %v13007_v63 }
 0x22b   :  { %21253 = vst [vmem:[#allocation32_spill] sm:$0xff] %v19138_v28  ;;  %v21082_v31 = vmax.f32 %v19138_v28, 0.0  ;;  %14995 = vmatpush3.msra.mxu0 %v13007_v63 }
 0x22c   :  { %14908 = vmatmul.mubr.msk.f32.gmra.mrb[42].mxu1 %vm215_vm1, %v12881_v53  ;;  %21254 = vst [vmem:[#allocation33_spill] sm:$0xff] %v19145_v6  ;;  %v21111_v51 = vmax.f32 %v19145_v6, 0.0  ;;  %v14510_v53 = vpop.f32.mrb[20].mxu1 }
 0x22d   :  { %14910 = vmatprep.mubr.msk.f32.mxu1 %vm215_vm1, %v12882_v4  ;;  %4513 = vst.msk [vmem:[#allocation2 + $0x271] sm:$0xff] %vm33_vm2, %v21082_v31  ;;  %v19157_v4 = vadd.f32 %v14510_v53, %v18329_v34  ;;  %v4315_v7 = vpop.f32.mrb[21].mxu1 }
 0x22e   :  { %4512 = vst.msk [vmem:[#allocation2 + $0x261] sm:$0xff] %vm33_vm2, %v21111_v51  ;;  %v19164_v11 = vadd.f32 %v18329_v34, %v4315_v7 }
 0x22f   :  { %21255 = vst [vmem:[#allocation34_spill] sm:$0xff] %v19157_v4 }
 0x230   :  { %14911 = vmatmul.mubr.msk.f32.gmra.mrb[44].mxu1 %vm215_vm1, %v12883_v1  ;;  %21256 = vst [vmem:[#allocation35_spill] sm:$0xff] %v19164_v11  ;;  %v21081_v1 = vmax.f32 %v19157_v4, 0.0  ;;  %v14513_v3 = vpop.f32.mrb[22].mxu1 }
 0x231   :  { %14913 = vmatprep.mubr.msk.f32.mxu1 %vm215_vm1, %v12884_v5  ;;  %v21110_v5 = vmax.f32 %v19164_v11, 0.0  ;;  %v4325_v53 = vpop.f32.mrb[23].mxu1 }
 0x232   :  { %4515 = vst.msk [vmem:[#allocation2 + $0x291] sm:$0xff] %vm33_vm2, %v21081_v1 }
 0x233   :  { %4514 = vst.msk [vmem:[#allocation2 + $0x281] sm:$0xff] %vm33_vm2, %v21110_v5  ;;  %v13040_v5 = vld [vmem:[%s21007_s3 + $0x10] sm:$0xff] }
 0x234   :  { %14914 = vmatmul.mubr.msk.f32.gmra.mrb[46].mxu1 %vm215_vm1, %v12885_v55  ;;  %v19179_v55 = vadd.f32 %v14513_v3, %v18329_v34 }
 0x235   :  { %14918 = vmatprep.mubr.msk.f32.mxu1 %vm215_vm1, %v18340_v44  ;;  %v19187_v44 = vadd.f32 %v18329_v34, %v4325_v53 }
 0x236   :  { %21257 = vst [vmem:[#allocation6_spill] sm:$0xff] %v19179_v55  ;;  %v21108_v7 = vmax.f32 %v19179_v55, 0.0  ;;  %v9510_v55 = vld [vmem:[#allocation2 + $0x270] sm:$0xff] }
 0x237   :  { %21258 = vst [vmem:[#allocation7_spill] sm:$0xff] %v19187_v44  ;;  %v21084_v3 = vmax.f32 %v19187_v44, 0.0 }
 0x238   :  { %14919 = vmatmul.mubr.msk.f32.vlgmr.msra.gmra.mrb[32].mxu1 %vm215_vm1, %v18351_v25  ;;  %v14516_v25 = vpop.f32.mrb[24].mxu1  ;;  %4517 = vst.msk [vmem:[#allocation2 + $0x2b1] sm:$0xff] %vm33_vm2, %v21108_v7  ;;  %v8858_v7 = vld [vmem:[#allocation2] sm:$0xff] }
 0x239   :  { %14943 = vmatpush3.msk.msra.mxu1 %vm264_vm0, %v12954_v24  ;;  %14921 = vmatprep.mubr.msk.f32.mxu1 %vm215_vm1, %v18372_v33  ;;  %v19200_v53 = vadd.f32 %v14516_v25, %v18329_v34  ;;  %v4335_v1 = vpop.f32.mrb[25].mxu1  ;;  %4516 = vst.msk [vmem:[#allocation2 + $0x2a1] sm:$0xff] %vm33_vm2, %v21084_v3  ;;  %v9512_v6 = vld [vmem:[#allocation2 + $0x290] sm:$0xff] }
 0x23a   :  { %14968 = vmatprep.subr.msk.mxu1 %vm264_vm0, %v19173_v12  ;;  %v19208_v33 = vadd.f32 %v18329_v34, %v4335_v1  ;;  %v14519_v25 = vpop.f32.mrb[26].mxu1  ;;  %v9511_v11 = vld [vmem:[#allocation2 + $0x280] sm:$0xff] }
 0x23b   :  { %21259 = vst [vmem:[#allocation8_spill] sm:$0xff] %v19200_v53  ;;  %v21085_v24 = vmax.f32 %v19200_v53, 0.0  ;;  %v4345_v1 = vpop.f32.mrb[27].mxu1  ;;  %v9509_v53 = vld [vmem:[#allocation2 + $0x260] sm:$0xff] }
 0x23c   :  { %14922 = vmatmul.mubr.msk.f32.gmra.mrb[34].mxu1 %vm215_vm1, %v18388_v50  ;;  %21260 = vst [vmem:[#allocation9_spill] sm:$0xff] %v19208_v33  ;;  %v21086_v31 = vmax.f32 %v19208_v33, 0.0  ;;  %v19221_v50 = vadd.f32 %v14519_v25, %v18329_v34  ;;  %v19229_v3 = vadd.f32 %v18329_v34, %v4345_v1 }
 0x23d   :  { %14924 = vmatprep.mubr.msk.f32.mxu1 %vm215_vm1, %v18418_v39  ;;  %4519 = vst.msk [vmem:[#allocation2 + $0x2e1] sm:$0xff] %vm33_vm2, %v21085_v24  ;;  %v8876_v39 = vld [vmem:[#allocation2 + $0x120] sm:$0xff] }
 0x23e   :  { %21261 = vst [vmem:[#allocation10_spill] sm:$0xff] %v19221_v50  ;;  %4518 = vst.msk [vmem:[#allocation2 + $0x2d1] sm:$0xff] %vm33_vm2, %v21086_v31  ;;  %v21087_v25 = vmax.f32 %v19221_v50, 0.0  ;;  %14996 = vmatprep.mubr.msk.f32.mxu0 %vm33_vm2, %v8876_v39  ;;  %v21088_v24 = vmax.f32 %v19229_v3, 0.0  ;;  %v13091_v50 = vld [vmem:[%s21007_s3 + $0x28] sm:$0xff] }
 0x23f   :  { %21262 = vst [vmem:[#allocation11_spill] sm:$0xff] %v19229_v3  ;;  %v9514_v16 = vld [vmem:[#allocation2 + $0x2b0] sm:$0xff] }
 0x240   :  { %14925 = vmatmul.mubr.msk.f32.gmra.mrb[36].mxu1 %vm215_vm1, %v18429_v15  ;;  %v14522_v15 = vpop.f32.mrb[28].mxu1  ;;  %4521 = vst.msk [vmem:[#allocation2 + $0x301] sm:$0xff] %vm33_vm2, %v21087_v25  ;;  %4520 = vst.msk [vmem:[#allocation2 + $0x2f1] sm:$0xff] %vm33_vm2, %v21088_v24 }
 0x241   :  { %14927 = vmatprep.mubr.msk.f32.mxu1 %vm215_vm1, %v18461_v47  ;;  %v19240_v31 = vadd.f32 %v14522_v15, %v18329_v34  ;;  %v4355_v1 = vpop.f32.mrb[29].mxu1 }
 0x242   :  { %v19248_v47 = vadd.f32 %v18329_v34, %v4355_v1  ;;  %v14525_v15 = vpop.f32.mrb[30].mxu1 }
 0x243   :  { %21263 = vst [vmem:[#allocation12_spill] sm:$0xff] %v19240_v31  ;;  %v21106_v63 = vmax.f32 %v19240_v31, 0.0  ;;  %v4365_v25 = vpop.f32.mrb[31].mxu1  ;;  %v9508_v31 = vld [vmem:[#allocation2 + $0x250] sm:$0xff] }
 0x244   :  { %14928 = vmatmul.mubr.msk.f32.gmra.mrb[38].mxu1 %vm215_vm1, %v18830_v49  ;;  %21264 = vst [vmem:[#allocation13_spill] sm:$0xff] %v19248_v47  ;;  %v21094_v39 = vmax.f32 %v19248_v47, 0.0  ;;  %v19258_v49 = vadd.f32 %v14525_v15, %v18329_v34  ;;  %v12948_v15 = vld [vmem:[%s21004_s0 + $0x301] sm:$0xff] }
 0x245   :  { %14930 = vmatprep.mubr.msk.f32.mxu1 %vm215_vm1, %v18500_v19  ;;  %4523 = vst.msk [vmem:[#allocation2 + $0x321] sm:$0xff] %vm33_vm2, %v21106_v63  ;;  %v19266_v19 = vadd.f32 %v18329_v34, %v4365_v25  ;;  %v12938_v34 = vld [vmem:[%s21004_s0 + $0x251] sm:$0xff] }
 0x246   :  { %21265 = vst [vmem:[#allocation14_spill] sm:$0xff] %v19258_v49  ;;  %4522 = vst.msk [vmem:[#allocation2 + $0x311] sm:$0xff] %vm33_vm2, %v21094_v39  ;;  %v21103_v1 = vmax.f32 %v19258_v49, 0.0  ;;  %v12947_v25 = vld [vmem:[%s21004_s0 + $0x2f1] sm:$0xff]  ;;  %v9507_v49 = vld [vmem:[#allocation2 + $0x240] sm:$0xff] }
 0x247   :  { %21266 = vst [vmem:[#allocation15_spill] sm:$0xff] %v19266_v19  ;;  %v21093_v24 = vmax.f32 %v19266_v19, 0.0 }
 0x248   :  { %14931 = vmatmul.mubr.msk.f32.gmra.mrb[40].mxu1 %vm215_vm1, %v18511_v43  ;;  %4525 = vst.msk [vmem:[#allocation2 + $0x341] sm:$0xff] %vm33_vm2, %v21103_v1  ;;  %v12939_v43 = vld [vmem:[%s21004_s0 + $0x261] sm:$0xff] }
 0x249   :  { %14933 = vmatprep.mubr.msk.f32.mxu1 %vm215_vm1, %v18538_v10  ;;  %4524 = vst.msk [vmem:[#allocation2 + $0x331] sm:$0xff] %vm33_vm2, %v21093_v24  ;;  %v12940_v10 = vld [vmem:[%s21004_s0 + $0x271] sm:$0xff] }
 0x24c   :  { %14934 = vmatmul.mubr.msk.f32.gmra.mrb[42].mxu1 %vm215_vm1, %v18617_v52  ;;  %v12941_v52 = vld [vmem:[%s21004_s0 + $0x281] sm:$0xff] }
 0x24d   :  { %14936 = vmatprep.mubr.msk.f32.mxu1 %vm215_vm1, %v18644_v60  ;;  %v12942_v60 = vld [vmem:[%s21004_s0 + $0x291] sm:$0xff] }
 0x250   :  { %14937 = vmatmul.mubr.msk.f32.gmra.mrb[44].mxu1 %vm215_vm1, %v18655_v57  ;;  %v12944_v57 = vld [vmem:[%s21004_s0 + $0x2b1] sm:$0xff] }
 0x251   :  { %14939 = vmatprep.mubr.msk.f32.mxu1 %vm215_vm1, %v18682_v21  ;;  %v12943_v21 = vld [vmem:[%s21004_s0 + $0x2a1] sm:$0xff] }
 0x254   :  { %14940 = vmatmul.mubr.msk.f32.gmra.mrb[46].mxu1 %vm215_vm1, %v18900_v13  ;;  %v19319_v13 = vld [vmem:[%s21007_s3] sm:$0xff] }
 0x255   :  { %14944 = vmatprep.mubr.msk.f32.mxu1 %vm215_vm1, %v12938_v34  ;;  %15020 = vmatprep.subr.mxu0 %v19319_v13  ;;  %v12949_v34 = vld [vmem:[%s21004_s0 + $0x311] sm:$0xff] }
 0x258   :  { %14945 = vmatmul.mubr.msk.f32.vlgmr.msra.gmra.mrb[32].mxu1 %vm215_vm1, %v12939_v43  ;;  %v12951_v43 = vld [vmem:[%s21004_s0 + $0x331] sm:$0xff] }
 0x259   :  { %14969 = vmatpush3.msk.msra.mxu1 %vm264_vm0, %v19173_v12  ;;  %14947 = vmatprep.mubr.msk.f32.mxu1 %vm215_vm1, %v12940_v10  ;;  %v12946_v12 = vld [vmem:[%s21004_s0 + $0x2e1] sm:$0xff] }
 0x25a   :  { %v12952_v10 = vld [vmem:[%s21004_s0 + $0x341] sm:$0xff] }
 0x25c   :  { %14948 = vmatmul.mubr.msk.f32.gmra.mrb[34].mxu1 %vm215_vm1, %v12941_v52 }
 0x25d   :  { %14950 = vmatprep.mubr.msk.f32.mxu1 %vm215_vm1, %v12942_v60 }
 0x260   :  { %14951 = vmatmul.mubr.msk.f32.gmra.mrb[36].mxu1 %vm215_vm1, %v12943_v21 }
 0x261   :  { %14953 = vmatprep.mubr.msk.f32.mxu1 %vm215_vm1, %v12944_v57 }
 0x264   :  { %14954 = vmatmul.mubr.msk.f32.gmra.mrb[38].mxu1 %vm215_vm1, %v18954_v9  ;;  %v12950_v9 = vld [vmem:[%s21004_s0 + $0x321] sm:$0xff] }
 0x265   :  { %14956 = vmatprep.mubr.msk.f32.mxu1 %vm215_vm1, %v12946_v12 }
 0x268   :  { %14957 = vmatmul.mubr.msk.f32.gmra.mrb[40].mxu1 %vm215_vm1, %v12947_v25 }
 0x269   :  { %14959 = vmatprep.mubr.msk.f32.mxu1 %vm215_vm1, %v12948_v15 }
 0x26c   :  { %14960 = vmatmul.mubr.msk.f32.gmra.mrb[42].mxu1 %vm215_vm1, %v12949_v34 }
 0x26d   :  { %14962 = vmatprep.mubr.msk.f32.mxu1 %vm215_vm1, %v12950_v9 }
 0x270   :  { %14963 = vmatmul.mubr.msk.f32.gmra.mrb[44].mxu1 %vm215_vm1, %v12951_v43 }
 0x271   :  { %14965 = vmatprep.mubr.msk.f32.mxu1 %vm215_vm1, %v12952_v10 }
 0x274   :  { %14966 = vmatmul.mubr.msk.f32.gmra.mrb[46].mxu1 %vm215_vm1, %v19011_v22 }
 0x275   :  { %14970 = vmatprep.mubr.msk.f32.mxu1 %vm215_vm1, %v18716_v0  ;;  %v12979_v0 = vld [vmem:[%s21004_s0 + $0x3e1] sm:$0xff] }
 0x278   :  { %14971 = vmatmul.mubr.msk.f32.vlgmr.msra.gmra.mrb[32].mxu1 %vm215_vm1, %v18732_v42 }
 0x279   :  { %14973 = vmatprep.mubr.msk.f32.mxu1 %vm215_vm1, %v18748_v41  ;;  %v19395_v41 = vld [vmem:[%s21006_s2] ss:$0 sm:$0xff] }
 0x27c   :  { %14974 = vmatmul.mubr.msk.f32.gmra.mrb[34].mxu1 %vm215_vm1, %v18759_v32 }
 0x27d   :  { %14976 = vmatprep.mubr.msk.f32.mxu1 %vm215_vm1, %v18770_v38 }
 0x280   :  { %14977 = vmatmul.mubr.msk.f32.gmra.mrb[36].mxu1 %vm215_vm1, %v18777_v17 }
 0x281   :  { %14979 = vmatprep.mubr.msk.f32.mxu1 %vm215_vm1, %v18788_v8 }
 0x284   :  { %14980 = vmatmul.mubr.msk.f32.gmra.mrb[38].mxu1 %vm215_vm1, %v12979_v0 }
 0x285   :  { %14982 = vmatprep.mubr.msk.f32.mxu1 %vm215_vm1, %v18805_v56  ;;  %v12987_v56 = vld [vmem:[%s21004_s0 + $0x471] sm:$0xff] }
 0x288   :  { %14983 = vmatmul.mubr.msk.f32.gmra.mrb[40].mxu1 %vm215_vm1, %v18812_v26 }
 0x289   :  { %14985 = vmatprep.mubr.msk.f32.mxu1 %vm215_vm1, %v18823_v40 }
 0x28c   :  { %14986 = vmatmul.mubr.msk.f32.gmra.mrb[42].mxu1 %vm215_vm1, %v18835_v29 }
 0x28d   :  { %14988 = vmatprep.mubr.msk.f32.mxu1 %vm215_vm1, %v18846_v48 }
 0x290   :  { %14989 = vmatmul.mubr.msk.f32.gmra.mrb[44].mxu1 %vm215_vm1, %v18853_v58 }
 0x291   :  { %14991 = vmatprep.mubr.msk.f32.mxu1 %vm215_vm1, %v18864_v37 }
 0x294   :  { %14992 = vmatmul.mubr.msk.f32.gmra.mrb[46].mxu1 %vm215_vm1, %v12987_v56 }
 0x2b3   :  { %v14738_v29 = vpop.f32.mrb[16].mxu0 }
 0x2b4   :  { %v19398_v48 = vadd.f32 %v14738_v29, %v19395_v41  ;;  %v6462_v42 = vpop.f32.mrb[17].mxu0 }
 0x2b5   :  { %v19401_v58 = vadd.f32 %v19395_v41, %v6462_v42 }
 0x2b6   :  { %21267 = vst [vmem:[#allocation16_spill] sm:$0xff] %v19398_v48  ;;  %v21101_v37 = vmax.f32 %v19398_v48, 0.0 }
 0x2b7   :  { %21268 = vst [vmem:[#allocation17_spill] sm:$0xff] %v19401_v58  ;;  %v21092_v32 = vmax.f32 %v19401_v58, 0.0  ;;  %v14741_v38 = vpop.f32.mrb[18].mxu0 }
 0x2b8   :  { %6678 = vst.msk [vmem:[#allocation2 + $0x140] sm:$0xff] %vm33_vm2, %v21101_v37  ;;  %v19409_v17 = vadd.f32 %v14741_v38, %v19395_v41  ;;  %v6472_v8 = vpop.f32.mrb[19].mxu0 }
 0x2b9   :  { %6677 = vst.msk [vmem:[#allocation2 + $0x130] sm:$0xff] %vm33_vm2, %v21092_v32  ;;  %v19415_v26 = vadd.f32 %v19395_v41, %v6472_v8 }
 0x2ba   :  { %21269 = vst [vmem:[#allocation18_spill] sm:$0xff] %v19409_v17  ;;  %v21099_v40 = vmax.f32 %v19409_v17, 0.0 }
 0x2bb   :  { %21270 = vst [vmem:[#allocation19_spill] sm:$0xff] %v19415_v26  ;;  %v21091_v22 = vmax.f32 %v19415_v26, 0.0  ;;  %v14744_v52 = vpop.f32.mrb[20].mxu0 }
 0x2bc   :  { %6680 = vst.msk [vmem:[#allocation2 + $0x160] sm:$0xff] %vm33_vm2, %v21099_v40  ;;  %v19423_v60 = vadd.f32 %v14744_v52, %v19395_v41  ;;  %v6482_v21 = vpop.f32.mrb[21].mxu0 }
 0x2bd   :  { %6679 = vst.msk [vmem:[#allocation2 + $0x150] sm:$0xff] %vm33_vm2, %v21091_v22  ;;  %v19429_v57 = vadd.f32 %v19395_v41, %v6482_v21 }
 0x2be   :  { %21271 = vst [vmem:[#allocation20_spill] sm:$0xff] %v19423_v60  ;;  %v21098_v12 = vmax.f32 %v19423_v60, 0.0 }
 0x2bf   :  { %21272 = vst [vmem:[#allocation21_spill] sm:$0xff] %v19429_v57  ;;  %v21090_v25 = vmax.f32 %v19429_v57, 0.0  ;;  %v14747_v15 = vpop.f32.mrb[22].mxu0  ;;  %v19449_v0 = vld [vmem:[#allocation2 + $0x140] sm:$0xff] }
 0x2c0   :  { %6682 = vst.msk [vmem:[#allocation2 + $0x180] sm:$0xff] %vm33_vm2, %v21098_v12  ;;  %v19437_v34 = vadd.f32 %v14747_v15, %v19395_v41  ;;  %v6492_v9 = vpop.f32.mrb[23].mxu0  ;;  %v19439_v43 = vld [vmem:[#allocation2 + $0x130] sm:$0xff] }
 0x2c1   :  { %6681 = vst.msk [vmem:[#allocation2 + $0x170] sm:$0xff] %vm33_vm2, %v21090_v25  ;;  %v19445_v10 = vadd.f32 %v19395_v41, %v6492_v9  ;;  %14997 = vmatmul.mubr.msk.f32.vlgmr.msra.gmra.mrb[32].mxu0 %vm33_vm2, %v19439_v43 }
 0x2c2   :  { %21273 = vst [vmem:[#allocation22_spill] sm:$0xff] %v19437_v34  ;;  %v21097_v56 = vmax.f32 %v19437_v34, 0.0  ;;  %14999 = vmatprep.mubr.msk.f32.mxu0 %vm33_vm2, %v19449_v0  ;;  %15021 = vmatpush3.msra.mxu0 %v19319_v13 }
 0x2c3   :  { %21274 = vst [vmem:[#allocation23_spill] sm:$0xff] %v19445_v10  ;;  %v21089_v29 = vmax.f32 %v19445_v10, 0.0  ;;  %v14750_v42 = vpop.f32.mrb[24].mxu0  ;;  %v19472_v13 = vld [vmem:[#allocation2 + $0x160] sm:$0xff]  ;;  %15046 = vmatprep.subr.mxu0 %v13040_v5 }
 0x2c4   :  { %6684 = vst.msk [vmem:[#allocation2 + $0x1a0] sm:$0xff] %vm33_vm2, %v21097_v56  ;;  %v19460_v38 = vadd.f32 %v14750_v42, %v19395_v41  ;;  %v6502_v8 = vpop.f32.mrb[25].mxu0  ;;  %v19462_v52 = vld [vmem:[#allocation2 + $0x150] sm:$0xff] }
 0x2c5   :  { %6683 = vst.msk [vmem:[#allocation2 + $0x190] sm:$0xff] %vm33_vm2, %v21089_v29  ;;  %v19468_v21 = vadd.f32 %v19395_v41, %v6502_v8  ;;  %15000 = vmatmul.mubr.msk.f32.gmra.mrb[34].mxu0 %vm33_vm2, %v19462_v52 }
 0x2c6   :  { %21275 = vst [vmem:[#allocation24_spill] sm:$0xff] %v19460_v38  ;;  %v21095_v15 = vmax.f32 %v19460_v38, 0.0  ;;  %15002 = vmatprep.mubr.msk.f32.mxu0 %vm33_vm2, %v19472_v13 }
 0x2c7   :  { %21276 = vst [vmem:[#allocation25_spill] sm:$0xff] %v19468_v21  ;;  %v21096_v9 = vmax.f32 %v19468_v21, 0.0  ;;  %v14753_v42 = vpop.f32.mrb[26].mxu0  ;;  %v19494_v32 = vld [vmem:[#allocation2 + $0x180] sm:$0xff] }
 0x2c8   :  { %6686 = vst.msk [vmem:[#allocation2 + $0x1d0] sm:$0xff] %vm33_vm2, %v21095_v15  ;;  %v19482_v8 = vadd.f32 %v14753_v42, %v19395_v41  ;;  %v6512_v29 = vpop.f32.mrb[27].mxu0  ;;  %v19484_v25 = vld [vmem:[#allocation2 + $0x170] sm:$0xff] }
 0x2c9   :  { %6685 = vst.msk [vmem:[#allocation2 + $0x1c0] sm:$0xff] %vm33_vm2, %v21096_v9  ;;  %v19490_v22 = vadd.f32 %v19395_v41, %v6512_v29  ;;  %15003 = vmatmul.mubr.msk.f32.gmra.mrb[36].mxu0 %vm33_vm2, %v19484_v25  ;;  %v8884_v15 = vld [vmem:[#allocation2 + $0x1b0] sm:$0xff] }
 0x2ca   :  { %21277 = vst [vmem:[#allocation26_spill] sm:$0xff] %v19482_v8  ;;  %v21100_v24 = vmax.f32 %v19482_v8, 0.0  ;;  %15005 = vmatprep.mubr.msk.f32.mxu0 %vm33_vm2, %v19494_v32 }
 0x2cb   :  { %21278 = vst [vmem:[#allocation36_spill] sm:$0xff] %v19490_v22  ;;  %v21102_v42 = vmax.f32 %v19490_v22, 0.0  ;;  %v14756_v39 = vpop.f32.mrb[28].mxu0 }
 0x2cc   :  { %6688 = vst.msk [vmem:[#allocation2 + $0x1f0] sm:$0xff] %vm33_vm2, %v21100_v24  ;;  %v19504_v29 = vadd.f32 %v14756_v39, %v19395_v41  ;;  %v6522_v9 = vpop.f32.mrb[29].mxu0  ;;  %v19506_v56 = vld [vmem:[#allocation2 + $0x190] sm:$0xff] }
 0x2cd   :  { %6687 = vst.msk [vmem:[#allocation2 + $0x1e0] sm:$0xff] %vm33_vm2, %v21102_v42  ;;  %v19512_v12 = vadd.f32 %v19395_v41, %v6522_v9  ;;  %15006 = vmatmul.mubr.msk.f32.gmra.mrb[38].mxu0 %vm33_vm2, %v19506_v56 }
 0x2ce   :  { %21279 = vst [vmem:[#allocation37_spill] sm:$0xff] %v19504_v29  ;;  %v21104_v40 = vmax.f32 %v19504_v29, 0.0  ;;  %15008 = vmatprep.mubr.msk.f32.mxu0 %vm33_vm2, %v8884_v15 }
 0x2cf   :  { %21280 = vst [vmem:[#allocation38_spill] sm:$0xff] %v19512_v12  ;;  %v21105_v39 = vmax.f32 %v19512_v12, 0.0  ;;  %v14759_v24 = vpop.f32.mrb[30].mxu0  ;;  %v19535_v15 = vld [vmem:[#allocation2 + $0x1d0] sm:$0xff] }
 0x2d0   :  { %6690 = vst.msk [vmem:[#allocation2 + $0x210] sm:$0xff] %vm33_vm2, %v21104_v40  ;;  %v19523_v37 = vadd.f32 %v14759_v24, %v19395_v41  ;;  %v6532_v42 = vpop.f32.mrb[31].mxu0  ;;  %v19525_v9 = vld [vmem:[#allocation2 + $0x1c0] sm:$0xff] }
 0x2d1   :  { %6689 = vst.msk [vmem:[#allocation2 + $0x200] sm:$0xff] %vm33_vm2, %v21105_v39  ;;  %v19531_v1 = vadd.f32 %v19395_v41, %v6532_v42  ;;  %15009 = vmatmul.mubr.msk.f32.gmra.mrb[40].mxu0 %vm33_vm2, %v19525_v9 }
 0x2d2   :  { %21281 = vst [vmem:[#allocation39_spill] sm:$0xff] %v19523_v37  ;;  %v21107_v40 = vmax.f32 %v19523_v37, 0.0  ;;  %15011 = vmatprep.mubr.msk.f32.mxu0 %vm33_vm2, %v19535_v15 }
 0x2d3   :  { %21282 = vst [vmem:[#allocation40_spill] sm:$0xff] %v19531_v1  ;;  %v21109_v24 = vmax.f32 %v19531_v1, 0.0  ;;  %v19551_v42 = vld [vmem:[#allocation2 + $0x1f0] sm:$0xff] }
 0x2d4   :  { %6692 = vst.msk [vmem:[#allocation2 + $0x230] sm:$0xff] %vm33_vm2, %v21107_v40  ;;  %v19544_v39 = vld [vmem:[#allocation2 + $0x1e0] sm:$0xff] }
 0x2d5   :  { %6691 = vst.msk [vmem:[#allocation2 + $0x220] sm:$0xff] %vm33_vm2, %v21109_v24  ;;  %15012 = vmatmul.mubr.msk.f32.gmra.mrb[42].mxu0 %vm33_vm2, %v19544_v39 }
 0x2d6   :  { %15014 = vmatprep.mubr.msk.f32.mxu0 %vm33_vm2, %v19551_v42 }
 0x2d7   :  { %v19559_v40 = vld [vmem:[#allocation2 + $0x210] sm:$0xff] }
 0x2d8   :  { %v19555_v63 = vld [vmem:[#allocation2 + $0x200] sm:$0xff] }
 0x2d9   :  { %15015 = vmatmul.mubr.msk.f32.gmra.mrb[44].mxu0 %vm33_vm2, %v19555_v63 }
 0x2da   :  { %15017 = vmatprep.mubr.msk.f32.mxu0 %vm33_vm2, %v19559_v40 }
 0x2dc   :  { %v19563_v24 = vld [vmem:[#allocation2 + $0x220] sm:$0xff] }
 0x2dd   :  { %15018 = vmatmul.mubr.msk.f32.gmra.mrb[46].mxu0 %vm33_vm2, %v19563_v24 }
 0x2de   :  { %15022 = vmatprep.mubr.msk.f32.mxu0 %vm33_vm2, %v8858_v7 }
 0x34b   :  { %v14972_v51 = vpop.f32.mrb[32].mxu1 }
 0x34c   :  { %v19572_v20 = vadd.f32 %v14972_v51, %v19395_v41  ;;  %v8627_v1 = vpop.f32.mrb[33].mxu1 }
 0x34d   :  { %v19575_v12 = vadd.f32 %v19395_v41, %v8627_v1 }
 0x34e   :  { %21283 = vst [vmem:[#allocation41_spill] sm:$0xff] %v19572_v20  ;;  %v21121_v22 = vmax.f32 %v19572_v20, 0.0 }
 0x34f   :  { %21284 = vst [vmem:[#allocation42_spill] sm:$0xff] %v19575_v12  ;;  %v21122_v21 = vmax.f32 %v19575_v12, 0.0  ;;  %v14975_v10 = vpop.f32.mrb[34].mxu1 }
 0x350   :  { %8843 = vst.msk [vmem:[#allocation2 + $0x21] sm:$0xff] %vm33_vm2, %v21121_v22  ;;  %v19583_v57 = vadd.f32 %v14975_v10, %v19395_v41  ;;  %v8637_v7 = vpop.f32.mrb[35].mxu1 }
 0x351   :  { %8842 = vst.msk [vmem:[#allocation2 + $0x11] sm:$0xff] %vm33_vm2, %v21122_v21  ;;  %v19589_v51 = vadd.f32 %v19395_v41, %v8637_v7 }
 0x352   :  { %21285 = vst [vmem:[#allocation43_spill] sm:$0xff] %v19583_v57  ;;  %v21125_v1 = vmax.f32 %v19583_v57, 0.0 }
 0x353   :  { %21286 = vst [vmem:[#allocation44_spill] sm:$0xff] %v19589_v51  ;;  %v21127_v26 = vmax.f32 %v19589_v51, 0.0  ;;  %v14978_v58 = vpop.f32.mrb[36].mxu1 }
 0x354   :  { %8845 = vst.msk [vmem:[#allocation2 + $0x41] sm:$0xff] %vm33_vm2, %v21125_v1  ;;  %v19597_v10 = vadd.f32 %v14978_v58, %v19395_v41  ;;  %v8647_v22 = vpop.f32.mrb[37].mxu1 }
 0x355   :  { %8844 = vst.msk [vmem:[#allocation2 + $0x31] sm:$0xff] %vm33_vm2, %v21127_v26  ;;  %v19603_v7 = vadd.f32 %v19395_v41, %v8647_v22  ;;  %v19618_v22 = vld [vmem:[%s21007_s3 + $0x18] sm:$0xff] }
 0x356   :  { %21287 = vst [vmem:[#allocation45_spill] sm:$0xff] %v19597_v10  ;;  %v21128_v21 = vmax.f32 %v19597_v10, 0.0 }
 0x357   :  { %21288 = vst [vmem:[#allocation46_spill] sm:$0xff] %v19603_v7  ;;  %v21131_v12 = vmax.f32 %v19603_v7, 0.0  ;;  %v14981_v19 = vpop.f32.mrb[38].mxu1 }
 0x358   :  { %8847 = vst.msk [vmem:[#allocation2 + $0x61] sm:$0xff] %vm33_vm2, %v21128_v21  ;;  %v19611_v58 = vadd.f32 %v14981_v19, %v19395_v41  ;;  %v8657_v1 = vpop.f32.mrb[39].mxu1  ;;  %v19613_v47 = vld [vmem:[#allocation2 + $0x10] sm:$0xff]  ;;  %v19628_v19 = vld [vmem:[#allocation2 + $0x20] sm:$0xff] }
 0x359   :  { %8846 = vst.msk [vmem:[#allocation2 + $0x51] sm:$0xff] %vm33_vm2, %v21131_v12  ;;  %v19624_v26 = vadd.f32 %v19395_v41, %v8657_v1  ;;  %15023 = vmatmul.mubr.msk.f32.vlgmr.msra.gmra.mrb[32].mxu0 %vm33_vm2, %v19613_v47 }
 0x35a   :  { %21289 = vst [vmem:[#allocation47_spill] sm:$0xff] %v19611_v58  ;;  %v21134_v21 = vmax.f32 %v19611_v58, 0.0  ;;  %15025 = vmatprep.mubr.msk.f32.mxu0 %vm33_vm2, %v19628_v19  ;;  %15047 = vmatpush3.msra.mxu0 %v13040_v5 }
 0x35b   :  { %21290 = vst [vmem:[#allocation48_spill] sm:$0xff] %v19624_v26  ;;  %v21136_v51 = vmax.f32 %v19624_v26, 0.0  ;;  %v14984_v3 = vpop.f32.mrb[40].mxu1  ;;  %15072 = vmatprep.subr.mxu0 %v19618_v22  ;;  %v19651_v33 = vld [vmem:[#allocation2 + $0x40] sm:$0xff] }
 0x35c   :  { %8849 = vst.msk [vmem:[#allocation2 + $0x81] sm:$0xff] %vm33_vm2, %v21134_v21  ;;  %v19639_v1 = vadd.f32 %v14984_v3, %v19395_v41  ;;  %v8667_v12 = vpop.f32.mrb[41].mxu1  ;;  %v19641_v7 = vld [vmem:[#allocation2 + $0x30] sm:$0xff] }
 0x35d   :  { %8848 = vst.msk [vmem:[#allocation2 + $0x71] sm:$0xff] %vm33_vm2, %v21136_v51  ;;  %v19647_v5 = vadd.f32 %v19395_v41, %v8667_v12  ;;  %15026 = vmatmul.mubr.msk.f32.gmra.mrb[34].mxu0 %vm33_vm2, %v19641_v7  ;;  %v19759_v57 = vld [vmem:[#allocation2 + $0x31] sm:$0xff] }
 0x35e   :  { %21291 = vst [vmem:[#allocation49_spill] sm:$0xff] %v19639_v1  ;;  %v21140_v21 = vmax.f32 %v19639_v1, 0.0  ;;  %15028 = vmatprep.mubr.msk.f32.mxu0 %vm33_vm2, %v19651_v33  ;;  %v8866_v1 = vld [vmem:[#allocation2 + $0x90] sm:$0xff] }
 0x35f   :  { %21292 = vst [vmem:[#allocation50_spill] sm:$0xff] %v19647_v5  ;;  %v21143_v3 = vmax.f32 %v19647_v5, 0.0  ;;  %v14987_v44 = vpop.f32.mrb[42].mxu1  ;;  %v19673_v28 = vld [vmem:[#allocation2 + $0x60] sm:$0xff] }
 0x360   :  { %8851 = vst.msk [vmem:[#allocation2 + $0xb1] sm:$0xff] %vm33_vm2, %v21140_v21  ;;  %v19661_v12 = vadd.f32 %v14987_v44, %v19395_v41  ;;  %v8677_v51 = vpop.f32.mrb[43].mxu1  ;;  %v19663_v26 = vld [vmem:[#allocation2 + $0x50] sm:$0xff]  ;;  %v19771_v37 = vld [vmem:[#allocation2 + $0x61] sm:$0xff] }
 0x361   :  { %8850 = vst.msk [vmem:[#allocation2 + $0xa1] sm:$0xff] %vm33_vm2, %v21143_v3  ;;  %v19669_v4 = vadd.f32 %v19395_v41, %v8677_v51  ;;  %15029 = vmatmul.mubr.msk.f32.gmra.mrb[36].mxu0 %vm33_vm2, %v19663_v26  ;;  %v19767_v20 = vld [vmem:[#allocation2 + $0x51] sm:$0xff] }
 0x362   :  { %21293 = vst [vmem:[#allocation51_spill] sm:$0xff] %v19661_v12  ;;  %v21147_v21 = vmax.f32 %v19661_v12, 0.0  ;;  %15031 = vmatprep.mubr.msk.f32.mxu0 %vm33_vm2, %v19673_v28 }
 0x363   :  { %21294 = vst [vmem:[#allocation52_spill] sm:$0xff] %v19669_v4  ;;  %v21149_v44 = vmax.f32 %v19669_v4, 0.0  ;;  %v14990_v27 = vpop.f32.mrb[44].mxu1 }
 0x364   :  { %8853 = vst.msk [vmem:[#allocation2 + $0xd1] sm:$0xff] %vm33_vm2, %v21147_v21  ;;  %v19683_v51 = vadd.f32 %v14990_v27, %v19395_v41  ;;  %v8687_v3 = vpop.f32.mrb[45].mxu1  ;;  %v19685_v5 = vld [vmem:[#allocation2 + $0x70] sm:$0xff] }
 0x365   :  { %8852 = vst.msk [vmem:[#allocation2 + $0xc1] sm:$0xff] %vm33_vm2, %v21149_v44  ;;  %v19691_v58 = vadd.f32 %v19395_v41, %v8687_v3  ;;  %15032 = vmatmul.mubr.msk.f32.gmra.mrb[38].mxu0 %vm33_vm2, %v19685_v5  ;;  %v19775_v29 = vld [vmem:[#allocation2 + $0x71] sm:$0xff] }
 0x366   :  { %21295 = vst [vmem:[#allocation53_spill] sm:$0xff] %v19683_v51  ;;  %v21151_v12 = vmax.f32 %v19683_v51, 0.0  ;;  %15034 = vmatprep.mubr.msk.f32.mxu0 %vm33_vm2, %v8866_v1  ;;  %v19747_v51 = vld [vmem:[#allocation2 + $0x11] sm:$0xff] }
 0x367   :  { %21296 = vst [vmem:[#allocation54_spill] sm:$0xff] %v19691_v58  ;;  %v21152_v27 = vmax.f32 %v19691_v58, 0.0  ;;  %v14993_v21 = vpop.f32.mrb[46].mxu1  ;;  %v19714_v1 = vld [vmem:[#allocation2 + $0xb0] sm:$0xff]  ;;  %v19754_v58 = vld [vmem:[#allocation2 + $0x21] sm:$0xff] }
 0x368   :  { %8855 = vst.msk [vmem:[#allocation2 + $0xf1] sm:$0xff] %vm33_vm2, %v21151_v12  ;;  %v19702_v4 = vadd.f32 %v14993_v21, %v19395_v41  ;;  %v8697_v44 = vpop.f32.mrb[47].mxu1  ;;  %v19704_v3 = vld [vmem:[#allocation2 + $0xa0] sm:$0xff]  ;;  %v19784_v38 = vld [vmem:[#allocation2 + $0xb1] sm:$0xff] }
 0x369   :  { %8854 = vst.msk [vmem:[#allocation2 + $0xe1] sm:$0xff] %vm33_vm2, %v21152_v27  ;;  %v19710_v10 = vadd.f32 %v19395_v41, %v8697_v44  ;;  %15035 = vmatmul.mubr.msk.f32.gmra.mrb[40].mxu0 %vm33_vm2, %v19704_v3  ;;  %v19780_v8 = vld [vmem:[#allocation2 + $0xa1] sm:$0xff] }
 0x36a   :  { %21297 = vst [vmem:[#allocation55_spill] sm:$0xff] %v19702_v4  ;;  %v21153_v12 = vmax.f32 %v19702_v4, 0.0  ;;  %15037 = vmatprep.mubr.msk.f32.mxu0 %vm33_vm2, %v19714_v1  ;;  %v9280_v4 = vld [vmem:[#allocation2 + $0x1] sm:$0xff] }
 0x36b   :  { %21298 = vst [vmem:[#allocation56_spill] sm:$0xff] %v19710_v10  ;;  %v21155_v21 = vmax.f32 %v19710_v10, 0.0  ;;  %v19730_v41 = vld [vmem:[#allocation2 + $0xd0] sm:$0xff]  ;;  %v13074_v10 = vld [vmem:[%s21007_s3 + $0x20] sm:$0xff] }
 0x36c   :  { %8857 = vst.msk [vmem:[#allocation2 + $0x111] sm:$0xff] %vm33_vm2, %v21153_v12  ;;  %v19723_v27 = vld [vmem:[#allocation2 + $0xc0] sm:$0xff]  ;;  %v19792_v60 = vld [vmem:[#allocation2 + $0xd1] sm:$0xff] }
 0x36d   :  { %8856 = vst.msk [vmem:[#allocation2 + $0x101] sm:$0xff] %vm33_vm2, %v21155_v21  ;;  %15038 = vmatmul.mubr.msk.f32.gmra.mrb[42].mxu0 %vm33_vm2, %v19723_v27  ;;  %v19788_v34 = vld [vmem:[#allocation2 + $0xc1] sm:$0xff] }
 0x36e   :  { %15040 = vmatprep.mubr.msk.f32.mxu0 %vm33_vm2, %v19730_v41 }
 0x36f   :  { %v19738_v12 = vld [vmem:[#allocation2 + $0xf0] sm:$0xff] }
 0x370   :  { %v19734_v44 = vld [vmem:[#allocation2 + $0xe0] sm:$0xff]  ;;  %v19800_v17 = vld [vmem:[#allocation2 + $0xf1] sm:$0xff] }
 0x371   :  { %15041 = vmatmul.mubr.msk.f32.gmra.mrb[44].mxu0 %vm33_vm2, %v19734_v44 }
 0x372   :  { %15043 = vmatprep.mubr.msk.f32.mxu0 %vm33_vm2, %v19738_v12 }
 0x374   :  { %v19742_v21 = vld [vmem:[#allocation2 + $0x100] sm:$0xff] }
 0x375   :  { %15044 = vmatmul.mubr.msk.f32.gmra.mrb[46].mxu0 %vm33_vm2, %v19742_v21  ;;  %v19804_v48 = vld [vmem:[#allocation2 + $0x101] sm:$0xff] }
 0x376   :  { %15048 = vmatprep.mubr.msk.f32.mxu0 %vm33_vm2, %v9280_v4  ;;  %v19763_v4 = vld [vmem:[#allocation2 + $0x41] sm:$0xff] }
 0x379   :  { %15049 = vmatmul.mubr.msk.f32.vlgmr.msra.gmra.mrb[32].mxu0 %vm33_vm2, %v19747_v51 }
 0x37a   :  { %15051 = vmatprep.mubr.msk.f32.mxu0 %vm33_vm2, %v19754_v58  ;;  %15073 = vmatpush3.msra.mxu0 %v19618_v22  ;;  %v9288_v22 = vld [vmem:[#allocation2 + $0x91] sm:$0xff] }
 0x37b   :  { %15098 = vmatprep.subr.mxu0 %v13074_v10 }
 0x37d   :  { %15052 = vmatmul.mubr.msk.f32.gmra.mrb[34].mxu0 %vm33_vm2, %v19759_v57 }
 0x37e   :  { %15054 = vmatprep.mubr.msk.f32.mxu0 %vm33_vm2, %v19763_v4 }
 0x381   :  { %15055 = vmatmul.mubr.msk.f32.gmra.mrb[36].mxu0 %vm33_vm2, %v19767_v20 }
 0x382   :  { %15057 = vmatprep.mubr.msk.f32.mxu0 %vm33_vm2, %v19771_v37 }
 0x385   :  { %15058 = vmatmul.mubr.msk.f32.gmra.mrb[38].mxu0 %vm33_vm2, %v19775_v29 }
 0x386   :  { %15060 = vmatprep.mubr.msk.f32.mxu0 %vm33_vm2, %v9288_v22  ;;  %v19796_v22 = vld [vmem:[#allocation2 + $0xe1] sm:$0xff] }
 0x389   :  { %15061 = vmatmul.mubr.msk.f32.gmra.mrb[40].mxu0 %vm33_vm2, %v19780_v8 }
 0x38a   :  { %15063 = vmatprep.mubr.msk.f32.mxu0 %vm33_vm2, %v19784_v38 }
 0x38d   :  { %15064 = vmatmul.mubr.msk.f32.gmra.mrb[42].mxu0 %vm33_vm2, %v19788_v34 }
 0x38e   :  { %15066 = vmatprep.mubr.msk.f32.mxu0 %vm33_vm2, %v19792_v60 }
 0x391   :  { %15067 = vmatmul.mubr.msk.f32.gmra.mrb[44].mxu0 %vm33_vm2, %v19796_v22 }
 0x392   :  { %15069 = vmatprep.mubr.msk.f32.mxu0 %vm33_vm2, %v19800_v17 }
 0x395   :  { %15070 = vmatmul.mubr.msk.f32.gmra.mrb[46].mxu0 %vm33_vm2, %v19804_v48 }
 0x396   :  { %15074 = vmatprep.mubr.msk.f32.mxu0 %vm33_vm2, %v9507_v49  ;;  %v9513_v49 = vld [vmem:[#allocation2 + $0x2a0] sm:$0xff] }
 0x399   :  { %15075 = vmatmul.mubr.msk.f32.vlgmr.msra.gmra.mrb[32].mxu0 %vm33_vm2, %v9508_v31  ;;  %v9515_v31 = vld [vmem:[#allocation2 + $0x2d0] sm:$0xff] }
 0x39a   :  { %15077 = vmatprep.mubr.msk.f32.mxu0 %vm33_vm2, %v9509_v53  ;;  %15099 = vmatpush3.msra.mxu0 %v13074_v10  ;;  %v9516_v53 = vld [vmem:[#allocation2 + $0x2e0] sm:$0xff]  ;;  %v9517_v10 = vld [vmem:[#allocation2 + $0x2f0] sm:$0xff] }
 0x39b   :  { %15124 = vmatprep.subr.mxu0 %v13091_v50 }
 0x39d   :  { %15078 = vmatmul.mubr.msk.f32.gmra.mrb[34].mxu0 %vm33_vm2, %v9510_v55  ;;  %v9518_v55 = vld [vmem:[#allocation2 + $0x300] sm:$0xff] }
 0x39e   :  { %15080 = vmatprep.mubr.msk.f32.mxu0 %vm33_vm2, %v9511_v11  ;;  %v9519_v11 = vld [vmem:[#allocation2 + $0x310] sm:$0xff] }
 0x3a1   :  { %15081 = vmatmul.mubr.msk.f32.gmra.mrb[36].mxu0 %vm33_vm2, %v9512_v6  ;;  %v9520_v6 = vld [vmem:[#allocation2 + $0x320] sm:$0xff] }
 0x3a2   :  { %15083 = vmatprep.mubr.msk.f32.mxu0 %vm33_vm2, %v9513_v49  ;;  %v9521_v49 = vld [vmem:[#allocation2 + $0x330] sm:$0xff] }
 0x3a5   :  { %15084 = vmatmul.mubr.msk.f32.gmra.mrb[38].mxu0 %vm33_vm2, %v9514_v16  ;;  %v9522_v16 = vld [vmem:[#allocation2 + $0x340] sm:$0xff] }
 0x3a6   :  { %15086 = vmatprep.mubr.msk.f32.mxu0 %vm33_vm2, %v9515_v31  ;;  %v9734_v31 = vld [vmem:[#allocation2 + $0x360] sm:$0xff] }
 0x3a9   :  { %15087 = vmatmul.mubr.msk.f32.gmra.mrb[40].mxu0 %vm33_vm2, %v9516_v53  ;;  %v9735_v53 = vld [vmem:[#allocation2 + $0x370] sm:$0xff] }
 0x3aa   :  { %15089 = vmatprep.mubr.msk.f32.mxu0 %vm33_vm2, %v9517_v10  ;;  %v13108_v10 = vld [vmem:[%s21007_s3 + $0x30] sm:$0xff] }
 0x3ad   :  { %15090 = vmatmul.mubr.msk.f32.gmra.mrb[42].mxu0 %vm33_vm2, %v9518_v55  ;;  %v9736_v55 = vld [vmem:[#allocation2 + $0x380] sm:$0xff] }
 0x3ae   :  { %15092 = vmatprep.mubr.msk.f32.mxu0 %vm33_vm2, %v9519_v11  ;;  %v9737_v11 = vld [vmem:[#allocation2 + $0x390] sm:$0xff] }
 0x3b1   :  { %15093 = vmatmul.mubr.msk.f32.gmra.mrb[44].mxu0 %vm33_vm2, %v9520_v6  ;;  %v9738_v6 = vld [vmem:[#allocation2 + $0x3a0] sm:$0xff] }
 0x3b2   :  { %15095 = vmatprep.mubr.msk.f32.mxu0 %vm33_vm2, %v9521_v49  ;;  %v9739_v49 = vld [vmem:[#allocation2 + $0x3b0] sm:$0xff] }
 0x3b5   :  { %15096 = vmatmul.mubr.msk.f32.gmra.mrb[46].mxu0 %vm33_vm2, %v9522_v16  ;;  %v9740_v16 = vld [vmem:[#allocation2 + $0x3c0] sm:$0xff] }
 0x3b6   :  { %15100 = vmatprep.mubr.msk.f32.mxu0 %vm33_vm2, %v9734_v31  ;;  %v9741_v31 = vld [vmem:[#allocation2 + $0x3d0] sm:$0xff] }
 0x3b9   :  { %15101 = vmatmul.mubr.msk.f32.vlgmr.msra.gmra.mrb[32].mxu0 %vm33_vm2, %v9735_v53  ;;  %v9742_v53 = vld [vmem:[#allocation2 + $0x3f0] sm:$0xff] }
 0x3ba   :  { %15103 = vmatprep.mubr.msk.f32.mxu0 %vm33_vm2, %v9736_v55  ;;  %15125 = vmatpush3.msra.mxu0 %v13091_v50  ;;  %v9743_v50 = vld [vmem:[#allocation2 + $0x400] sm:$0xff]  ;;  %v9744_v55 = vld [vmem:[#allocation2 + $0x410] sm:$0xff] }
 0x3bb   :  { %15150 = vmatprep.subr.mxu0 %v13108_v10 }
 0x3bd   :  { %15104 = vmatmul.mubr.msk.f32.gmra.mrb[34].mxu0 %vm33_vm2, %v9737_v11  ;;  %v9745_v11 = vld [vmem:[#allocation2 + $0x420] sm:$0xff] }
 0x3be   :  { %15106 = vmatprep.mubr.msk.f32.mxu0 %vm33_vm2, %v9738_v6  ;;  %v9746_v6 = vld [vmem:[#allocation2 + $0x430] sm:$0xff] }
 0x3c1   :  { %15107 = vmatmul.mubr.msk.f32.gmra.mrb[36].mxu0 %vm33_vm2, %v9739_v49  ;;  %v9747_v49 = vld [vmem:[#allocation2 + $0x440] sm:$0xff] }
 0x3c2   :  { %15109 = vmatprep.mubr.msk.f32.mxu0 %vm33_vm2, %v9740_v16  ;;  %v9748_v16 = vld [vmem:[#allocation2 + $0x450] sm:$0xff] }
 0x3c5   :  { %15110 = vmatmul.mubr.msk.f32.gmra.mrb[38].mxu0 %vm33_vm2, %v9741_v31  ;;  %v9749_v31 = vld [vmem:[#allocation2 + $0x460] sm:$0xff] }
 0x3c6   :  { %15112 = vmatprep.mubr.msk.f32.mxu0 %vm33_vm2, %v9742_v53  ;;  %v9961_v53 = vld [vmem:[#allocation2 + $0x241] sm:$0xff] }
 0x3c9   :  { %15113 = vmatmul.mubr.msk.f32.gmra.mrb[40].mxu0 %vm33_vm2, %v9743_v50  ;;  %v9962_v50 = vld [vmem:[#allocation2 + $0x251] sm:$0xff] }
 0x3ca   :  { %15115 = vmatprep.mubr.msk.f32.mxu0 %vm33_vm2, %v9744_v55  ;;  %v13125_v55 = vld [vmem:[%s21007_s3 + $0x38] sm:$0xff] }
 0x3cd   :  { %15116 = vmatmul.mubr.msk.f32.gmra.mrb[42].mxu0 %vm33_vm2, %v9745_v11  ;;  %v9963_v11 = vld [vmem:[#allocation2 + $0x261] sm:$0xff] }
 0x3ce   :  { %15118 = vmatprep.mubr.msk.f32.mxu0 %vm33_vm2, %v9746_v6  ;;  %v9964_v6 = vld [vmem:[#allocation2 + $0x271] sm:$0xff] }
 0x3d1   :  { %15119 = vmatmul.mubr.msk.f32.gmra.mrb[44].mxu0 %vm33_vm2, %v9747_v49  ;;  %v9965_v49 = vld [vmem:[#allocation2 + $0x281] sm:$0xff] }
 0x3d2   :  { %15121 = vmatprep.mubr.msk.f32.mxu0 %vm33_vm2, %v9748_v16  ;;  %v9966_v16 = vld [vmem:[#allocation2 + $0x291] sm:$0xff] }
 0x3d5   :  { %15122 = vmatmul.mubr.msk.f32.gmra.mrb[46].mxu0 %vm33_vm2, %v9749_v31  ;;  %v9967_v31 = vld [vmem:[#allocation2 + $0x2a1] sm:$0xff] }
 0x3d6   :  { %15126 = vmatprep.mubr.msk.f32.mxu0 %vm33_vm2, %v9961_v53  ;;  %v9968_v53 = vld [vmem:[#allocation2 + $0x2b1] sm:$0xff] }
 0x3d9   :  { %15127 = vmatmul.mubr.msk.f32.vlgmr.msra.gmra.mrb[32].mxu0 %vm33_vm2, %v9962_v50  ;;  %v9969_v50 = vld [vmem:[#allocation2 + $0x2d1] sm:$0xff] }
 0x3da   :  { %15129 = vmatprep.mubr.msk.f32.mxu0 %vm33_vm2, %v9963_v11  ;;  %15151 = vmatpush3.msra.mxu0 %v13108_v10  ;;  %v9970_v10 = vld [vmem:[#allocation2 + $0x2e1] sm:$0xff]  ;;  %v9971_v11 = vld [vmem:[#allocation2 + $0x2f1] sm:$0xff] }
 0x3db   :  { %15176 = vmatprep.subr.mxu0 %v13125_v55 }
 0x3dd   :  { %15130 = vmatmul.mubr.msk.f32.gmra.mrb[34].mxu0 %vm33_vm2, %v9964_v6  ;;  %v9972_v6 = vld [vmem:[#allocation2 + $0x301] sm:$0xff] }
 0x3de   :  { %15132 = vmatprep.mubr.msk.f32.mxu0 %vm33_vm2, %v9965_v49  ;;  %v9973_v49 = vld [vmem:[#allocation2 + $0x311] sm:$0xff] }
 0x3e1   :  { %15133 = vmatmul.mubr.msk.f32.gmra.mrb[36].mxu0 %vm33_vm2, %v9966_v16  ;;  %v9974_v16 = vld [vmem:[#allocation2 + $0x321] sm:$0xff] }
 0x3e2   :  { %15135 = vmatprep.mubr.msk.f32.mxu0 %vm33_vm2, %v9967_v31  ;;  %v9975_v31 = vld [vmem:[#allocation2 + $0x331] sm:$0xff] }
 0x3e5   :  { %15136 = vmatmul.mubr.msk.f32.gmra.mrb[38].mxu0 %vm33_vm2, %v9968_v53  ;;  %v9976_v53 = vld [vmem:[#allocation2 + $0x341] sm:$0xff] }
 0x3e6   :  { %15138 = vmatprep.mubr.msk.f32.mxu0 %vm33_vm2, %v9969_v50  ;;  %v13142_v50 = vld [vmem:[%s21007_s3 + $0x40] sm:$0xff] }
 0x3e9   :  { %15139 = vmatmul.mubr.msk.f32.gmra.mrb[40].mxu0 %vm33_vm2, %v9970_v10 }
 0x3ea   :  { %15141 = vmatprep.mubr.msk.f32.mxu0 %vm33_vm2, %v9971_v11 }
 0x3ed   :  { %15142 = vmatmul.mubr.msk.f32.gmra.mrb[42].mxu0 %vm33_vm2, %v9972_v6 }
 0x3ee   :  { %15144 = vmatprep.mubr.msk.f32.mxu0 %vm33_vm2, %v9973_v49 }
 0x3f1   :  { %15145 = vmatmul.mubr.msk.f32.gmra.mrb[44].mxu0 %vm33_vm2, %v9974_v16 }
 0x3f2   :  { %15147 = vmatprep.mubr.msk.f32.mxu0 %vm33_vm2, %v9975_v31 }
 0x3f5   :  { %15148 = vmatmul.mubr.msk.f32.gmra.mrb[46].mxu0 %vm33_vm2, %v9976_v53 }
 0x3f6   :  { %15152 = vmatprep.mubr.msk.f32.mxu0 %vm33_vm2, %v19613_v47  ;;  %v10195_v47 = vld [vmem:[#allocation2 + $0x80] sm:$0xff] }
 0x3f9   :  { %15153 = vmatmul.mubr.msk.f32.vlgmr.msra.gmra.mrb[32].mxu0 %vm33_vm2, %v19628_v19 }
 0x3fa   :  { %15155 = vmatprep.mubr.msk.f32.mxu0 %vm33_vm2, %v19641_v7  ;;  %15177 = vmatpush3.msra.mxu0 %v13125_v55 }
 0x3fb   :  { %15202 = vmatprep.subr.mxu0 %v13142_v50 }
 0x3fd   :  { %15156 = vmatmul.mubr.msk.f32.gmra.mrb[34].mxu0 %vm33_vm2, %v19651_v33  ;;  %v10422_v33 = vld [vmem:[#allocation2 + $0x1a0] sm:$0xff] }
 0x3fe   :  { %15158 = vmatprep.mubr.msk.f32.mxu0 %vm33_vm2, %v19663_v26 }
 0x401   :  { %15159 = vmatmul.mubr.msk.f32.gmra.mrb[36].mxu0 %vm33_vm2, %v19673_v28  ;;  %v10203_v28 = vld [vmem:[#allocation2 + $0x110] sm:$0xff] }
 0x402   :  { %15161 = vmatprep.mubr.msk.f32.mxu0 %vm33_vm2, %v19685_v5 }
 0x405   :  { %15162 = vmatmul.mubr.msk.f32.gmra.mrb[38].mxu0 %vm33_vm2, %v10195_v47 }
 0x406   :  { %15164 = vmatprep.mubr.msk.f32.mxu0 %vm33_vm2, %v19704_v3 }
 0x409   :  { %15165 = vmatmul.mubr.msk.f32.gmra.mrb[40].mxu0 %vm33_vm2, %v19714_v1 }
 0x40a   :  { %15167 = vmatprep.mubr.msk.f32.mxu0 %vm33_vm2, %v19723_v27 }
 0x40d   :  { %15168 = vmatmul.mubr.msk.f32.gmra.mrb[42].mxu0 %vm33_vm2, %v19730_v41 }
 0x40e   :  { %15170 = vmatprep.mubr.msk.f32.mxu0 %vm33_vm2, %v19734_v44 }
 0x411   :  { %15171 = vmatmul.mubr.msk.f32.gmra.mrb[44].mxu0 %vm33_vm2, %v19738_v12 }
 0x412   :  { %15173 = vmatprep.mubr.msk.f32.mxu0 %vm33_vm2, %v19742_v21 }
 0x415   :  { %15174 = vmatmul.mubr.msk.f32.gmra.mrb[46].mxu0 %vm33_vm2, %v10203_v28 }
 0x416   :  { %15178 = vmatprep.mubr.msk.f32.mxu0 %vm33_vm2, %v19439_v43 }
 0x419   :  { %15179 = vmatmul.mubr.msk.f32.vlgmr.msra.gmra.mrb[32].mxu0 %vm33_vm2, %v19449_v0 }
 0x41a   :  { %15181 = vmatprep.mubr.msk.f32.mxu0 %vm33_vm2, %v19462_v52  ;;  %15203 = vmatpush3.msra.mxu0 %v13142_v50 }
 0x41d   :  { %15182 = vmatmul.mubr.msk.f32.gmra.mrb[34].mxu0 %vm33_vm2, %v19472_v13 }
 0x41e   :  { %15184 = vmatprep.mubr.msk.f32.mxu0 %vm33_vm2, %v19484_v25 }
 0x421   :  { %15185 = vmatmul.mubr.msk.f32.gmra.mrb[36].mxu0 %vm33_vm2, %v19494_v32  ;;  %v10430_v32 = vld [vmem:[#allocation2 + $0x230] sm:$0xff] }
 0x422   :  { %15187 = vmatprep.mubr.msk.f32.mxu0 %vm33_vm2, %v19506_v56 }
 0x425   :  { %15188 = vmatmul.mubr.msk.f32.gmra.mrb[38].mxu0 %vm33_vm2, %v10422_v33 }
 0x426   :  { %15190 = vmatprep.mubr.msk.f32.mxu0 %vm33_vm2, %v19525_v9 }
 0x429   :  { %15191 = vmatmul.mubr.msk.f32.gmra.mrb[40].mxu0 %vm33_vm2, %v19535_v15 }
 0x42a   :  { %15193 = vmatprep.mubr.msk.f32.mxu0 %vm33_vm2, %v19544_v39 }
 0x42d   :  { %15194 = vmatmul.mubr.msk.f32.gmra.mrb[42].mxu0 %vm33_vm2, %v19551_v42 }
 0x42e   :  { %15196 = vmatprep.mubr.msk.f32.mxu0 %vm33_vm2, %v19555_v63  ;;  %v10649_v63 = vld [vmem:[#allocation2 + $0x81] sm:$0xff] }
 0x431   :  { %15197 = vmatmul.mubr.msk.f32.gmra.mrb[44].mxu0 %vm33_vm2, %v19559_v40 }
 0x432   :  { %15199 = vmatprep.mubr.msk.f32.mxu0 %vm33_vm2, %v19563_v24 }
 0x435   :  { %15200 = vmatmul.mubr.msk.f32.gmra.mrb[46].mxu0 %vm33_vm2, %v10430_v32 }
 0x436   :  { %15204 = vmatprep.mubr.msk.f32.mxu0 %vm33_vm2, %v19747_v51 }
 0x439   :  { %15205 = vmatmul.mubr.msk.f32.vlgmr.msra.gmra.mrb[32].mxu0 %vm33_vm2, %v19754_v58 }
 0x43a   :  { %15207 = vmatprep.mubr.msk.f32.mxu0 %vm33_vm2, %v19759_v57 }
 0x43d   :  { %15208 = vmatmul.mubr.msk.f32.gmra.mrb[34].mxu0 %vm33_vm2, %v19763_v4 }
 0x43e   :  { %15210 = vmatprep.mubr.msk.f32.mxu0 %vm33_vm2, %v19767_v20  ;;  %v10657_v20 = vld [vmem:[#allocation2 + $0x111] sm:$0xff] }
 0x441   :  { %15211 = vmatmul.mubr.msk.f32.gmra.mrb[36].mxu0 %vm33_vm2, %v19771_v37  ;;  %v19961_v37 = vld [vmem:[%s21008_s4] ss:$0 sm:$0xff] }
 0x442   :  { %15213 = vmatprep.mubr.msk.f32.mxu0 %vm33_vm2, %v19775_v29 }
 0x445   :  { %15214 = vmatmul.mubr.msk.f32.gmra.mrb[38].mxu0 %vm33_vm2, %v10649_v63 }
 0x446   :  { %15216 = vmatprep.mubr.msk.f32.mxu0 %vm33_vm2, %v19780_v8 }
 0x449   :  { %15217 = vmatmul.mubr.msk.f32.gmra.mrb[40].mxu0 %vm33_vm2, %v19784_v38 }
 0x44a   :  { %15219 = vmatprep.mubr.msk.f32.mxu0 %vm33_vm2, %v19788_v34 }
 0x44d   :  { %15220 = vmatmul.mubr.msk.f32.gmra.mrb[42].mxu0 %vm33_vm2, %v19792_v60 }
 0x44e   :  { %15222 = vmatprep.mubr.msk.f32.mxu0 %vm33_vm2, %v19796_v22 }
 0x451   :  { %15223 = vmatmul.mubr.msk.f32.gmra.mrb[44].mxu0 %vm33_vm2, %v19800_v17 }
 0x452   :  { %15225 = vmatprep.mubr.msk.f32.mxu0 %vm33_vm2, %v19804_v48 }
 0x455   :  { %15226 = vmatmul.mubr.msk.f32.gmra.mrb[46].mxu0 %vm33_vm2, %v10657_v20 }
 0x50c   :  { %v15206_v26 = vpop.f32.mrb[32].mxu0 }
 0x50d   :  { %v10877_v40 = vadd.f32 %v15206_v26, %v19961_v37  ;;  %v10774_v60 = vpop.f32.mrb[33].mxu0 }
 0x50e   :  { %v10876_v57 = vadd.f32 %v19961_v37, %v10774_v60 }
 0x50f   :  { %v10893_v25 = vmax.f32 %v10877_v40, 0.0 }
 0x510   :  { %v10892_v17 = vmax.f32 %v10876_v57, 0.0  ;;  %v15209_v34 = vpop.f32.mrb[34].mxu0 }
 0x511   :  { %v10879_v48 = vadd.f32 %v15209_v34, %v19961_v37  ;;  %v10784_v43 = vpop.f32.mrb[35].mxu0  ;;  %v10912_v0 = vsel %vm10908_vm4, %v10893_v25, 0.0 }
 0x512   :  { %v10878_v56 = vadd.f32 %v19961_v37, %v10784_v43  ;;  %v10909_v38 = vsel %vm10908_vm4, %v10892_v17, 0.0 }
 0x513   :  { %v10895_v52 = vmax.f32 %v10879_v48, 0.0  ;;  %10910 = vadd.xlane.f32.xlu0 %v10909_v38  ;;  %v11682_v13 = vadd.f32 %v10912_v0, %v10909_v38 }
 0x514   :  { %v10894_v8 = vmax.f32 %v10878_v56, 0.0  ;;  %v15212_v29 = vpop.f32.mrb[36].mxu0 }
 0x515   :  { %v10881_v39 = vadd.f32 %v15212_v29, %v19961_v37  ;;  %v10794_v9 = vpop.f32.mrb[37].mxu0  ;;  %v10918_v15 = vsel %vm10908_vm4, %v10895_v52, 0.0 }
 0x516   :  { %v10880_v24 = vadd.f32 %v19961_v37, %v10794_v9  ;;  %10919 = vadd.xlane.f32.xlu1 %v10918_v15  ;;  %v10915_v42 = vsel %vm10908_vm4, %v10894_v8, 0.0 }
 0x517   :  { %10913 = vadd.xlane.f32.xlu0 %v10912_v0  ;;  %v11683_v7 = vadd.f32 %v11682_v13, %v10915_v42  ;;  %v10897_v58 = vmax.f32 %v10881_v39, 0.0 }
 0x518   :  { %v10896_v19 = vmax.f32 %v10880_v24, 0.0  ;;  %v15215_v5 = vpop.f32.mrb[38].mxu0 }
 0x519   :  { %v10883_v12 = vadd.f32 %v15215_v5, %v19961_v37  ;;  %v10804_v51 = vpop.f32.mrb[39].mxu0  ;;  %v11684_v27 = vadd.f32 %v11683_v7, %v10918_v15  ;;  %v10924_v22 = vsel %vm10908_vm4, %v10897_v58, 0.0 }
 0x51a   :  { %v10882_v3 = vadd.f32 %v19961_v37, %v10804_v51  ;;  %10916 = vadd.xlane.f32.xlu1 %v10915_v42  ;;  %v10921_v1 = vsel %vm10908_vm4, %v10896_v19, 0.0 }
 0x51b   :  { %10922 = vadd.xlane.f32.xlu0 %v10921_v1  ;;  %v11685_v21 = vadd.f32 %v11684_v27, %v10921_v1  ;;  %v10899_v41 = vmax.f32 %v10883_v12, 0.0 }
 0x51c   :  { %v10898_v44 = vmax.f32 %v10882_v3, 0.0  ;;  %v15218_v4 = vpop.f32.mrb[40].mxu0 }
 0x51d   :  { %v10885_v55 = vadd.f32 %v15218_v4, %v19961_v37  ;;  %v10814_v10 = vpop.f32.mrb[41].mxu0  ;;  %v11686_v11 = vadd.f32 %v11685_v21, %v10924_v22  ;;  %v10930_v47 = vsel %vm10908_vm4, %v10899_v41, 0.0  ;;  %v21299_v21 = vmax.f32 %v18346_v23, 0.0 }
 0x51e   :  { %v10884_v6 = vadd.f32 %v19961_v37, %v10814_v10  ;;  %10925 = vadd.xlane.f32.xlu1 %v10924_v22  ;;  %v10927_v49 = vsel %vm10908_vm4, %v10898_v44, 0.0  ;;  %v21302_v23 = vmax.f32 %v18405_v54, 0.0 }
 0x51f   :  { %v10901_v16 = vmax.f32 %v10885_v55, 0.0  ;;  %10928 = vadd.xlane.f32.xlu0 %v10927_v49  ;;  %v11687_v31 = vadd.f32 %v11686_v11, %v10927_v49  ;;  %v2265_v41 = vsel %vm33_vm2, %v21299_v21, 0.0  ;;  %v21300_v55 = vmax.f32 %v18354_v36, 0.0 }
 0x520   :  { %v10900_v53 = vmax.f32 %v10884_v6, 0.0  ;;  %v15221_v50 = vpop.f32.mrb[42].mxu0  ;;  %v21301_v11 = vmax.f32 %v18394_v45, 0.0  ;;  %v21304_v45 = vmax.f32 %v18444_v46, 0.0  ;;  %v21307_v46 = vmax.f32 %v18517_v61, 0.0 }
 0x521   :  { %v10887_v28 = vadd.f32 %v15221_v50, %v19961_v37  ;;  %v10824_v33 = vpop.f32.mrb[43].mxu0  ;;  %v11688_v32 = vadd.f32 %v11687_v31, %v10930_v47  ;;  %v10936_v63 = vsel %vm10908_vm4, %v10901_v16, 0.0  ;;  %v2262_v10 = vsel %vm33_vm2, %v21300_v55, 0.0  ;;  %v21332_v55 = vld [vmem:[#allocation16_spill] sm:$0xff] }
 0x522   :  { %v10886_v20 = vadd.f32 %v19961_v37, %v10824_v33  ;;  %10931 = vadd.xlane.f32.xlu1 %v10930_v47  ;;  %v10933_v26 = vsel %vm10908_vm4, %v10900_v53, 0.0  ;;  %v2271_v6 = vsel %vm33_vm2, %v21301_v11, 0.0  ;;  %v2268_v53 = vsel %vm33_vm2, %v21302_v23, 0.0 }
 0x523   :  { %10934 = vadd.xlane.f32.xlu0 %v10933_v26  ;;  %v11695_v40 = vadd.f32 %v10936_v63, %v10933_v26  ;;  %v10903_v60 = vmax.f32 %v10887_v28, 0.0  ;;  %v11689_v0 = vrot.slane %v11688_v32, 4  ;;  %v21303_v50 = vmax.f32 %v18435_v2, 0.0 }
 0x524   :  { %v10902_v57 = vmax.f32 %v10886_v20, 0.0  ;;  %v15224_v25 = vpop.f32.mrb[44].mxu0  ;;  %v21306_v2 = vmax.f32 %v18489_v14, 0.0  ;;  %v10974_v14 = vld [vmem:[%s21011_s7] sm:$0xff] }
 0x525   :  { %v10889_v17 = vadd.f32 %v15224_v25, %v19961_v37  ;;  %v10834_v34 = vpop.f32.mrb[45].mxu0  ;;  %v10942_v8 = vsel %vm10908_vm4, %v10903_v60, 0.0  ;;  %v11690_v42 = vadd.f32 %v11689_v0, %v11688_v32  ;;  %v2277_v36 = vsel %vm33_vm2, %v21303_v50, 0.0  ;;  %15260 = vmatprep.mubr.f32.mxu1 %v10974_v14  ;;  %v21312_v0 = vld [vmem:[#allocation27_spill] sm:$0xff]  ;;  %v21338_v50 = vld [vmem:[#allocation22_spill] sm:$0xff] }
 0x526   :  { %v10888_v48 = vadd.f32 %v19961_v37, %v10834_v34  ;;  %10937 = vadd.xlane.f32.xlu1 %v10936_v63  ;;  %v10939_v43 = vsel %vm10908_vm4, %v10902_v57, 0.0  ;;  %v2274_v32 = vsel %vm33_vm2, %v21304_v45, 0.0  ;;  %v21305_v63 = vmax.f32 %v18478_v59, 0.0 }
 0x527   :  { %10940 = vadd.xlane.f32.xlu0 %v10939_v43  ;;  %v11696_v56 = vadd.f32 %v11695_v40, %v10939_v43  ;;  %v10905_v38 = vmax.f32 %v10889_v17, 0.0  ;;  %v11691_v27 = vrot.slane %v11690_v42, 2  ;;  %v2280_v40 = vsel %vm33_vm2, %v21306_v2, 0.0 }
 0x528   :  { %v10904_v52 = vmax.f32 %v10888_v48, 0.0  ;;  %v15227_v13 = vpop.f32.mrb[46].mxu0  ;;  %v2283_v54 = vsel %vm33_vm2, %v21305_v63, 0.0  ;;  %v2289_v57 = vsel %vm33_vm2, %v21307_v46, 0.0  ;;  %v21308_v59 = vmax.f32 %v18526_v30, 0.0 }
 0x529   :  { %v10891_v29 = vadd.f32 %v15227_v13, %v19961_v37  ;;  %v10844_v39 = vpop.f32.mrb[47].mxu0  ;;  %v11697_v9 = vadd.f32 %v11696_v56, %v10942_v8  ;;  %v10948_v5 = vsel %vm10908_vm4, %v10905_v38, 0.0  ;;  %v11692_v44 = vadd.f32 %v11691_v27, %v11690_v42  ;;  %v21314_v38 = vld [vmem:[#allocation29_spill] sm:$0xff]  ;;  %v21326_v27 = vld [vmem:[#allocation10_spill] sm:$0xff] }
 0x52a   :  { %v10890_v15 = vadd.f32 %v19961_v37, %v10844_v39  ;;  %10943 = vadd.xlane.f32.xlu1 %v10942_v8  ;;  %v10945_v24 = vsel %vm10908_vm4, %v10904_v52, 0.0  ;;  %v2286_v25 = vsel %vm33_vm2, %v21308_v59, 0.0  ;;  %v21309_v17 = vmax.f32 %v18623_v18, 0.0  ;;  %v21318_v39 = vld [vmem:[#allocation33_spill] sm:$0xff] }
 0x52b   :  { %10946 = vadd.xlane.f32.xlu0 %v10945_v24  ;;  %v11698_v7 = vadd.f32 %v11697_v9, %v10945_v24  ;;  %v10907_v58 = vmax.f32 %v10891_v29, 0.0  ;;  %v11693_v49 = vrot.slane %v11692_v44, 1  ;;  %v21310_v48 = vmax.f32 %v18632_v35, 0.0  ;;  %v21316_v35 = vld [vmem:[#allocation31_spill] sm:$0xff]  ;;  %v21348_v59 = vld [vmem:[#allocation41_spill] sm:$0xff] }
 0x52c   :  { %v10906_v19 = vmax.f32 %v10890_v15, 0.0  ;;  %v2295_v34 = vsel %vm33_vm2, %v21309_v17, 0.0  ;;  %v21311_v30 = vmax.f32 %v18661_v62, 0.0  ;;  %v21313_v18 = vmax.f32 %v21312_v0, 0.0  ;;  %v21320_v15 = vld [vmem:[#allocation35_spill] sm:$0xff] }
 0x52d   :  { %v11699_v12 = vadd.f32 %v11698_v7, %v10948_v5  ;;  %v10954_v1 = vsel %vm10908_vm4, %v10907_v58, 0.0  ;;  %v11694_v47 = vadd.f32 %v11693_v49, %v11692_v44  ;;  %v2292_v61 = vsel %vm33_vm2, %v21310_v48, 0.0  ;;  %v21322_v7 = vld [vmem:[#allocation6_spill] sm:$0xff] }
 0x52e   :  { %10949 = vadd.xlane.f32.xlu1 %v10948_v5  ;;  %v10951_v51 = vsel %vm10908_vm4, %v10906_v19, 0.0  ;;  %v2301_v43 = vsel %vm33_vm2, %v21311_v30, 0.0  ;;  %v2298_v56 = vsel %vm33_vm2, %v21313_v18, 0.0  ;;  %v21315_v52 = vmax.f32 %v21314_v38, 0.0  ;;  %v21324_v5 = vld [vmem:[#allocation8_spill] sm:$0xff]  ;;  %v21330_v44 = vld [vmem:[#allocation14_spill] sm:$0xff] }
 0x52f   :  { %10952 = vadd.xlane.f32.xlu0 %v10951_v51  ;;  %v11700_v3 = vadd.f32 %v11699_v12, %v10951_v51  ;;  %v11709_v20 = vmul.f32 0.015625, %v11694_v47  ;;  %v21317_v8 = vmax.f32 %v21316_v35, 0.0  ;;  %v21319_v62 = vmax.f32 %v21318_v39, 0.0  ;;  %v21354_v18 = vld [vmem:[#allocation47_spill] sm:$0xff] }
 0x530   :  { %v2304_v13 = vsel %vm33_vm2, %v21315_v52, 0.0  ;;  %v21321_v24 = vmax.f32 %v21320_v15, 0.0  ;;  %v21323_v58 = vmax.f32 %v21322_v7, 0.0  ;;  %v21325_v12 = vmax.f32 %v21324_v5, 0.0 }
 0x531   :  { %v11701_v37 = vadd.f32 %v11700_v3, %v10954_v1  ;;  %v4429_v29 = vsel %vm33_vm2, %v21317_v8, 0.0  ;;  %v4435_v9 = vsel %vm33_vm2, %v21319_v62, 0.0  ;;  %v21327_v3 = vmax.f32 %v21326_v27, 0.0 }
 0x532   :  { %10955 = vadd.xlane.f32.xlu1 %v10954_v1  ;;  %v4441_v42 = vsel %vm33_vm2, %v21321_v24, 0.0  ;;  %v4450_v19 = vsel %vm33_vm2, %v21323_v58, 0.0  ;;  %v4456_v51 = vsel %vm33_vm2, %v21325_v12, 0.0 }
 0x533   :  { %v11702_v4 = vrot.slane %v11701_v37, 4  ;;  %2266 = vadd.xlane.f32.xlu0 %v2265_v41  ;;  %v4462_v1 = vsel %vm33_vm2, %v21327_v3, 0.0 }
 0x535   :  { %v11703_v22 = vadd.f32 %v11702_v4, %v11701_v37  ;;  %v21328_v37 = vld [vmem:[#allocation12_spill] sm:$0xff]  ;;  %v21331_v4 = vmax.f32 %v21330_v44, 0.0 }
 0x536   :  { %2263 = vadd.xlane.f32.xlu1 %v2262_v10  ;;  %v21329_v21 = vmax.f32 %v21328_v37, 0.0  ;;  %v21333_v10 = vmax.f32 %v21332_v55, 0.0 }
 0x537   :  { %v11704_v16 = vrot.slane %v11703_v22, 2  ;;  %2272 = vadd.xlane.f32.xlu0 %v2271_v6  ;;  %v21334_v6 = vld [vmem:[#allocation18_spill] sm:$0xff] }
 0x538   :  { %v4468_v41 = vsel %vm33_vm2, %v21329_v21, 0.0  ;;  %v6599_v11 = vsel %vm33_vm2, %v21333_v10, 0.0  ;;  %v21335_v49 = vmax.f32 %v21334_v6, 0.0 }
 0x539   :  { %v11705_v31 = vadd.f32 %v11704_v16, %v11703_v22  ;;  %v4474_v22 = vsel %vm33_vm2, %v21331_v4, 0.0 }
 0x53a   :  { %2269 = vadd.xlane.f32.xlu1 %v2268_v53  ;;  %v6605_v16 = vsel %vm33_vm2, %v21335_v49, 0.0 }
 0x53b   :  { %v11706_v28 = vrot.slane %v11705_v31, 1  ;;  %2278 = vadd.xlane.f32.xlu0 %v2277_v36  ;;  %v21339_v36 = vmax.f32 %v21338_v50, 0.0 }
 0x53d   :  { %v11707_v33 = vadd.f32 %v11706_v28, %v11705_v31  ;;  %v21336_v31 = vld [vmem:[#allocation20_spill] sm:$0xff]  ;;  %v6617_v47 = vsel %vm33_vm2, %v21339_v36, 0.0 }
 0x53e   :  { %2275 = vadd.xlane.f32.xlu1 %v2274_v32  ;;  %v21337_v23 = vmax.f32 %v21336_v31, 0.0  ;;  %v21340_v28 = vld [vmem:[#allocation24_spill] sm:$0xff]  ;;  %v21342_v32 = vld [vmem:[#allocation26_spill] sm:$0xff] }
 0x53f   :  { %v11710_v26 = vmul.f32 0.015625, %v11707_v33  ;;  %2284 = vadd.xlane.f32.xlu0 %v2283_v54  ;;  %v21341_v33 = vmax.f32 %v21340_v28, 0.0  ;;  %v21343_v63 = vmax.f32 %v21342_v32, 0.0 }
 0x540   :  { %v6611_v53 = vsel %vm33_vm2, %v21337_v23, 0.0 }
 0x541   :  { %v20019_v60 = vsel %vm11722_vm5, %v11710_v26, %v11709_v20  ;;  %v6623_v45 = vsel %vm33_vm2, %v21341_v33, 0.0  ;;  %v6629_v54 = vsel %vm33_vm2, %v21343_v63, 0.0  ;;  %v21344_v20 = vld [vmem:[#allocation37_spill] sm:$0xff] }
 0x542   :  { %2281 = vadd.xlane.f32.xlu1 %v2280_v40  ;;  %v21345_v26 = vmax.f32 %v21344_v20, 0.0  ;;  %v21346_v40 = vld [vmem:[#allocation39_spill] sm:$0xff] }
 0x543   :  { %2290 = vadd.xlane.f32.xlu0 %v2289_v57  ;;  %v21347_v46 = vmax.f32 %v21346_v40, 0.0 }
 0x544   :  { %v6635_v2 = vsel %vm33_vm2, %v21345_v26, 0.0 }
 0x545   :  { %v6641_v57 = vsel %vm33_vm2, %v21347_v46, 0.0  ;;  %v10975_v46 = vld [vmem:[%s21011_s7 + $0x8] sm:$0xff] }
 0x546   :  { %2287 = vadd.xlane.f32.xlu1 %v2286_v25  ;;  %v21349_v25 = vmax.f32 %v21348_v59, 0.0  ;;  %v10976_v59 = vld [vmem:[%s21011_s7 + $0x10] sm:$0xff] }
 0x547   :  { %2296 = vadd.xlane.f32.xlu0 %v2295_v34  ;;  %v21350_v34 = vld [vmem:[#allocation43_spill] sm:$0xff] }
 0x548   :  { %v8764_v17 = vsel %vm33_vm2, %v21349_v25, 0.0  ;;  %v21351_v14 = vmax.f32 %v21350_v34, 0.0 }
 0x54a   :  { %2293 = vadd.xlane.f32.xlu1 %v2292_v61  ;;  %v8770_v48 = vsel %vm33_vm2, %v21351_v14, 0.0  ;;  %v21352_v61 = vld [vmem:[#allocation45_spill] sm:$0xff] }
 0x54b   :  { %2302 = vadd.xlane.f32.xlu0 %v2301_v43  ;;  %v21353_v30 = vmax.f32 %v21352_v61, 0.0  ;;  %v10977_v14 = vld [vmem:[%s21011_s7 + $0x18] sm:$0xff]  ;;  %v10978_v61 = vld [vmem:[%s21011_s7 + $0x20] sm:$0xff] }
 0x54d   :  { %v8776_v43 = vsel %vm33_vm2, %v21353_v30, 0.0 }
 0x54e   :  { %2299 = vadd.xlane.f32.xlu1 %v2298_v56  ;;  %v21355_v56 = vmax.f32 %v21354_v18, 0.0  ;;  %v10979_v18 = vld [vmem:[%s21011_s7 + $0x28] sm:$0xff] }
 0x550   :  { %v8782_v38 = vsel %vm33_vm2, %v21355_v56, 0.0 }
 0x552   :  { %2305 = vadd.xlane.f32.xlu1 %v2304_v13 }
 0x556   :  { %4430 = vadd.xlane.f32.xlu1 %v4429_v29  ;;  %v21356_v29 = vld [vmem:[#allocation49_spill] sm:$0xff] }
 0x557   :  { %v21357_v39 = vmax.f32 %v21356_v29, 0.0 }
 0x559   :  { %v8788_v62 = vsel %vm33_vm2, %v21357_v39, 0.0  ;;  %v10982_v39 = vld [vmem:[%s21011_s7 + $0x40] sm:$0xff] }
 0x55a   :  { %4436 = vadd.xlane.f32.xlu1 %v4435_v9 }
 0x55e   :  { %4442 = vadd.xlane.f32.xlu1 %v4441_v42 }
 0x562   :  { %4451 = vadd.xlane.f32.xlu1 %v4450_v19 }
 0x566   :  { %4457 = vadd.xlane.f32.xlu1 %v4456_v51 }
 0x56a   :  { %4463 = vadd.xlane.f32.xlu1 %v4462_v1 }
 0x56e   :  { %4469 = vadd.xlane.f32.xlu1 %v4468_v41 }
 0x572   :  { %4475 = vadd.xlane.f32.xlu1 %v4474_v22 }
 0x576   :  { %6600 = vadd.xlane.f32.xlu1 %v6599_v11 }
 0x57a   :  { %6606 = vadd.xlane.f32.xlu1 %v6605_v16 }
 0x57e   :  { %6612 = vadd.xlane.f32.xlu1 %v6611_v53 }
 0x582   :  { %6618 = vadd.xlane.f32.xlu1 %v6617_v47 }
 0x586   :  { %6624 = vadd.xlane.f32.xlu1 %v6623_v45 }
 0x58a   :  { %6630 = vadd.xlane.f32.xlu1 %v6629_v54 }
 0x58e   :  { %6636 = vadd.xlane.f32.xlu1 %v6635_v2 }
 0x592   :  { %6642 = vadd.xlane.f32.xlu1 %v6641_v57 }
 0x596   :  { %8765 = vadd.xlane.f32.xlu1 %v8764_v17 }
 0x59a   :  { %8771 = vadd.xlane.f32.xlu1 %v8770_v48 }
 0x59e   :  { %8777 = vadd.xlane.f32.xlu1 %v8776_v43 }
 0x5a0   :  { %v10911_v0 = vpop.xlane.xlu0 %10910 }
 0x5a1   :  { %v10958_v35 = vmul.f32 0.0625, %v10911_v0 }
 0x5a2   :  { %8783 = vadd.xlane.f32.xlu1 %v8782_v38  ;;  %v10980_v38 = vld [vmem:[%s21011_s7 + $0x30] sm:$0xff] }
 0x5a3   :  { %v10920_v52 = vpop.xlane.xlu1 %10919 }
 0x5a4   :  { %v10914_v13 = vpop.xlane.xlu0 %10913  ;;  %v10961_v24 = vmul.f32 0.0625, %v10920_v52 }
 0x5a5   :  { %v10959_v8 = vmul.f32 0.0625, %v10914_v13 }
 0x5a6   :  { %8789 = vadd.xlane.f32.xlu1 %v8788_v62 }
 0x5a7   :  { %v20108_v9 = vpack.c.bf16 %v10959_v8, %v10958_v35  ;;  %v10917_v15 = vpop.xlane.xlu1 %10916  ;;  %v10981_v8 = vld [vmem:[%s21011_s7 + $0x38] sm:$0xff] }
 0x5a8   :  { %v10960_v42 = vmul.f32 0.0625, %v10917_v15  ;;  %v10923_v7 = vpop.xlane.xlu0 %10922 }
 0x5a9   :  { %15460 = vmatprep.subr.bf16.mxu1 %v20108_v9  ;;  %v10962_v5 = vmul.f32 0.0625, %v10923_v7 }
 0x5aa   :  { %v20111_v58 = vpack.c.bf16 %v10961_v24, %v10960_v42  ;;  %15462 = vmatpush3.bf16.msra.mxu1 %v20108_v9  ;;  %v10983_v42 = vld [vmem:[%s21011_s7 + $0x48] sm:$0xff] }
 0x5ab   :  { %v10926_v19 = vpop.xlane.xlu1 %10925 }
 0x5ac   :  { %v10963_v12 = vmul.f32 0.0625, %v10926_v19  ;;  %15464 = vmatprep.subr.bf16.mxu1 %v20111_v58  ;;  %v10929_v51 = vpop.xlane.xlu0 %10928  ;;  %v10984_v19 = vld [vmem:[%s21011_s7 + $0x50] sm:$0xff] }
 0x5ad   :  { %v10964_v1 = vmul.f32 0.0625, %v10929_v51 }
 0x5ae   :  { %v20115_v27 = vpack.c.bf16 %v10963_v12, %v10962_v5  ;;  %15466 = vmatpush3.bf16.msra.mxu1 %v20111_v58 }
 0x5af   :  { %v10932_v3 = vpop.xlane.xlu1 %10931 }
 0x5b0   :  { %v10965_v37 = vmul.f32 0.0625, %v10932_v3  ;;  %15468 = vmatprep.subr.bf16.mxu1 %v20115_v27  ;;  %v10935_v21 = vpop.xlane.xlu0 %10934  ;;  %v10985_v3 = vld [vmem:[%s21011_s7 + $0x58] sm:$0xff] }
 0x5b1   :  { %v10966_v4 = vmul.f32 0.0625, %v10935_v21 }
 0x5b2   :  { %v20119_v41 = vpack.c.bf16 %v10965_v37, %v10964_v1  ;;  %15470 = vmatpush3.bf16.msra.mxu1 %v20115_v27  ;;  %v10986_v37 = vld [vmem:[%s21011_s7 + $0x60] sm:$0xff] }
 0x5b3   :  { %v10938_v44 = vpop.xlane.xlu1 %10937 }
 0x5b4   :  { %v10967_v22 = vmul.f32 0.0625, %v10938_v44  ;;  %15472 = vmatprep.subr.bf16.mxu1 %v20119_v41  ;;  %v10941_v55 = vpop.xlane.xlu0 %10940  ;;  %v10987_v44 = vld [vmem:[%s21011_s7 + $0x68] sm:$0xff] }
 0x5b5   :  { %v10968_v6 = vmul.f32 0.0625, %v10941_v55 }
 0x5b6   :  { %v20123_v10 = vpack.c.bf16 %v10967_v22, %v10966_v4  ;;  %15474 = vmatpush3.bf16.msra.mxu1 %v20119_v41  ;;  %v10988_v22 = vld [vmem:[%s21011_s7 + $0x70] sm:$0xff] }
 0x5b7   :  { %v10944_v11 = vpop.xlane.xlu1 %10943 }
 0x5b8   :  { %v10969_v49 = vmul.f32 0.0625, %v10944_v11  ;;  %15476 = vmatprep.subr.bf16.mxu1 %v20123_v10  ;;  %v10947_v16 = vpop.xlane.xlu0 %10946  ;;  %v10989_v11 = vld [vmem:[%s21011_s7 + $0x78] sm:$0xff] }
 0x5b9   :  { %v10970_v53 = vmul.f32 0.0625, %v10947_v16 }
 0x5ba   :  { %v20127_v31 = vpack.c.bf16 %v10969_v49, %v10968_v6  ;;  %15478 = vmatpush3.bf16.msra.mxu1 %v20123_v10  ;;  %v11151_v49 = vld [vmem:[%s21011_s7 + $0x80] sm:$0xff] }
 0x5bb   :  { %v10950_v23 = vpop.xlane.xlu1 %10949 }
 0x5bc   :  { %v10971_v50 = vmul.f32 0.0625, %v10950_v23  ;;  %15480 = vmatprep.subr.bf16.mxu1 %v20127_v31  ;;  %v10953_v36 = vpop.xlane.xlu0 %10952  ;;  %v11152_v23 = vld [vmem:[%s21011_s7 + $0x88] sm:$0xff] }
 0x5bd   :  { %v10972_v33 = vmul.f32 0.0625, %v10953_v36 }
 0x5be   :  { %v20131_v47 = vpack.c.bf16 %v10971_v50, %v10970_v53  ;;  %15482 = vmatpush3.bf16.msra.mxu1 %v20127_v31  ;;  %v11153_v50 = vld [vmem:[%s21011_s7 + $0x90] sm:$0xff] }
 0x5bf   :  { %v10956_v28 = vpop.xlane.xlu1 %10955 }
 0x5c0   :  { %v10973_v45 = vmul.f32 0.0625, %v10956_v28  ;;  %15484 = vmatprep.subr.bf16.mxu1 %v20131_v47  ;;  %v2267_v32 = vpop.xlane.xlu0 %2266  ;;  %v11154_v28 = vld [vmem:[%s21011_s7 + $0x98] sm:$0xff] }
 0x5c1   :  { %v2312_v63 = vmul.f32 0.125, %v2267_v32 }
 0x5c2   :  { %v20135_v54 = vpack.c.bf16 %v10973_v45, %v10972_v33  ;;  %15486 = vmatpush3.bf16.msra.mxu1 %v20131_v47  ;;  %v11155_v45 = vld [vmem:[%s21011_s7 + $0xa0] sm:$0xff] }
 0x5c3   :  { %2329 = vst.msk [vmem:[%s21012_s8 + $0x8] sm:$0xff] %vm2327_vm6, %v2312_v63  ;;  %v2264_v20 = vpop.xlane.xlu1 %2263  ;;  %v11156_v63 = vld [vmem:[%s21011_s7 + $0xa8] sm:$0xff] }
 0x5c4   :  { %v2311_v26 = vmul.f32 0.125, %v2264_v20  ;;  %15488 = vmatprep.subr.bf16.mxu1 %v20135_v54  ;;  %v2273_v2 = vpop.xlane.xlu0 %2272 }
 0x5c5   :  { %v2314_v40 = vmul.f32 0.125, %v2273_v2 }
 0x5c6   :  { %2328 = vst.msk [vmem:[%s21012_s8] sm:$0xff] %vm2327_vm6, %v2311_v26  ;;  %15490 = vmatpush3.bf16.msra.mxu1 %v20135_v54  ;;  %v11157_v26 = vld [vmem:[%s21011_s7 + $0xb0] sm:$0xff] }
 0x5c7   :  { %2331 = vst.msk [vmem:[%s21012_s8 + $0x18] sm:$0xff] %vm2327_vm6, %v2314_v40  ;;  %v2270_v57 = vpop.xlane.xlu1 %2269  ;;  %15492 = vmatprep.subr.bf16.mxu1 %v20108_v9  ;;  %v11158_v40 = vld [vmem:[%s21011_s7 + $0xb8] sm:$0xff] }
 0x5c8   :  { %v2313_v25 = vmul.f32 0.125, %v2270_v57  ;;  %v2279_v17 = vpop.xlane.xlu0 %2278  ;;  %v11159_v57 = vld [vmem:[%s21011_s7 + $0xc0] sm:$0xff] }
 0x5c9   :  { %v2316_v34 = vmul.f32 0.125, %v2279_v17  ;;  %15261 = vmatmul.mubr.f32.vlgmr.msra.gmra.mrb[48].mxu1 %v10975_v46 }
 0x5ca   :  { %2330 = vst.msk [vmem:[%s21012_s8 + $0x10] sm:$0xff] %vm2327_vm6, %v2313_v25  ;;  %15494 = vmatpush3.bf16.msra.mxu1 %v20108_v9  ;;  %15263 = vmatprep.mubr.f32.mxu1 %v10976_v59  ;;  %v11160_v25 = vld [vmem:[%s21011_s7 + $0xc8] sm:$0xff] }
 0x5cb   :  { %2333 = vst.msk [vmem:[%s21012_s8 + $0x28] sm:$0xff] %vm2327_vm6, %v2316_v34  ;;  %v2276_v48 = vpop.xlane.xlu1 %2275  ;;  %15496 = vmatprep.subr.bf16.mxu1 %v20111_v58  ;;  %v11161_v34 = vld [vmem:[%s21011_s7 + $0xd0] sm:$0xff] }
 0x5cc   :  { %v2315_v30 = vmul.f32 0.125, %v2276_v48  ;;  %v2285_v43 = vpop.xlane.xlu0 %2284  ;;  %v11162_v48 = vld [vmem:[%s21011_s7 + $0xd8] sm:$0xff] }
 0x5cd   :  { %v2318_v0 = vmul.f32 0.125, %v2285_v43  ;;  %15264 = vmatmul.mubr.f32.gmra.mrb[50].mxu1 %v10977_v14 }
 0x5ce   :  { %2332 = vst.msk [vmem:[%s21012_s8 + $0x20] sm:$0xff] %vm2327_vm6, %v2315_v30  ;;  %15498 = vmatpush3.bf16.msra.mxu1 %v20111_v58  ;;  %15266 = vmatprep.mubr.f32.mxu1 %v10978_v61  ;;  %v11163_v30 = vld [vmem:[%s21011_s7 + $0xe0] sm:$0xff] }
 0x5cf   :  { %2335 = vst.msk [vmem:[%s21012_s8 + $0x38] sm:$0xff] %vm2327_vm6, %v2318_v0  ;;  %v2282_v56 = vpop.xlane.xlu1 %2281  ;;  %15500 = vmatprep.subr.bf16.mxu1 %v20115_v27  ;;  %v11164_v0 = vld [vmem:[%s21011_s7 + $0xe8] sm:$0xff] }
 0x5d0   :  { %v2317_v52 = vmul.f32 0.125, %v2282_v56  ;;  %v2291_v13 = vpop.xlane.xlu0 %2290  ;;  %v11165_v56 = vld [vmem:[%s21011_s7 + $0xf0] sm:$0xff] }
 0x5d1   :  { %v2320_v35 = vmul.f32 0.125, %v2291_v13  ;;  %15267 = vmatmul.mubr.f32.gmra.mrb[52].mxu1 %v10979_v18 }
 0x5d2   :  { %2334 = vst.msk [vmem:[%s21012_s8 + $0x30] sm:$0xff] %vm2327_vm6, %v2317_v52  ;;  %15502 = vmatpush3.bf16.msra.mxu1 %v20115_v27  ;;  %15269 = vmatprep.mubr.f32.mxu1 %v10980_v38  ;;  %v11166_v52 = vld [vmem:[%s21011_s7 + $0xf8] sm:$0xff] }
 0x5d3   :  { %2337 = vst.msk [vmem:[%s21012_s8 + $0x48] sm:$0xff] %vm2327_vm6, %v2320_v35  ;;  %v2288_v29 = vpop.xlane.xlu1 %2287  ;;  %15504 = vmatprep.subr.bf16.mxu1 %v20119_v41  ;;  %v11328_v35 = vld [vmem:[%s21011_s7 + $0x100] sm:$0xff] }
 0x5d4   :  { %v2319_v62 = vmul.f32 0.125, %v2288_v29  ;;  %v2297_v15 = vpop.xlane.xlu0 %2296  ;;  %v11329_v29 = vld [vmem:[%s21011_s7 + $0x108] sm:$0xff] }
 0x5d5   :  { %v2322_v24 = vmul.f32 0.125, %v2297_v15  ;;  %15270 = vmatmul.mubr.f32.gmra.mrb[54].mxu1 %v10981_v8 }
 0x5d6   :  { %2336 = vst.msk [vmem:[%s21012_s8 + $0x40] sm:$0xff] %vm2327_vm6, %v2319_v62  ;;  %15506 = vmatpush3.bf16.msra.mxu1 %v20119_v41  ;;  %15272 = vmatprep.mubr.f32.mxu1 %v10982_v39  ;;  %v11330_v62 = vld [vmem:[%s21011_s7 + $0x110] sm:$0xff] }
 0x5d7   :  { %2339 = vst.msk [vmem:[%s21012_s8 + $0x58] sm:$0xff] %vm2327_vm6, %v2322_v24  ;;  %v2294_v7 = vpop.xlane.xlu1 %2293  ;;  %15508 = vmatprep.subr.bf16.mxu1 %v20123_v10  ;;  %v11331_v24 = vld [vmem:[%s21011_s7 + $0x118] sm:$0xff] }
 0x5d8   :  { %v2321_v5 = vmul.f32 0.125, %v2294_v7  ;;  %v2303_v12 = vpop.xlane.xlu0 %2302  ;;  %v11332_v7 = vld [vmem:[%s21011_s7 + $0x120] sm:$0xff] }
 0x5d9   :  { %v2324_v51 = vmul.f32 0.125, %v2303_v12  ;;  %15273 = vmatmul.mubr.f32.gmra.mrb[56].mxu1 %v10983_v42  ;;  %v11334_v12 = vld [vmem:[%s21011_s7 + $0x130] sm:$0xff] }
 0x5da   :  { %2338 = vst.msk [vmem:[%s21012_s8 + $0x50] sm:$0xff] %vm2327_vm6, %v2321_v5  ;;  %15510 = vmatpush3.bf16.msra.mxu1 %v20123_v10  ;;  %15275 = vmatprep.mubr.f32.mxu1 %v10984_v19 }
 0x5db   :  { %2341 = vst.msk [vmem:[%s21012_s8 + $0x68] sm:$0xff] %vm2327_vm6, %v2324_v51  ;;  %v2300_v1 = vpop.xlane.xlu1 %2299  ;;  %15512 = vmatprep.subr.bf16.mxu1 %v20127_v31 }
 0x5dc   :  { %v2323_v21 = vmul.f32 0.125, %v2300_v1  ;;  %v11336_v1 = vld [vmem:[%s21011_s7 + $0x140] sm:$0xff] }
 0x5dd   :  { %15276 = vmatmul.mubr.f32.gmra.mrb[58].mxu1 %v10985_v3 }
 0x5de   :  { %2340 = vst.msk [vmem:[%s21012_s8 + $0x60] sm:$0xff] %vm2327_vm6, %v2323_v21  ;;  %15514 = vmatpush3.bf16.msra.mxu1 %v20127_v31  ;;  %15278 = vmatprep.mubr.f32.mxu1 %v10986_v37 }
 0x5df   :  { %v2306_v4 = vpop.xlane.xlu1 %2305  ;;  %15516 = vmatprep.subr.bf16.mxu1 %v20131_v47 }
 0x5e0   :  { %v2325_v55 = vmul.f32 0.125, %v2306_v4 }
 0x5e1   :  { %15279 = vmatmul.mubr.f32.gmra.mrb[60].mxu1 %v10987_v44  ;;  %v11338_v44 = vld [vmem:[%s21011_s7 + $0x150] sm:$0xff] }
 0x5e2   :  { %2342 = vst.msk [vmem:[%s21012_s8 + $0x70] sm:$0xff] %vm2327_vm6, %v2325_v55  ;;  %15518 = vmatpush3.bf16.msra.mxu1 %v20131_v47  ;;  %15281 = vmatprep.mubr.f32.mxu1 %v10988_v22  ;;  %v11340_v55 = vld [vmem:[%s21011_s7 + $0x160] sm:$0xff] }
 0x5e3   :  { %v4431_v6 = vpop.xlane.xlu1 %4430  ;;  %15520 = vmatprep.subr.bf16.mxu1 %v20135_v54 }
 0x5e4   :  { %v4477_v16 = vmul.f32 0.125, %v4431_v6 }
 0x5e5   :  { %15282 = vmatmul.mubr.f32.gmra.mrb[62].mxu1 %v10989_v11 }
 0x5e6   :  { %4493 = vst.msk [vmem:[%s21012_s8 + $0x80] sm:$0xff] %vm2327_vm6, %v4477_v16  ;;  %15522 = vmatpush3.bf16.msra.mxu1 %v20135_v54  ;;  %15316 = vmatprep.mubr.f32.mxu1 %v11151_v49  ;;  %v11342_v49 = vld [vmem:[%s21011_s7 + $0x170] sm:$0xff] }
 0x5e7   :  { %v4437_v53 = vpop.xlane.xlu1 %4436  ;;  %15524 = vmatprep.subr.bf16.mxu1 %v20108_v9 }
 0x5e8   :  { %v4479_v36 = vmul.f32 0.125, %v4437_v53  ;;  %v11505_v53 = vld [vmem:[%s21011_s7 + $0x180] sm:$0xff] }
 0x5e9   :  { %15317 = vmatmul.mubr.f32.vlgmr.msra.gmra.mrb[64].mxu1 %v11152_v23 }
 0x5ea   :  { %4495 = vst.msk [vmem:[%s21012_s8 + $0x90] sm:$0xff] %vm2327_vm6, %v4479_v36  ;;  %15526 = vmatpush3.bf16.msra.mxu1 %v20108_v9  ;;  %15319 = vmatprep.mubr.f32.mxu1 %v11153_v50  ;;  %v11711_v50 = vld [vmem:[%s21009_s5] sm:$0xff] }
 0x5eb   :  { %v4443_v33 = vpop.xlane.xlu1 %4442  ;;  %15528 = vmatprep.subr.bf16.mxu1 %v20111_v58 }
 0x5ec   :  { %v4481_v32 = vmul.f32 0.125, %v4443_v33 }
 0x5ed   :  { %15320 = vmatmul.mubr.f32.gmra.mrb[66].mxu1 %v11154_v28  ;;  %v11506_v28 = vld [vmem:[%s21011_s7 + $0x188] sm:$0xff] }
 0x5ee   :  { %4497 = vst.msk [vmem:[%s21012_s8 + $0xa0] sm:$0xff] %vm2327_vm6, %v4481_v32  ;;  %15530 = vmatpush3.bf16.msra.mxu1 %v20111_v58  ;;  %15322 = vmatprep.mubr.f32.mxu1 %v11155_v45  ;;  %v16265_v32 = vmov 0.0|0.0  }
 0x5ef   :  { %v4452_v20 = vpop.xlane.xlu1 %4451  ;;  %15532 = vmatprep.subr.bf16.mxu1 %v20115_v27 }
 0x5f0   :  { %v4484_v2 = vmul.f32 0.125, %v4452_v20 }
 0x5f1   :  { %15323 = vmatmul.mubr.f32.gmra.mrb[68].mxu1 %v11156_v63  ;;  %v11507_v63 = vld [vmem:[%s21011_s7 + $0x190] sm:$0xff] }
 0x5f2   :  { %4500 = vst.msk [vmem:[%s21012_s8 + $0xb8] sm:$0xff] %vm2327_vm6, %v4484_v2  ;;  %15534 = vmatpush3.bf16.msra.mxu1 %v20115_v27  ;;  %15325 = vmatprep.mubr.f32.mxu1 %v11157_v26  ;;  %v11509_v2 = vld [vmem:[%s21011_s7 + $0x1a0] sm:$0xff] }
 0x5f3   :  { %v4458_v46 = vpop.xlane.xlu1 %4457  ;;  %15536 = vmatprep.subr.bf16.mxu1 %v20119_v41 }
 0x5f4   :  { %v4486_v59 = vmul.f32 0.125, %v4458_v46  ;;  %v11510_v46 = vld [vmem:[%s21011_s7 + $0x1a8] sm:$0xff] }
 0x5f5   :  { %15326 = vmatmul.mubr.f32.gmra.mrb[70].mxu1 %v11158_v40 }
 0x5f6   :  { %4502 = vst.msk [vmem:[%s21012_s8 + $0xc8] sm:$0xff] %vm2327_vm6, %v4486_v59  ;;  %15538 = vmatpush3.bf16.msra.mxu1 %v20119_v41  ;;  %15328 = vmatprep.mubr.f32.mxu1 %v11159_v57  ;;  %v11511_v59 = vld [vmem:[%s21011_s7 + $0x1b0] sm:$0xff] }
 0x5f7   :  { %v4464_v17 = vpop.xlane.xlu1 %4463  ;;  %15540 = vmatprep.subr.bf16.mxu1 %v20123_v10 }
 0x5f8   :  { %v4488_v14 = vmul.f32 0.125, %v4464_v17  ;;  %v11512_v17 = vld [vmem:[%s21011_s7 + $0x1b8] sm:$0xff] }
 0x5f9   :  { %15329 = vmatmul.mubr.f32.gmra.mrb[72].mxu1 %v11160_v25 }
 0x5fa   :  { %4504 = vst.msk [vmem:[%s21012_s8 + $0xd8] sm:$0xff] %vm2327_vm6, %v4488_v14  ;;  %15542 = vmatpush3.bf16.msra.mxu1 %v20123_v10  ;;  %15331 = vmatprep.mubr.f32.mxu1 %v11161_v34  ;;  %v11513_v14 = vld [vmem:[%s21011_s7 + $0x1c0] sm:$0xff] }
 0x5fb   :  { %v4470_v61 = vpop.xlane.xlu1 %4469  ;;  %15544 = vmatprep.subr.bf16.mxu1 %v20127_v31 }
 0x5fc   :  { %v4490_v43 = vmul.f32 0.125, %v4470_v61  ;;  %v11514_v61 = vld [vmem:[%s21011_s7 + $0x1c8] sm:$0xff] }
 0x5fd   :  { %15332 = vmatmul.mubr.f32.gmra.mrb[74].mxu1 %v11162_v48 }
 0x5fe   :  { %4506 = vst.msk [vmem:[%s21012_s8 + $0xe8] sm:$0xff] %vm2327_vm6, %v4490_v43  ;;  %15546 = vmatpush3.bf16.msra.mxu1 %v20127_v31  ;;  %15334 = vmatprep.mubr.f32.mxu1 %v11163_v30  ;;  %v11515_v30 = vld [vmem:[%s21011_s7 + $0x1d0] sm:$0xff]  ;;  %v11516_v43 = vld [vmem:[%s21011_s7 + $0x1d8] sm:$0xff] }
 0x5ff   :  { %v4476_v18 = vpop.xlane.xlu1 %4475  ;;  %15548 = vmatprep.subr.bf16.mxu1 %v20131_v47 }
 0x600   :  { %v4492_v38 = vmul.f32 0.125, %v4476_v18  ;;  %v11518_v18 = vld [vmem:[%s21011_s7 + $0x1e8] sm:$0xff] }
 0x601   :  { %15335 = vmatmul.mubr.f32.gmra.mrb[76].mxu1 %v11164_v0  ;;  %v11517_v0 = vld [vmem:[%s21011_s7 + $0x1e0] sm:$0xff] }
 0x602   :  { %4508 = vst.msk [vmem:[%s21012_s8 + $0xf8] sm:$0xff] %vm2327_vm6, %v4492_v38  ;;  %15550 = vmatpush3.bf16.msra.mxu1 %v20131_v47  ;;  %15337 = vmatprep.mubr.f32.mxu1 %v11165_v56  ;;  %v11519_v56 = vld [vmem:[%s21011_s7 + $0x1f0] sm:$0xff]  ;;  %v11520_v38 = vld [vmem:[%s21011_s7 + $0x1f8] sm:$0xff] }
 0x603   :  { %v6601_v13 = vpop.xlane.xlu1 %6600  ;;  %15552 = vmatprep.subr.bf16.mxu1 %v20135_v54 }
 0x604   :  { %v6645_v8 = vmul.f32 0.125, %v6601_v13 }
 0x605   :  { %15338 = vmatmul.mubr.f32.gmra.mrb[78].mxu1 %v11166_v52  ;;  %v21358_v52 = vmov 0.0  }
 0x606   :  { %6661 = vst.msk [vmem:[%s21012_s8 + $0x108] sm:$0xff] %vm2327_vm6, %v6645_v8  ;;  %15554 = vmatpush3.bf16.msra.mxu1 %v20135_v54  ;;  %15372 = vmatprep.mubr.f32.mxu1 %v11328_v35 }
 0x607   :  { %v6607_v39 = vpop.xlane.xlu1 %6606  ;;  %15556 = vmatprep.subr.bf16.mxu1 %v20108_v9 }
 0x608   :  { %v6647_v15 = vmul.f32 0.125, %v6607_v39 }
 0x609   :  { %15373 = vmatmul.mubr.f32.vlgmr.msra.gmra.mrb[80].mxu1 %v11329_v29 }
 0x60a   :  { %6663 = vst.msk [vmem:[%s21012_s8 + $0x118] sm:$0xff] %vm2327_vm6, %v6647_v15  ;;  %15558 = vmatpush3.bf16.msra.mxu1 %v20108_v9  ;;  %15375 = vmatprep.mubr.f32.mxu1 %v11330_v62  ;;  %v11333_v9 = vld [vmem:[%s21011_s7 + $0x128] sm:$0xff] }
 0x60b   :  { %v6613_v42 = vpop.xlane.xlu1 %6612  ;;  %15560 = vmatprep.subr.bf16.mxu1 %v20111_v58 }
 0x60c   :  { %v6649_v19 = vmul.f32 0.125, %v6613_v42 }
 0x60d   :  { %15376 = vmatmul.mubr.f32.gmra.mrb[82].mxu1 %v11331_v24 }
 0x60e   :  { %6665 = vst.msk [vmem:[%s21012_s8 + $0x128] sm:$0xff] %vm2327_vm6, %v6649_v19  ;;  %15562 = vmatpush3.bf16.msra.mxu1 %v20111_v58  ;;  %15378 = vmatprep.mubr.f32.mxu1 %v11332_v7  ;;  %v11335_v58 = vld [vmem:[%s21011_s7 + $0x138] sm:$0xff] }
 0x60f   :  { %v6619_v5 = vpop.xlane.xlu1 %6618  ;;  %15564 = vmatprep.subr.bf16.mxu1 %v20115_v27 }
 0x610   :  { %v6651_v51 = vmul.f32 0.125, %v6619_v5 }
 0x611   :  { %15379 = vmatmul.mubr.f32.gmra.mrb[84].mxu1 %v11333_v9 }
 0x612   :  { %6667 = vst.msk [vmem:[%s21012_s8 + $0x138] sm:$0xff] %vm2327_vm6, %v6651_v51  ;;  %15566 = vmatpush3.bf16.msra.mxu1 %v20115_v27  ;;  %15381 = vmatprep.mubr.f32.mxu1 %v11334_v12  ;;  %v11337_v27 = vld [vmem:[%s21011_s7 + $0x148] sm:$0xff] }
 0x613   :  { %v6625_v3 = vpop.xlane.xlu1 %6624  ;;  %15568 = vmatprep.subr.bf16.mxu1 %v20119_v41 }
 0x614   :  { %v6653_v37 = vmul.f32 0.125, %v6625_v3 }
 0x615   :  { %15382 = vmatmul.mubr.f32.gmra.mrb[86].mxu1 %v11335_v58 }
 0x616   :  { %6669 = vst.msk [vmem:[%s21012_s8 + $0x148] sm:$0xff] %vm2327_vm6, %v6653_v37  ;;  %15570 = vmatpush3.bf16.msra.mxu1 %v20119_v41  ;;  %15384 = vmatprep.mubr.f32.mxu1 %v11336_v1  ;;  %v11339_v41 = vld [vmem:[%s21011_s7 + $0x158] sm:$0xff] }
 0x617   :  { %v6631_v21 = vpop.xlane.xlu1 %6630  ;;  %15572 = vmatprep.subr.bf16.mxu1 %v20123_v10 }
 0x618   :  { %v6655_v4 = vmul.f32 0.125, %v6631_v21 }
 0x619   :  { %15385 = vmatmul.mubr.f32.gmra.mrb[88].mxu1 %v11337_v27 }
 0x61a   :  { %6671 = vst.msk [vmem:[%s21012_s8 + $0x158] sm:$0xff] %vm2327_vm6, %v6655_v4  ;;  %15574 = vmatpush3.bf16.msra.mxu1 %v20123_v10  ;;  %15387 = vmatprep.mubr.f32.mxu1 %v11338_v44  ;;  %v11341_v10 = vld [vmem:[%s21011_s7 + $0x168] sm:$0xff] }
 0x61b   :  { %v6637_v22 = vpop.xlane.xlu1 %6636  ;;  %15576 = vmatprep.subr.bf16.mxu1 %v20127_v31 }
 0x61c   :  { %v6657_v11 = vmul.f32 0.125, %v6637_v22 }
 0x61d   :  { %15388 = vmatmul.mubr.f32.gmra.mrb[90].mxu1 %v11339_v41 }
 0x61e   :  { %6673 = vst.msk [vmem:[%s21012_s8 + $0x168] sm:$0xff] %vm2327_vm6, %v6657_v11  ;;  %15578 = vmatpush3.bf16.msra.mxu1 %v20127_v31  ;;  %15390 = vmatprep.mubr.f32.mxu1 %v11340_v55  ;;  %v11343_v31 = vld [vmem:[%s21011_s7 + $0x178] sm:$0xff] }
 0x61f   :  { %v6643_v6 = vpop.xlane.xlu1 %6642  ;;  %15580 = vmatprep.subr.bf16.mxu1 %v20131_v47 }
 0x620   :  { %v6659_v16 = vmul.f32 0.125, %v6643_v6 }
 0x621   :  { %15391 = vmatmul.mubr.f32.gmra.mrb[92].mxu1 %v11341_v10 }
 0x622   :  { %6675 = vst.msk [vmem:[%s21012_s8 + $0x178] sm:$0xff] %vm2327_vm6, %v6659_v16  ;;  %15582 = vmatpush3.bf16.msra.mxu1 %v20131_v47  ;;  %15393 = vmatprep.mubr.f32.mxu1 %v11342_v49  ;;  %v11712_v47 = vld [vmem:[%s21009_s5 + $0x8] sm:$0xff] }
 0x623   :  { %v8766_v23 = vpop.xlane.xlu1 %8765  ;;  %15584 = vmatprep.subr.bf16.mxu1 %v20135_v54  ;;  %v15588_v33 = vpack.c.bf16 %v11712_v47, %v11711_v50 }
 0x624   :  { %v8810_v36 = vmul.f32 0.125, %v8766_v23 }
 0x625   :  { %15394 = vmatmul.mubr.f32.gmra.mrb[94].mxu1 %v11343_v31 }
 0x626   :  { %8826 = vst.msk [vmem:[%s21012_s8 + $0x188] sm:$0xff] %vm2327_vm6, %v8810_v36  ;;  %15586 = vmatpush3.bf16.msra.mxu1 %v20135_v54  ;;  %15428 = vmatprep.mubr.f32.mxu1 %v11505_v53  ;;  %v11508_v54 = vld [vmem:[%s21011_s7 + $0x198] sm:$0xff] }
 0x627   :  { %v8772_v45 = vpop.xlane.xlu1 %8771  ;;  %15587 = vmatprep.subr.bf16.mxu1 %v16265_v32 }
 0x628   :  { %v8812_v20 = vmul.f32 0.125, %v8772_v45 }
 0x629   :  { %15429 = vmatmul.mubr.f32.vlgmr.msra.gmra.mrb[96].mxu1 %v11506_v28 }
 0x62a   :  { %8828 = vst.msk [vmem:[%s21012_s8 + $0x198] sm:$0xff] %vm2327_vm6, %v8812_v20  ;;  %15589 = vmatpush3.bf16.msra.mxu1 %v15588_v33  ;;  %15431 = vmatprep.mubr.f32.mxu1 %v11507_v63 }
 0x62b   :  { %v8778_v26 = vpop.xlane.xlu1 %8777 }
 0x62c   :  { %v8814_v40 = vmul.f32 0.125, %v8778_v26 }
 0x62d   :  { %15432 = vmatmul.mubr.f32.gmra.mrb[98].mxu1 %v11508_v54 }
 0x62e   :  { %8830 = vst.msk [vmem:[%s21012_s8 + $0x1a8] sm:$0xff] %vm2327_vm6, %v8814_v40  ;;  %15434 = vmatprep.mubr.f32.mxu1 %v11509_v2 }
 0x62f   :  { %v8784_v57 = vpop.xlane.xlu1 %8783 }
 0x630   :  { %v8816_v25 = vmul.f32 0.125, %v8784_v57 }
 0x631   :  { %15435 = vmatmul.mubr.f32.gmra.mrb[100].mxu1 %v11510_v46 }
 0x632   :  { %8832 = vst.msk [vmem:[%s21012_s8 + $0x1b8] sm:$0xff] %vm2327_vm6, %v8816_v25  ;;  %15437 = vmatprep.mubr.f32.mxu1 %v11511_v59 }
 0x633   :  { %v8790_v34 = vpop.xlane.xlu1 %8789 }
 0x634   :  { %v8818_v48 = vmul.f32 0.125, %v8790_v34 }
 0x635   :  { %15438 = vmatmul.mubr.f32.gmra.mrb[102].mxu1 %v11512_v17 }
 0x636   :  { %8834 = vst.msk [vmem:[%s21012_s8 + $0x1c8] sm:$0xff] %vm2327_vm6, %v8818_v48  ;;  %15440 = vmatprep.mubr.f32.mxu1 %v11513_v14 }
 0x639   :  { %15441 = vmatmul.mubr.f32.gmra.mrb[104].mxu1 %v11514_v61 }
 0x63a   :  { %15443 = vmatprep.mubr.f32.mxu1 %v11515_v30 }
 0x63d   :  { %15444 = vmatmul.mubr.f32.gmra.mrb[106].mxu1 %v11516_v43 }
 0x63e   :  { %15446 = vmatprep.mubr.f32.mxu1 %v11517_v0 }
 0x641   :  { %15447 = vmatmul.mubr.f32.gmra.mrb[108].mxu1 %v11518_v18 }
 0x642   :  { %15449 = vmatprep.mubr.f32.mxu1 %v11519_v56 }
 0x645   :  { %15450 = vmatmul.mubr.f32.gmra.mrb[110].mxu1 %v11520_v38 }
 0x646   :  { %15456 = vmatprep.mubr.msk.f32.mxu1 %vm16266_vm7, %v21358_v52 }
 0x649   :  { %15457 = vmatmul.mubr.msk.f32.vlgmr.msra.gmra.mrb[112].mxu1 %vm10908_vm4, %v20019_v60 }
 0x69c   :  { %v15262_v13 = vpop.f32.mrb[48].mxu1 }
 0x69d   :  { %11136 = vst.msk [vmem:[%s21013_s9 + $0x8] sm:$0xff] %vm2327_vm6, %v15262_v13  ;;  %v11056_v35 = vpop.f32.mrb[49].mxu1  ;;  %v13160_v13 = vld [vmem:[%s21010_s6] ss:$0 sm:$0xff]  ;;  %s16240_s6 = scalar_lea.vmem %s11820_s17, 32 }
 0x69e   :  { %11135 = vst.msk [vmem:[%s21013_s9] sm:$0xff] %vm2327_vm6, %v11056_v35  ;;  %p16241_p0 = scmp.ne.s32.totalorder %s11820_s17, %s16240_s6  ;;  %p16246_p2 = scmp.lt.s32.totalorder %s16240_s6, %s16240_s6 }
 0x6a0   :  { %v15265_v8 = vpop.f32.mrb[50].mxu1  ;;  %p16247_p3 = por %p16246_p2, %p16245_p1 }
 0x6a1   :  { %11138 = vst.msk [vmem:[%s21013_s9 + $0x18] sm:$0xff] %vm2327_vm6, %v15265_v8  ;;  %v11066_v29 = vpop.f32.mrb[51].mxu1 }
 0x6a2   :  { %11137 = vst.msk [vmem:[%s21013_s9 + $0x10] sm:$0xff] %vm2327_vm6, %v11066_v29  ;;  %p16248_p4 = pnand %p16247_p3, %p16241_p0 }
 0x6a4   :  { %v15268_v60 = vpop.f32.mrb[52].mxu1 }
 0x6a5   :  { %11140 = vst.msk [vmem:[%s21013_s9 + $0x28] sm:$0xff] %vm2327_vm6, %v15268_v60  ;;  %v11076_v39 = vpop.f32.mrb[53].mxu1 }
 0x6a6   :  { %11139 = vst.msk [vmem:[%s21013_s9 + $0x20] sm:$0xff] %vm2327_vm6, %v11076_v39  ;;  %v21359_v39 = vld [vmem:[#allocation28_spill] sm:$0xff] }
 0x6a8   :  { %v15271_v62 = vpop.f32.mrb[54].mxu1 }
 0x6a9   :  { %11142 = vst.msk [vmem:[%s21013_s9 + $0x38] sm:$0xff] %vm2327_vm6, %v15271_v62  ;;  %v11086_v15 = vpop.f32.mrb[55].mxu1  ;;  %v21360_v62 = vmax.f32 %v21359_v39, 0.0  ;;  %v21401_v39 = vld [vmem:[#allocation50_spill] sm:$0xff] }
 0x6aa   :  { %11141 = vst.msk [vmem:[%s21013_s9 + $0x30] sm:$0xff] %vm2327_vm6, %v11086_v15 }
 0x6ab   :  { %v2307_v15 = vsel %vm33_vm2, %v21360_v62, 0.0  ;;  %v21402_v62 = vmax.f32 %v21401_v39, 0.0 }
 0x6ac   :  { %v15274_v24 = vpop.f32.mrb[56].mxu1 }
 0x6ad   :  { %11144 = vst.msk [vmem:[%s21013_s9 + $0x48] sm:$0xff] %vm2327_vm6, %v15274_v24  ;;  %v11096_v42 = vpop.f32.mrb[57].mxu1  ;;  %v21361_v24 = vld [vmem:[#allocation30_spill] sm:$0xff] }
 0x6ae   :  { %11143 = vst.msk [vmem:[%s21013_s9 + $0x40] sm:$0xff] %vm2327_vm6, %v11096_v42  ;;  %v21362_v42 = vmax.f32 %v21361_v24, 0.0  ;;  %v21403_v24 = vld [vmem:[#allocation52_spill] sm:$0xff] }
 0x6b0   :  { %v15277_v7 = vpop.f32.mrb[58].mxu1 }
 0x6b1   :  { %11146 = vst.msk [vmem:[%s21013_s9 + $0x58] sm:$0xff] %vm2327_vm6, %v15277_v7  ;;  %v11106_v19 = vpop.f32.mrb[59].mxu1  ;;  %v4432_v7 = vsel %vm33_vm2, %v21362_v42, 0.0  ;;  %v21404_v42 = vmax.f32 %v21403_v24, 0.0 }
 0x6b2   :  { %11145 = vst.msk [vmem:[%s21013_s9 + $0x50] sm:$0xff] %vm2327_vm6, %v11106_v19  ;;  %v21363_v19 = vld [vmem:[#allocation32_spill] sm:$0xff] }
 0x6b4   :  { %v15280_v9 = vpop.f32.mrb[60].mxu1 }
 0x6b5   :  { %11148 = vst.msk [vmem:[%s21013_s9 + $0x68] sm:$0xff] %vm2327_vm6, %v15280_v9  ;;  %v11116_v5 = vpop.f32.mrb[61].mxu1  ;;  %v21364_v9 = vmax.f32 %v21363_v19, 0.0  ;;  %v21405_v19 = vld [vmem:[#allocation54_spill] sm:$0xff] }
 0x6b6   :  { %11147 = vst.msk [vmem:[%s21013_s9 + $0x60] sm:$0xff] %vm2327_vm6, %v11116_v5 }
 0x6b7   :  { %v4438_v5 = vsel %vm33_vm2, %v21364_v9, 0.0  ;;  %v21406_v9 = vmax.f32 %v21405_v19, 0.0 }
 0x6b8   :  { %v15283_v12 = vpop.f32.mrb[62].mxu1 }
 0x6b9   :  { %11150 = vst.msk [vmem:[%s21013_s9 + $0x78] sm:$0xff] %vm2327_vm6, %v15283_v12  ;;  %v11126_v51 = vpop.f32.mrb[63].mxu1  ;;  %v21365_v12 = vld [vmem:[#allocation34_spill] sm:$0xff] }
 0x6ba   :  { %11149 = vst.msk [vmem:[%s21013_s9 + $0x70] sm:$0xff] %vm2327_vm6, %v11126_v51  ;;  %v21366_v51 = vmax.f32 %v21365_v12, 0.0  ;;  %v21407_v12 = vld [vmem:[#allocation56_spill] sm:$0xff] }
 0x6bc   :  { %v15318_v58 = vpop.f32.mrb[64].mxu1 }
 0x6bd   :  { %11313 = vst.msk [vmem:[%s21013_s9 + $0x88] sm:$0xff] %vm2327_vm6, %v15318_v58  ;;  %v11233_v3 = vpop.f32.mrb[65].mxu1  ;;  %v4444_v58 = vsel %vm33_vm2, %v21366_v51, 0.0  ;;  %v21408_v51 = vmax.f32 %v21407_v12, 0.0 }
 0x6be   :  { %11312 = vst.msk [vmem:[%s21013_s9 + $0x80] sm:$0xff] %vm2327_vm6, %v11233_v3  ;;  %v21367_v3 = vld [vmem:[#allocation7_spill] sm:$0xff] }
 0x6c0   :  { %v15321_v1 = vpop.f32.mrb[66].mxu1 }
 0x6c1   :  { %11315 = vst.msk [vmem:[%s21013_s9 + $0x98] sm:$0xff] %vm2327_vm6, %v15321_v1  ;;  %v11243_v37 = vpop.f32.mrb[67].mxu1  ;;  %v21368_v1 = vmax.f32 %v21367_v3, 0.0 }
 0x6c2   :  { %11314 = vst.msk [vmem:[%s21013_s9 + $0x90] sm:$0xff] %vm2327_vm6, %v11243_v37 }
 0x6c3   :  { %v4447_v37 = vsel %vm33_vm2, %v21368_v1, 0.0 }
 0x6c4   :  { %v15324_v27 = vpop.f32.mrb[68].mxu1 }
 0x6c5   :  { %11317 = vst.msk [vmem:[%s21013_s9 + $0xa8] sm:$0xff] %vm2327_vm6, %v15324_v27  ;;  %v11253_v21 = vpop.f32.mrb[69].mxu1  ;;  %v21369_v27 = vld [vmem:[#allocation9_spill] sm:$0xff] }
 0x6c6   :  { %11316 = vst.msk [vmem:[%s21013_s9 + $0xa0] sm:$0xff] %vm2327_vm6, %v11253_v21  ;;  %v21370_v21 = vmax.f32 %v21369_v27, 0.0 }
 0x6c8   :  { %v15327_v44 = vpop.f32.mrb[70].mxu1 }
 0x6c9   :  { %11319 = vst.msk [vmem:[%s21013_s9 + $0xb8] sm:$0xff] %vm2327_vm6, %v15327_v44  ;;  %v11263_v4 = vpop.f32.mrb[71].mxu1  ;;  %v4453_v44 = vsel %vm33_vm2, %v21370_v21, 0.0 }
 0x6ca   :  { %11318 = vst.msk [vmem:[%s21013_s9 + $0xb0] sm:$0xff] %vm2327_vm6, %v11263_v4  ;;  %v21371_v4 = vld [vmem:[#allocation11_spill] sm:$0xff] }
 0x6cc   :  { %v15330_v41 = vpop.f32.mrb[72].mxu1 }
 0x6cd   :  { %11321 = vst.msk [vmem:[%s21013_s9 + $0xc8] sm:$0xff] %vm2327_vm6, %v15330_v41  ;;  %v11273_v22 = vpop.f32.mrb[73].mxu1  ;;  %v21372_v41 = vmax.f32 %v21371_v4, 0.0 }
 0x6ce   :  { %11320 = vst.msk [vmem:[%s21013_s9 + $0xc0] sm:$0xff] %vm2327_vm6, %v11273_v22 }
 0x6cf   :  { %v4459_v22 = vsel %vm33_vm2, %v21372_v41, 0.0 }
 0x6d0   :  { %v15333_v55 = vpop.f32.mrb[74].mxu1 }
 0x6d1   :  { %11323 = vst.msk [vmem:[%s21013_s9 + $0xd8] sm:$0xff] %vm2327_vm6, %v15333_v55  ;;  %v11283_v11 = vpop.f32.mrb[75].mxu1  ;;  %v21373_v55 = vld [vmem:[#allocation13_spill] sm:$0xff] }
 0x6d2   :  { %11322 = vst.msk [vmem:[%s21013_s9 + $0xd0] sm:$0xff] %vm2327_vm6, %v11283_v11  ;;  %v21374_v11 = vmax.f32 %v21373_v55, 0.0 }
 0x6d4   :  { %v15336_v10 = vpop.f32.mrb[76].mxu1 }
 0x6d5   :  { %11325 = vst.msk [vmem:[%s21013_s9 + $0xe8] sm:$0xff] %vm2327_vm6, %v15336_v10  ;;  %v11293_v6 = vpop.f32.mrb[77].mxu1  ;;  %v4465_v10 = vsel %vm33_vm2, %v21374_v11, 0.0 }
 0x6d6   :  { %11324 = vst.msk [vmem:[%s21013_s9 + $0xe0] sm:$0xff] %vm2327_vm6, %v11293_v6  ;;  %v21375_v6 = vld [vmem:[#allocation15_spill] sm:$0xff] }
 0x6d8   :  { %v15339_v49 = vpop.f32.mrb[78].mxu1 }
 0x6d9   :  { %11327 = vst.msk [vmem:[%s21013_s9 + $0xf8] sm:$0xff] %vm2327_vm6, %v15339_v49  ;;  %v11303_v16 = vpop.f32.mrb[79].mxu1  ;;  %v21376_v49 = vmax.f32 %v21375_v6, 0.0 }
 0x6da   :  { %11326 = vst.msk [vmem:[%s21013_s9 + $0xf0] sm:$0xff] %vm2327_vm6, %v11303_v16 }
 0x6db   :  { %v4471_v16 = vsel %vm33_vm2, %v21376_v49, 0.0  ;;  %v21409_v49 = vld [vmem:[#allocation51_spill] sm:$0xff] }
 0x6dc   :  { %v15374_v31 = vpop.f32.mrb[80].mxu1 }
 0x6dd   :  { %11490 = vst.msk [vmem:[%s21013_s9 + $0x108] sm:$0xff] %vm2327_vm6, %v15374_v31  ;;  %v11410_v23 = vpop.f32.mrb[81].mxu1  ;;  %v21377_v31 = vld [vmem:[#allocation17_spill] sm:$0xff] }
 0x6de   :  { %11489 = vst.msk [vmem:[%s21013_s9 + $0x100] sm:$0xff] %vm2327_vm6, %v11410_v23  ;;  %v21378_v23 = vmax.f32 %v21377_v31, 0.0 }
 0x6e0   :  { %v15377_v53 = vpop.f32.mrb[82].mxu1 }
 0x6e1   :  { %11492 = vst.msk [vmem:[%s21013_s9 + $0x118] sm:$0xff] %vm2327_vm6, %v15377_v53  ;;  %v11420_v50 = vpop.f32.mrb[83].mxu1  ;;  %v6596_v53 = vsel %vm33_vm2, %v21378_v23, 0.0 }
 0x6e2   :  { %11491 = vst.msk [vmem:[%s21013_s9 + $0x110] sm:$0xff] %vm2327_vm6, %v11420_v50  ;;  %v21379_v50 = vld [vmem:[#allocation19_spill] sm:$0xff] }
 0x6e4   :  { %v15380_v47 = vpop.f32.mrb[84].mxu1 }
 0x6e5   :  { %11494 = vst.msk [vmem:[%s21013_s9 + $0x128] sm:$0xff] %vm2327_vm6, %v15380_v47  ;;  %v11430_v36 = vpop.f32.mrb[85].mxu1  ;;  %v21380_v47 = vmax.f32 %v21379_v50, 0.0  ;;  %v21411_v50 = vld [vmem:[#allocation53_spill] sm:$0xff] }
 0x6e6   :  { %11493 = vst.msk [vmem:[%s21013_s9 + $0x120] sm:$0xff] %vm2327_vm6, %v11430_v36 }
 0x6e7   :  { %v6602_v36 = vsel %vm33_vm2, %v21380_v47, 0.0  ;;  %v21412_v47 = vmax.f32 %v21411_v50, 0.0 }
 0x6e8   :  { %v15383_v28 = vpop.f32.mrb[86].mxu1 }
 0x6e9   :  { %11496 = vst.msk [vmem:[%s21013_s9 + $0x138] sm:$0xff] %vm2327_vm6, %v15383_v28  ;;  %v11440_v33 = vpop.f32.mrb[87].mxu1  ;;  %v21381_v28 = vld [vmem:[#allocation21_spill] sm:$0xff] }
 0x6ea   :  { %11495 = vst.msk [vmem:[%s21013_s9 + $0x130] sm:$0xff] %vm2327_vm6, %v11440_v33  ;;  %v21382_v33 = vmax.f32 %v21381_v28, 0.0 }
 0x6ec   :  { %v15386_v45 = vpop.f32.mrb[88].mxu1 }
 0x6ed   :  { %11498 = vst.msk [vmem:[%s21013_s9 + $0x148] sm:$0xff] %vm2327_vm6, %v15386_v45  ;;  %v11450_v32 = vpop.f32.mrb[89].mxu1  ;;  %v6608_v45 = vsel %vm33_vm2, %v21382_v33, 0.0 }
 0x6ee   :  { %11497 = vst.msk [vmem:[%s21013_s9 + $0x140] sm:$0xff] %vm2327_vm6, %v11450_v32  ;;  %v21383_v32 = vld [vmem:[#allocation23_spill] sm:$0xff] }
 0x6f0   :  { %v15389_v63 = vpop.f32.mrb[90].mxu1 }
 0x6f1   :  { %11500 = vst.msk [vmem:[%s21013_s9 + $0x158] sm:$0xff] %vm2327_vm6, %v15389_v63  ;;  %v11460_v20 = vpop.f32.mrb[91].mxu1  ;;  %v21384_v63 = vmax.f32 %v21383_v32, 0.0 }
 0x6f2   :  { %11499 = vst.msk [vmem:[%s21013_s9 + $0x150] sm:$0xff] %vm2327_vm6, %v11460_v20 }
 0x6f3   :  { %v6614_v20 = vsel %vm33_vm2, %v21384_v63, 0.0 }
 0x6f4   :  { %v15392_v54 = vpop.f32.mrb[92].mxu1 }
 0x6f5   :  { %11502 = vst.msk [vmem:[%s21013_s9 + $0x168] sm:$0xff] %vm2327_vm6, %v15392_v54  ;;  %v11470_v26 = vpop.f32.mrb[93].mxu1  ;;  %v21385_v54 = vld [vmem:[#allocation25_spill] sm:$0xff] }
 0x6f6   :  { %11501 = vst.msk [vmem:[%s21013_s9 + $0x160] sm:$0xff] %vm2327_vm6, %v11470_v26  ;;  %v21386_v26 = vmax.f32 %v21385_v54, 0.0 }
 0x6f8   :  { %v15395_v2 = vpop.f32.mrb[94].mxu1 }
 0x6f9   :  { %11504 = vst.msk [vmem:[%s21013_s9 + $0x178] sm:$0xff] %vm2327_vm6, %v15395_v2  ;;  %v11480_v40 = vpop.f32.mrb[95].mxu1  ;;  %v6620_v2 = vsel %vm33_vm2, %v21386_v26, 0.0 }
 0x6fa   :  { %11503 = vst.msk [vmem:[%s21013_s9 + $0x170] sm:$0xff] %vm2327_vm6, %v11480_v40  ;;  %v21387_v40 = vld [vmem:[#allocation36_spill] sm:$0xff] }
 0x6fc   :  { %v15430_v46 = vpop.f32.mrb[96].mxu1 }
 0x6fd   :  { %11667 = vst.msk [vmem:[%s21013_s9 + $0x188] sm:$0xff] %vm2327_vm6, %v15430_v46  ;;  %v11587_v57 = vpop.f32.mrb[97].mxu1  ;;  %v21388_v46 = vmax.f32 %v21387_v40, 0.0 }
 0x6fe   :  { %11666 = vst.msk [vmem:[%s21013_s9 + $0x180] sm:$0xff] %vm2327_vm6, %v11587_v57 }
 0x6ff   :  { %v6626_v57 = vsel %vm33_vm2, %v21388_v46, 0.0 }
 0x700   :  { %v15433_v59 = vpop.f32.mrb[98].mxu1 }
 0x701   :  { %11669 = vst.msk [vmem:[%s21013_s9 + $0x198] sm:$0xff] %vm2327_vm6, %v15433_v59  ;;  %v11597_v25 = vpop.f32.mrb[99].mxu1  ;;  %v21389_v59 = vld [vmem:[#allocation38_spill] sm:$0xff] }
 0x702   :  { %11668 = vst.msk [vmem:[%s21013_s9 + $0x190] sm:$0xff] %vm2327_vm6, %v11597_v25  ;;  %v21390_v25 = vmax.f32 %v21389_v59, 0.0 }
 0x704   :  { %v15436_v17 = vpop.f32.mrb[100].mxu1 }
 0x705   :  { %11671 = vst.msk [vmem:[%s21013_s9 + $0x1a8] sm:$0xff] %vm2327_vm6, %v15436_v17  ;;  %v11607_v34 = vpop.f32.mrb[101].mxu1  ;;  %v6632_v17 = vsel %vm33_vm2, %v21390_v25, 0.0 }
 0x706   :  { %11670 = vst.msk [vmem:[%s21013_s9 + $0x1a0] sm:$0xff] %vm2327_vm6, %v11607_v34  ;;  %v21391_v34 = vld [vmem:[#allocation40_spill] sm:$0xff] }
 0x708   :  { %v15439_v14 = vpop.f32.mrb[102].mxu1 }
 0x709   :  { %11673 = vst.msk [vmem:[%s21013_s9 + $0x1b8] sm:$0xff] %vm2327_vm6, %v15439_v14  ;;  %v11617_v48 = vpop.f32.mrb[103].mxu1  ;;  %v21392_v14 = vmax.f32 %v21391_v34, 0.0 }
 0x70a   :  { %11672 = vst.msk [vmem:[%s21013_s9 + $0x1b0] sm:$0xff] %vm2327_vm6, %v11617_v48 }
 0x70b   :  { %v6638_v48 = vsel %vm33_vm2, %v21392_v14, 0.0 }
 0x70c   :  { %v15442_v61 = vpop.f32.mrb[104].mxu1 }
 0x70d   :  { %11675 = vst.msk [vmem:[%s21013_s9 + $0x1c8] sm:$0xff] %vm2327_vm6, %v15442_v61  ;;  %v11627_v30 = vpop.f32.mrb[105].mxu1  ;;  %v21393_v61 = vld [vmem:[#allocation42_spill] sm:$0xff] }
 0x70e   :  { %11674 = vst.msk [vmem:[%s21013_s9 + $0x1c0] sm:$0xff] %vm2327_vm6, %v11627_v30  ;;  %v21394_v30 = vmax.f32 %v21393_v61, 0.0 }
 0x710   :  { %v15445_v43 = vpop.f32.mrb[106].mxu1 }
 0x711   :  { %11677 = vst.msk [vmem:[%s21013_s9 + $0x1d8] sm:$0xff] %vm2327_vm6, %v15445_v43  ;;  %v11637_v0 = vpop.f32.mrb[107].mxu1  ;;  %v8761_v43 = vsel %vm33_vm2, %v21394_v30, 0.0 }
 0x712   :  { %11676 = vst.msk [vmem:[%s21013_s9 + $0x1d0] sm:$0xff] %vm2327_vm6, %v11637_v0  ;;  %v21395_v0 = vld [vmem:[#allocation44_spill] sm:$0xff] }
 0x714   :  { %v15448_v18 = vpop.f32.mrb[108].mxu1 }
 0x715   :  { %11679 = vst.msk [vmem:[%s21013_s9 + $0x1e8] sm:$0xff] %vm2327_vm6, %v15448_v18  ;;  %v11647_v56 = vpop.f32.mrb[109].mxu1  ;;  %v21396_v18 = vmax.f32 %v21395_v0, 0.0 }
 0x716   :  { %11678 = vst.msk [vmem:[%s21013_s9 + $0x1e0] sm:$0xff] %vm2327_vm6, %v11647_v56 }
 0x717   :  { %v8767_v56 = vsel %vm33_vm2, %v21396_v18, 0.0 }
 0x718   :  { %v15451_v38 = vpop.f32.mrb[110].mxu1 }
 0x719   :  { %11681 = vst.msk [vmem:[%s21013_s9 + $0x1f8] sm:$0xff] %vm2327_vm6, %v15451_v38  ;;  %v11657_v52 = vpop.f32.mrb[111].mxu1  ;;  %v21397_v38 = vld [vmem:[#allocation46_spill] sm:$0xff] }
 0x71a   :  { %11680 = vst.msk [vmem:[%s21013_s9 + $0x1f0] sm:$0xff] %vm2327_vm6, %v11657_v52  ;;  %v21398_v52 = vmax.f32 %v21397_v38, 0.0 }
 0x71c   :  { %v11792_v35 = vpop.f32.mrb[112].mxu1 }
 0x71d   :  { %v11793_v8 = vadd.f32 %v13160_v13, %v11792_v35  ;;  %v15458_v29 = vpop.f32.mrb[113].mxu1  ;;  %v8773_v13 = vsel %vm33_vm2, %v21398_v52, 0.0  ;;  %v21399_v35 = vld [vmem:[#allocation48_spill] sm:$0xff] }
 0x71e   :  { %v21400_v29 = vmax.f32 %v21399_v35, 0.0 }
 0x71f   :  { %v11797_v60 = vsel %vm11796_vm8, %v11793_v8, -inf }
 0x720   :  { %11798 = vmax.xlane.f32.xlu0 %v11797_v60  ;;  %v8779_v60 = vsel %vm33_vm2, %v21400_v29, 0.0 }
 0x724   :  { %2308 = vadd.xlane.f32.xlu0 %v2307_v15  ;;  %v8785_v15 = vsel %vm33_vm2, %v21402_v62, 0.0 }
 0x728   :  { %4433 = vadd.xlane.f32.xlu0 %v4432_v7  ;;  %v8791_v7 = vsel %vm33_vm2, %v21404_v42, 0.0 }
 0x72c   :  { %4439 = vadd.xlane.f32.xlu0 %v4438_v5  ;;  %v8797_v5 = vsel %vm33_vm2, %v21406_v9, 0.0 }
 0x730   :  { %4445 = vadd.xlane.f32.xlu0 %v4444_v58  ;;  %v8803_v58 = vsel %vm33_vm2, %v21408_v51, 0.0 }
 0x734   :  { %4448 = vadd.xlane.f32.xlu0 %v4447_v37 }
 0x738   :  { %4454 = vadd.xlane.f32.xlu0 %v4453_v44 }
 0x73c   :  { %4460 = vadd.xlane.f32.xlu0 %v4459_v22 }
 0x740   :  { %4466 = vadd.xlane.f32.xlu0 %v4465_v10 }
 0x744   :  { %4472 = vadd.xlane.f32.xlu0 %v4471_v16  ;;  %v21410_v16 = vmax.f32 %v21409_v49, 0.0 }
 0x746   :  { %v8794_v31 = vsel %vm33_vm2, %v21410_v16, 0.0 }
 0x748   :  { %6597 = vadd.xlane.f32.xlu0 %v6596_v53 }
 0x74c   :  { %6603 = vadd.xlane.f32.xlu0 %v6602_v36  ;;  %v8800_v36 = vsel %vm33_vm2, %v21412_v47, 0.0 }
 0x750   :  { %6609 = vadd.xlane.f32.xlu0 %v6608_v45  ;;  %v21413_v45 = vld [vmem:[#allocation55_spill] sm:$0xff] }
 0x751   :  { %v21414_v32 = vmax.f32 %v21413_v45, 0.0 }
 0x753   :  { %v8806_v63 = vsel %vm33_vm2, %v21414_v32, 0.0 }
 0x754   :  { %6615 = vadd.xlane.f32.xlu0 %v6614_v20 }
 0x758   :  { %6621 = vadd.xlane.f32.xlu0 %v6620_v2 }
 0x75c   :  { %6627 = vadd.xlane.f32.xlu0 %v6626_v57 }
 0x760   :  { %6633 = vadd.xlane.f32.xlu0 %v6632_v17 }
 0x764   :  { %6639 = vadd.xlane.f32.xlu0 %v6638_v48 }
 0x768   :  { %8762 = vadd.xlane.f32.xlu0 %v8761_v43 }
 0x76c   :  { %8768 = vadd.xlane.f32.xlu0 %v8767_v56 }
 0x770   :  { %8774 = vadd.xlane.f32.xlu0 %v8773_v13 }
 0x774   :  { %8780 = vadd.xlane.f32.xlu0 %v8779_v60 }
 0x778   :  { %8786 = vadd.xlane.f32.xlu0 %v8785_v15 }
 0x77c   :  { %8792 = vadd.xlane.f32.xlu0 %v8791_v7 }
 0x780   :  { %8798 = vadd.xlane.f32.xlu0 %v8797_v5 }
 0x784   :  { %8804 = vadd.xlane.f32.xlu0 %v8803_v58 }
 0x7ad   :  { %v11799_v3 = vpop.xlane.xlu0 %11798 }
 0x7ae   :  { %v11800_v1 = vsub.f32 %v11793_v8, %v11799_v3 }
 0x7b0   :  { %v11801_v37 = vmul.f32 1.442695, %v11800_v1 }
 0x7b1   :  { %v2309_v27 = vpop.xlane.xlu0 %2308 }
 0x7b2   :  { %16236 = vpow2.f32 %v11801_v37  ;;  %v2326_v21 = vmul.f32 0.125, %v2309_v27 }
 0x7b4   :  { %2343 = vst.msk [vmem:[%s21012_s8 + $0x78] sm:$0xff] %vm2327_vm6, %v2326_v21 }
 0x7b5   :  { %v4434_v44 = vpop.xlane.xlu0 %4433 }
 0x7b6   :  { %v4478_v4 = vmul.f32 0.125, %v4434_v44 }
 0x7b8   :  { %4494 = vst.msk [vmem:[%s21012_s8 + $0x88] sm:$0xff] %vm2327_vm6, %v4478_v4 }
 0x7b9   :  { %v4440_v41 = vpop.xlane.xlu0 %4439 }
 0x7ba   :  { %v4480_v22 = vmul.f32 0.125, %v4440_v41 }
 0x7bc   :  { %v20873_v55 = vpop.eup %16236  ;;  %4496 = vst.msk [vmem:[%s21012_s8 + $0x98] sm:$0xff] %vm2327_vm6, %v4480_v22 }
 0x7bd   :  { %v4446_v8 = vpop.xlane.xlu0 %4445  ;;  %v11803_v11 = vsel %vm11796_vm8, %v20873_v55, 0.0 }
 0x7be   :  { %v4482_v10 = vmul.f32 0.125, %v4446_v8  ;;  %11804 = vadd.xlane.f32.xlu1 %v11803_v11 }
 0x7c0   :  { %4498 = vst.msk [vmem:[%s21012_s8 + $0xa8] sm:$0xff] %vm2327_vm6, %v4482_v10 }
 0x7c1   :  { %v4449_v6 = vpop.xlane.xlu0 %4448 }
 0x7c2   :  { %v4483_v23 = vmul.f32 0.125, %v4449_v6  ;;  %8795 = vadd.xlane.f32.xlu1 %v8794_v31 }
 0x7c4   :  { %4499 = vst.msk [vmem:[%s21012_s8 + $0xb0] sm:$0xff] %vm2327_vm6, %v4483_v23 }
 0x7c5   :  { %v4455_v53 = vpop.xlane.xlu0 %4454 }
 0x7c6   :  { %v4485_v28 = vmul.f32 0.125, %v4455_v53  ;;  %8801 = vadd.xlane.f32.xlu1 %v8800_v36 }
 0x7c8   :  { %4501 = vst.msk [vmem:[%s21012_s8 + $0xc0] sm:$0xff] %vm2327_vm6, %v4485_v28 }
 0x7c9   :  { %v4461_v33 = vpop.xlane.xlu0 %4460 }
 0x7ca   :  { %v4487_v20 = vmul.f32 0.125, %v4461_v33  ;;  %8807 = vadd.xlane.f32.xlu1 %v8806_v63 }
 0x7cc   :  { %4503 = vst.msk [vmem:[%s21012_s8 + $0xd0] sm:$0xff] %vm2327_vm6, %v4487_v20 }
 0x7cd   :  { %v4467_v54 = vpop.xlane.xlu0 %4466 }
 0x7ce   :  { %v4489_v26 = vmul.f32 0.125, %v4467_v54 }
 0x7d0   :  { %4505 = vst.msk [vmem:[%s21012_s8 + $0xe0] sm:$0xff] %vm2327_vm6, %v4489_v26 }
 0x7d1   :  { %v4473_v2 = vpop.xlane.xlu0 %4472 }
 0x7d2   :  { %v4491_v40 = vmul.f32 0.125, %v4473_v2 }
 0x7d4   :  { %4507 = vst.msk [vmem:[%s21012_s8 + $0xf0] sm:$0xff] %vm2327_vm6, %v4491_v40 }
 0x7d5   :  { %v6598_v46 = vpop.xlane.xlu0 %6597 }
 0x7d6   :  { %v6644_v57 = vmul.f32 0.125, %v6598_v46 }
 0x7d8   :  { %6660 = vst.msk [vmem:[%s21012_s8 + $0x100] sm:$0xff] %vm2327_vm6, %v6644_v57 }
 0x7d9   :  { %v6604_v59 = vpop.xlane.xlu0 %6603 }
 0x7da   :  { %v6646_v25 = vmul.f32 0.125, %v6604_v59 }
 0x7dc   :  { %6662 = vst.msk [vmem:[%s21012_s8 + $0x110] sm:$0xff] %vm2327_vm6, %v6646_v25 }
 0x7dd   :  { %v6610_v17 = vpop.xlane.xlu0 %6609 }
 0x7de   :  { %v6648_v34 = vmul.f32 0.125, %v6610_v17 }
 0x7e0   :  { %6664 = vst.msk [vmem:[%s21012_s8 + $0x120] sm:$0xff] %vm2327_vm6, %v6648_v34 }
 0x7e1   :  { %v6616_v14 = vpop.xlane.xlu0 %6615 }
 0x7e2   :  { %v6650_v48 = vmul.f32 0.125, %v6616_v14 }
 0x7e4   :  { %6666 = vst.msk [vmem:[%s21012_s8 + $0x130] sm:$0xff] %vm2327_vm6, %v6650_v48 }
 0x7e5   :  { %v6622_v61 = vpop.xlane.xlu0 %6621 }
 0x7e6   :  { %v6652_v30 = vmul.f32 0.125, %v6622_v61 }
 0x7e8   :  { %6668 = vst.msk [vmem:[%s21012_s8 + $0x140] sm:$0xff] %vm2327_vm6, %v6652_v30 }
 0x7e9   :  { %v6628_v43 = vpop.xlane.xlu0 %6627 }
 0x7ea   :  { %v6654_v0 = vmul.f32 0.125, %v6628_v43 }
 0x7ec   :  { %6670 = vst.msk [vmem:[%s21012_s8 + $0x150] sm:$0xff] %vm2327_vm6, %v6654_v0 }
 0x7ed   :  { %v6634_v18 = vpop.xlane.xlu0 %6633 }
 0x7ee   :  { %v6656_v56 = vmul.f32 0.125, %v6634_v18 }
 0x7f0   :  { %6672 = vst.msk [vmem:[%s21012_s8 + $0x160] sm:$0xff] %vm2327_vm6, %v6656_v56 }
 0x7f1   :  { %v6640_v38 = vpop.xlane.xlu0 %6639 }
 0x7f2   :  { %v6658_v52 = vmul.f32 0.125, %v6640_v38 }
 0x7f4   :  { %6674 = vst.msk [vmem:[%s21012_s8 + $0x170] sm:$0xff] %vm2327_vm6, %v6658_v52 }
 0x7f5   :  { %v8763_v13 = vpop.xlane.xlu0 %8762 }
 0x7f6   :  { %v8809_v35 = vmul.f32 0.125, %v8763_v13 }
 0x7f8   :  { %8825 = vst.msk [vmem:[%s21012_s8 + $0x180] sm:$0xff] %vm2327_vm6, %v8809_v35 }
 0x7f9   :  { %v8769_v29 = vpop.xlane.xlu0 %8768 }
 0x7fa   :  { %v8811_v60 = vmul.f32 0.125, %v8769_v29 }
 0x7fc   :  { %8827 = vst.msk [vmem:[%s21012_s8 + $0x190] sm:$0xff] %vm2327_vm6, %v8811_v60 }
 0x7fd   :  { %v8775_v39 = vpop.xlane.xlu0 %8774 }
 0x7fe   :  { %v8813_v62 = vmul.f32 0.125, %v8775_v39 }
 0x800   :  { %8829 = vst.msk [vmem:[%s21012_s8 + $0x1a0] sm:$0xff] %vm2327_vm6, %v8813_v62 }
 0x801   :  { %v8781_v15 = vpop.xlane.xlu0 %8780 }
 0x802   :  { %v8815_v24 = vmul.f32 0.125, %v8781_v15 }
 0x804   :  { %8831 = vst.msk [vmem:[%s21012_s8 + $0x1b0] sm:$0xff] %vm2327_vm6, %v8815_v24 }
 0x805   :  { %v8787_v42 = vpop.xlane.xlu0 %8786 }
 0x806   :  { %v8817_v7 = vmul.f32 0.125, %v8787_v42 }
 0x808   :  { %8833 = vst.msk [vmem:[%s21012_s8 + $0x1c0] sm:$0xff] %vm2327_vm6, %v8817_v7 }
 0x809   :  { %v8793_v19 = vpop.xlane.xlu0 %8792 }
 0x80a   :  { %v8819_v9 = vmul.f32 0.125, %v8793_v19 }
 0x80c   :  { %8835 = vst.msk [vmem:[%s21012_s8 + $0x1d0] sm:$0xff] %vm2327_vm6, %v8819_v9 }
 0x80d   :  { %v8799_v5 = vpop.xlane.xlu0 %8798 }
 0x80e   :  { %v8821_v12 = vmul.f32 0.125, %v8799_v5 }
 0x810   :  { %8837 = vst.msk [vmem:[%s21012_s8 + $0x1e0] sm:$0xff] %vm2327_vm6, %v8821_v12 }
 0x811   :  { %v8805_v51 = vpop.xlane.xlu0 %8804 }
 0x812   :  { %v8823_v58 = vmul.f32 0.125, %v8805_v51 }
 0x814   :  { %8839 = vst.msk [vmem:[%s21012_s8 + $0x1f0] sm:$0xff] %vm2327_vm6, %v8823_v58 }
 0x84b   :  { %v11805_v3 = vpop.xlane.xlu1 %11804 }
 0x84c   :  { %16238 = vrcp.f32 %v11805_v3 }
 0x84f   :  { %v8796_v1 = vpop.xlane.xlu1 %8795 }
 0x850   :  { %v8820_v37 = vmul.f32 0.125, %v8796_v1 }
 0x852   :  { %8836 = vst.msk [vmem:[%s21012_s8 + $0x1d8] sm:$0xff] %vm2327_vm6, %v8820_v37 }
 0x853   :  { %v8802_v27 = vpop.xlane.xlu1 %8801 }
 0x854   :  { %v8822_v21 = vmul.f32 0.125, %v8802_v27 }
 0x856   :  { %v16239_v44 = vpop.eup %16238  ;;  %8838 = vst.msk [vmem:[%s21012_s8 + $0x1e8] sm:$0xff] %vm2327_vm6, %v8822_v21 }
 0x857   :  { %v8808_v4 = vpop.xlane.xlu1 %8807  ;;  %v11807_v41 = vmul.f32 %v16239_v44, %v20873_v55 }
 0x858   :  { %v8824_v22 = vmul.f32 0.125, %v8808_v4 }
 0x859   :  { %11808 = vst.msk [vmem:[#allocation3] sm:$0x3] %vm11796_vm8, %v11807_v41 }
 0x85a   :  { %8840 = vst.msk [vmem:[%s21012_s8 + $0x1f8] sm:$0xff] %vm2327_vm6, %v8824_v22 }
 0x85b   :  { %16251 = shalt.err (!%p16248_p4)
}
 0x85c   :  { %s16252_s3 = scalar_lea.hbm %s21014_s10, 32 }
 0x85d   :  { %p16253_p5 = scmp.ne.s32.totalorder %s21014_s10, %s16252_s3  ;;  %p16256_p6 = scmp.lt.u32.totalorder %s16252_s3, %s21014_s10 }
 0x85f   :  { %p16258_p7 = pnand %p16256_p6, %p16253_p5 }
 0x861   :  { %16261 = shalt.err (!%p16258_p7)
}
 0x862   :  { %11822 = dma.vmem_to_hbm [thread:$0]  %s11820_s17, 32, %s21014_s10, [#allocation4]  }
 0x863   :  { %16262 = dma.done.wait [#allocation4], 32  }
 0x864   :  { %16263 = vsyncadd [#allocation4], 4294967264 }
 0x865   :  { %11830 = vsyncpa [#allocation4], 1 }

</bundles_post_ra>
